<compile_context>
chip_gen: v6e
topology: v6e:2x2x1
jax: 0.10.0
libtpu: 0.0.40
codegen_flags: <defaults>
</compile_context>

<pallas_src>
import jax
import jax.numpy as jnp
from jax.experimental import pallas as pl
from jax.experimental.pallas import tpu as pltpu

BN_EPS = 1e-5


# ----------------------------- pass 1: fused conv -----------------------------
def conv_kernel(xp_ref, w_ref, conv_ref, stats_ref):
    """im2col + single fused matmul (branches + shortcut) + BN-stat accumulation."""
    H = xp_ref.shape[1] - 4
    W = xp_ref.shape[2] - 4
    Cin = xp_ref.shape[3]
    HW = H * W

    xp = xp_ref[0]                                      # (H+4, W+4, Cin), pad=2 halo
    # im2col: 25 shifted views -> (HW, 25*Cin) patch matrix (tap-major, Cin-minor).
    cols = [xp[ky:ky + H, kx:kx + W, :].reshape(HW, Cin)
            for ky in range(5) for kx in range(5)]
    patch = jnp.concatenate(cols, axis=-1).astype(w_ref.dtype)   # bf16 (or f32) operand

    # one MXU matmul: cols [0:Cout] = branch convs, [Cout:2*Cout] = shortcut conv,
    # remaining columns are zero padding so stores stay 128-lane dense.
    conv = jnp.dot(patch, w_ref[...], preferred_element_type=jnp.float32)
    conv_ref[0] = conv

    # training-mode BN statistics, accumulated across the (arbitrary) batch axis.
    @pl.when(pl.program_id(0) == 0)
    def _init():
        stats_ref[...] = jnp.zeros_like(stats_ref)

    stats_ref[...] += jnp.concatenate(
        [jnp.sum(conv, axis=0, keepdims=True),
         jnp.sum(conv * conv, axis=0, keepdims=True)], axis=0)


# -------------------- pass 2: BN + ReLU + SE + residual + ReLU --------------------
def apply_kernel(conv_ref, bnp_ref, fc1_ref, fc2_ref, out_ref):
    HW, CP = conv_ref.shape[1], conv_ref.shape[2]
    Cout = fc1_ref.shape[0]

    # fused BatchNorm: y = f * scale + shift (scale/shift precomputed per channel)
    y = conv_ref[0] * bnp_ref[0:1, :] + bnp_ref[1:2, :]            # (HW, 128)
    branch = jnp.maximum(y[:, :Cout], 0.0)                         # BN+ReLU branches
    short = y[:, Cout:2 * Cout]                                    # BN'd shortcut (no ReLU)

    # SE block: per-image global average pool -> FC -> ReLU -> FC -> sigmoid
    pooled = jnp.sum(branch, axis=0, keepdims=True) * (1.0 / HW)   # (1, Cout)
    h = jnp.maximum(jnp.dot(pooled, fc1_ref[...],
                            preferred_element_type=jnp.float32), 0.0)
    z = jnp.dot(h, fc2_ref[...], preferred_element_type=jnp.float32)
    se = 1.0 / (1.0 + jnp.exp(-z))                                 # (1, Cout)

    res = jnp.maximum(branch * se + short, 0.0)                    # (HW, Cout)
    # pad back to 128 lanes so the store is unmasked / lane-dense; wrapper slices.
    out_ref[0] = jnp.concatenate(
        [res, jnp.zeros((HW, CP - Cout), jnp.float32)], axis=-1)


# ------------------------------ params / weights ------------------------------
def init_params(key, in_channels, out_channels):
    c1 = out_channels // 4
    c2 = out_channels // 2
    hidden = out_channels // 16          # SE reduction = 16
    ks = jax.random.split(key, 12)
    return {
        "w1":  jax.random.normal(ks[0], (in_channels, c1), jnp.float32) * 0.2,
        "w3":  jax.random.normal(ks[1], (9, in_channels, c2), jnp.float32) * 0.1,
        "w5":  jax.random.normal(ks[2], (25, in_channels, c1), jnp.float32) * 0.05,
        "g1":  1.0 + 0.1 * jax.random.normal(ks[3], (1, c1), jnp.float32),
        "b1":  0.1 * jax.random.normal(ks[4], (1, c1), jnp.float32),
        "g2":  1.0 + 0.1 * jax.random.normal(ks[5], (1, c2), jnp.float32),
        "b2":  0.1 * jax.random.normal(ks[6], (1, c2), jnp.float32),
        "g3":  1.0 + 0.1 * jax.random.normal(ks[7], (1, c1), jnp.float32),
        "b3":  0.1 * jax.random.normal(ks[8], (1, c1), jnp.float32),
        "ws":  jax.random.normal(ks[9], (in_channels, out_channels), jnp.float32) * 0.2,
        "gs":  jnp.ones((1, out_channels), jnp.float32),
        "bs":  jnp.zeros((1, out_channels), jnp.float32),
        "fc1": jax.random.normal(ks[10], (out_channels, hidden), jnp.float32) * 0.3,
        "fc2": jax.random.normal(ks[11], (hidden, out_channels), jnp.float32) * 0.3,
    }


def _fused_weight(p, CP):
    """Scatter [w1 | w3 | w5 | shortcut] into one (25*Cin, CP) im2col weight."""
    Cin, C1 = p["w1"].shape
    C2 = p["w3"].shape[2]
    Cout = p["ws"].shape[1]
    wf = jnp.zeros((25, Cin, CP), jnp.float32)
    wf = wf.at[12, :, 0:C1].set(p["w1"])                                 # 1x1 @ tap (2,2)
    idx3 = jnp.array([(ky + 1) * 5 + (kx + 1)
                      for ky in range(3) for kx in range(3)])
    wf = wf.at[idx3, :, C1:C1 + C2].set(p["w3"])                         # 3x3 @ taps (1..3,1..3)
    wf = wf.at[:, :, C1 + C2:Cout].set(p["w5"])                          # 5x5 @ all taps
    wf = wf.at[12, :, Cout:2 * Cout].set(p["ws"])                        # shortcut 1x1 @ (2,2)
    return wf.reshape(25 * Cin, CP)


# ---------------------------------- wrapper ----------------------------------
def multi_scale_residual_block(x_nchw, p, compute_dtype=jnp.bfloat16):
    B, Cin, H, W = x_nchw.shape
    Cout = p["ws"].shape[1]
    hidden = p["fc1"].shape[1]
    HW = H * W
    CP = 128                      # lane-dense padded channel width (branches+shortcut+pad)
    assert 2 * Cout <= CP

    # NHWC + single pad=2 halo (serves all three conv branches via the fused weight).
    x = jnp.transpose(x_nchw, (0, 2, 3, 1))
    xp = jnp.pad(x, ((0, 0), (2, 2), (2, 2), (0, 0)))
    wf = _fused_weight(p, CP).astype(compute_dtype)

    cparams_seq = pltpu.CompilerParams(
        dimension_semantics=("arbitrary",), vmem_limit_bytes=32 * 1024 * 1024)
    cparams_par = pltpu.CompilerParams(
        dimension_semantics=("parallel",), vmem_limit_bytes=32 * 1024 * 1024)

    # ---- pass 1: fused conv (all branches + projection shortcut) + BN stats ----
    conv_full, stats = pl.pallas_call(
        conv_kernel,
        grid=(B,),
        in_specs=[pl.BlockSpec((1, H + 4, W + 4, Cin), lambda b: (b, 0, 0, 0)),
                  pl.BlockSpec((25 * Cin, CP), lambda b: (0, 0))],
        out_specs=(pl.BlockSpec((1, HW, CP), lambda b: (b, 0, 0)),
                   pl.BlockSpec((2, CP), lambda b: (0, 0))),
        out_shape=(jax.ShapeDtypeStruct((B, HW, CP), jnp.float32),
                   jax.ShapeDtypeStruct((2, CP), jnp.float32)),
        compiler_params=cparams_seq,
    )(xp, wf)

    # ---- tiny glue: fold training-mode BN into a single per-channel scale/shift ----
    # TODO(synk): E[x^2]-E[x]^2 can cancel for large activation means; switch to a
    #             two-pass / Welford accumulation if that regime shows up.
    n = float(B * HW)
    mean = stats[0] / n
    var = jnp.maximum(stats[1] / n - mean * mean, 0.0)          # biased var (train-mode BN)
    gamma = jnp.concatenate([p["g1"][0], p["g2"][0], p["g3"][0], p["gs"][0],
                             jnp.zeros((CP - 2 * Cout,), jnp.float32)])
    beta = jnp.concatenate([p["b1"][0], p["b2"][0], p["b3"][0], p["bs"][0],
                            jnp.zeros((CP - 2 * Cout,), jnp.float32)])
    scale = gamma * jax.lax.rsqrt(var + BN_EPS)
    shift = beta - mean * scale
    bnp = jnp.stack([scale, shift], axis=0)                     # (2, CP)

    # ---- pass 2: BN + ReLU + SE + shortcut add + final ReLU (parallel over batch) ----
    out_padded = pl.pallas_call(
        apply_kernel,
        grid=(B,),
        in_specs=[pl.BlockSpec((1, HW, CP), lambda b: (b, 0, 0)),
                  pl.BlockSpec((2, CP), lambda b: (0, 0)),
                  pl.BlockSpec((Cout, hidden), lambda b: (0, 0)),
                  pl.BlockSpec((hidden, Cout), lambda b: (0, 0))],
        out_specs=pl.BlockSpec((1, HW, CP), lambda b: (b, 0, 0)),
        out_shape=jax.ShapeDtypeStruct((B, HW, CP), jnp.float32),
        compiler_params=cparams_par,
    )(conv_full, bnp, p["fc1"], p["fc2"])

    out = out_padded[:, :, :Cout].reshape(B, H, W, Cout)
    return jnp.transpose(out, (0, 3, 1, 2))                     # -> NCHW


# ------------------------- pure-JAX reference -------------------------
def reference_forward(x_nchw, p, conv_dtype=jnp.float32):
    x = jnp.transpose(x_nchw, (0, 2, 3, 1))
    Cin = x.shape[-1]
    xc = x.astype(conv_dtype)

    def conv(w_hwio, pad):
        return jax.lax.conv_general_dilated(
            xc, w_hwio.astype(conv_dtype), (1, 1), [(pad, pad), (pad, pad)],
            dimension_numbers=("NHWC", "HWIO", "NHWC"),
            preferred_element_type=jnp.float32)

    def bn(f, g, b):
        m = jnp.mean(f, axis=(0, 1, 2), keepdims=True)
        v = jnp.mean(f * f, axis=(0, 1, 2), keepdims=True) - m * m
        return ((f - m) * jax.lax.rsqrt(v + BN_EPS)
                * g.reshape(1, 1, 1, -1) + b.reshape(1, 1, 1, -1))

    C1 = p["w1"].shape[1]
    C2 = p["w3"].shape[2]
    f1 = jax.nn.relu(bn(conv(p["w1"].reshape(1, 1, Cin, C1), 0), p["g1"], p["b1"]))
    f2 = jax.nn.relu(bn(conv(p["w3"].reshape(3, 3, Cin, C2), 1), p["g2"], p["b2"]))
    f3 = jax.nn.relu(bn(conv(p["w5"].reshape(5, 5, Cin, C1), 2), p["g3"], p["b3"]))
    out = jnp.concatenate([f1, f2, f3], axis=-1)

    pooled = jnp.mean(out, axis=(1, 2))
    h = jax.nn.relu(jnp.dot(pooled, p["fc1"]))
    se = jax.nn.sigmoid(jnp.dot(h, p["fc2"]))
    out = out * se[:, None, None, :]

    Cout = p["ws"].shape[1]
    sc = bn(conv(p["ws"].reshape(1, 1, Cin, Cout), 0), p["gs"], p["bs"])
    y = jax.nn.relu(out + sc)
    return jnp.transpose(y, (0, 3, 1, 2))


if __name__ == "__main__":
    key = jax.random.PRNGKey(0)
    kx_, kp_ = jax.random.split(key)

    B, Cin, H, W = 2, 4, 16, 16
    Cout = 32                                   # branches 8 / 16 / 8, SE hidden 2
    x = jax.random.normal(kx_, (B, Cin, H, W), jnp.float32)
    params = init_params(kp_, Cin, Cout)

    # optimized bf16-MXU path, checked against a reference whose conv operands are
    # rounded to bf16 identically (f32 accumulation in both paths).
    out_bf16 = jax.block_until_ready(
        multi_scale_residual_block(x, params, compute_dtype=jnp.bfloat16))
    ref_bf16 = jax.block_until_ready(reference_forward(x, params, jnp.bfloat16))
    assert out_bf16.shape == (B, Cout, H, W), out_bf16.shape
    assert jnp.allclose(out_bf16, ref_bf16, rtol=3e-3, atol=3e-3), (
        float(jnp.max(jnp.abs(out_bf16 - ref_bf16))))

    # full-f32 path, checked against the pure f32 reference.
    out_f32 = jax.block_until_ready(
        multi_scale_residual_block(x, params, compute_dtype=jnp.float32))
    ref_f32 = jax.block_until_ready(reference_forward(x, params, jnp.float32))
    assert jnp.allclose(out_f32, ref_f32, rtol=3e-3, atol=3e-3), (
        float(jnp.max(jnp.abs(out_f32 - ref_f32))))

    print("KERNEL_OK")
</pallas_src>

<mosaic_0001>
module attributes {stable_mosaic.version = 11 : i64} {
  func.func @conv_kernel(%arg0: i32, %arg1: memref<1x20x20x4xf32, #tpu.memory_space<vmem>>, %arg2: memref<100x128xbf16, #tpu.memory_space<vmem>>, %arg3: memref<1x256x128xf32, #tpu.memory_space<vmem>>, %arg4: memref<2x128xf32, #tpu.memory_space<vmem>>) attributes {dimension_semantics = [#tpu.dimension_semantics<arbitrary>], iteration_bounds = array<i64: 2>, scalar_prefetch = 0 : i64, scratch_operands = 0 : i64, tpu.core_type = #tpu.core_type<tc>, window_params = [{transform_indices = @transform_0, window_bounds = array<i64: 1, 20, 20, 4>}, {pipeline_mode = #tpu.pipeline_mode<synchronous>, transform_indices = @transform_1, window_bounds = array<i64: 100, 128>}, {transform_indices = @transform_2, window_bounds = array<i64: 1, 256, 128>}, {pipeline_mode = #tpu.pipeline_mode<synchronous>, transform_indices = @transform_3, window_bounds = array<i64: 2, 128>}]} {
    %c0 = arith.constant 0 : index
    %c0_0 = arith.constant 0 : index
    %c0_1 = arith.constant 0 : index
    %c0_2 = arith.constant 0 : index
    %0 = vector.load %arg1[%c0, %c0_0, %c0_1, %c0_2] : memref<1x20x20x4xf32, #tpu.memory_space<vmem>>, vector<1x20x20x4xf32>
    %1 = vector.shape_cast %0 : vector<1x20x20x4xf32> to vector<20x20x4xf32>
    %2 = vector.extract_strided_slice %1 {offsets = [0, 0, 0], sizes = [16, 16, 4], strides = [1, 1, 1]} : vector<20x20x4xf32> to vector<16x16x4xf32>
    %3 = vector.shape_cast %2 : vector<16x16x4xf32> to vector<256x4xf32>
    %4 = vector.extract_strided_slice %1 {offsets = [0, 1, 0], sizes = [16, 16, 4], strides = [1, 1, 1]} : vector<20x20x4xf32> to vector<16x16x4xf32>
    %5 = vector.shape_cast %4 : vector<16x16x4xf32> to vector<256x4xf32>
    %6 = vector.extract_strided_slice %1 {offsets = [0, 2, 0], sizes = [16, 16, 4], strides = [1, 1, 1]} : vector<20x20x4xf32> to vector<16x16x4xf32>
    %7 = vector.shape_cast %6 : vector<16x16x4xf32> to vector<256x4xf32>
    %8 = vector.extract_strided_slice %1 {offsets = [0, 3, 0], sizes = [16, 16, 4], strides = [1, 1, 1]} : vector<20x20x4xf32> to vector<16x16x4xf32>
    %9 = vector.shape_cast %8 : vector<16x16x4xf32> to vector<256x4xf32>
    %10 = vector.extract_strided_slice %1 {offsets = [0, 4, 0], sizes = [16, 16, 4], strides = [1, 1, 1]} : vector<20x20x4xf32> to vector<16x16x4xf32>
    %11 = vector.shape_cast %10 : vector<16x16x4xf32> to vector<256x4xf32>
    %12 = vector.extract_strided_slice %1 {offsets = [1, 0, 0], sizes = [16, 16, 4], strides = [1, 1, 1]} : vector<20x20x4xf32> to vector<16x16x4xf32>
    %13 = vector.shape_cast %12 : vector<16x16x4xf32> to vector<256x4xf32>
    %14 = vector.extract_strided_slice %1 {offsets = [1, 1, 0], sizes = [16, 16, 4], strides = [1, 1, 1]} : vector<20x20x4xf32> to vector<16x16x4xf32>
    %15 = vector.shape_cast %14 : vector<16x16x4xf32> to vector<256x4xf32>
    %16 = vector.extract_strided_slice %1 {offsets = [1, 2, 0], sizes = [16, 16, 4], strides = [1, 1, 1]} : vector<20x20x4xf32> to vector<16x16x4xf32>
    %17 = vector.shape_cast %16 : vector<16x16x4xf32> to vector<256x4xf32>
    %18 = vector.extract_strided_slice %1 {offsets = [1, 3, 0], sizes = [16, 16, 4], strides = [1, 1, 1]} : vector<20x20x4xf32> to vector<16x16x4xf32>
    %19 = vector.shape_cast %18 : vector<16x16x4xf32> to vector<256x4xf32>
    %20 = vector.extract_strided_slice %1 {offsets = [1, 4, 0], sizes = [16, 16, 4], strides = [1, 1, 1]} : vector<20x20x4xf32> to vector<16x16x4xf32>
    %21 = vector.shape_cast %20 : vector<16x16x4xf32> to vector<256x4xf32>
    %22 = vector.extract_strided_slice %1 {offsets = [2, 0, 0], sizes = [16, 16, 4], strides = [1, 1, 1]} : vector<20x20x4xf32> to vector<16x16x4xf32>
    %23 = vector.shape_cast %22 : vector<16x16x4xf32> to vector<256x4xf32>
    %24 = vector.extract_strided_slice %1 {offsets = [2, 1, 0], sizes = [16, 16, 4], strides = [1, 1, 1]} : vector<20x20x4xf32> to vector<16x16x4xf32>
    %25 = vector.shape_cast %24 : vector<16x16x4xf32> to vector<256x4xf32>
    %26 = vector.extract_strided_slice %1 {offsets = [2, 2, 0], sizes = [16, 16, 4], strides = [1, 1, 1]} : vector<20x20x4xf32> to vector<16x16x4xf32>
    %27 = vector.shape_cast %26 : vector<16x16x4xf32> to vector<256x4xf32>
    %28 = vector.extract_strided_slice %1 {offsets = [2, 3, 0], sizes = [16, 16, 4], strides = [1, 1, 1]} : vector<20x20x4xf32> to vector<16x16x4xf32>
    %29 = vector.shape_cast %28 : vector<16x16x4xf32> to vector<256x4xf32>
    %30 = vector.extract_strided_slice %1 {offsets = [2, 4, 0], sizes = [16, 16, 4], strides = [1, 1, 1]} : vector<20x20x4xf32> to vector<16x16x4xf32>
    %31 = vector.shape_cast %30 : vector<16x16x4xf32> to vector<256x4xf32>
    %32 = vector.extract_strided_slice %1 {offsets = [3, 0, 0], sizes = [16, 16, 4], strides = [1, 1, 1]} : vector<20x20x4xf32> to vector<16x16x4xf32>
    %33 = vector.shape_cast %32 : vector<16x16x4xf32> to vector<256x4xf32>
    %34 = vector.extract_strided_slice %1 {offsets = [3, 1, 0], sizes = [16, 16, 4], strides = [1, 1, 1]} : vector<20x20x4xf32> to vector<16x16x4xf32>
    %35 = vector.shape_cast %34 : vector<16x16x4xf32> to vector<256x4xf32>
    %36 = vector.extract_strided_slice %1 {offsets = [3, 2, 0], sizes = [16, 16, 4], strides = [1, 1, 1]} : vector<20x20x4xf32> to vector<16x16x4xf32>
    %37 = vector.shape_cast %36 : vector<16x16x4xf32> to vector<256x4xf32>
    %38 = vector.extract_strided_slice %1 {offsets = [3, 3, 0], sizes = [16, 16, 4], strides = [1, 1, 1]} : vector<20x20x4xf32> to vector<16x16x4xf32>
    %39 = vector.shape_cast %38 : vector<16x16x4xf32> to vector<256x4xf32>
    %40 = vector.extract_strided_slice %1 {offsets = [3, 4, 0], sizes = [16, 16, 4], strides = [1, 1, 1]} : vector<20x20x4xf32> to vector<16x16x4xf32>
    %41 = vector.shape_cast %40 : vector<16x16x4xf32> to vector<256x4xf32>
    %42 = vector.extract_strided_slice %1 {offsets = [4, 0, 0], sizes = [16, 16, 4], strides = [1, 1, 1]} : vector<20x20x4xf32> to vector<16x16x4xf32>
    %43 = vector.shape_cast %42 : vector<16x16x4xf32> to vector<256x4xf32>
    %44 = vector.extract_strided_slice %1 {offsets = [4, 1, 0], sizes = [16, 16, 4], strides = [1, 1, 1]} : vector<20x20x4xf32> to vector<16x16x4xf32>
    %45 = vector.shape_cast %44 : vector<16x16x4xf32> to vector<256x4xf32>
    %46 = vector.extract_strided_slice %1 {offsets = [4, 2, 0], sizes = [16, 16, 4], strides = [1, 1, 1]} : vector<20x20x4xf32> to vector<16x16x4xf32>
    %47 = vector.shape_cast %46 : vector<16x16x4xf32> to vector<256x4xf32>
    %48 = vector.extract_strided_slice %1 {offsets = [4, 3, 0], sizes = [16, 16, 4], strides = [1, 1, 1]} : vector<20x20x4xf32> to vector<16x16x4xf32>
    %49 = vector.shape_cast %48 : vector<16x16x4xf32> to vector<256x4xf32>
    %50 = vector.extract_strided_slice %1 {offsets = [4, 4, 0], sizes = [16, 16, 4], strides = [1, 1, 1]} : vector<20x20x4xf32> to vector<16x16x4xf32>
    %51 = vector.shape_cast %50 : vector<16x16x4xf32> to vector<256x4xf32>
    %52 = tpu.concatenate %3, %5, %7, %9, %11, %13, %15, %17, %19, %21, %23, %25, %27, %29, %31, %33 in 1 : vector<256x4xf32>, vector<256x4xf32>, vector<256x4xf32>, vector<256x4xf32>, vector<256x4xf32>, vector<256x4xf32>, vector<256x4xf32>, vector<256x4xf32>, vector<256x4xf32>, vector<256x4xf32>, vector<256x4xf32>, vector<256x4xf32>, vector<256x4xf32>, vector<256x4xf32>, vector<256x4xf32>, vector<256x4xf32> -> vector<256x64xf32>
    %53 = tpu.concatenate %35, %37, %39, %41, %43, %45, %47, %49, %51 in 1 : vector<256x4xf32>, vector<256x4xf32>, vector<256x4xf32>, vector<256x4xf32>, vector<256x4xf32>, vector<256x4xf32>, vector<256x4xf32>, vector<256x4xf32>, vector<256x4xf32> -> vector<256x36xf32>
    %54 = tpu.concatenate %52, %53 in 1 : vector<256x64xf32>, vector<256x36xf32> -> vector<256x100xf32>
    %55 = arith.truncf %54 : vector<256x100xf32> to vector<256x100xbf16>
    %c0_3 = arith.constant 0 : index
    %c0_4 = arith.constant 0 : index
    %56 = vector.load %arg2[%c0_3, %c0_4] : memref<100x128xbf16, #tpu.memory_space<vmem>>, vector<100x128xbf16>
    %cst = arith.constant dense<0.000000e+00> : vector<256x128xf32>
    %57 = tpu.matmul %55, %56, %cst {dimension_numbers = #tpu.dot_dimension_numbers<[1], [0], [0], [1], [0, 0, 1, 1], [], []>} : vector<256x100xbf16>, vector<100x128xbf16>, vector<256x128xf32> -> vector<256x128xf32>
    %c0_5 = arith.constant 0 : index
    %c0_6 = arith.constant 0 : index
    %c0_7 = arith.constant 0 : index
    %58 = vector.load %arg3[%c0_5, %c0_6, %c0_7] : memref<1x256x128xf32, #tpu.memory_space<vmem>>, vector<1x256x128xf32>
    %59 = vector.shape_cast %58 : vector<1x256x128xf32> to vector<256x128xf32>
    %60 = vector.shape_cast %57 : vector<256x128xf32> to vector<1x256x128xf32>
    tpu.vector_store %arg3[%c0_5, %c0_6, %c0_7], %60 {strides = array<i32>} : memref<1x256x128xf32, #tpu.memory_space<vmem>>, vector<1x256x128xf32>,
    %c0_i32 = arith.constant 0 : i32
    %61 = arith.cmpi eq, %arg0, %c0_i32 : i32
    %62 = arith.extui %61 : i1 to i32
    %c0_i32_8 = arith.constant 0 : i32
    %63 = arith.cmpi ne, %62, %c0_i32_8 : i32
    scf.if %63 {
      %cst_15 = arith.constant 0.000000e+00 : f32
      %73 = vector.broadcast %cst_15 : f32 to vector<2x128xf32>
      %c0_16 = arith.constant 0 : index
      %c0_17 = arith.constant 0 : index
      %74 = vector.load %arg4[%c0_16, %c0_17] : memref<2x128xf32, #tpu.memory_space<vmem>>, vector<2x128xf32>
      tpu.vector_store %arg4[%c0_16, %c0_17], %73 {strides = array<i32>} : memref<2x128xf32, #tpu.memory_space<vmem>>, vector<2x128xf32>,
    } else {
    }
    %c0_9 = arith.constant 0 : index
    %c0_10 = arith.constant 0 : index
    %64 = vector.load %arg4[%c0_9, %c0_10] : memref<2x128xf32, #tpu.memory_space<vmem>>, vector<2x128xf32>
    %cst_11 = arith.constant dense<0.000000e+00> : vector<128xf32>
    %65 = vector.multi_reduction <add>, %57, %cst_11 [0] : vector<256x128xf32> to vector<128xf32>
    %66 = vector.shape_cast %65 : vector<128xf32> to vector<1x128xf32>
    %67 = arith.mulf %57, %57 : vector<256x128xf32>
    %cst_12 = arith.constant dense<0.000000e+00> : vector<128xf32>
    %68 = vector.multi_reduction <add>, %67, %cst_12 [0] : vector<256x128xf32> to vector<128xf32>
    %69 = vector.shape_cast %68 : vector<128xf32> to vector<1x128xf32>
    %70 = tpu.concatenate %66, %69 in 0 : vector<1x128xf32>, vector<1x128xf32> -> vector<2x128xf32>
    %71 = arith.addf %64, %70 : vector<2x128xf32>
    %c0_13 = arith.constant 0 : index
    %c0_14 = arith.constant 0 : index
    %72 = vector.load %arg4[%c0_13, %c0_14] : memref<2x128xf32, #tpu.memory_space<vmem>>, vector<2x128xf32>
    tpu.vector_store %arg4[%c0_13, %c0_14], %71 {strides = array<i32>} : memref<2x128xf32, #tpu.memory_space<vmem>>, vector<2x128xf32>,
    return
  }
  func.func @transform_0(%arg0: i32) -> (i32, i32, i32, i32) {
    %c0_i32 = arith.constant 0 : i32
    %c0_i32_0 = arith.constant 0 : i32
    %c0_i32_1 = arith.constant 0 : i32
    %c0_i32_2 = arith.constant 0 : i32
    return %arg0, %c0_i32, %c0_i32_0, %c0_i32_1 : i32, i32, i32, i32
  }
  func.func @transform_1(%arg0: i32) -> (i32, i32) {
    %c0_i32 = arith.constant 0 : i32
    %c0_i32_0 = arith.constant 0 : i32
    %c0_i32_1 = arith.constant 0 : i32
    return %c0_i32, %c0_i32_0 : i32, i32
  }
  func.func @transform_2(%arg0: i32) -> (i32, i32, i32) {
    %c0_i32 = arith.constant 0 : i32
    %c0_i32_0 = arith.constant 0 : i32
    %c0_i32_1 = arith.constant 0 : i32
    return %arg0, %c0_i32, %c0_i32_0 : i32, i32, i32
  }
  func.func @transform_3(%arg0: i32) -> (i32, i32) {
    %c0_i32 = arith.constant 0 : i32
    %c0_i32_0 = arith.constant 0 : i32
    %c0_i32_1 = arith.constant 0 : i32
    return %c0_i32, %c0_i32_0 : i32, i32
  }
}

</mosaic_0001>

<bundles_post_ra>
// kernel: tpu_custom_call.1
= control target key start
LH: loop header
LB: loop body
LE: loop exit
PB: predicated region body
PF: predicated region fallthrough
CT: control target
= control target key end

     0   :  { %9 = vsyncpa [#allocation3], 0  ;;  %s11295_s0 = inlined_call_operand.vmem [shape: f32[2,20,20,4], index: 0, kind: input, shape index: {}]   ;;  %s11296_s1 = inlined_call_operand.vmem [shape: bf16[100,128], index: 1, kind: input, shape index: {}]   ;;  %s11297_s2 = inlined_call_operand.hbm [shape: f32[2,256,128], index: 2, kind: output, shape index: {0}]   ;;  %s11298_s3 = inlined_call_operand.hbm [shape: f32[2,128], index: 3, kind: output, shape index: {1}]  }
   0x1   :  { %11 = vsyncpa [#allocation3 + $0x1], 0 }
   0x2   :  { %12 = vsyncpa [#allocation5], 0  ;;  %s6689_s12 = smov 0   ;;  %s6691_s13 = smov 0  }
   0x3   :  { %s6693_s14 = smov 0   ;;  %s6695_s15 = smov 0  }
   0x4 LB: > { %s6710_s16 = sadd.s32 4294967295, %s6647_s15   ;;  %s4373_s17 = sadd.s32 4294967294, %s6647_s15   ;;  %s6647_s15 = sphi %s6695_s15, %s12526_s15   ;;  %s6643_s14 = sphi %s6693_s14, %s12525_s14   ;;  %s6639_s13 = sphi %s6691_s13, %s12524_s13   ;;  %s6635_s12 = sphi %s6689_s12, %s12523_s12  }
   0x5   : > { %s6714_s18 = sadd.s32 1, %s6647_s15   ;;  %s72_s19 = sadd.s32 1, %s6643_s14 }
   0x6   : > { %s69_s20 = ssub.s32 %s6647_s15, %s6714_s18  ;;  %p82_p0 = scmp.ne.s32.totalorder %s6643_s14, %s6639_s13 }
   0x7   : > { %p70_p1 = scmp.eq.s32.totalorder %s69_s20, 0  ;;  %p83_p2 = scmp.eq.s32.totalorder %s6710_s16, 1 }
   0x8   : > { %p88_p3 = scmp.ne.s32.totalorder %s6639_s13, %s6635_s12  ;;  %p89_p4 = scmp.eq.s32.totalorder %s4373_s17, 1 }
   0x9   : > { %s6725_s21 = scalar_select %p70_p1, %s6643_s14, %s72_s19  }
   0xa   : > { %p6729_p5 = por %p83_p2, %p82_p0  ;;  %p6733_p6 = por %p89_p4, %p88_p3 }
   0xb   : > { %p4376_p7 = scmp.ge.s32.totalorder %s6647_s15, 1  ;;  %p139_p8 = scmp.lt.s32.totalorder %s6647_s15, 3 }
   0xd   : > { %p140_p9 = pnand %p4376_p7, %p139_p8 }
   0xf   : > { %143 = sbr.rel (%p140_p9) target bundleno = 1315 (0x523), region = 28 }
  0x14   : > { %p163_p10 = scmp.lt.s32.totalorder %s6710_s16, 1  ;;  %vm277_vm0 = vcmask 1046528   ;;  %s6649_s29 = smov 4   ;;  %vm358_vm1 = vcmask 1045504   ;;  %vm439_vm2 = vcmask 1044480   ;;  %vm520_vm3 = vcmask 1043456  }
  0x15   : > { %s6650_s30 = smov 8   ;;  %s6651_s4 = smov 12   ;;  %vm2165_vm4 = vcmask 31744   ;;  %vm2198_vm5 = vcmask 64512   ;;  %vm2231_vm6 = vcmask 97280   ;;  %vm2264_vm7 = vcmask 130048  }
  0x16   : > { %s164_s24 = scalar_select %p163_p10, %s6710_s16, 1  ;;  %vm2297_vm8 = vcmask 162816   ;;  %vm2330_vm9 = vcmask 195584   ;;  %vm2363_vm10 = vcmask 228352   ;;  %vm2396_vm11 = vcmask 261120  }
  0x17   : > { %s6652_s5 = smov 16   ;;  %s6653_s6 = smov 20   ;;  %vm2429_vm12 = vcmask 293888   ;;  %vm2462_vm13 = vcmask 326656   ;;  %vm11701_vm14 = vcmask 359424   ;;  %vm11631_vm15 = vcmask 392192  }
  0x18   : > { %s4496_s25 = smul.u32 480, %s164_s24  ;;  %s6654_s7 = smov 24  }
  0x19   : > { %s6655_s8 = smov 28   ;;  %s6656_s9 = smov 32  }
  0x1a   : > { %s6744_s28 = scalar_lea.vmem %s11295_s0, %s4496_s25  ;;  %s6657_s10 = smov 36  }
  0x1b   : > { %v6747_v0 = vld [vmem:[%s6744_s28 + $0x30] sm:$0xff]  ;;  %v6750_v1 = vld [vmem:[%s6744_s28 + $0x38] sm:$0xff]  ;;  %v6753_v2 = vld [vmem:[%s6744_s28 + $0x40] sm:$0xf]  ;;  %s6658_s11 = smov 40   ;;  %s6659_s17 = smov 44  }
  0x1c   : > { %v288_v3 = vrot.slane %v6747_v0, 1  ;;  %v289_v4 = vrot.slane %v6750_v1, 1  ;;  %v291_v5 = vrot.slane %v6753_v2, 1  ;;  %v6759_v6 = vld [vmem:[%s6744_s28] sm:$0xff]  ;;  %v6762_v7 = vld [vmem:[%s6744_s28 + $0x8] sm:$0xff]  ;;  %v6773_v12 = vld [vmem:[%s6744_s28 + $0x50] sm:$0xff] }
  0x1d   : > { %v6765_v8 = vld [vmem:[%s6744_s28 + $0x48] sm:$0xff]  ;;  %v6768_v9 = vld [vmem:[%s6744_s28 + $0x10] sm:$0xf]  ;;  %v278_v10 = vrot.slane %v6759_v6, 1  ;;  %v279_v11 = vrot.slane %v6762_v7, 1  ;;  %v294_v18 = vrot.slane %v6773_v12, 1 }
  0x1e   : > { %v293_v13 = vrot.slane %v6765_v8, 1  ;;  %v290_v14 = vsel %vm277_vm0, %v288_v3, %v289_v4  ;;  %v292_v15 = vsel %vm277_vm0, %v289_v4, %v291_v5  ;;  %v281_v16 = vrot.slane %v6768_v9, 1  ;;  %v6780_v17 = vld [vmem:[%s6744_s28 + $0x58] sm:$0xf]  ;;  %v6787_v20 = vld [vmem:[%s6744_s28 + $0x20] sm:$0xff]  ;;  %v6815_v33 = vld [vmem:[%s6744_s28 + $0x68] sm:$0xff] }
  0x1f   : > { %v6784_v19 = vld [vmem:[%s6744_s28 + $0x18] sm:$0xff]  ;;  %11705 = vst [vmem:[#allocation9_spill] sm:$0xff] %v6787_v20  ;;  %v6789_v21 = vpack.i.bf16 %v292_v15, %v290_v14  ;;  %v280_v22 = vsel %vm277_vm0, %v278_v10, %v279_v11  ;;  %v296_v23 = vrot.slane %v6780_v17, 1  ;;  %v6794_v24 = vld [vmem:[%s6744_s28 + $0x28] sm:$0xf]  ;;  %v6800_v26 = vld [vmem:[%s6744_s28 + $0x80] sm:$0xff] }
  0x20   : > { %11704 = vst [vmem:[#allocation8_spill] sm:$0xff] %v6784_v19  ;;  %v6797_v25 = vld [vmem:[%s6744_s28 + $0x78] sm:$0xff]  ;;  %v282_v27 = vsel %vm277_vm0, %v279_v11, %v281_v16  ;;  %v6804_v28 = vsel %vm277_vm0, %v293_v13, %v294_v18  ;;  %v283_v29 = vrot.slane %v6784_v19, 1  ;;  %v284_v30 = vrot.slane %v6787_v20, 1  ;;  %v6809_v31 = vld [vmem:[%s6744_s28 + $0x88] sm:$0xf] }
  0x21   : > { %11706 = vst [vmem:[#allocation10_spill] sm:$0xff] %v6789_v21  ;;  %11707 = vst [vmem:[#allocation11_spill] sm:$0xff] %v6804_v28  ;;  %v6812_v32 = vld [vmem:[%s6744_s28 + $0x60] sm:$0xff]  ;;  %4572 = vrot.lane.b32.xlu1 %v6789_v21, %s6649_s29  ;;  %v4561_v34 = vpack.i.bf16 %v282_v27, %v280_v22  ;;  %v6820_v35 = vsel %vm277_vm0, %v294_v18, %v296_v23  ;;  %v286_v36 = vrot.slane %v6794_v24, 1  ;;  %v303_v37 = vrot.slane %v6797_v25, 1  ;;  %v6828_v39 = vld [vmem:[%s6744_s28 + $0xa8] sm:$0xff] }
  0x22   : > { %11708 = vst [vmem:[#allocation12_spill] sm:$0xff] %v6809_v31  ;;  %11709 = vst [vmem:[#allocation13_spill] sm:$0xff] %v6812_v32  ;;  %v6825_v38 = vld [vmem:[%s6744_s28 + $0x70] sm:$0xf]  ;;  %v6832_v40 = vpack.i.bf16 %v6820_v35, %v6804_v28  ;;  %v285_v41 = vsel %vm277_vm0, %v283_v29, %v284_v30  ;;  %v304_v42 = vrot.slane %v6800_v26, 1  ;;  %v306_v43 = vrot.slane %v6809_v31, 1 }
  0x23   : > { %11710 = vst [vmem:[#allocation14_spill] sm:$0xff] %v6815_v33  ;;  %11711 = vst [vmem:[#allocation15_spill] sm:$0xff] %v6820_v35  ;;  %v6838_v44 = vld [vmem:[%s6744_s28 + $0xb0] sm:$0xff]  ;;  %v6841_v45 = vld [vmem:[%s6744_s28 + $0xb8] sm:$0xf]  ;;  %4562 = vrot.lane.b32.xlu0 %v4561_v34, %s6649_s29  ;;  %v287_v46 = vsel %vm277_vm0, %v284_v30, %v286_v36  ;;  %v298_v47 = vrot.slane %v6812_v32, 1 }
  0x24   : > { %11712 = vst [vmem:[#allocation16_spill] sm:$0xff] %v6825_v38  ;;  %11713 = vst [vmem:[#allocation17_spill] sm:$0xff] %v6832_v40  ;;  %v299_v48 = vrot.slane %v6815_v33, 1  ;;  %v301_v49 = vrot.slane %v6825_v38, 1  ;;  %v6849_v50 = vld [vmem:[%s6744_s28 + $0x90] sm:$0xff]  ;;  %v6852_v51 = vld [vmem:[%s6744_s28 + $0x98] sm:$0xff]  ;;  %v6854_v52 = vpack.i.bf16 %v287_v46, %v285_v41  ;;  %v6857_v53 = vsel %vm277_vm0, %v303_v37, %v304_v42 }
  0x25   : > { %11714 = vst [vmem:[#allocation18_spill] sm:$0xff] %v6838_v44  ;;  %11716 = vst [vmem:[#allocation20_spill] sm:$0xff] %v6857_v53  ;;  %v6860_v54 = vsel %vm277_vm0, %v304_v42, %v306_v43  ;;  %v313_v55 = vrot.slane %v6828_v39, 1  ;;  %v6864_v56 = vld [vmem:[%s6744_s28 + $0xa0] sm:$0xf]  ;;  %v6867_v57 = vld [vmem:[%s6744_s28 + $0xd8] sm:$0xff]  ;;  %4577 = vrot.lane.b32.xlu1 %v6832_v40, %s6649_s29 }
  0x26   : > { %11715 = vst [vmem:[#allocation19_spill] sm:$0xff] %v6854_v52  ;;  %11717 = vst [vmem:[#allocation21_spill] sm:$0xff] %v6860_v54  ;;  %v6870_v58 = vld [vmem:[%s6744_s28 + $0xe0] sm:$0xff]  ;;  %v6876_v59 = vpack.i.bf16 %v6860_v54, %v6857_v53  ;;  %v6879_v60 = vsel %vm277_vm0, %v298_v47, %v299_v48  ;;  %v6882_v61 = vsel %vm277_vm0, %v299_v48, %v301_v49  ;;  %v314_v62 = vrot.slane %v6838_v44, 1  ;;  %v6886_v63 = vld [vmem:[%s6744_s28 + $0xe8] sm:$0xf] }
  0x27   : > { %11719 = vst [vmem:[#allocation23_spill] sm:$0xff] %v6879_v60  ;;  %11720 = vst [vmem:[#allocation24_spill] sm:$0xff] %v6882_v61  ;;  %v6889_v3 = vld [vmem:[%s6744_s28 + $0xc0] sm:$0xff]  ;;  %v6893_v4 = vpack.i.bf16 %v6882_v61, %v6879_v60  ;;  %v316_v5 = vrot.slane %v6841_v45, 1  ;;  %v308_v10 = vrot.slane %v6849_v50, 1  ;;  %v309_v11 = vrot.slane %v6852_v51, 1  ;;  %4567 = vrot.lane.b32.xlu0 %v6854_v52, %s6649_s29 }
  0x28   : > { %11718 = vst [vmem:[#allocation22_spill] sm:$0xff] %v6876_v59  ;;  %v6899_v13 = vld [vmem:[%s6744_s28 + $0xc8] sm:$0xff]  ;;  %v6904_v14 = vsel %vm277_vm0, %v313_v55, %v314_v62  ;;  %v311_v15 = vrot.slane %v6864_v56, 1  ;;  %v323_v16 = vrot.slane %v6867_v57, 1  ;;  %v324_v18 = vrot.slane %v6870_v58, 1  ;;  %v6924_v36 = vld [vmem:[%s6744_s28 + $0x110] sm:$0xff] }
  0x29   : > { %11721 = vst [vmem:[#allocation25_spill] sm:$0xff] %v6893_v4  ;;  %11722 = vst [vmem:[#allocation26_spill] sm:$0xff] %v6904_v14  ;;  %v6910_v22 = vld [vmem:[%s6744_s28 + $0xd0] sm:$0xf]  ;;  %v6913_v23 = vld [vmem:[%s6744_s28 + $0x108] sm:$0xff]  ;;  %v6916_v27 = vsel %vm277_vm0, %v314_v62, %v316_v5  ;;  %v6919_v29 = vsel %vm277_vm0, %v308_v10, %v309_v11  ;;  %v326_v30 = vrot.slane %v6886_v63, 1  ;;  %4587 = vrot.lane.b32.xlu1 %v6876_v59, %s6649_s29 }
  0x2a   : > { %11723 = vst [vmem:[#allocation27_spill] sm:$0xff] %v6916_v27  ;;  %11724 = vst [vmem:[#allocation28_spill] sm:$0xff] %v6919_v29  ;;  %v318_v34 = vrot.slane %v6889_v3, 1  ;;  %v6927_v37 = vld [vmem:[%s6744_s28 + $0x118] sm:$0xf]  ;;  %v6933_v41 = vpack.i.bf16 %v6916_v27, %v6904_v14  ;;  %v6936_v42 = vsel %vm277_vm0, %v309_v11, %v311_v15  ;;  %v319_v43 = vrot.slane %v6899_v13, 1 }
  0x2b   : > { %11726 = vst [vmem:[#allocation30_spill] sm:$0xff] %v6936_v42  ;;  %v6940_v46 = vld [vmem:[%s6744_s28 + $0xf0] sm:$0xff]  ;;  %v6943_v47 = vld [vmem:[%s6744_s28 + $0xf8] sm:$0xff]  ;;  %v6946_v48 = vld [vmem:[%s6744_s28 + $0x100] sm:$0xf]  ;;  %v6949_v49 = vsel %vm277_vm0, %v323_v16, %v324_v18  ;;  %v6952_v55 = vsel %vm277_vm0, %v324_v18, %v326_v30  ;;  %v321_v62 = vrot.slane %v6910_v22, 1  ;;  %4582 = vrot.lane.b32.xlu0 %v6893_v4, %s6649_s29  ;;  %v6963_v11 = vpack.i.bf16 %v6936_v42, %v6919_v29 }
  0x2c   : > { %11725 = vst [vmem:[#allocation29_spill] sm:$0xff] %v6933_v41  ;;  %11727 = vst [vmem:[#allocation31_spill] sm:$0xff] %v6949_v49  ;;  %v333_v5 = vrot.slane %v6913_v23, 1  ;;  %v6957_v10 = vld [vmem:[%s6744_s28 + $0x138] sm:$0xff]  ;;  %v6966_v15 = vsel %vm277_vm0, %v318_v34, %v319_v43  ;;  %v334_v16 = vrot.slane %v6924_v36, 1  ;;  %v336_v18 = vrot.slane %v6927_v37, 1 }
  0x2d   : > { %11728 = vst [vmem:[#allocation32_spill] sm:$0xff] %v6952_v55  ;;  %11729 = vst [vmem:[#allocation33_spill] sm:$0xff] %v6957_v10  ;;  %v6971_v30 = vld [vmem:[%s6744_s28 + $0x140] sm:$0xff]  ;;  %v6977_v27 = vsel %vm277_vm0, %v319_v43, %v321_v62  ;;  %v328_v53 = vrot.slane %v6940_v46, 1  ;;  %v329_v54 = vrot.slane %v6943_v47, 1  ;;  %v331_v29 = vrot.slane %v6946_v48, 1  ;;  %4597 = vrot.lane.b32.xlu1 %v6933_v41, %s6649_s29 }
  0x2e   : > { %11730 = vst [vmem:[#allocation34_spill] sm:$0xff] %v6963_v11  ;;  %11731 = vst [vmem:[#allocation35_spill] sm:$0xff] %v6966_v15  ;;  %v6974_v14 = vld [vmem:[%s6744_s28 + $0x120] sm:$0xff]  ;;  %v6983_v34 = vld [vmem:[%s6744_s28 + $0x148] sm:$0xf]  ;;  %v6992_v28 = vpack.i.bf16 %v6952_v55, %v6949_v49  ;;  %v6995_v43 = vsel %vm277_vm0, %v333_v5, %v334_v16  ;;  %v343_v62 = vrot.slane %v6957_v10, 1  ;;  %v7002_v60 = vsel %vm277_vm0, %v334_v16, %v336_v18 }
  0x2f   : > { %11732 = vst [vmem:[#allocation36_spill] sm:$0xff] %v6971_v30  ;;  %11733 = vst [vmem:[#allocation37_spill] sm:$0xff] %v6977_v27  ;;  %v6986_v42 = vld [vmem:[%s6744_s28 + $0x128] sm:$0xff]  ;;  %v6999_v35 = vld [vmem:[%s6744_s28 + $0x130] sm:$0xf]  ;;  %v7005_v61 = vsel %vm277_vm0, %v328_v53, %v329_v54  ;;  %v7008_v41 = vsel %vm277_vm0, %v329_v54, %v331_v29  ;;  %v344_v49 = vrot.slane %v6971_v30, 1  ;;  %4592 = vrot.lane.b32.xlu0 %v6963_v11, %s6649_s29 }
  0x30   : > { %11734 = vst [vmem:[#allocation38_spill] sm:$0xff] %v6983_v34  ;;  %11735 = vst [vmem:[#allocation39_spill] sm:$0xff] %v6986_v42  ;;  %v7012_v5 = vld [vmem:[%s6744_s28 + $0x168] sm:$0xff]  ;;  %v7018_v55 = vpack.i.bf16 %v6977_v27, %v6966_v15  ;;  %v346_v16 = vrot.slane %v6983_v34, 1  ;;  %v338_v53 = vrot.slane %v6974_v14, 1  ;;  %v339_v18 = vrot.slane %v6986_v42, 1 }
  0x31   : > { %11736 = vst [vmem:[#allocation40_spill] sm:$0xff] %v6992_v28  ;;  %11737 = vst [vmem:[#allocation41_spill] sm:$0xff] %v6995_v43  ;;  %v7024_v54 = vld [vmem:[%s6744_s28 + $0x170] sm:$0xff]  ;;  %v7027_v29 = vld [vmem:[%s6744_s28 + $0x178] sm:$0xf]  ;;  %v341_v59 = vrot.slane %v6999_v35, 1  ;;  %4607 = vrot.lane.b32.xlu1 %v6992_v28, %s6649_s29  ;;  %v7040_v15 = vpack.i.bf16 %v7002_v60, %v6995_v43  ;;  %v7044_v27 = vpack.i.bf16 %v7008_v41, %v7005_v61 }
  0x32   : > { %11738 = vst [vmem:[#allocation42_spill] sm:$0xff] %v6999_v35  ;;  %11739 = vst [vmem:[#allocation43_spill] sm:$0xff] %v7002_v60  ;;  %v7031_v40 = vld [vmem:[%s6744_s28 + $0x150] sm:$0xff]  ;;  %v7034_v4 = vld [vmem:[%s6744_s28 + $0x158] sm:$0xff]  ;;  %v7047_v11 = vsel %vm277_vm0, %v343_v62, %v344_v49  ;;  %v7053_v21 = vsel %vm277_vm0, %v344_v49, %v346_v16  ;;  %v353_v35 = vrot.slane %v7012_v5, 1  ;;  %v354_v28 = vrot.slane %v7024_v54, 1 }
  0x33   : > { %11740 = vst [vmem:[#allocation44_spill] sm:$0xff] %v7005_v61  ;;  %11741 = vst [vmem:[#allocation45_spill] sm:$0xff] %v7008_v41  ;;  %v7050_v52 = vld [vmem:[%s6744_s28 + $0x160] sm:$0xf]  ;;  %v356_v42 = vrot.slane %v7027_v29, 1  ;;  %4602 = vrot.lane.b32.xlu0 %v7018_v55, %s6649_s29  ;;  %v7061_v61 = vsel %vm277_vm0, %v338_v53, %v339_v18  ;;  %v7064_v62 = vsel %vm277_vm0, %v339_v18, %v341_v59  ;;  %v348_v41 = vrot.slane %v7031_v40, 1 }
  0x34   : > { %11742 = vst [vmem:[#allocation46_spill] sm:$0xff] %v7018_v55  ;;  %11743 = vst [vmem:[#allocation47_spill] sm:$0xff] %v7027_v29  ;;  %v349_v49 = vrot.slane %v7034_v4, 1  ;;  %v351_v16 = vrot.slane %v7050_v52, 1  ;;  %v364_v43 = vrot.slane %v6784_v19, 2  ;;  %v365_v60 = vrot.slane %v6787_v20, 2 }
  0x35   : > { %11744 = vst [vmem:[#allocation48_spill] sm:$0xff] %v7040_v15  ;;  %11745 = vst [vmem:[#allocation49_spill] sm:$0xff] %v7044_v27  ;;  %v367_v29 = vrot.slane %v6794_v24, 2  ;;  %4617 = vrot.lane.b32.xlu1 %v7040_v15, %s6649_s29  ;;  %v7076_v53 = vpack.i.bf16 %v7053_v21, %v7047_v11  ;;  %v7079_v59 = vsel %vm277_vm0, %v353_v35, %v354_v28  ;;  %s6660_s19 = smov 48   ;;  %s6661_s20 = smov 52  }
  0x36   : > { %11746 = vst [vmem:[#allocation50_spill] sm:$0xff] %v7047_v11  ;;  %11747 = vst [vmem:[#allocation51_spill] sm:$0xff] %v7053_v21  ;;  %v7082_v18 = vsel %vm277_vm0, %v354_v28, %v356_v42  ;;  %v7088_v55 = vpack.i.bf16 %v7064_v62, %v7061_v61  ;;  %v7091_v15 = vsel %vm277_vm0, %v348_v41, %v349_v49  ;;  %v359_v11 = vrot.slane %v6759_v6, 2  ;;  %s6662_s24 = smov 56   ;;  %s6663_s25 = smov 60  }
  0x37   : > { %11748 = vst [vmem:[#allocation52_spill] sm:$0xff] %v7061_v61  ;;  %11749 = vst [vmem:[#allocation53_spill] sm:$0xff] %v7064_v62  ;;  %4612 = vrot.lane.b32.xlu0 %v7044_v27, %s6649_s29  ;;  %v360_v21 = vrot.slane %v6762_v7, 2  ;;  %v7096_v35 = vsel %vm277_vm0, %v349_v49, %v351_v16  ;;  %v366_v28 = vsel %vm358_vm1, %v364_v43, %v365_v60  ;;  %v362_v27 = vrot.slane %v6768_v9, 2  ;;  %p4402_p11 = scmp.ne.s32.totalorder %s6710_s16, 0 }
  0x38   : > { %11750 = vst [vmem:[#allocation54_spill] sm:$0xff] %v7076_v53  ;;  %11751 = vst [vmem:[#allocation55_spill] sm:$0xff] %v7079_v59  ;;  %v368_v42 = vsel %vm358_vm1, %v365_v60, %v367_v29  ;;  %v7105_v41 = vpack.i.bf16 %v7082_v18, %v7079_v59  ;;  %v374_v61 = vrot.slane %v6765_v8, 2  ;;  %v375_v62 = vrot.slane %v6773_v12, 2 }
  0x39   : > { %11752 = vst [vmem:[#allocation56_spill] sm:$0xff] %v7082_v18  ;;  %11753 = vst [vmem:[#allocation57_spill] sm:$0xff] %v7088_v55  ;;  %4627 = vrot.lane.b32.xlu1 %v7076_v53, %s6649_s29  ;;  %v377_v49 = vrot.slane %v6780_v17, 2  ;;  %v7114_v60 = vpack.i.bf16 %v7096_v35, %v7091_v15  ;;  %v7116_v43 = vpack.i.bf16 %v368_v42, %v366_v28  ;;  %v369_v59 = vrot.slane %v6747_v0, 2 }
  0x3a   : > { %11754 = vst [vmem:[#allocation58_spill] sm:$0xff] %v7091_v15  ;;  %11755 = vst [vmem:[#allocation59_spill] sm:$0xff] %v7096_v35  ;;  %v361_v29 = vsel %vm358_vm1, %v359_v11, %v360_v21  ;;  %v363_v16 = vsel %vm358_vm1, %v360_v21, %v362_v27  ;;  %v370_v18 = vrot.slane %v6750_v1, 2  ;;  %v372_v53 = vrot.slane %v6753_v2, 2 }
  0x3b   : > { %11756 = vst [vmem:[#allocation60_spill] sm:$0xff] %v7105_v41  ;;  %4622 = vrot.lane.b32.xlu0 %v7088_v55, %s6649_s29  ;;  %11757 = vst [vmem:[#allocation61_spill] sm:$0xff] %v7114_v60  ;;  %v376_v55 = vsel %vm358_vm1, %v374_v61, %v375_v62  ;;  %v378_v15 = vsel %vm358_vm1, %v375_v62, %v377_v49  ;;  %v384_v28 = vrot.slane %v6797_v25, 2  ;;  %v385_v42 = vrot.slane %v6800_v26, 2 }
  0x3c   : > { %11758 = vst [vmem:[#allocation62_spill] sm:$0xff] %v7116_v43  ;;  %v387_v11 = vrot.slane %v6809_v31, 2  ;;  %v379_v21 = vrot.slane %v6812_v32, 2  ;;  %v380_v27 = vrot.slane %v6815_v33, 2  ;;  %v382_v35 = vrot.slane %v6825_v38, 2 }
  0x3d   : > { %4637 = vrot.lane.b32.xlu1 %v7105_v41, %s6649_s29  ;;  %v4641_v41 = vpack.i.bf16 %v363_v16, %v361_v29  ;;  %v371_v61 = vsel %vm358_vm1, %v369_v59, %v370_v18  ;;  %v373_v62 = vsel %vm358_vm1, %v370_v18, %v372_v53  ;;  %v7139_v49 = vpack.i.bf16 %v378_v15, %v376_v55 }
  0x3e   : > { %v386_v32 = vsel %vm358_vm1, %v384_v28, %v385_v42  ;;  %v394_v33 = vrot.slane %v6828_v39, 2  ;;  %v395_v38 = vrot.slane %v6838_v44, 2  ;;  %v388_v31 = vsel %vm358_vm1, %v385_v42, %v387_v11 }
  0x3f   : > { %4632 = vrot.lane.b32.xlu0 %v7114_v60, %s6649_s29  ;;  %11759 = vst [vmem:[#allocation63_spill] sm:$0xff] %v7139_v49  ;;  %v381_v29 = vsel %vm358_vm1, %v379_v21, %v380_v27  ;;  %v383_v59 = vsel %vm358_vm1, %v380_v27, %v382_v35  ;;  %v397_v53 = vrot.slane %v6841_v45, 2  ;;  %v7149_v18 = vpack.i.bf16 %v373_v62, %v371_v61 }
  0x40   : > { %v389_v55 = vrot.slane %v6849_v50, 2  ;;  %v390_v15 = vrot.slane %v6852_v51, 2  ;;  %v392_v16 = vrot.slane %v6864_v56, 2  ;;  %v7156_v28 = vpack.i.bf16 %v388_v31, %v386_v32 }
  0x41   : > { %4647 = vrot.lane.b32.xlu1 %v7116_v43, %s6650_s30  ;;  %11760 = vst [vmem:[#allocation64_spill] sm:$0xff] %v7149_v18  ;;  %v7158_v42 = vpack.i.bf16 %v383_v59, %v381_v29  ;;  %v396_v35 = vsel %vm358_vm1, %v394_v33, %v395_v38  ;;  %v398_v11 = vsel %vm358_vm1, %v395_v38, %v397_v53  ;;  %v405_v21 = vrot.slane %v6870_v58, 2 }
  0x42   : > { %11761 = vst [vmem:[#allocation65_spill] sm:$0xff] %v7156_v28  ;;  %v407_v27 = vrot.slane %v6886_v63, 2  ;;  %v391_v61 = vsel %vm358_vm1, %v389_v55, %v390_v15  ;;  %v393_v31 = vsel %vm358_vm1, %v390_v15, %v392_v16  ;;  %v399_v32 = vrot.slane %v6889_v3, 2 }
  0x43   : > { %4642 = vrot.lane.b32.xlu0 %v4641_v41, %s6650_s30  ;;  %11762 = vst [vmem:[#allocation66_spill] sm:$0xff] %v7158_v42  ;;  %v404_v41 = vrot.slane %v6867_v57, 2  ;;  %v400_v62 = vrot.slane %v6899_v13, 2  ;;  %v402_v33 = vrot.slane %v6910_v22, 2  ;;  %v7174_v38 = vpack.i.bf16 %v398_v11, %v396_v35 }
  0x44   : > { %v414_v29 = vrot.slane %v6913_v23, 2  ;;  %v415_v59 = vrot.slane %v6924_v36, 2  ;;  %v7178_v53 = vpack.i.bf16 %v393_v31, %v391_v61  ;;  %v408_v15 = vsel %vm358_vm1, %v405_v21, %v407_v27 }
  0x45   : > { %4657 = vrot.lane.b32.xlu1 %v7139_v49, %s6650_s30  ;;  %11763 = vst [vmem:[#allocation67_spill] sm:$0xff] %v7174_v38  ;;  %v406_v55 = vsel %vm358_vm1, %v404_v41, %v405_v21  ;;  %v417_v16 = vrot.slane %v6927_v37, 2  ;;  %v409_v35 = vrot.slane %v6940_v46, 2  ;;  %v445_v11 = vrot.slane %v6784_v19, 3 }
  0x46   : > { %11764 = vst [vmem:[#allocation68_spill] sm:$0xff] %v7178_v53  ;;  %v446_v49 = vrot.slane %v6787_v20, 3  ;;  %v403_v61 = vsel %vm358_vm1, %v400_v62, %v402_v33  ;;  %v410_v31 = vrot.slane %v6943_v47, 2  ;;  %v412_v41 = vrot.slane %v6946_v48, 2 }
  0x47   : > { %4652 = vrot.lane.b32.xlu0 %v7149_v18, %s6650_s30  ;;  %v448_v21 = vrot.slane %v6794_v24, 3  ;;  %v7195_v27 = vpack.i.bf16 %v408_v15, %v406_v55  ;;  %v425_v43 = vrot.slane %v6971_v30, 2  ;;  %v418_v18 = vsel %vm358_vm1, %v415_v59, %v417_v16  ;;  %v11769_v16 = vld [vmem:[#allocation42_spill] sm:$0xff] }
  0x48   : > { %v447_v33 = vsel %vm439_vm2, %v445_v11, %v446_v49  ;;  %v419_v55 = vrot.slane %v6974_v14, 2  ;;  %v411_v30 = vsel %vm358_vm1, %v409_v35, %v410_v31 }
  0x49   : > { %4667 = vrot.lane.b32.xlu1 %v7156_v28, %s6650_s30  ;;  %v401_v28 = vsel %vm358_vm1, %v399_v32, %v400_v62  ;;  %11765 = vst [vmem:[#allocation69_spill] sm:$0xff] %v7195_v27  ;;  %v416_v32 = vsel %vm358_vm1, %v414_v29, %v415_v59  ;;  %v427_v62 = vrot.slane %v6983_v34, 2  ;;  %v449_v60 = vsel %vm439_vm2, %v446_v49, %v448_v21  ;;  %v11767_v29 = vld [vmem:[#allocation39_spill] sm:$0xff] }
  0x4a   : > { %v420_v15 = vrot.slane %v11767_v29, 2  ;;  %v413_v59 = vsel %vm358_vm1, %v410_v31, %v412_v41  ;;  %v422_v34 = vrot.slane %v11769_v16, 2  ;;  %v7217_v49 = vpack.i.bf16 %v418_v18, %v416_v32  ;;  %v11771_v21 = vld [vmem:[#allocation47_spill] sm:$0xff] }
  0x4b   : > { %4662 = vrot.lane.b32.xlu0 %v7158_v42, %s6650_s30  ;;  %v424_v42 = vrot.slane %v6957_v10, 2  ;;  %v7210_v10 = vpack.i.bf16 %v449_v60, %v447_v33  ;;  %v428_v11 = vsel %vm358_vm1, %v425_v43, %v427_v62  ;;  %v435_v60 = vrot.slane %v7024_v54, 2 }
  0x4c   : > { %11770 = vst [vmem:[#allocation42_spill] sm:$0xff] %v7217_v49  ;;  %v437_v33 = vrot.slane %v11771_v21, 2  ;;  %v7226_v35 = vpack.i.bf16 %v413_v59, %v411_v30  ;;  %v421_v31 = vsel %vm358_vm1, %v419_v55, %v420_v15  ;;  %v423_v18 = vsel %vm358_vm1, %v420_v15, %v422_v34 }
  0x4d   : > { %4677 = vrot.lane.b32.xlu1 %v7174_v38, %s6650_s30  ;;  %v7206_v38 = vpack.i.bf16 %v403_v61, %v401_v28  ;;  %11768 = vst [vmem:[#allocation39_spill] sm:$0xff] %v7210_v10  ;;  %v426_v28 = vsel %vm358_vm1, %v424_v42, %v425_v43  ;;  %v434_v61 = vrot.slane %v7012_v5, 2  ;;  %v429_v41 = vrot.slane %v7031_v40, 2 }
  0x4e   : > { %11772 = vst [vmem:[#allocation47_spill] sm:$0xff] %v7226_v35  ;;  %v430_v42 = vrot.slane %v7034_v4, 2  ;;  %v432_v43 = vrot.slane %v7050_v52, 2  ;;  %v7235_v32 = vpack.i.bf16 %v428_v11, %v426_v28  ;;  %v440_v62 = vrot.slane %v6759_v6, 3 }
  0x4f   : > { %4672 = vrot.lane.b32.xlu0 %v7178_v53, %s6650_s30  ;;  %11766 = vst [vmem:[#allocation70_spill] sm:$0xff] %v7206_v38  ;;  %v441_v30 = vrot.slane %v6762_v7, 3  ;;  %v436_v59 = vsel %vm358_vm1, %v434_v61, %v435_v60  ;;  %v438_v55 = vsel %vm358_vm1, %v435_v60, %v437_v33  ;;  %v443_v34 = vrot.slane %v6768_v9, 3 }
  0x50   : > { %11773 = vst [vmem:[#allocation71_spill] sm:$0xff] %v7235_v32  ;;  %v7244_v15 = vpack.i.bf16 %v423_v18, %v421_v31  ;;  %v433_v28 = vsel %vm358_vm1, %v430_v42, %v432_v43  ;;  %v7250_v11 = vpack.i.bf16 %v438_v55, %v436_v59  ;;  %v455_v60 = vrot.slane %v6765_v8, 3 }
  0x51   : > { %4687 = vrot.lane.b32.xlu1 %v7195_v27, %s6650_s30  ;;  %v431_v27 = vsel %vm358_vm1, %v429_v41, %v430_v42  ;;  %v442_v61 = vsel %vm439_vm2, %v440_v62, %v441_v30  ;;  %v456_v33 = vrot.slane %v6773_v12, 3  ;;  %v458_v31 = vrot.slane %v6780_v17, 3 }
  0x52   : > { %11774 = vst [vmem:[#allocation72_spill] sm:$0xff] %v7244_v15  ;;  %11775 = vst [vmem:[#allocation73_spill] sm:$0xff] %v7250_v11  ;;  %v450_v18 = vrot.slane %v6747_v0, 3  ;;  %v451_v41 = vrot.slane %v6750_v1, 3  ;;  %v7261_v42 = vpack.i.bf16 %v433_v28, %v431_v27  ;;  %v453_v43 = vrot.slane %v6753_v2, 3  ;;  %v11778_v28 = vld [vmem:[#allocation13_spill] sm:$0xff] }
  0x53   : > { %4682 = vrot.lane.b32.xlu0 %v7206_v38, %s6650_s30  ;;  %v457_v59 = vsel %vm439_vm2, %v455_v60, %v456_v33  ;;  %v459_v55 = vsel %vm439_vm2, %v456_v33, %v458_v31  ;;  %v11780_v60 = vld [vmem:[#allocation16_spill] sm:$0xff]  ;;  %v475_v31 = vrot.slane %v6828_v39, 3  ;;  %v478_v53 = vrot.slane %v6841_v45, 3 }
  0x54   : > { %11776 = vst [vmem:[#allocation74_spill] sm:$0xff] %v7261_v42  ;;  %v454_v27 = vsel %vm439_vm2, %v451_v41, %v453_v43  ;;  %v463_v38 = vrot.slane %v11780_v60, 3  ;;  %v7280_v33 = vpack.i.bf16 %v459_v55, %v457_v59  ;;  %v470_v55 = vrot.slane %v6849_v50, 3 }
  0x55   : > { %4697 = vrot.lane.b32.xlu1 %v7217_v49, %s6650_s30  ;;  %v444_v49 = vsel %vm439_vm2, %v441_v30, %v443_v34  ;;  %v465_v30 = vrot.slane %v6797_v25, 3  ;;  %v452_v34 = vsel %vm439_vm2, %v450_v18, %v451_v41  ;;  %v476_v18 = vrot.slane %v6838_v44, 3 }
  0x56   : > { %v4721_v62 = vpack.i.bf16 %v444_v49, %v442_v61  ;;  %v11779_v49 = vld [vmem:[#allocation14_spill] sm:$0xff]  ;;  %v471_v44 = vrot.slane %v6852_v51, 3 }
  0x57   : > { %4692 = vrot.lane.b32.xlu0 %v7226_v35, %s6650_s30  ;;  %v11777_v35 = vld [vmem:[#allocation12_spill] sm:$0xff]  ;;  %v461_v61 = vrot.slane %v11779_v49, 3 }
  0x58   : > { %11781 = vst [vmem:[#allocation12_spill] sm:$0xff] %v7280_v33 }
  0x59   : > { %4707 = vrot.lane.b32.xlu1 %v7235_v32, %s6650_s30  ;;  %v466_v32 = vrot.slane %v6800_v26, 3  ;;  %v464_v59 = vsel %vm439_vm2, %v461_v61, %v463_v38  ;;  %v485_v38 = vrot.slane %v6867_v57, 3 }
  0x5b   : > { %4702 = vrot.lane.b32.xlu0 %v7244_v15, %s6650_s30  ;;  %v468_v15 = vrot.slane %v11777_v35, 3  ;;  %v467_v41 = vsel %vm439_vm2, %v465_v30, %v466_v32  ;;  %v527_v30 = vrot.slane %v6787_v20, 4 }
  0x5d   : > { %4717 = vrot.lane.b32.xlu1 %v7250_v11, %s6650_s30  ;;  %v460_v11 = vrot.slane %v11778_v28, 3  ;;  %v469_v43 = vsel %vm439_vm2, %v466_v32, %v468_v15  ;;  %v529_v32 = vrot.slane %v6794_v24, 4 }
  0x5e   : > { %v7300_v15 = vpack.i.bf16 %v469_v43, %v467_v41  ;;  %v480_v41 = vrot.slane %v6889_v3, 3 }
  0x5f   : > { %4712 = vrot.lane.b32.xlu0 %v7261_v42, %s6650_s30  ;;  %v7284_v42 = vpack.i.bf16 %v454_v27, %v452_v34  ;;  %v462_v60 = vsel %vm439_vm2, %v460_v11, %v461_v61  ;;  %v473_v34 = vrot.slane %v6864_v56, 3  ;;  %v477_v11 = vsel %vm439_vm2, %v475_v31, %v476_v18 }
  0x60   : > { %11783 = vst [vmem:[#allocation14_spill] sm:$0xff] %v7300_v15  ;;  %v479_v27 = vsel %vm439_vm2, %v476_v18, %v478_v53  ;;  %v488_v61 = vrot.slane %v6886_v63, 3  ;;  %v530_v20 = vsel %vm520_vm3, %v527_v30, %v529_v32  ;;  %v7311_v24 = vpack.i.bf16 %v464_v59, %v462_v60 }
  0x61   : > { %4727 = vrot.lane.b32.xlu1 %v7210_v10, %s6651_s4  ;;  %11782 = vst [vmem:[#allocation13_spill] sm:$0xff] %v7284_v42  ;;  %v526_v10 = vrot.slane %v6784_v19, 4  ;;  %v481_v31 = vrot.slane %v6899_v13, 3  ;;  %v474_v53 = vsel %vm439_vm2, %v471_v44, %v473_v34  ;;  %v483_v18 = vrot.slane %v6910_v22, 3 }
  0x62   : > { %11784 = vst [vmem:[#allocation75_spill] sm:$0xff] %v7311_v24  ;;  %v490_v32 = vrot.slane %v6940_v46, 3 }
  0x63   : > { %4722 = vrot.lane.b32.xlu0 %v4721_v62, %s6651_s4  ;;  %v486_v62 = vrot.slane %v6870_v58, 3  ;;  %v528_v19 = vsel %vm520_vm3, %v526_v10, %v527_v30  ;;  %v7322_v10 = vpack.i.bf16 %v479_v27, %v477_v11  ;;  %v495_v30 = vrot.slane %v6913_v23, 3  ;;  %v11788_v27 = vld [vmem:[#allocation33_spill] sm:$0xff] }
  0x64   : > { %v7315_v43 = vpack.i.bf16 %v530_v20, %v528_v19  ;;  %v496_v19 = vrot.slane %v6924_v36, 3  ;;  %v498_v20 = vrot.slane %v6927_v37, 3  ;;  %v484_v34 = vsel %vm439_vm2, %v481_v31, %v483_v18 }
  0x65   : > { %4737 = vrot.lane.b32.xlu1 %v7280_v33, %s6651_s4  ;;  %v472_v33 = vsel %vm439_vm2, %v470_v55, %v471_v44  ;;  %11785 = vst [vmem:[#allocation76_spill] sm:$0xff] %v7322_v10  ;;  %v487_v60 = vsel %vm439_vm2, %v485_v38, %v486_v62  ;;  %v489_v59 = vsel %vm439_vm2, %v486_v62, %v488_v61  ;;  %v491_v11 = vrot.slane %v6943_v47, 3 }
  0x66   : > { %v7331_v44 = vpack.i.bf16 %v474_v53, %v472_v33  ;;  %v482_v55 = vsel %vm439_vm2, %v480_v41, %v481_v31  ;;  %v493_v38 = vrot.slane %v6946_v48, 3  ;;  %v7340_v62 = vpack.i.bf16 %v489_v59, %v487_v60  ;;  %v11790_v31 = vld [vmem:[#allocation38_spill] sm:$0xff] }
  0x67   : > { %4732 = vrot.lane.b32.xlu0 %v7284_v42, %s6651_s4  ;;  %v505_v61 = vrot.slane %v11788_v27, 3  ;;  %v497_v53 = vsel %vm439_vm2, %v495_v30, %v496_v19  ;;  %v499_v41 = vsel %vm439_vm2, %v496_v19, %v498_v20  ;;  %v508_v18 = vrot.slane %v11790_v31, 3 }
  0x68   : > { %11786 = vst [vmem:[#allocation77_spill] sm:$0xff] %v7331_v44  ;;  %11787 = vst [vmem:[#allocation78_spill] sm:$0xff] %v7340_v62  ;;  %v500_v42 = vrot.slane %v6974_v14, 3  ;;  %v501_v60 = vrot.slane %v11767_v29, 3  ;;  %v492_v59 = vsel %vm439_vm2, %v490_v32, %v491_v11  ;;  %v7358_v30 = vpack.i.bf16 %v499_v41, %v497_v53 }
  0x69   : > { %4747 = vrot.lane.b32.xlu1 %v7300_v15, %s6651_s4  ;;  %v11789_v15 = vld [vmem:[#allocation36_spill] sm:$0xff]  ;;  %v510_v53 = vrot.slane %v7031_v40, 3 }
  0x6a   : > { %v506_v33 = vrot.slane %v11789_v15, 3  ;;  %v503_v15 = vrot.slane %v11769_v16, 3  ;;  %11792 = vst [vmem:[#allocation38_spill] sm:$0xff] %v7358_v30 }
  0x6b   : > { %4742 = vrot.lane.b32.xlu0 %v7311_v24, %s6651_s4  ;;  %v7349_v24 = vpack.i.bf16 %v484_v34, %v482_v55  ;;  %v515_v55 = vrot.slane %v7012_v5, 3  ;;  %v516_v34 = vrot.slane %v7024_v54, 3 }
  0x6c   : > { %v507_v19 = vsel %vm439_vm2, %v505_v61, %v506_v33  ;;  %v509_v20 = vsel %vm439_vm2, %v506_v33, %v508_v18  ;;  %v511_v61 = vrot.slane %v7034_v4, 3  ;;  %v513_v33 = vrot.slane %v7050_v52, 3 }
  0x6d   : > { %4757 = vrot.lane.b32.xlu1 %v7322_v10, %s6651_s4  ;;  %11791 = vst [vmem:[#allocation33_spill] sm:$0xff] %v7349_v24  ;;  %v494_v10 = vsel %vm439_vm2, %v491_v11, %v493_v38  ;;  %v502_v11 = vsel %vm439_vm2, %v500_v42, %v501_v60  ;;  %v504_v38 = vsel %vm439_vm2, %v501_v60, %v503_v15  ;;  %v521_v15 = vrot.slane %v6759_v6, 4 }
  0x6e   : > { %v7367_v32 = vpack.i.bf16 %v494_v10, %v492_v59  ;;  %v7376_v41 = vpack.i.bf16 %v509_v20, %v507_v19  ;;  %v517_v18 = vsel %vm439_vm2, %v515_v55, %v516_v34  ;;  %v7382_v42 = vpack.i.bf16 %v504_v38, %v502_v11 }
  0x6f   : > { %4752 = vrot.lane.b32.xlu0 %v7331_v44, %s6651_s4  ;;  %v518_v44 = vrot.slane %v11771_v21, 3  ;;  %v522_v60 = vrot.slane %v6762_v7, 4  ;;  %v512_v59 = vsel %vm439_vm2, %v510_v53, %v511_v61  ;;  %v524_v19 = vrot.slane %v6768_v9, 4 }
  0x70   : > { %11793 = vst [vmem:[#allocation79_spill] sm:$0xff] %v7367_v32  ;;  %11794 = vst [vmem:[#allocation80_spill] sm:$0xff] %v7376_v41  ;;  %v537_v55 = vrot.slane %v6773_v12, 4  ;;  %v531_v11 = vrot.slane %v6747_v0, 4  ;;  %v532_v38 = vrot.slane %v6750_v1, 4  ;;  %v534_v53 = vrot.slane %v6753_v2, 4 }
  0x71   : > { %4767 = vrot.lane.b32.xlu1 %v7340_v62, %s6651_s4  ;;  %v519_v10 = vsel %vm439_vm2, %v516_v34, %v518_v44  ;;  %11795 = vst [vmem:[#allocation81_spill] sm:$0xff] %v7382_v42  ;;  %v514_v62 = vsel %vm439_vm2, %v511_v61, %v513_v33  ;;  %v536_v44 = vrot.slane %v6765_v8, 4  ;;  %v539_v34 = vrot.slane %v6780_v17, 4 }
  0x72   : > { %v7391_v20 = vpack.i.bf16 %v519_v10, %v517_v18  ;;  %v7398_v6 = vpack.i.bf16 %v514_v62, %v512_v59  ;;  %v523_v7 = vsel %vm520_vm3, %v521_v15, %v522_v60  ;;  %v525_v9 = vsel %vm520_vm3, %v522_v60, %v524_v19  ;;  %v11798_v19 = vld [vmem:[#allocation16_spill] sm:$0xff] }
  0x73   : > { %4762 = vrot.lane.b32.xlu0 %v7349_v24, %s6651_s4  ;;  %v546_v17 = vrot.slane %v6797_v25, 4  ;;  %v547_v61 = vrot.slane %v6800_v26, 4  ;;  %v538_v62 = vsel %vm520_vm3, %v536_v44, %v537_v55  ;;  %v540_v33 = vsel %vm520_vm3, %v537_v55, %v539_v34 }
  0x74   : > { %11796 = vst [vmem:[#allocation82_spill] sm:$0xff] %v7391_v20  ;;  %11797 = vst [vmem:[#allocation83_spill] sm:$0xff] %v7398_v6  ;;  %v549_v18 = vrot.slane %v11777_v35, 4  ;;  %v4801_v10 = vpack.i.bf16 %v525_v9, %v523_v7  ;;  %v541_v15 = vrot.slane %v11778_v28, 4  ;;  %v542_v2 = vrot.slane %v11779_v49, 4  ;;  %v11800_v7 = vld [vmem:[#allocation18_spill] sm:$0xff] }
  0x75   : > { %4777 = vrot.lane.b32.xlu1 %v7358_v30, %s6651_s4  ;;  %v533_v60 = vsel %vm520_vm3, %v531_v11, %v532_v38  ;;  %v535_v59 = vsel %vm520_vm3, %v532_v38, %v534_v53  ;;  %v7421_v44 = vpack.i.bf16 %v540_v33, %v538_v62  ;;  %v548_v35 = vsel %vm520_vm3, %v546_v17, %v547_v61 }
  0x76   : > { %v550_v55 = vsel %vm520_vm3, %v547_v61, %v549_v18  ;;  %v556_v34 = vrot.slane %v6828_v39, 4  ;;  %v557_v9 = vrot.slane %v11800_v7, 4  ;;  %v559_v11 = vrot.slane %v6841_v45, 4 }
  0x77   : > { %4772 = vrot.lane.b32.xlu0 %v7367_v32, %s6651_s4  ;;  %11799 = vst [vmem:[#allocation16_spill] sm:$0xff] %v7421_v44  ;;  %v7429_v38 = vpack.i.bf16 %v535_v59, %v533_v60  ;;  %v543_v53 = vsel %vm520_vm3, %v541_v15, %v542_v2  ;;  %v551_v62 = vrot.slane %v6849_v50, 4  ;;  %v552_v17 = vrot.slane %v6852_v51, 4 }
  0x78   : > { %v554_v61 = vrot.slane %v6864_v56, 4  ;;  %v7438_v33 = vpack.i.bf16 %v550_v55, %v548_v35  ;;  %v566_v45 = vrot.slane %v6867_v57, 4  ;;  %v567_v18 = vrot.slane %v6870_v58, 4 }
  0x79   : > { %4787 = vrot.lane.b32.xlu1 %v7376_v41, %s6651_s4  ;;  %11801 = vst [vmem:[#allocation18_spill] sm:$0xff] %v7429_v38  ;;  %v560_v15 = vsel %vm520_vm3, %v557_v9, %v559_v11  ;;  %v561_v56 = vrot.slane %v6889_v3, 4  ;;  %v562_v60 = vrot.slane %v6899_v13, 4  ;;  %v553_v59 = vsel %vm520_vm3, %v551_v62, %v552_v17 }
  0x7a   : > { %11802 = vst [vmem:[#allocation84_spill] sm:$0xff] %v7438_v33  ;;  %v555_v35 = vsel %vm520_vm3, %v552_v17, %v554_v61  ;;  %v564_v55 = vrot.slane %v6910_v22, 4  ;;  %v576_v11 = vrot.slane %v6913_v23, 4  ;;  %v571_v61 = vrot.slane %v6940_v46, 4 }
  0x7b   : > { %4782 = vrot.lane.b32.xlu0 %v7382_v42, %s6651_s4  ;;  %v7465_v62 = vpack.i.bf16 %v555_v35, %v553_v59  ;;  %v563_v22 = vsel %vm520_vm3, %v561_v56, %v562_v60 }
  0x7c   : > { %v565_v17 = vsel %vm520_vm3, %v562_v60, %v564_v55  ;;  %v589_v60 = vrot.slane %v11790_v31, 4  ;;  %v582_v55 = vrot.slane %v11767_v29, 4 }
  0x7d   : > { %4797 = vrot.lane.b32.xlu1 %v7391_v20, %s6651_s4  ;;  %v544_v20 = vrot.slane %v11798_v19, 4  ;;  %11805 = vst [vmem:[#allocation87_spill] sm:$0xff] %v7465_v62  ;;  %v7483_v35 = vpack.i.bf16 %v565_v17, %v563_v22  ;;  %v597_v22 = vrot.slane %v7024_v54, 4  ;;  %v599_v17 = vrot.slane %v11771_v21, 4 }
  0x7f   : > { %4792 = vrot.lane.b32.xlu0 %v7398_v6, %s6651_s4  ;;  %v545_v19 = vsel %vm520_vm3, %v542_v2, %v544_v20  ;;  %v569_v20 = vrot.slane %v6886_v63, 4  ;;  %v568_v63 = vsel %vm520_vm3, %v566_v45, %v567_v18  ;;  %v572_v45 = vrot.slane %v6943_v47, 4 }
  0x80   : > { %v7447_v2 = vpack.i.bf16 %v545_v19, %v543_v53  ;;  %v577_v53 = vrot.slane %v6924_v36, 4  ;;  %v579_v19 = vrot.slane %v6927_v37, 4  ;;  %v586_v37 = vrot.slane %v11788_v27, 4 }
  0x81   : > { %4807 = vrot.lane.b32.xlu1 %v7315_v43, %s6652_s5 }
  0x82   : > { %11803 = vst [vmem:[#allocation85_spill] sm:$0xff] %v7447_v2  ;;  %v578_v59 = vsel %vm520_vm3, %v576_v11, %v577_v53  ;;  %v580_v56 = vsel %vm520_vm3, %v577_v53, %v579_v19  ;;  %v596_v19 = vrot.slane %v7012_v5, 4 }
  0x83   : > { %4802 = vrot.lane.b32.xlu0 %v4801_v10, %s6652_s5  ;;  %v558_v10 = vsel %vm520_vm3, %v556_v34, %v557_v9  ;;  %v570_v9 = vsel %vm520_vm3, %v567_v18, %v569_v20  ;;  %v574_v18 = vrot.slane %v6946_v48, 4  ;;  %v581_v48 = vrot.slane %v6974_v14, 4 }
  0x84   : > { %v7456_v34 = vpack.i.bf16 %v560_v15, %v558_v10  ;;  %v7474_v10 = vpack.i.bf16 %v570_v9, %v568_v63  ;;  %v11807_v15 = vld [vmem:[#allocation36_spill] sm:$0xff]  ;;  %v573_v63 = vsel %vm520_vm3, %v571_v61, %v572_v45  ;;  %v7492_v11 = vpack.i.bf16 %v580_v56, %v578_v59 }
  0x85   : > { %4817 = vrot.lane.b32.xlu1 %v7421_v44, %s6652_s5  ;;  %v587_v20 = vrot.slane %v11807_v15, 4  ;;  %11808 = vst [vmem:[#allocation36_spill] sm:$0xff] %v7483_v35  ;;  %v575_v9 = vsel %vm520_vm3, %v572_v45, %v574_v18  ;;  %v583_v45 = vsel %vm520_vm3, %v581_v48, %v582_v55  ;;  %v594_v59 = vrot.slane %v7050_v52, 4 }
  0x86   : > { %11804 = vst [vmem:[#allocation86_spill] sm:$0xff] %v7456_v34  ;;  %11806 = vst [vmem:[#allocation88_spill] sm:$0xff] %v7474_v10 }
  0x87   : > { %4812 = vrot.lane.b32.xlu0 %v7429_v38, %s6652_s5  ;;  %11809 = vst [vmem:[#allocation89_spill] sm:$0xff] %v7492_v11  ;;  %v588_v31 = vsel %vm520_vm3, %v586_v37, %v587_v20  ;;  %v590_v53 = vsel %vm520_vm3, %v587_v20, %v589_v60  ;;  %v591_v37 = vrot.slane %v7031_v40, 4  ;;  %v592_v20 = vrot.slane %v7034_v4, 4 }
  0x88   : > { %v7514_v21 = vpack.i.bf16 %v590_v53, %v588_v31  ;;  %v598_v60 = vsel %vm520_vm3, %v596_v19, %v597_v22 }
  0x89   : > { %4827 = vrot.lane.b32.xlu1 %v7438_v33, %s6652_s5  ;;  %v593_v52 = vsel %vm520_vm3, %v591_v37, %v592_v20  ;;  %v11820_v37 = vld [vmem:[#allocation9_spill] sm:$0xff] }
  0x8a   : > { %11813 = vst [vmem:[#allocation93_spill] sm:$0xff] %v7514_v21 }
  0x8b   : > { %4822 = vrot.lane.b32.xlu0 %v7447_v2, %s6652_s5 }
  0x8d   : > { %4837 = vrot.lane.b32.xlu1 %v7456_v34, %s6652_s5  ;;  %v584_v34 = vrot.slane %v11769_v16, 4  ;;  %v7503_v16 = vpack.i.bf16 %v575_v9, %v573_v63  ;;  %v600_v63 = vsel %vm520_vm3, %v597_v22, %v599_v17  ;;  %v4886_v17 = vpack.i.bf16 %v6750_v1, %v6747_v0 }
  0x8e   : > { %v7530_v31 = vpack.i.bf16 %v600_v63, %v598_v60  ;;  %v4896_v60 = vpack.i.bf16 %v11779_v49, %v11778_v28  ;;  %v4891_v0 = vpack.i.bf16 %v6773_v12, %v6765_v8  ;;  %v4901_v28 = vpack.i.bf16 %v6800_v26, %v6797_v25 }
  0x8f   : > { %4832 = vrot.lane.b32.xlu0 %v7465_v62, %s6652_s5  ;;  %11811 = vst [vmem:[#allocation91_spill] sm:$0xff] %v7503_v16  ;;  %v585_v18 = vsel %vm520_vm3, %v582_v55, %v584_v34  ;;  %v595_v55 = vsel %vm520_vm3, %v592_v20, %v594_v59  ;;  %v4916_v8 = vpack.i.bf16 %v6899_v13, %v6889_v3 }
  0x90   : > { %v7522_v48 = vpack.i.bf16 %v585_v18, %v583_v45  ;;  %11817 = vst [vmem:[#allocation97_spill] sm:$0xff] %v7530_v31  ;;  %v7536_v19 = vpack.i.bf16 %v595_v55, %v593_v52  ;;  %v11819_v18 = vld [vmem:[#allocation8_spill] sm:$0xff]  ;;  %v4906_v52 = vpack.i.bf16 %v6852_v51, %v6849_v50  ;;  %v4911_v50 = vpack.i.bf16 %v11800_v7, %v6828_v39 }
  0x91   : > { %4847 = vrot.lane.b32.xlu1 %v7474_v10, %s6652_s5  ;;  %v4881_v20 = vpack.i.bf16 %v11820_v37, %v11819_v18  ;;  %v4926_v25 = vpack.i.bf16 %v6943_v47, %v6940_v46  ;;  %v4921_v3 = vpack.i.bf16 %v6870_v58, %v6867_v57  ;;  %v4936_v39 = vpack.i.bf16 %v11767_v29, %v6974_v14  ;;  %v7606_v58 = vld [vmem:[%s6744_s28 + $0x180] sm:$0xff]  ;;  %v11829_v37 = vld [vmem:[#allocation10_spill] sm:$0xff] }
  0x92   : > { %11815 = vst [vmem:[#allocation95_spill] sm:$0xff] %v7522_v48  ;;  %11818 = vst [vmem:[#allocation98_spill] sm:$0xff] %v7536_v19  ;;  %v4931_v46 = vpack.i.bf16 %v6924_v36, %v6913_v23  ;;  %v4946_v57 = vpack.i.bf16 %v7034_v4, %v7031_v40  ;;  %v4941_v29 = vpack.i.bf16 %v11807_v15, %v11788_v27 }
  0x93   : > { %4842 = vrot.lane.b32.xlu0 %v7483_v35, %s6652_s5  ;;  %v7501_v61 = vpop.permute.xlu1 %4572  ;;  %v4951_v4 = vpack.i.bf16 %v7024_v54, %v7012_v5 }
  0x94   : > { %11810 = vst [vmem:[#allocation90_spill] sm:$0xff] %v7501_v61  ;;  %v11866_v61 = vld [vmem:[#allocation66_spill] sm:$0xff] }
  0x95   : > { %v7510_v56 = vpop.permute.xlu0 %4562  ;;  %4857 = vrot.lane.b32.xlu1 %v7492_v11, %s6652_s5 }
  0x96   : > { %11812 = vst [vmem:[#allocation92_spill] sm:$0xff] %v7510_v56 }
  0x97   : > { %4852 = vrot.lane.b32.xlu0 %v7503_v16, %s6652_s5  ;;  %v7520_v34 = vpop.permute.xlu1 %4577 }
  0x98   : > { %11814 = vst [vmem:[#allocation94_spill] sm:$0xff] %v7520_v34 }
  0x99   : > { %v7526_v9 = vpop.permute.xlu0 %4567  ;;  %4867 = vrot.lane.b32.xlu1 %v7514_v21, %s6652_s5 }
  0x9a   : > { %11816 = vst [vmem:[#allocation96_spill] sm:$0xff] %v7526_v9 }
  0x9b   : > { %4862 = vrot.lane.b32.xlu0 %v7522_v48, %s6652_s5  ;;  %v7534_v53 = vpop.permute.xlu1 %4587 }
  0x9d   : > { %v7538_v22 = vpop.permute.xlu0 %4582  ;;  %4877 = vrot.lane.b32.xlu1 %v7530_v31, %s6652_s5 }
  0x9f   : > { %4872 = vrot.lane.b32.xlu0 %v7536_v19, %s6652_s5  ;;  %v7546_v45 = vpop.permute.xlu1 %4597 }
  0xa1   : > { %v7550_v59 = vpop.permute.xlu0 %4592  ;;  %4887 = vrot.lane.b32.xlu1 %v4886_v17, %s6653_s6  ;;  %v7609_v17 = vld [vmem:[%s6744_s28 + $0x188] sm:$0xff] }
  0xa2   : > { %v7621_v23 = vpack.i.bf16 %v7609_v17, %v7606_v58 }
  0xa3   : > { %4882 = vrot.lane.b32.xlu0 %v4881_v20, %s6653_s6  ;;  %v7556_v63 = vpop.permute.xlu1 %4607  ;;  %v11830_v20 = vld [vmem:[#allocation19_spill] sm:$0xff] }
  0xa4   : > { %11821 = vst [vmem:[#allocation8_spill] sm:$0xff] %v7556_v63 }
  0xa5   : > { %v7560_v1 = vpop.permute.xlu0 %4602  ;;  %4897 = vrot.lane.b32.xlu1 %v4896_v60, %s6653_s6  ;;  %v11833_v60 = vld [vmem:[#allocation25_spill] sm:$0xff] }
  0xa6   : > { %11822 = vst [vmem:[#allocation9_spill] sm:$0xff] %v7560_v1 }
  0xa7   : > { %4892 = vrot.lane.b32.xlu0 %v4891_v0, %s6653_s6  ;;  %v7566_v55 = vpop.permute.xlu1 %4617  ;;  %v11834_v0 = vld [vmem:[#allocation17_spill] sm:$0xff] }
  0xa8   : > { %11823 = vst [vmem:[#allocation99_spill] sm:$0xff] %v7566_v55  ;;  %v11851_v55 = vld [vmem:[#allocation48_spill] sm:$0xff] }
  0xa9   : > { %v7570_v49 = vpop.permute.xlu0 %4612  ;;  %4907 = vrot.lane.b32.xlu1 %v4906_v52, %s6653_s6 }
  0xaa   : > { %11824 = vst [vmem:[#allocation100_spill] sm:$0xff] %v7570_v49 }
  0xab   : > { %4902 = vrot.lane.b32.xlu0 %v4901_v28, %s6653_s6  ;;  %v7576_v12 = vpop.permute.xlu1 %4627 }
  0xad   : > { %v7580_v51 = vpop.permute.xlu0 %4622  ;;  %4917 = vrot.lane.b32.xlu1 %v4916_v8, %s6653_s6  ;;  %v11837_v8 = vld [vmem:[#allocation34_spill] sm:$0xff] }
  0xaf   : > { %4912 = vrot.lane.b32.xlu0 %v4911_v50, %s6653_s6  ;;  %v7586_v26 = vpop.permute.xlu1 %4637  ;;  %v11838_v50 = vld [vmem:[#allocation22_spill] sm:$0xff] }
  0xb1   : > { %v7590_v13 = vpop.permute.xlu0 %4632  ;;  %4927 = vrot.lane.b32.xlu1 %v4926_v25, %s6653_s6 }
  0xb3   : > { %4922 = vrot.lane.b32.xlu0 %v4921_v3, %s6653_s6  ;;  %v7596_v7 = vpop.permute.xlu1 %4647 }
  0xb4   : > { %11825 = vst [vmem:[#allocation101_spill] sm:$0xff] %v7596_v7 }
  0xb5   : > { %v7600_v47 = vpop.permute.xlu0 %4642  ;;  %4937 = vrot.lane.b32.xlu1 %v4936_v39, %s6653_s6  ;;  %v11840_v39 = vld [vmem:[#allocation46_spill] sm:$0xff] }
  0xb6   : > { %11826 = vst [vmem:[#allocation102_spill] sm:$0xff] %v7600_v47  ;;  %v11848_v47 = vld [vmem:[#allocation57_spill] sm:$0xff] }
  0xb7   : > { %4932 = vrot.lane.b32.xlu0 %v4931_v46, %s6653_s6  ;;  %v7612_v14 = vpop.permute.xlu1 %4657  ;;  %v11841_v46 = vld [vmem:[#allocation29_spill] sm:$0xff] }
  0xb8   : > { %11827 = vst [vmem:[#allocation103_spill] sm:$0xff] %v7612_v14 }
  0xb9   : > { %v7616_v18 = vpop.permute.xlu0 %4652  ;;  %4947 = vrot.lane.b32.xlu1 %v4946_v57, %s6653_s6 }
  0xba   : > { %11828 = vst [vmem:[#allocation104_spill] sm:$0xff] %v7616_v18 }
  0xbb   : > { %4942 = vrot.lane.b32.xlu0 %v4941_v29, %s6653_s6  ;;  %v7624_v40 = vpop.permute.xlu1 %4667  ;;  %v7668_v29 = vld [vmem:[%s6744_s28 + $0x190] sm:$0xf] }
  0xbd   : > { %v7628_v36 = vpop.permute.xlu0 %4662  ;;  %4957 = vrot.lane.b32.xlu1 %v7621_v23, %s6653_s6 }
  0xbf   : > { %4952 = vrot.lane.b32.xlu0 %v4951_v4, %s6653_s6  ;;  %v7633_v27 = vpop.permute.xlu1 %4677 }
  0xc1   : > { %v7635_v15 = vpop.permute.xlu0 %4672  ;;  %4967 = vrot.lane.b32.xlu1 %v11829_v37, %s6654_s7 }
  0xc3   : > { %4962 = vrot.lane.b32.xlu0 %v11830_v20, %s6654_s7  ;;  %v7641_v5 = vpop.permute.xlu1 %4687  ;;  %v11844_v20 = vld [vmem:[#allocation49_spill] sm:$0xff] }
  0xc4   : > { %11831 = vst [vmem:[#allocation10_spill] sm:$0xff] %v7641_v5  ;;  %v11845_v5 = vld [vmem:[#allocation40_spill] sm:$0xff] }
  0xc5   : > { %v7643_v54 = vpop.permute.xlu0 %4682  ;;  %4977 = vrot.lane.b32.xlu1 %v11833_v60, %s6654_s7 }
  0xc6   : > { %11832 = vst [vmem:[#allocation19_spill] sm:$0xff] %v7643_v54  ;;  %v607_v54 = vrot.slane %v7668_v29, 1 }
  0xc7   : > { %4972 = vrot.lane.b32.xlu0 %v11834_v0, %s6654_s7  ;;  %v7649_v52 = vpop.permute.xlu1 %4697 }
  0xc8   : > { %11835 = vst [vmem:[#allocation17_spill] sm:$0xff] %v7649_v52  ;;  %v605_v52 = vrot.slane %v7609_v17, 1 }
  0xc9   : > { %v7651_v28 = vpop.permute.xlu0 %4692  ;;  %4987 = vrot.lane.b32.xlu1 %v11837_v8, %s6654_s7 }
  0xca   : > { %11836 = vst [vmem:[#allocation105_spill] sm:$0xff] %v7651_v28  ;;  %v604_v28 = vrot.slane %v7606_v58, 1  ;;  %v7689_v49 = vsel %vm277_vm0, %v605_v52, %v607_v54 }
  0xcb   : > { %4982 = vrot.lane.b32.xlu0 %v11838_v50, %s6654_s7  ;;  %v7657_v25 = vpop.permute.xlu1 %4707  ;;  %11850 = vst [vmem:[#allocation112_spill] sm:$0xff] %v7689_v49 }
  0xcc   : > { %v7686_v7 = vsel %vm277_vm0, %v604_v28, %v605_v52  ;;  %v11856_v28 = vld [vmem:[#allocation54_spill] sm:$0xff]  ;;  %v11859_v52 = vld [vmem:[#allocation60_spill] sm:$0xff] }
  0xcd   : > { %v7659_v3 = vpop.permute.xlu0 %4702  ;;  %4997 = vrot.lane.b32.xlu1 %v11840_v39, %s6654_s7  ;;  %11849 = vst [vmem:[#allocation111_spill] sm:$0xff] %v7686_v7 }
  0xce   : > { %11839 = vst [vmem:[#allocation106_spill] sm:$0xff] %v7659_v3 }
  0xcf   : > { %4992 = vrot.lane.b32.xlu0 %v11841_v46, %s6654_s7  ;;  %v7665_v57 = vpop.permute.xlu1 %4717 }
  0xd0   : > { %11842 = vst [vmem:[#allocation107_spill] sm:$0xff] %v7665_v57 }
  0xd1   : > { %v7670_v4 = vpop.permute.xlu0 %4712  ;;  %5007 = vrot.lane.b32.xlu1 %v11844_v20, %s6654_s7 }
  0xd2   : > { %11843 = vst [vmem:[#allocation108_spill] sm:$0xff] %v7670_v4 }
  0xd3   : > { %5002 = vrot.lane.b32.xlu0 %v11845_v5, %s6654_s7  ;;  %v7679_v18 = vpop.permute.xlu1 %4727 }
  0xd4   : > { %11846 = vst [vmem:[#allocation109_spill] sm:$0xff] %v7679_v18  ;;  %v11854_v18 = vld [vmem:[#allocation61_spill] sm:$0xff] }
  0xd5   : > { %v7681_v14 = vpop.permute.xlu0 %4722  ;;  %5017 = vrot.lane.b32.xlu1 %v11848_v47, %s6654_s7 }
  0xd6   : > { %11847 = vst [vmem:[#allocation110_spill] sm:$0xff] %v7681_v14  ;;  %v7701_v14 = vpack.i.bf16 %v7689_v49, %v7686_v7  ;;  %v11862_v7 = vld [vmem:[#allocation64_spill] sm:$0xff]  ;;  %v11863_v49 = vld [vmem:[#allocation62_spill] sm:$0xff] }
  0xd7   : > { %5012 = vrot.lane.b32.xlu0 %v11851_v55, %s6654_s7  ;;  %v7693_v1 = vpop.permute.xlu1 %4737 }
  0xd8   : > { %11852 = vst [vmem:[#allocation113_spill] sm:$0xff] %v7693_v1  ;;  %11855 = vst [vmem:[#allocation115_spill] sm:$0xff] %v7701_v14 }
  0xd9   : > { %v7695_v63 = vpop.permute.xlu0 %4732  ;;  %5027 = vrot.lane.b32.xlu1 %v11854_v18, %s6654_s7 }
  0xda   : > { %11853 = vst [vmem:[#allocation114_spill] sm:$0xff] %v7695_v63 }
  0xdb   : > { %5022 = vrot.lane.b32.xlu0 %v11856_v28, %s6654_s7  ;;  %v7705_v9 = vpop.permute.xlu1 %4747 }
  0xdc   : > { %11857 = vst [vmem:[#allocation116_spill] sm:$0xff] %v7705_v9  ;;  %v11870_v9 = vld [vmem:[#allocation68_spill] sm:$0xff] }
  0xdd   : > { %v7707_v54 = vpop.permute.xlu0 %4742  ;;  %5037 = vrot.lane.b32.xlu1 %v7701_v14, %s6654_s7 }
  0xde   : > { %11858 = vst [vmem:[#allocation117_spill] sm:$0xff] %v7707_v54  ;;  %v11867_v54 = vld [vmem:[#allocation63_spill] sm:$0xff] }
  0xdf   : > { %5032 = vrot.lane.b32.xlu0 %v11859_v52, %s6654_s7  ;;  %v7713_v63 = vpop.permute.xlu1 %4757 }
  0xe0   : > { %11860 = vst [vmem:[#allocation118_spill] sm:$0xff] %v7713_v63 }
  0xe1   : > { %v7715_v1 = vpop.permute.xlu0 %4752  ;;  %5047 = vrot.lane.b32.xlu1 %v11862_v7, %s6655_s8  ;;  %v11871_v7 = vld [vmem:[#allocation65_spill] sm:$0xff] }
  0xe2   : > { %11861 = vst [vmem:[#allocation119_spill] sm:$0xff] %v7715_v1 }
  0xe3   : > { %5042 = vrot.lane.b32.xlu0 %v11863_v49, %s6655_s8  ;;  %v7721_v34 = vpop.permute.xlu1 %4767 }
  0xe4   : > { %11864 = vst [vmem:[#allocation62_spill] sm:$0xff] %v7721_v34 }
  0xe5   : > { %v7723_v56 = vpop.permute.xlu0 %4762  ;;  %5057 = vrot.lane.b32.xlu1 %v11866_v61, %s6655_s8  ;;  %v11875_v61 = vld [vmem:[#allocation67_spill] sm:$0xff] }
  0xe6   : > { %11865 = vst [vmem:[#allocation120_spill] sm:$0xff] %v7723_v56  ;;  %v11874_v56 = vld [vmem:[#allocation70_spill] sm:$0xff] }
  0xe7   : > { %5052 = vrot.lane.b32.xlu0 %v11867_v54, %s6655_s8  ;;  %v7729_v63 = vpop.permute.xlu1 %4777 }
  0xe8   : > { %11868 = vst [vmem:[#allocation121_spill] sm:$0xff] %v7729_v63 }
  0xe9   : > { %v7731_v1 = vpop.permute.xlu0 %4772  ;;  %5067 = vrot.lane.b32.xlu1 %v11870_v9, %s6655_s8  ;;  %v609_v9 = vrot.slane %v7606_v58, 2 }
  0xea   : > { %11869 = vst [vmem:[#allocation122_spill] sm:$0xff] %v7731_v1  ;;  %v11878_v1 = vld [vmem:[#allocation47_spill] sm:$0xff] }
  0xeb   : > { %5062 = vrot.lane.b32.xlu0 %v11871_v7, %s6655_s8  ;;  %v7737_v49 = vpop.permute.xlu1 %4787  ;;  %v610_v7 = vrot.slane %v7609_v17, 2 }
  0xec   : > { %11872 = vst [vmem:[#allocation123_spill] sm:$0xff] %v7737_v49  ;;  %v612_v49 = vrot.slane %v7668_v29, 2 }
  0xed   : > { %v7739_v34 = vpop.permute.xlu0 %4782  ;;  %5077 = vrot.lane.b32.xlu1 %v11874_v56, %s6655_s8 }
  0xee   : > { %11873 = vst [vmem:[#allocation124_spill] sm:$0xff] %v7739_v34  ;;  %v11879_v34 = vld [vmem:[#allocation69_spill] sm:$0xff] }
  0xef   : > { %5072 = vrot.lane.b32.xlu0 %v11875_v61, %s6655_s8  ;;  %v7745_v4 = vpop.permute.xlu1 %4797  ;;  %v11883_v61 = vld [vmem:[#allocation42_spill] sm:$0xff] }
  0xf0   : > { %11876 = vst [vmem:[#allocation125_spill] sm:$0xff] %v7745_v4  ;;  %v11882_v4 = vld [vmem:[#allocation72_spill] sm:$0xff] }
  0xf1   : > { %v7747_v63 = vpop.permute.xlu0 %4792  ;;  %5087 = vrot.lane.b32.xlu1 %v11878_v1, %s6655_s8  ;;  %v613_v1 = vsel %vm358_vm1, %v610_v7, %v612_v49 }
  0xf2   : > { %11877 = vst [vmem:[#allocation126_spill] sm:$0xff] %v7747_v63  ;;  %v611_v63 = vsel %vm358_vm1, %v609_v9, %v610_v7  ;;  %v11889_v7 = vld [vmem:[#allocation73_spill] sm:$0xff] }
  0xf3   : > { %5082 = vrot.lane.b32.xlu0 %v11879_v34, %s6655_s8  ;;  %v7756_v56 = vpop.permute.xlu1 %4807  ;;  %v11886_v34 = vld [vmem:[#allocation74_spill] sm:$0xff] }
  0xf4   : > { %11880 = vst [vmem:[#allocation127_spill] sm:$0xff] %v7756_v56  ;;  %v7772_v56 = vpack.i.bf16 %v613_v1, %v611_v63  ;;  %v11891_v63 = vld [vmem:[#allocation13_spill] sm:$0xff]  ;;  %v11892_v1 = vld [vmem:[#allocation39_spill] sm:$0xff] }
  0xf5   : > { %v7758_v57 = vpop.permute.xlu0 %4802  ;;  %5097 = vrot.lane.b32.xlu1 %v11882_v4, %s6655_s8 }
  0xf6   : > { %11881 = vst [vmem:[#allocation128_spill] sm:$0xff] %v7758_v57  ;;  %11887 = vst [vmem:[#allocation131_spill] sm:$0xff] %v7772_v56  ;;  %v11888_v57 = vld [vmem:[#allocation71_spill] sm:$0xff] }
  0xf7   : > { %5092 = vrot.lane.b32.xlu0 %v11883_v61, %s6655_s8  ;;  %v7766_v3 = vpop.permute.xlu1 %4817  ;;  %v11899_v61 = vld [vmem:[#allocation77_spill] sm:$0xff] }
  0xf8   : > { %11884 = vst [vmem:[#allocation129_spill] sm:$0xff] %v7766_v3 }
  0xf9   : > { %v7768_v54 = vpop.permute.xlu0 %4812  ;;  %5107 = vrot.lane.b32.xlu1 %v11886_v34, %s6655_s8 }
  0xfa   : > { %11885 = vst [vmem:[#allocation130_spill] sm:$0xff] %v7768_v54 }
  0xfb   : > { %5102 = vrot.lane.b32.xlu0 %v11888_v57, %s6655_s8  ;;  %v7776_v4 = vpop.permute.xlu1 %4827 }
  0xfd   : > { %v7778_v9 = vpop.permute.xlu0 %4822  ;;  %5117 = vrot.lane.b32.xlu1 %v7772_v56, %s6655_s8  ;;  %v11895_v56 = vld [vmem:[#allocation75_spill] sm:$0xff] }
  0xff   : > { %5112 = vrot.lane.b32.xlu0 %v11889_v7, %s6655_s8  ;;  %v7784_v49 = vpop.permute.xlu1 %4837  ;;  %v11896_v7 = vld [vmem:[#allocation12_spill] sm:$0xff] }
 0x101   : > { %v7786_v54 = vpop.permute.xlu0 %4832  ;;  %5127 = vrot.lane.b32.xlu1 %v11891_v63, %s6656_s9  ;;  %v11900_v63 = vld [vmem:[#allocation14_spill] sm:$0xff] }
 0x102   : > { %11890 = vst [vmem:[#allocation132_spill] sm:$0xff] %v7786_v54 }
 0x103   : > { %5122 = vrot.lane.b32.xlu0 %v11892_v1, %s6656_s9  ;;  %v7792_v3 = vpop.permute.xlu1 %4847 }
 0x104   : > { %11893 = vst [vmem:[#allocation39_spill] sm:$0xff] %v7792_v3 }
 0x105   : > { %v7794_v34 = vpop.permute.xlu0 %4842  ;;  %5137 = vrot.lane.b32.xlu1 %v11895_v56, %s6656_s9 }
 0x106   : > { %11894 = vst [vmem:[#allocation133_spill] sm:$0xff] %v7794_v34  ;;  %v11902_v34 = vld [vmem:[#allocation76_spill] sm:$0xff] }
 0x107   : > { %5132 = vrot.lane.b32.xlu0 %v11896_v7, %s6656_s9  ;;  %v7800_v57 = vpop.permute.xlu1 %4857  ;;  %v11905_v7 = vld [vmem:[#allocation78_spill] sm:$0xff] }
 0x108   : > { %11897 = vst [vmem:[#allocation134_spill] sm:$0xff] %v7800_v57 }
 0x109   : > { %v7802_v54 = vpop.permute.xlu0 %4852  ;;  %5147 = vrot.lane.b32.xlu1 %v11899_v61, %s6656_s9  ;;  %v615_v61 = vrot.slane %v7609_v17, 3 }
 0x10a   : > { %11898 = vst [vmem:[#allocation135_spill] sm:$0xff] %v7802_v54  ;;  %v614_v54 = vrot.slane %v7606_v58, 3 }
 0x10b   : > { %5142 = vrot.lane.b32.xlu0 %v11900_v63, %s6656_s9  ;;  %v7808_v1 = vpop.permute.xlu1 %4867  ;;  %v617_v63 = vrot.slane %v7668_v29, 3 }
 0x10d   : > { %v7810_v3 = vpop.permute.xlu0 %4862  ;;  %5157 = vrot.lane.b32.xlu1 %v7349_v24, %s6656_s9 }
 0x10e   : > { %11901 = vst [vmem:[#allocation136_spill] sm:$0xff] %v7810_v3 }
 0x10f   : > { %5152 = vrot.lane.b32.xlu0 %v11902_v34, %s6656_s9  ;;  %v7816_v56 = vpop.permute.xlu1 %4877  ;;  %v616_v34 = vsel %vm439_vm2, %v614_v54, %v615_v61 }
 0x110   : > { %11903 = vst [vmem:[#allocation137_spill] sm:$0xff] %v7816_v56 }
 0x111   : > { %v7818_v57 = vpop.permute.xlu0 %4872  ;;  %5167 = vrot.lane.b32.xlu1 %v7367_v32, %s6656_s9  ;;  %v618_v32 = vsel %vm439_vm2, %v615_v61, %v617_v63  ;;  %v11911_v61 = vld [vmem:[#allocation82_spill] sm:$0xff] }
 0x112   : > { %11904 = vst [vmem:[#allocation138_spill] sm:$0xff] %v7818_v57 }
 0x113   : > { %5162 = vrot.lane.b32.xlu0 %v11905_v7, %s6656_s9  ;;  %v7827_v24 = vpop.permute.xlu1 %4887 }
 0x114   : > { %11906 = vst [vmem:[#allocation139_spill] sm:$0xff] %v7827_v24  ;;  %v7843_v24 = vpack.i.bf16 %v618_v32, %v616_v34 }
 0x115   : > { %v7829_v3 = vpop.permute.xlu0 %4882  ;;  %5177 = vrot.lane.b32.xlu1 %v7382_v42, %s6656_s9  ;;  %v6502_v42 = vld [vmem:[%s6744_s28 + $0xc0] sm:$0xff] }
 0x116   : > { %11907 = vst [vmem:[#allocation140_spill] sm:$0xff] %v7829_v3  ;;  %11910 = vst [vmem:[#allocation143_spill] sm:$0xff] %v7843_v24 }
 0x117   : > { %5172 = vrot.lane.b32.xlu0 %v7358_v30, %s6656_s9  ;;  %v7837_v57 = vpop.permute.xlu1 %4897 }
 0x118   : > { %11908 = vst [vmem:[#allocation141_spill] sm:$0xff] %v7837_v57 }
 0x119   : > { %v7839_v56 = vpop.permute.xlu0 %4892  ;;  %5187 = vrot.lane.b32.xlu1 %v7398_v6, %s6656_s9  ;;  %v6500_v6 = vld [vmem:[%s6744_s28 + $0xd8] sm:$0xff] }
 0x11a   : > { %11909 = vst [vmem:[#allocation142_spill] sm:$0xff] %v7839_v56 }
 0x11b   : > { %5182 = vrot.lane.b32.xlu0 %v7376_v41, %s6656_s9  ;;  %v7847_v3 = vpop.permute.xlu1 %4907  ;;  %v6503_v41 = vld [vmem:[%s6744_s28 + $0xc8] sm:$0xff] }
 0x11c   : > { %v5311_v30 = vpack.i.bf16 %v6503_v41, %v6502_v42  ;;  %v8000_v42 = vld [vmem:[%s6744_s28 + $0x138] sm:$0xff] }
 0x11d   : > { %v7849_v54 = vpop.permute.xlu0 %4902  ;;  %5197 = vrot.lane.b32.xlu1 %v7843_v24, %s6656_s9 }
 0x11f   : > { %5192 = vrot.lane.b32.xlu0 %v11911_v61, %s6656_s9  ;;  %v7855_v63 = vpop.permute.xlu1 %4917  ;;  %v6501_v61 = vld [vmem:[%s6744_s28 + $0xe0] sm:$0xff] }
 0x121   : > { %v7857_v56 = vpop.permute.xlu0 %4912  ;;  %5207 = vrot.lane.b32.xlu1 %v7429_v38, %s6657_s10  ;;  %v7969_v38 = vld [vmem:[%s6744_s28 + $0x90] sm:$0xff] }
 0x123   : > { %5202 = vrot.lane.b32.xlu0 %v7315_v43, %s6657_s10  ;;  %v7863_v32 = vpop.permute.xlu1 %4927 }
 0x124   : > { %11912 = vst [vmem:[#allocation144_spill] sm:$0xff] %v7863_v32 }
 0x125   : > { %v7865_v34 = vpop.permute.xlu0 %4922  ;;  %5217 = vrot.lane.b32.xlu1 %v7447_v2, %s6657_s10 }
 0x126   : > { %11913 = vst [vmem:[#allocation145_spill] sm:$0xff] %v7865_v34  ;;  %v11917_v34 = vld [vmem:[#allocation86_spill] sm:$0xff] }
 0x127   : > { %5212 = vrot.lane.b32.xlu0 %v7421_v44, %s6657_s10  ;;  %v7871_v57 = vpop.permute.xlu1 %4937 }
 0x128   : > { %11914 = vst [vmem:[#allocation146_spill] sm:$0xff] %v7871_v57 }
 0x129   : > { %v7873_v24 = vpop.permute.xlu0 %4932  ;;  %5227 = vrot.lane.b32.xlu1 %v7465_v62, %s6657_s10  ;;  %v620_v62 = vrot.slane %v7609_v17, 4 }
 0x12a   : > { %11915 = vst [vmem:[#allocation147_spill] sm:$0xff] %v7873_v24  ;;  %v619_v24 = vrot.slane %v7606_v58, 4 }
 0x12b   : > { %5222 = vrot.lane.b32.xlu0 %v7438_v33, %s6657_s10  ;;  %v7879_v43 = vpop.permute.xlu1 %4947  ;;  %v622_v33 = vrot.slane %v7668_v29, 4 }
 0x12d   : > { %v7881_v32 = vpop.permute.xlu0 %4942  ;;  %5237 = vrot.lane.b32.xlu1 %v7483_v35, %s6657_s10  ;;  %v623_v58 = vsel %vm520_vm3, %v620_v62, %v622_v33 }
 0x12e   : > { %11916 = vst [vmem:[#allocation148_spill] sm:$0xff] %v7881_v32 }
 0x12f   : > { %5232 = vrot.lane.b32.xlu0 %v11917_v34, %s6657_s10  ;;  %v7887_v2 = vpop.permute.xlu1 %4957 }
 0x130   : > { %11918 = vst [vmem:[#allocation149_spill] sm:$0xff] %v7887_v2 }
 0x131   : > { %v7889_v57 = vpop.permute.xlu0 %4952  ;;  %5247 = vrot.lane.b32.xlu1 %v7503_v16, %s6657_s10  ;;  %v621_v16 = vsel %vm520_vm3, %v619_v24, %v620_v62  ;;  %v6488_v62 = vld [vmem:[%s6744_s28 + $0x48] sm:$0xff] }
 0x132   : > { %11919 = vst [vmem:[#allocation150_spill] sm:$0xff] %v7889_v57 }
 0x133   : > { %5242 = vrot.lane.b32.xlu0 %v7474_v10, %s6657_s10  ;;  %v7898_v35 = vpop.permute.xlu1 %4967 }
 0x134   : > { %11920 = vst [vmem:[#allocation151_spill] sm:$0xff] %v7898_v35  ;;  %v6491_v35 = vld [vmem:[%s6744_s28 + $0x38] sm:$0xff] }
 0x135   : > { %v7900_v34 = vpop.permute.xlu0 %4962  ;;  %5257 = vrot.lane.b32.xlu1 %v7522_v48, %s6657_s10 }
 0x136   : > { %11921 = vst [vmem:[#allocation152_spill] sm:$0xff] %v7900_v34  ;;  %v7914_v34 = vpack.i.bf16 %v623_v58, %v621_v16  ;;  %v6490_v58 = vld [vmem:[%s6744_s28 + $0x30] sm:$0xff] }
 0x137   : > { %5252 = vrot.lane.b32.xlu0 %v7492_v11, %s6657_s10  ;;  %v7908_v17 = vpop.permute.xlu1 %4977  ;;  %v7958_v11 = vld [vmem:[%s6744_s28 + $0xa8] sm:$0xff] }
 0x138   : > { %11922 = vst [vmem:[#allocation153_spill] sm:$0xff] %v7908_v17  ;;  %11924 = vst [vmem:[#allocation155_spill] sm:$0xff] %v7914_v34 }
 0x139   : > { %v7910_v29 = vpop.permute.xlu0 %4972  ;;  %5267 = vrot.lane.b32.xlu1 %v7536_v19, %s6657_s10  ;;  %v5281_v19 = vpack.i.bf16 %v6491_v35, %v6490_v58  ;;  %v7947_v35 = vld [vmem:[%s6744_s28 + $0x60] sm:$0xff]  ;;  %v7950_v58 = vld [vmem:[%s6744_s28 + $0x68] sm:$0xff] }
 0x13a   : > { %11923 = vst [vmem:[#allocation154_spill] sm:$0xff] %v7910_v29  ;;  %v6489_v29 = vld [vmem:[%s6744_s28 + $0x50] sm:$0xff] }
 0x13b   : > { %5262 = vrot.lane.b32.xlu0 %v7514_v21, %s6657_s10  ;;  %v7918_v24 = vpop.permute.xlu1 %4987  ;;  %v5286_v17 = vpack.i.bf16 %v6489_v29, %v6488_v62  ;;  %v7939_v29 = vld [vmem:[%s6744_s28 + $0x80] sm:$0xff] }
 0x13c   : > { %11925 = vst [vmem:[#allocation156_spill] sm:$0xff] %v7918_v24 }
 0x13d   : > { %v7920_v33 = vpop.permute.xlu0 %4982  ;;  %5277 = vrot.lane.b32.xlu1 %v7914_v34, %s6657_s10  ;;  %v7936_v34 = vld [vmem:[%s6744_s28 + $0x78] sm:$0xff] }
 0x13e   : > { %11926 = vst [vmem:[#allocation157_spill] sm:$0xff] %v7920_v33  ;;  %v5296_v62 = vpack.i.bf16 %v7939_v29, %v7936_v34  ;;  %v8039_v33 = vld [vmem:[%s6744_s28 + $0x150] sm:$0xff] }
 0x13f   : > { %5272 = vrot.lane.b32.xlu0 %v7530_v31, %s6657_s10  ;;  %v7928_v16 = vpop.permute.xlu1 %4997 }
 0x140   : > { %11927 = vst [vmem:[#allocation158_spill] sm:$0xff] %v7928_v16 }
 0x141   : > { %v7932_v48 = vpop.permute.xlu0 %4992  ;;  %5287 = vrot.lane.b32.xlu1 %v5286_v17, %s6658_s11  ;;  %v5291_v17 = vpack.i.bf16 %v7950_v58, %v7947_v35 }
 0x142   : > { %11928 = vst [vmem:[#allocation159_spill] sm:$0xff] %v7932_v48 }
 0x143   : > { %5282 = vrot.lane.b32.xlu0 %v5281_v19, %s6658_s11  ;;  %v7944_v31 = vpop.permute.xlu1 %5007  ;;  %v7961_v19 = vld [vmem:[%s6744_s28 + $0xb0] sm:$0xff] }
 0x144   : > { %11929 = vst [vmem:[#allocation160_spill] sm:$0xff] %v7944_v31  ;;  %v5306_v31 = vpack.i.bf16 %v7961_v19, %v7958_v11 }
 0x145   : > { %v7954_v21 = vpop.permute.xlu0 %5002  ;;  %5297 = vrot.lane.b32.xlu1 %v5296_v62, %s6658_s11 }
 0x146   : > { %11930 = vst [vmem:[#allocation161_spill] sm:$0xff] %v7954_v21  ;;  %v7972_v21 = vld [vmem:[%s6744_s28 + $0x98] sm:$0xff] }
 0x147   : > { %5292 = vrot.lane.b32.xlu0 %v5291_v17, %s6658_s11  ;;  %v7966_v10 = vpop.permute.xlu1 %5017  ;;  %v5301_v62 = vpack.i.bf16 %v7972_v21, %v7969_v38  ;;  %v5316_v17 = vpack.i.bf16 %v6501_v61, %v6500_v6  ;;  %v6506_v61 = vld [vmem:[%s6744_s28 + $0xf0] sm:$0xff] }
 0x148   : > { %11931 = vst [vmem:[#allocation162_spill] sm:$0xff] %v7966_v10 }
 0x149   : > { %v7976_v44 = vpop.permute.xlu0 %5012  ;;  %5307 = vrot.lane.b32.xlu1 %v5306_v31, %s6658_s11  ;;  %v6504_v31 = vld [vmem:[%s6744_s28 + $0x108] sm:$0xff] }
 0x14a   : > { %11932 = vst [vmem:[#allocation163_spill] sm:$0xff] %v7976_v44  ;;  %v6505_v44 = vld [vmem:[%s6744_s28 + $0x110] sm:$0xff] }
 0x14b   : > { %5302 = vrot.lane.b32.xlu0 %v5301_v62, %s6658_s11  ;;  %v7982_v10 = vpop.permute.xlu1 %5027  ;;  %v5326_v48 = vpack.i.bf16 %v6505_v44, %v6504_v31  ;;  %v6507_v62 = vld [vmem:[%s6744_s28 + $0xf8] sm:$0xff]  ;;  %v8011_v31 = vld [vmem:[%s6744_s28 + $0x120] sm:$0xff] }
 0x14c   : > { %11933 = vst [vmem:[#allocation164_spill] sm:$0xff] %v7982_v10  ;;  %v5321_v10 = vpack.i.bf16 %v6507_v62, %v6506_v61  ;;  %v8014_v61 = vld [vmem:[%s6744_s28 + $0x128] sm:$0xff] }
 0x14d   : > { %v7986_v7 = vpop.permute.xlu0 %5022  ;;  %5317 = vrot.lane.b32.xlu1 %v5316_v17, %s6658_s11  ;;  %v8003_v17 = vld [vmem:[%s6744_s28 + $0x140] sm:$0xff] }
 0x14e   : > { %11934 = vst [vmem:[#allocation165_spill] sm:$0xff] %v7986_v7  ;;  %v8030_v7 = vld [vmem:[%s6744_s28 + $0x198] sm:$0xff] }
 0x14f   : > { %5312 = vrot.lane.b32.xlu0 %v5311_v30, %s6658_s11  ;;  %v7992_v6 = vpop.permute.xlu1 %5037  ;;  %v5336_v30 = vpack.i.bf16 %v8003_v17, %v8000_v42 }
 0x150   : > { %11935 = vst [vmem:[#allocation166_spill] sm:$0xff] %v7992_v6  ;;  %v8025_v6 = vld [vmem:[%s6744_s28 + $0x170] sm:$0xff] }
 0x151   : > { %v7996_v41 = vpop.permute.xlu0 %5032  ;;  %5327 = vrot.lane.b32.xlu1 %v5326_v48, %s6658_s11  ;;  %v5331_v48 = vpack.i.bf16 %v8014_v61, %v8011_v31 }
 0x152   : > { %11936 = vst [vmem:[#allocation167_spill] sm:$0xff] %v7996_v41  ;;  %v8022_v41 = vld [vmem:[%s6744_s28 + $0x168] sm:$0xff] }
 0x153   : > { %5322 = vrot.lane.b32.xlu0 %v5321_v10, %s6658_s11  ;;  %v8008_v44 = vpop.permute.xlu1 %5047  ;;  %v5346_v10 = vpack.i.bf16 %v8025_v6, %v8022_v41 }
 0x154   : > { %11937 = vst [vmem:[#allocation168_spill] sm:$0xff] %v8008_v44  ;;  %v8033_v44 = vld [vmem:[%s6744_s28 + $0x1a0] sm:$0xff] }
 0x155   : > { %v8018_v62 = vpop.permute.xlu0 %5042  ;;  %5337 = vrot.lane.b32.xlu1 %v5336_v30, %s6658_s11  ;;  %v5356_v57 = vpack.i.bf16 %v8033_v44, %v8030_v7 }
 0x156   : > { %11938 = vst [vmem:[#allocation169_spill] sm:$0xff] %v8018_v62  ;;  %v8042_v62 = vld [vmem:[%s6744_s28 + $0x158] sm:$0xff] }
 0x157   : > { %5332 = vrot.lane.b32.xlu0 %v5331_v48, %s6658_s11  ;;  %v8036_v16 = vpop.permute.xlu1 %5057  ;;  %v5341_v30 = vpack.i.bf16 %v8042_v62, %v8039_v33 }
 0x158   : > { %11939 = vst [vmem:[#allocation170_spill] sm:$0xff] %v8036_v16 }
 0x159   : > { %v8046_v24 = vpop.permute.xlu0 %5052  ;;  %5347 = vrot.lane.b32.xlu1 %v5346_v10, %s6658_s11 }
 0x15a   : > { %11940 = vst [vmem:[#allocation171_spill] sm:$0xff] %v8046_v24  ;;  %v4589_v24 = vunpack.i.l.bf16 %v7534_v53 }
 0x15b   : > { %5342 = vrot.lane.b32.xlu0 %v5341_v30, %s6658_s11  ;;  %v8052_v2 = vpop.permute.xlu1 %5067 }
 0x15d   : > { %v8054_v48 = vpop.permute.xlu0 %5062  ;;  %5357 = vrot.lane.b32.xlu1 %v5356_v57, %s6658_s11 }
 0x15f   : > { %5352 = vrot.lane.b32.xlu0 %v7621_v23, %s6658_s11  ;;  %v8059_v16 = vpop.permute.xlu1 %5077 }
 0x161   : > { %v8061_v32 = vpop.permute.xlu0 %5072  ;;  %5367 = vrot.lane.b32.xlu1 %v11834_v0, %s6659_s17 }
 0x163   : > { %5362 = vrot.lane.b32.xlu0 %v11829_v37, %s6659_s17  ;;  %v8067_v10 = vpop.permute.xlu1 %5087 }
 0x164   : > { %11941 = vst [vmem:[#allocation172_spill] sm:$0xff] %v8067_v10 }
 0x165   : > { %v8069_v30 = vpop.permute.xlu0 %5082  ;;  %5377 = vrot.lane.b32.xlu1 %v11838_v50, %s6659_s17  ;;  %v4584_v50 = vunpack.i.l.bf16 %v7538_v22 }
 0x166   : > { %11942 = vst [vmem:[#allocation173_spill] sm:$0xff] %v8069_v30 }
 0x167   : > { %5372 = vrot.lane.b32.xlu0 %v11833_v60, %s6659_s17  ;;  %v8075_v23 = vpop.permute.xlu1 %5097 }
 0x168   : > { %11943 = vst [vmem:[#allocation174_spill] sm:$0xff] %v8075_v23  ;;  %v8094_v23 = vld [vmem:[%s6744_s28 + $0x1a8] sm:$0xf] }
 0x169   : > { %v8077_v57 = vpop.permute.xlu0 %5092  ;;  %5387 = vrot.lane.b32.xlu1 %v11841_v46, %s6659_s17  ;;  %v627_v46 = vrot.slane %v8030_v7, 1 }
 0x16a   : > { %11944 = vst [vmem:[#allocation175_spill] sm:$0xff] %v8077_v57  ;;  %v4590_v57 = vunpack.i.h.bf16 %v7534_v53 }
 0x16b   : > { %5382 = vrot.lane.b32.xlu0 %v11837_v8, %s6659_s17  ;;  %v8083_v37 = vpop.permute.xlu1 %5107  ;;  %v630_v8 = vrot.slane %v8094_v23, 1 }
 0x16c   : > { %v2177_v53 = vsel %vm2165_vm4, %v7939_v29, %v4590_v57  ;;  %v4669_v57 = vunpack.i.l.bf16 %v7624_v40 }
 0x16d   : > { %v8085_v0 = vpop.permute.xlu0 %5102  ;;  %5397 = vrot.lane.b32.xlu1 %v11845_v5, %s6659_s17  ;;  %v628_v5 = vrot.slane %v8033_v44, 1 }
 0x16f   : > { %5392 = vrot.lane.b32.xlu0 %v11840_v39, %s6659_s17  ;;  %v8091_v30 = vpop.permute.xlu1 %5117  ;;  %v4585_v39 = vunpack.i.h.bf16 %v7538_v22  ;;  %v8121_v22 = vsel %vm277_vm0, %v627_v46, %v628_v5 }
 0x170   : > { %11945 = vst [vmem:[#allocation176_spill] sm:$0xff] %v8091_v30  ;;  %v2176_v30 = vsel %vm2165_vm4, %v7936_v34, %v4589_v24  ;;  %11949 = vst [vmem:[#allocation180_spill] sm:$0xff] %v8121_v22  ;;  %v4595_v34 = vunpack.i.h.bf16 %v7550_v59 }
 0x171   : > { %v8097_v10 = vpop.permute.xlu0 %5112  ;;  %5407 = vrot.lane.b32.xlu1 %v11851_v55, %s6659_s17 }
 0x172   : > { %11946 = vst [vmem:[#allocation177_spill] sm:$0xff] %v8097_v10  ;;  %v4600_v10 = vunpack.i.h.bf16 %v7546_v45 }
 0x173   : > { %5402 = vrot.lane.b32.xlu0 %v11844_v20, %s6659_s17  ;;  %v8109_v60 = vpop.permute.xlu1 %5127  ;;  %v8124_v20 = vsel %vm277_vm0, %v628_v5, %v630_v8  ;;  %v4594_v5 = vunpack.i.l.bf16 %v7550_v59  ;;  %v4630_v8 = vunpack.i.h.bf16 %v7576_v12  ;;  %v4639_v59 = vunpack.i.l.bf16 %v7586_v26 }
 0x174   : > { %11947 = vst [vmem:[#allocation178_spill] sm:$0xff] %v8109_v60  ;;  %11950 = vst [vmem:[#allocation181_spill] sm:$0xff] %v8124_v20  ;;  %v2175_v60 = vsel %vm2165_vm4, %v7950_v58, %v4585_v39  ;;  %v2181_v46 = vsel %vm2165_vm4, %v7961_v19, %v4600_v10  ;;  %v4629_v39 = vunpack.i.l.bf16 %v7576_v12  ;;  %v4640_v58 = vunpack.i.h.bf16 %v7586_v26 }
 0x175   : > { %v8112_v55 = vpop.permute.xlu0 %5122  ;;  %5417 = vrot.lane.b32.xlu1 %v11856_v28, %s6659_s17  ;;  %v4599_v28 = vunpack.i.l.bf16 %v7546_v45  ;;  %v4624_v45 = vunpack.i.l.bf16 %v7580_v51  ;;  %v4635_v19 = vunpack.i.h.bf16 %v7590_v13  ;;  %v4634_v12 = vunpack.i.l.bf16 %v7590_v13 }
 0x176   : > { %11948 = vst [vmem:[#allocation179_spill] sm:$0xff] %v8112_v55  ;;  %v2174_v55 = vsel %vm2165_vm4, %v7947_v35, %v4584_v50  ;;  %v4625_v50 = vunpack.i.h.bf16 %v7580_v51  ;;  %v8149_v35 = vpack.i.bf16 %v8124_v20, %v8121_v22  ;;  %v4670_v10 = vunpack.i.h.bf16 %v7624_v40 }
 0x177   : > { %5412 = vrot.lane.b32.xlu0 %v11848_v47, %s6659_s17  ;;  %v8133_v29 = vpop.permute.xlu1 %5137  ;;  %v2180_v51 = vsel %vm2165_vm4, %v7958_v11, %v4599_v28  ;;  %v2179_v20 = vsel %vm2165_vm4, %v7972_v21, %v4595_v34  ;;  %v2178_v26 = vsel %vm2165_vm4, %v7969_v38, %v4594_v5  ;;  %v2193_v13 = vsel %vm2165_vm4, %v8003_v17, %v4630_v8  ;;  %v11974_v47 = vld [vmem:[#allocation126_spill] sm:$0xff] }
 0x178   : > { %11951 = vst [vmem:[#allocation182_spill] sm:$0xff] %v8133_v29  ;;  %11953 = vst [vmem:[#allocation184_spill] sm:$0xff] %v8149_v35  ;;  %v4664_v11 = vunpack.i.l.bf16 %v7628_v36  ;;  %v2192_v28 = vsel %vm2165_vm4, %v8000_v42, %v4629_v39  ;;  %v2191_v40 = vsel %vm2165_vm4, %v8014_v61, %v4625_v50  ;;  %v2197_v38 = vsel %vm2165_vm4, %v8025_v6, %v4640_v58  ;;  %v11954_v39 = vld [vmem:[#allocation63_spill] sm:$0xff]  ;;  %v11955_v50 = vld [vmem:[#allocation106_spill] sm:$0xff] }
 0x179   : > { %v8143_v24 = vpop.permute.xlu0 %5132  ;;  %5427 = vrot.lane.b32.xlu1 %v11859_v52, %s6659_s17  ;;  %v2196_v21 = vsel %vm2165_vm4, %v8022_v41, %v4639_v59  ;;  %v2195_v42 = vsel %vm2165_vm4, %v8042_v62, %v4635_v19  ;;  %v2194_v17 = vsel %vm2165_vm4, %v8039_v33, %v4634_v12  ;;  %v2210_v61 = vsel %vm2198_vm5, %v2177_v53, %v4670_v10  ;;  %v11956_v58 = vld [vmem:[#allocation107_spill] sm:$0xff]  ;;  %v11957_v19 = vld [vmem:[#allocation108_spill] sm:$0xff] }
 0x17a   : > { %11952 = vst [vmem:[#allocation183_spill] sm:$0xff] %v8143_v24  ;;  %v2190_v24 = vsel %vm2165_vm4, %v8011_v31, %v4624_v45  ;;  %v2209_v31 = vsel %vm2198_vm5, %v2176_v30, %v4669_v57  ;;  %v4665_v34 = vunpack.i.h.bf16 %v7628_v36  ;;  %v2207_v41 = vsel %vm2198_vm5, %v2174_v55, %v4664_v11  ;;  %v11958_v10 = vld [vmem:[#allocation64_spill] sm:$0xff] }
 0x17b   : > { %5422 = vrot.lane.b32.xlu0 %v11854_v18, %s6659_s17  ;;  %v8161_v22 = vpop.permute.xlu1 %5147  ;;  %v4680_v5 = vunpack.i.h.bf16 %v7633_v27  ;;  %v4679_v62 = vunpack.i.l.bf16 %v7633_v27  ;;  %v4674_v33 = vunpack.i.l.bf16 %v7635_v15  ;;  %v4675_v53 = vunpack.i.h.bf16 %v7635_v15 }
 0x17c   : > { %v4710_v30 = vunpack.i.h.bf16 %v7657_v25  ;;  %v4709_v36 = vunpack.i.l.bf16 %v7657_v25  ;;  %v4705_v55 = vunpack.i.h.bf16 %v11955_v50  ;;  %v4704_v45 = vunpack.i.l.bf16 %v11955_v50 }
 0x17d   : > { %v8176_v29 = vpop.permute.xlu0 %5142  ;;  %5437 = vrot.lane.b32.xlu1 %v8149_v35, %s6659_s17  ;;  %v4720_v27 = vunpack.i.h.bf16 %v11956_v58  ;;  %v4719_v59 = vunpack.i.l.bf16 %v11956_v58  ;;  %v2208_v15 = vsel %vm2198_vm5, %v2175_v60, %v4665_v34  ;;  %v4715_v12 = vunpack.i.h.bf16 %v11957_v19 }
 0x17e   : > { %v4714_v25 = vunpack.i.l.bf16 %v11957_v19  ;;  %v2214_v11 = vsel %vm2198_vm5, %v2181_v46, %v4680_v5  ;;  %v2213_v35 = vsel %vm2198_vm5, %v2180_v51, %v4679_v62  ;;  %v2211_v50 = vsel %vm2198_vm5, %v2178_v26, %v4674_v33 }
 0x17f   : > { %5432 = vrot.lane.b32.xlu0 %v7701_v14, %s6659_s17  ;;  %v8193_v6 = vpop.permute.xlu1 %5157  ;;  %v11960_v14 = vld [vmem:[#allocation116_spill] sm:$0xff]  ;;  %v2212_v58 = vsel %vm2198_vm5, %v2179_v20, %v4675_v53  ;;  %v2226_v60 = vsel %vm2198_vm5, %v2193_v13, %v4710_v30  ;;  %v2225_v34 = vsel %vm2198_vm5, %v2192_v28, %v4709_v36  ;;  %v2224_v46 = vsel %vm2198_vm5, %v2191_v40, %v4705_v55  ;;  %v11963_v28 = vld [vmem:[#allocation66_spill] sm:$0xff]  ;;  %v11969_v55 = vld [vmem:[#allocation67_spill] sm:$0xff] }
 0x180   : > { %v4749_v52 = vunpack.i.l.bf16 %v11960_v14  ;;  %v2230_v51 = vsel %vm2198_vm5, %v2197_v38, %v4720_v27  ;;  %v2229_v26 = vsel %vm2198_vm5, %v2196_v21, %v4719_v59  ;;  %v2227_v5 = vsel %vm2198_vm5, %v2194_v17, %v4714_v25  ;;  %v11966_v38 = vld [vmem:[#allocation118_spill] sm:$0xff]  ;;  %v11967_v17 = vld [vmem:[#allocation119_spill] sm:$0xff] }
 0x181   : > { %v8202_v8 = vpop.permute.xlu0 %5152  ;;  %5447 = vrot.lane.b32.xlu1 %v11954_v39, %s6660_s19  ;;  %v2228_v20 = vsel %vm2198_vm5, %v2195_v42, %v4715_v12  ;;  %v4750_v13 = vunpack.i.h.bf16 %v11960_v14  ;;  %v4759_v30 = vunpack.i.l.bf16 %v11966_v38  ;;  %v4760_v21 = vunpack.i.h.bf16 %v11966_v38 }
 0x182   : > { %v2242_v33 = vsel %vm2231_vm6, %v2209_v31, %v4749_v52  ;;  %v4755_v36 = vunpack.i.h.bf16 %v11967_v17  ;;  %v4754_v42 = vunpack.i.l.bf16 %v11967_v17  ;;  %v11971_v31 = vld [vmem:[#allocation124_spill] sm:$0xff] }
 0x183   : > { %5442 = vrot.lane.b32.xlu0 %v11958_v10, %s6660_s19  ;;  %v8215_v57 = vpop.permute.xlu1 %5167  ;;  %v11962_v10 = vld [vmem:[#allocation65_spill] sm:$0xff]  ;;  %v4785_v59 = vunpack.i.h.bf16 %v11971_v31  ;;  %v4784_v12 = vunpack.i.l.bf16 %v11971_v31  ;;  %v2243_v25 = vsel %vm2231_vm6, %v2210_v61, %v4750_v13  ;;  %v11973_v17 = vld [vmem:[#allocation68_spill] sm:$0xff]  ;;  %v2246_v18 = vsel %vm2231_vm6, %v2213_v35, %v4759_v30  ;;  %v11977_v30 = vld [vmem:[#allocation42_spill] sm:$0xff] }
 0x184   : > { %11959 = vst [vmem:[#allocation63_spill] sm:$0xff] %v8215_v57  ;;  %v2223_v57 = vsel %vm2198_vm5, %v2190_v24, %v4704_v45  ;;  %v11965_v24 = vld [vmem:[#allocation117_spill] sm:$0xff]  ;;  %v11970_v45 = vld [vmem:[#allocation123_spill] sm:$0xff]  ;;  %v4794_v31 = vunpack.i.l.bf16 %v11974_v47  ;;  %v2247_v61 = vsel %vm2231_vm6, %v2214_v11, %v4760_v21  ;;  %v2244_v13 = vsel %vm2231_vm6, %v2211_v50, %v4754_v42  ;;  %v11978_v21 = vld [vmem:[#allocation132_spill] sm:$0xff] }
 0x185   : > { %v8224_v19 = vpop.permute.xlu0 %5162  ;;  %5457 = vrot.lane.b32.xlu1 %v11962_v10, %s6660_s19  ;;  %v4745_v53 = vunpack.i.h.bf16 %v11965_v24  ;;  %v4744_v40 = vunpack.i.l.bf16 %v11965_v24  ;;  %v4790_v27 = vunpack.i.h.bf16 %v11970_v45  ;;  %v4789_v52 = vunpack.i.l.bf16 %v11970_v45  ;;  %v11972_v24 = vld [vmem:[#allocation125_spill] sm:$0xff] }
 0x186   : > { %11961 = vst [vmem:[#allocation106_spill] sm:$0xff] %v8224_v19  ;;  %v4800_v38 = vunpack.i.h.bf16 %v11972_v24  ;;  %v11975_v10 = vld [vmem:[#allocation69_spill] sm:$0xff]  ;;  %v8276_v35 = vsel %vm2231_vm6, %v2224_v46, %v4785_v59  ;;  %v4824_v46 = vunpack.i.l.bf16 %v7778_v9  ;;  %v633_v42 = vrot.slane %v8033_v44, 2 }
 0x187   : > { %5452 = vrot.lane.b32.xlu0 %v11963_v28, %s6660_s19  ;;  %v8237_v62 = vpop.permute.xlu1 %5177  ;;  %v2240_v19 = vsel %vm2231_vm6, %v2207_v41, %v4744_v40  ;;  %v2241_v45 = vsel %vm2231_vm6, %v2208_v15, %v4745_v53  ;;  %v2259_v41 = vsel %vm2231_vm6, %v2226_v60, %v4790_v27  ;;  %v2256_v15 = vsel %vm2231_vm6, %v2223_v57, %v4784_v12  ;;  %v11976_v53 = vld [vmem:[#allocation70_spill] sm:$0xff] }
 0x188   : > { %11964 = vst [vmem:[#allocation107_spill] sm:$0xff] %v8237_v62  ;;  %v4799_v62 = vunpack.i.l.bf16 %v11972_v24  ;;  %v2245_v24 = vsel %vm2231_vm6, %v2212_v58, %v4755_v36  ;;  %v8282_v50 = vsel %vm2231_vm6, %v2230_v51, %v4800_v38  ;;  %v4795_v58 = vunpack.i.h.bf16 %v11974_v47 }
 0x189   : > { %v8246_v14 = vpop.permute.xlu0 %5172  ;;  %5467 = vrot.lane.b32.xlu1 %v11969_v55, %s6660_s19  ;;  %v2260_v60 = vsel %vm2231_vm6, %v2227_v5, %v4794_v31  ;;  %v4830_v57 = vunpack.i.h.bf16 %v7776_v4  ;;  %v4840_v51 = vunpack.i.h.bf16 %v7784_v49  ;;  %v4834_v36 = vunpack.i.l.bf16 %v11978_v21 }
 0x18a   : > { %11968 = vst [vmem:[#allocation108_spill] sm:$0xff] %v8246_v14  ;;  %v8279_v11 = vsel %vm2231_vm6, %v2229_v26, %v4799_v62  ;;  %v4825_v26 = vunpack.i.h.bf16 %v7778_v9  ;;  %v4839_v62 = vunpack.i.l.bf16 %v7784_v49  ;;  %v632_v5 = vrot.slane %v8030_v7, 2  ;;  %v11979_v49 = vld [vmem:[#allocation47_spill] sm:$0xff] }
 0x18b   : > { %5462 = vrot.lane.b32.xlu0 %v11973_v17, %s6660_s19  ;;  %v8259_v14 = vpop.permute.xlu1 %5187  ;;  %v2258_v17 = vsel %vm2231_vm6, %v2225_v34, %v4789_v52  ;;  %v4829_v34 = vunpack.i.l.bf16 %v7776_v4  ;;  %v635_v4 = vrot.slane %v8094_v23, 2  ;;  %v4835_v27 = vunpack.i.h.bf16 %v11978_v21 }
 0x18c   : > { %v4870_v9 = vunpack.i.h.bf16 %v7808_v1  ;;  %v4869_v52 = vunpack.i.l.bf16 %v7808_v1  ;;  %v2261_v12 = vsel %vm2231_vm6, %v2228_v20, %v4795_v58  ;;  %v2276_v31 = vsel %vm2264_vm7, %v2243_v25, %v4830_v57  ;;  %v11983_v58 = vld [vmem:[#allocation136_spill] sm:$0xff] }
 0x18d   : > { %v8268_v55 = vpop.permute.xlu0 %5182  ;;  %5477 = vrot.lane.b32.xlu1 %v11975_v10, %s6660_s19  ;;  %v2275_v38 = vsel %vm2264_vm7, %v2242_v33, %v4829_v34  ;;  %v2274_v21 = vsel %vm2264_vm7, %v2241_v45, %v4825_v26  ;;  %v2279_v10 = vsel %vm2264_vm7, %v2246_v18, %v4839_v62  ;;  %v2280_v1 = vsel %vm2264_vm7, %v2247_v61, %v4840_v51  ;;  %v11984_v61 = vld [vmem:[#allocation72_spill] sm:$0xff]  ;;  %v11987_v62 = vld [vmem:[#allocation138_spill] sm:$0xff] }
 0x18e   : > { %v2277_v20 = vsel %vm2264_vm7, %v2244_v13, %v4834_v36  ;;  %v4864_v33 = vunpack.i.l.bf16 %v11983_v58  ;;  %v634_v25 = vsel %vm358_vm1, %v632_v5, %v633_v42  ;;  %v2278_v57 = vsel %vm2264_vm7, %v2245_v24, %v4835_v27  ;;  %v11986_v13 = vld [vmem:[#allocation137_spill] sm:$0xff] }
 0x18f   : > { %5472 = vrot.lane.b32.xlu0 %v11976_v53, %s6660_s19  ;;  %v8287_v40 = vpop.permute.xlu1 %5197  ;;  %v2291_v45 = vsel %vm2264_vm7, %v2258_v17, %v4869_v52  ;;  %v2292_v18 = vsel %vm2264_vm7, %v2259_v41, %v4870_v9  ;;  %v4880_v26 = vunpack.i.h.bf16 %v11986_v13  ;;  %v4879_v51 = vunpack.i.l.bf16 %v11986_v13 }
 0x190   : > { %v4874_v36 = vunpack.i.l.bf16 %v11987_v62  ;;  %v4875_v5 = vunpack.i.h.bf16 %v11987_v62  ;;  %v4910_v24 = vunpack.i.h.bf16 %v7847_v3  ;;  %v4909_v17 = vunpack.i.l.bf16 %v7847_v3 }
 0x191   : > { %v8296_v47 = vpop.permute.xlu0 %5192  ;;  %5487 = vrot.lane.b32.xlu1 %v11977_v30, %s6660_s19  ;;  %v2273_v30 = vsel %vm2264_vm7, %v2240_v19, %v4824_v46  ;;  %v636_v19 = vsel %vm358_vm1, %v633_v42, %v635_v4  ;;  %v4865_v46 = vunpack.i.h.bf16 %v11983_v58  ;;  %v11989_v42 = vld [vmem:[#allocation73_spill] sm:$0xff]  ;;  %v2289_v27 = vsel %vm2264_vm7, %v2256_v15, %v4864_v33 }
 0x192   : > { %v8344_v4 = vpack.i.bf16 %v636_v19, %v634_v25  ;;  %v4905_v9 = vunpack.i.h.bf16 %v7849_v54  ;;  %v4904_v52 = vunpack.i.l.bf16 %v7849_v54  ;;  %v4919_v58 = vunpack.i.l.bf16 %v7855_v63 }
 0x193   : > { %5482 = vrot.lane.b32.xlu0 %v11979_v49, %s6660_s19  ;;  %v8309_v59 = vpop.permute.xlu1 %5207  ;;  %v11982_v49 = vld [vmem:[#allocation71_spill] sm:$0xff]  ;;  %v4920_v13 = vunpack.i.h.bf16 %v7855_v63  ;;  %v4915_v62 = vunpack.i.h.bf16 %v7857_v56  ;;  %v4914_v3 = vunpack.i.l.bf16 %v7857_v56  ;;  %v2290_v15 = vsel %vm2264_vm7, %v8276_v35, %v4865_v46 }
 0x194   : > { %11980 = vst [vmem:[#allocation64_spill] sm:$0xff] %v8309_v59  ;;  %11990 = vst [vmem:[#allocation119_spill] sm:$0xff] %v8344_v4  ;;  %v2295_v33 = vsel %vm2264_vm7, %v8279_v11, %v4879_v51  ;;  %v2296_v54 = vsel %vm2264_vm7, %v8282_v50, %v4880_v26  ;;  %v2293_v63 = vsel %vm2264_vm7, %v2260_v60, %v4874_v36  ;;  %v4950_v26 = vunpack.i.h.bf16 %v7879_v43 }
 0x195   : > { %v8318_v53 = vpop.permute.xlu0 %5202  ;;  %5497 = vrot.lane.b32.xlu1 %v11982_v49, %s6660_s19  ;;  %v2294_v25 = vsel %vm2264_vm7, %v2261_v12, %v4875_v5  ;;  %v2308_v56 = vsel %vm2297_vm8, %v2275_v38, %v4909_v17  ;;  %v2309_v19 = vsel %vm2297_vm8, %v2276_v31, %v4910_v24  ;;  %v2306_v35 = vsel %vm2297_vm8, %v2273_v30, %v4904_v52  ;;  %v11992_v38 = vld [vmem:[#allocation131_spill] sm:$0xff]  ;;  %v11993_v30 = vld [vmem:[#allocation148_spill] sm:$0xff]  ;;  %v11996_v24 = vld [vmem:[#allocation150_spill] sm:$0xff] }
 0x196   : > { %11981 = vst [vmem:[#allocation116_spill] sm:$0xff] %v8318_v53  ;;  %v2307_v11 = vsel %vm2297_vm8, %v2274_v21, %v4905_v9  ;;  %v2312_v46 = vsel %vm2297_vm8, %v2279_v10, %v4919_v58  ;;  %v2313_v50 = vsel %vm2297_vm8, %v2280_v1, %v4920_v13  ;;  %v2310_v60 = vsel %vm2297_vm8, %v2277_v20, %v4914_v3  ;;  %v11994_v10 = vld [vmem:[#allocation149_spill] sm:$0xff] }
 0x197   : > { %5492 = vrot.lane.b32.xlu0 %v11984_v61, %s6660_s19  ;;  %v8331_v34 = vpop.permute.xlu1 %5217  ;;  %v2311_v12 = vsel %vm2297_vm8, %v2278_v57, %v4915_v62  ;;  %v4949_v51 = vunpack.i.l.bf16 %v7879_v43  ;;  %v4945_v36 = vunpack.i.h.bf16 %v11993_v30  ;;  %v4944_v21 = vunpack.i.l.bf16 %v11993_v30  ;;  %v11995_v57 = vld [vmem:[#allocation12_spill] sm:$0xff]  ;;  %v11997_v43 = vld [vmem:[#allocation13_spill] sm:$0xff] }
 0x198   : > { %11985 = vst [vmem:[#allocation117_spill] sm:$0xff] %v8331_v34  ;;  %v4960_v5 = vunpack.i.h.bf16 %v11994_v10  ;;  %v4959_v1 = vunpack.i.l.bf16 %v11994_v10  ;;  %v4955_v17 = vunpack.i.h.bf16 %v11996_v24  ;;  %v4954_v9 = vunpack.i.l.bf16 %v11996_v24 }
 0x199   : > { %v8340_v41 = vpop.permute.xlu0 %5212  ;;  %5507 = vrot.lane.b32.xlu1 %v11989_v42, %s6660_s19  ;;  %v637_v58 = vrot.slane %v8030_v7, 3  ;;  %v638_v13 = vrot.slane %v8033_v44, 3  ;;  %v640_v62 = vrot.slane %v8094_v23, 3  ;;  %v2324_v3 = vsel %vm2297_vm8, %v2291_v45, %v4949_v51  ;;  %v12001_v45 = vld [vmem:[#allocation156_spill] sm:$0xff] }
 0x19a   : > { %11988 = vst [vmem:[#allocation118_spill] sm:$0xff] %v8340_v41  ;;  %v11991_v41 = vld [vmem:[#allocation74_spill] sm:$0xff]  ;;  %v2325_v30 = vsel %vm2297_vm8, %v2292_v18, %v4950_v26  ;;  %v2322_v10 = vsel %vm2297_vm8, %v2289_v27, %v4944_v21  ;;  %v2323_v59 = vsel %vm2297_vm8, %v2290_v15, %v4945_v36  ;;  %v2328_v24 = vsel %vm2297_vm8, %v2295_v33, %v4959_v1  ;;  %v12002_v27 = vld [vmem:[#allocation157_spill] sm:$0xff]  ;;  %v12003_v33 = vld [vmem:[#allocation75_spill] sm:$0xff] }
 0x19b   : > { %5502 = vrot.lane.b32.xlu0 %v11991_v41, %s6660_s19  ;;  %v8355_v34 = vpop.permute.xlu1 %5227  ;;  %v2327_v42 = vsel %vm2297_vm8, %v2294_v25, %v4955_v17  ;;  %v4990_v51 = vunpack.i.h.bf16 %v12001_v45  ;;  %v4989_v18 = vunpack.i.l.bf16 %v12001_v45  ;;  %v4985_v26 = vunpack.i.h.bf16 %v12002_v27  ;;  %v12006_v1 = vld [vmem:[#allocation159_spill] sm:$0xff] }
 0x19c   : > { %v4984_v15 = vunpack.i.l.bf16 %v12002_v27  ;;  %v639_v36 = vsel %vm439_vm2, %v637_v58, %v638_v13  ;;  %v641_v21 = vsel %vm439_vm2, %v638_v13, %v640_v62  ;;  %v4995_v17 = vunpack.i.h.bf16 %v12006_v1  ;;  %v12008_v27 = vld [vmem:[#allocation76_spill] sm:$0xff] }
 0x19d   : > { %v8367_v53 = vpop.permute.xlu0 %5222  ;;  %5517 = vrot.lane.b32.xlu1 %v8344_v4, %s6660_s19  ;;  %v2326_v4 = vsel %vm2297_vm8, %v2293_v63, %v4954_v9  ;;  %v12005_v63 = vld [vmem:[#allocation158_spill] sm:$0xff]  ;;  %v4994_v9 = vunpack.i.l.bf16 %v12006_v1  ;;  %v8432_v58 = vpack.i.bf16 %v641_v21, %v639_v36  ;;  %v2340_v62 = vsel %vm2330_vm9, %v2307_v11, %v4985_v26  ;;  %v12014_v21 = vld [vmem:[#allocation167_spill] sm:$0xff] }
 0x19e   : > { %v4999_v25 = vunpack.i.l.bf16 %v12005_v63  ;;  %v2339_v13 = vsel %vm2330_vm9, %v2306_v35, %v4984_v15  ;;  %v2344_v35 = vsel %vm2330_vm9, %v2311_v12, %v4995_v17  ;;  %v12012_v15 = vld [vmem:[#allocation78_spill] sm:$0xff] }
 0x19f   : > { %5512 = vrot.lane.b32.xlu0 %v11992_v38, %s6660_s19  ;;  %v8379_v31 = vpop.permute.xlu1 %5237 }
 0x1a0   : > { %v2345_v1 = vsel %vm2330_vm9, %v2312_v46, %v4999_v25  ;;  %v12013_v46 = vld [vmem:[#allocation166_spill] sm:$0xff]  ;;  %v5034_v25 = vunpack.i.l.bf16 %v12014_v21 }
 0x1a1   : > { %v8387_v20 = vpop.permute.xlu0 %5232  ;;  %5527 = vrot.lane.b32.xlu1 %v11995_v57, %s6661_s20  ;;  %v5039_v36 = vunpack.i.l.bf16 %v12013_v46 }
 0x1a3   : > { %5522 = vrot.lane.b32.xlu0 %v11997_v43, %s6661_s20  ;;  %v8395_v52 = vpop.permute.xlu1 %5247  ;;  %v2329_v43 = vsel %vm2297_vm8, %v2296_v54, %v4960_v5  ;;  %v5000_v5 = vunpack.i.h.bf16 %v12005_v63  ;;  %v12009_v63 = vld [vmem:[#allocation77_spill] sm:$0xff] }
 0x1a4   : > { %11998 = vst [vmem:[#allocation123_spill] sm:$0xff] %v8395_v52  ;;  %v12000_v52 = vld [vmem:[#allocation14_spill] sm:$0xff] }
 0x1a5   : > { %v8406_v57 = vpop.permute.xlu0 %5242  ;;  %5537 = vrot.lane.b32.xlu1 %v12000_v52, %s6661_s20 }
 0x1a6   : > { %11999 = vst [vmem:[#allocation124_spill] sm:$0xff] %v8406_v57  ;;  %v2341_v57 = vsel %vm2330_vm9, %v2308_v56, %v4989_v18 }
 0x1a7   : > { %5532 = vrot.lane.b32.xlu0 %v12003_v33, %s6661_s20  ;;  %v8418_v54 = vpop.permute.xlu1 %5257 }
 0x1a8   : > { %12004 = vst [vmem:[#allocation125_spill] sm:$0xff] %v8418_v54  ;;  %v2342_v54 = vsel %vm2330_vm9, %v2309_v19, %v4990_v51  ;;  %v2343_v19 = vsel %vm2330_vm9, %v2310_v60, %v4994_v9  ;;  %v12011_v51 = vld [vmem:[#allocation165_spill] sm:$0xff] }
 0x1a9   : > { %v8426_v45 = vpop.permute.xlu0 %5252  ;;  %5547 = vrot.lane.b32.xlu1 %v12008_v27, %s6661_s20  ;;  %v12010_v27 = vld [vmem:[#allocation164_spill] sm:$0xff]  ;;  %v5025_v11 = vunpack.i.h.bf16 %v12011_v51  ;;  %v5024_v18 = vunpack.i.l.bf16 %v12011_v51  ;;  %v12015_v60 = vld [vmem:[#allocation33_spill] sm:$0xff] }
 0x1aa   : > { %12007 = vst [vmem:[#allocation126_spill] sm:$0xff] %v8426_v45  ;;  %v2346_v45 = vsel %vm2330_vm9, %v2313_v50, %v5000_v5  ;;  %v5030_v33 = vunpack.i.h.bf16 %v12010_v27  ;;  %v5029_v56 = vunpack.i.l.bf16 %v12010_v27  ;;  %v5040_v50 = vunpack.i.h.bf16 %v12013_v46 }
 0x1ab   : > { %5542 = vrot.lane.b32.xlu0 %v12009_v63, %s6661_s20  ;;  %v8438_v52 = vpop.permute.xlu1 %5267  ;;  %v5035_v5 = vunpack.i.h.bf16 %v12014_v21  ;;  %v8467_v27 = vsel %vm2330_vm9, %v2322_v10, %v5024_v18  ;;  %v8470_v51 = vsel %vm2330_vm9, %v2323_v59, %v5025_v11  ;;  %v5070_v46 = vunpack.i.h.bf16 %v8052_v2 }
 0x1ac   : > { %v8461_v17 = vsel %vm2330_vm9, %v2324_v3, %v5029_v56  ;;  %v8464_v9 = vsel %vm2330_vm9, %v2325_v30, %v5030_v33  ;;  %v5069_v21 = vunpack.i.l.bf16 %v8052_v2  ;;  %v8479_v3 = vsel %vm2330_vm9, %v2328_v24, %v5039_v36  ;;  %v12017_v56 = vld [vmem:[#allocation79_spill] sm:$0xff]  ;;  %v12020_v36 = vld [vmem:[#allocation80_spill] sm:$0xff] }
 0x1ad   : > { %v8448_v26 = vpop.permute.xlu0 %5262  ;;  %5557 = vrot.lane.b32.xlu1 %v12012_v15, %s6661_s20  ;;  %v8482_v30 = vsel %vm2330_vm9, %v2329_v43, %v5040_v50  ;;  %v8485_v10 = vsel %vm2330_vm9, %v2326_v4, %v5034_v25  ;;  %v8488_v59 = vsel %vm2330_vm9, %v2327_v42, %v5035_v5  ;;  %v5065_v2 = vunpack.i.h.bf16 %v8054_v48 }
 0x1ae   : > { %v5064_v33 = vunpack.i.l.bf16 %v8054_v48  ;;  %v5080_v24 = vunpack.i.h.bf16 %v8059_v16  ;;  %v5079_v43 = vunpack.i.l.bf16 %v8059_v16  ;;  %v5075_v18 = vunpack.i.h.bf16 %v8061_v32 }
 0x1af   : > { %5552 = vrot.lane.b32.xlu0 %v12015_v60, %s6661_s20  ;;  %v8458_v12 = vpop.permute.xlu1 %5277  ;;  %v12016_v60 = vld [vmem:[#allocation38_spill] sm:$0xff]  ;;  %v5074_v4 = vunpack.i.l.bf16 %v8061_v32  ;;  %v2374_v42 = vsel %vm2363_vm10, %v2341_v57, %v5069_v21  ;;  %v2375_v50 = vsel %vm2363_vm10, %v2342_v54, %v5070_v46  ;;  %v5150_v25 = vunpack.i.h.bf16 %v8161_v22 }
 0x1b0   : > { %v5149_v16 = vunpack.i.l.bf16 %v8161_v22  ;;  %v5144_v32 = vunpack.i.l.bf16 %v8176_v29  ;;  %v2372_v57 = vsel %vm2363_vm10, %v2339_v13, %v5064_v33  ;;  %v2373_v54 = vsel %vm2363_vm10, %v2340_v62, %v5065_v2 }
 0x1b1   : > { %v8474_v15 = vpop.permute.xlu0 %5272  ;;  %5567 = vrot.lane.b32.xlu1 %v12016_v60, %s6661_s20  ;;  %v5160_v46 = vunpack.i.h.bf16 %v8193_v6  ;;  %v5159_v21 = vunpack.i.l.bf16 %v8193_v6  ;;  %v2379_v22 = vsel %vm2363_vm10, %v2346_v45, %v5080_v24  ;;  %v2376_v60 = vsel %vm2363_vm10, %v2343_v19, %v5074_v4  ;;  %v12025_v4 = vld [vmem:[#allocation83_spill] sm:$0xff] }
 0x1b2   : > { %v5109_v62 = vunpack.i.l.bf16 %v8083_v37  ;;  %v5230_v2 = vunpack.i.h.bf16 %v8355_v34  ;;  %v5229_v6 = vunpack.i.l.bf16 %v8355_v34  ;;  %v2408_v45 = vsel %vm2396_vm11, %v2375_v50, %v5150_v25 }
 0x1b3   : > { %5562 = vrot.lane.b32.xlu0 %v12017_v56, %s6661_s20  ;;  %v8494_v11 = vpop.permute.xlu1 %5287  ;;  %v2405_v19 = vsel %vm2396_vm11, %v2372_v57, %v5144_v32  ;;  %v5224_v34 = vunpack.i.l.bf16 %v8367_v53  ;;  %v5154_v50 = vunpack.i.l.bf16 %v8202_v8  ;;  %v5240_v32 = vunpack.i.h.bf16 %v8379_v31 }
 0x1b4   : > { %12018 = vst [vmem:[#allocation132_spill] sm:$0xff] %v8494_v11  ;;  %v5145_v11 = vunpack.i.h.bf16 %v8176_v29  ;;  %v2377_v29 = vsel %vm2363_vm10, %v2344_v35, %v5075_v18  ;;  %v5225_v18 = vunpack.i.h.bf16 %v8367_v53  ;;  %v5239_v57 = vunpack.i.l.bf16 %v8379_v31 }
 0x1b5   : > { %v8502_v48 = vpop.permute.xlu0 %5282  ;;  %5577 = vrot.lane.b32.xlu1 %v12020_v36, %s6661_s20  ;;  %v2378_v36 = vsel %vm2363_vm10, %v2345_v1, %v5079_v43  ;;  %v2407_v1 = vsel %vm2396_vm11, %v2374_v42, %v5149_v16  ;;  %v2412_v43 = vsel %vm2396_vm11, %v2379_v22, %v5160_v46  ;;  %v5155_v42 = vunpack.i.h.bf16 %v8202_v8 }
 0x1b6   : > { %12019 = vst [vmem:[#allocation71_spill] sm:$0xff] %v8502_v48  ;;  %v12021_v48 = vld [vmem:[#allocation81_spill] sm:$0xff]  ;;  %v2406_v35 = vsel %vm2396_vm11, %v2373_v54, %v5145_v11  ;;  %v2411_v24 = vsel %vm2396_vm11, %v2378_v36, %v5159_v21  ;;  %v2440_v11 = vsel %vm2429_vm12, %v2407_v1, %v5229_v6  ;;  %v2441_v36 = vsel %vm2429_vm12, %v2408_v45, %v5230_v2  ;;  %v12026_v6 = vld [vmem:[#allocation143_spill] sm:$0xff] }
 0x1b7   : > { %5572 = vrot.lane.b32.xlu0 %v12021_v48, %s6661_s20  ;;  %v8517_v5 = vpop.permute.xlu1 %5297  ;;  %v2438_v22 = vsel %vm2429_vm12, %v2405_v19, %v5224_v34  ;;  %v5235_v2 = vunpack.i.h.bf16 %v8387_v20  ;;  %v5234_v31 = vunpack.i.l.bf16 %v8387_v20  ;;  %v2409_v19 = vsel %vm2396_vm11, %v2376_v60, %v5154_v50 }
 0x1b8   : > { %12022 = vst [vmem:[#allocation136_spill] sm:$0xff] %v8517_v5  ;;  %v12024_v5 = vld [vmem:[#allocation82_spill] sm:$0xff]  ;;  %v2445_v20 = vsel %vm2429_vm12, %v2412_v43, %v5240_v32  ;;  %v5105_v60 = vunpack.i.h.bf16 %v8085_v0  ;;  %v12030_v32 = vld [vmem:[#allocation176_spill] sm:$0xff] }
 0x1b9   : > { %v8527_v33 = vpop.permute.xlu0 %5292  ;;  %5587 = vrot.lane.b32.xlu1 %v12024_v5, %s6661_s20 }
 0x1ba   : > { %12023 = vst [vmem:[#allocation72_spill] sm:$0xff] %v8527_v33  ;;  %v6522_v33 = vld [vmem:[%s6744_s28 + $0x78] sm:$0xff] }
 0x1bb   : > { %5582 = vrot.lane.b32.xlu0 %v12025_v4, %s6661_s20  ;;  %v5308_v13 = vpop.permute.xlu1 %5307 }
 0x1bc   : > { %v5310_v25 = vunpack.i.h.bf16 %v5308_v13  ;;  %v5309_v16 = vunpack.i.l.bf16 %v5308_v13  ;;  %v2439_v13 = vsel %vm2429_vm12, %v2406_v35, %v5225_v18  ;;  %v2410_v35 = vsel %vm2396_vm11, %v2377_v29, %v5155_v42  ;;  %v12028_v42 = vld [vmem:[#allocation18_spill] sm:$0xff] }
 0x1bd   : > { %v5303_v54 = vpop.permute.xlu0 %5302  ;;  %5597 = vrot.lane.b32.xlu1 %v8432_v58, %s6661_s20  ;;  %v2444_v18 = vsel %vm2429_vm12, %v2411_v24, %v5239_v57  ;;  %v5104_v29 = vunpack.i.l.bf16 %v8085_v0  ;;  %v2442_v24 = vsel %vm2429_vm12, %v2409_v19, %v5234_v31  ;;  %v2443_v43 = vsel %vm2429_vm12, %v2410_v35, %v5235_v2  ;;  %v12031_v0 = vld [vmem:[#allocation177_spill] sm:$0xff]  ;;  %v12033_v19 = vld [vmem:[#allocation84_spill] sm:$0xff] }
 0x1be   : > { %v8550_v53 = vsel %vm2462_vm13, %v2440_v11, %v5309_v16  ;;  %v8553_v46 = vsel %vm2462_vm13, %v2441_v36, %v5310_v25  ;;  %v5305_v8 = vunpack.i.h.bf16 %v5303_v54  ;;  %v5304_v21 = vunpack.i.l.bf16 %v5303_v54  ;;  %v12027_v36 = vld [vmem:[#allocation16_spill] sm:$0xff] }
 0x1bf   : > { %5592 = vrot.lane.b32.xlu0 %v12026_v6, %s6661_s20  ;;  %v5318_v1 = vpop.permute.xlu1 %5317  ;;  %v5120_v57 = vunpack.i.h.bf16 %v12030_v32  ;;  %v5114_v31 = vunpack.i.l.bf16 %v12031_v0  ;;  %v5269_v35 = vunpack.i.l.bf16 %v8438_v52 }
 0x1c0   : > { %v8562_v45 = vsel %vm2462_vm13, %v2438_v22, %v5304_v21  ;;  %v8565_v25 = vsel %vm2462_vm13, %v2439_v13, %v5305_v8  ;;  %v5320_v16 = vunpack.i.h.bf16 %v5318_v1  ;;  %v5319_v11 = vunpack.i.l.bf16 %v5318_v1 }
 0x1c1   : > { %v5313_v34 = vpop.permute.xlu0 %5312  ;;  %5607 = vrot.lane.b32.xlu1 %v12027_v36, %s6662_s24  ;;  %v5119_v13 = vunpack.i.l.bf16 %v12030_v32  ;;  %v5200_v32 = vunpack.i.h.bf16 %v8287_v40 }
 0x1c2   : > { %v8574_v54 = vsel %vm2462_vm13, %v2444_v18, %v5319_v11  ;;  %v8577_v8 = vsel %vm2462_vm13, %v2445_v20, %v5320_v16  ;;  %v5315_v21 = vunpack.i.h.bf16 %v5313_v34  ;;  %v5314_v22 = vunpack.i.l.bf16 %v5313_v34 }
 0x1c3   : > { %5602 = vrot.lane.b32.xlu0 %v12028_v42, %s6662_s24  ;;  %v8585_v50 = vpop.permute.xlu1 %5327  ;;  %v5115_v11 = vunpack.i.h.bf16 %v12031_v0  ;;  %v5190_v20 = vunpack.i.h.bf16 %v8259_v14  ;;  %v5189_v34 = vunpack.i.l.bf16 %v8259_v14  ;;  %v5199_v0 = vunpack.i.l.bf16 %v8287_v40  ;;  %v12035_v14 = vld [vmem:[#allocation85_spill] sm:$0xff] }
 0x1c4   : > { %12029 = vst [vmem:[#allocation137_spill] sm:$0xff] %v8585_v50  ;;  %v8590_v1 = vsel %vm2462_vm13, %v2442_v24, %v5314_v22  ;;  %v8593_v16 = vsel %vm2462_vm13, %v2443_v43, %v5315_v21  ;;  %v5185_v21 = vunpack.i.h.bf16 %v8268_v55  ;;  %v5184_v22 = vunpack.i.l.bf16 %v8268_v55  ;;  %v6532_v50 = vld [vmem:[%s6744_s28 + $0x120] sm:$0xff] }
 0x1c5   : > { %v8597_v2 = vpop.permute.xlu0 %5322  ;;  %5617 = vrot.lane.b32.xlu1 %v12033_v19, %s6662_s24  ;;  %v2390_v24 = vsel %vm2363_vm10, %v8461_v17, %v5109_v62  ;;  %v12034_v43 = vunpack.i.h.bf16 %v8083_v37  ;;  %v2388_v55 = vsel %vm2363_vm10, %v8467_v27, %v5104_v29  ;;  %v2389_v17 = vsel %vm2363_vm10, %v8470_v51, %v5105_v60  ;;  %v12038_v51 = vld [vmem:[#allocation86_spill] sm:$0xff] }
 0x1c6   : > { %12032 = vst [vmem:[#allocation138_spill] sm:$0xff] %v8597_v2  ;;  %v2394_v37 = vsel %vm2363_vm10, %v8479_v3, %v5119_v13  ;;  %v2392_v40 = vsel %vm2363_vm10, %v8485_v10, %v5114_v31  ;;  %v2393_v62 = vsel %vm2363_vm10, %v8488_v59, %v5115_v11  ;;  %v2423_v3 = vsel %vm2396_vm11, %v2390_v24, %v5189_v34  ;;  %v12039_v13 = vld [vmem:[#allocation87_spill] sm:$0xff] }
 0x1c7   : > { %v2391_v42 = vsel %vm2363_vm10, %v8464_v9, %v12034_v43  ;;  %5612 = vrot.lane.b32.xlu0 %v12035_v14, %s6662_s24  ;;  %v8619_v18 = vpop.permute.xlu1 %5337  ;;  %v2395_v9 = vsel %vm2363_vm10, %v8482_v30, %v5120_v57  ;;  %v5270_v43 = vunpack.i.h.bf16 %v8438_v52  ;;  %v2421_v30 = vsel %vm2396_vm11, %v2388_v55, %v5184_v22 }
 0x1c8   : > { %12036 = vst [vmem:[#allocation74_spill] sm:$0xff] %v8619_v18  ;;  %v2424_v60 = vsel %vm2396_vm11, %v2391_v42, %v5190_v20  ;;  %v2422_v10 = vsel %vm2396_vm11, %v2389_v17, %v5185_v21  ;;  %v2427_v29 = vsel %vm2396_vm11, %v2394_v37, %v5199_v0  ;;  %v2428_v59 = vsel %vm2396_vm11, %v2395_v9, %v5200_v32 }
 0x1c9   : > { %v8635_v27 = vpop.permute.xlu0 %5332  ;;  %5627 = vrot.lane.b32.xlu1 %v12038_v51, %s6662_s24  ;;  %v5265_v57 = vunpack.i.h.bf16 %v8448_v26  ;;  %v5264_v52 = vunpack.i.l.bf16 %v8448_v26  ;;  %v5195_v31 = vunpack.i.h.bf16 %v8296_v47  ;;  %v5194_v20 = vunpack.i.l.bf16 %v8296_v47  ;;  %v12040_v26 = vld [vmem:[#allocation88_spill] sm:$0xff] }
 0x1ca   : > { %12037 = vst [vmem:[#allocation148_spill] sm:$0xff] %v8635_v27  ;;  %v2456_v21 = vsel %vm2429_vm12, %v2423_v3, %v5269_v35  ;;  %v2457_v24 = vsel %vm2429_vm12, %v2424_v60, %v5270_v43  ;;  %v5280_v42 = vunpack.i.h.bf16 %v8458_v12  ;;  %v5279_v32 = vunpack.i.l.bf16 %v8458_v12  ;;  %v12041_v3 = vld [vmem:[#allocation36_spill] sm:$0xff]  ;;  %v6521_v27 = vld [vmem:[%s6744_s28 + $0x98] sm:$0xff] }
 0x1cb   : > { %5622 = vrot.lane.b32.xlu0 %v12039_v13, %s6662_s24  ;;  %v5348_v11 = vpop.permute.xlu1 %5347  ;;  %v2454_v35 = vsel %vm2429_vm12, %v2421_v30, %v5264_v52  ;;  %v2455_v9 = vsel %vm2429_vm12, %v2422_v10, %v5265_v57  ;;  %v5275_v43 = vunpack.i.h.bf16 %v8474_v15  ;;  %v5274_v12 = vunpack.i.l.bf16 %v8474_v15 }
 0x1cc   : > { %v5350_v34 = vunpack.i.h.bf16 %v5348_v11  ;;  %v5349_v22 = vunpack.i.l.bf16 %v5348_v11  ;;  %v2425_v30 = vsel %vm2396_vm11, %v2392_v40, %v5194_v20  ;;  %v2426_v10 = vsel %vm2396_vm11, %v2393_v62, %v5195_v31 }
 0x1cd   : > { %v5343_v0 = vpop.permute.xlu0 %5342  ;;  %5637 = vrot.lane.b32.xlu1 %v12040_v26, %s6662_s24  ;;  %v2460_v57 = vsel %vm2429_vm12, %v2427_v29, %v5279_v32  ;;  %v2461_v15 = vsel %vm2429_vm12, %v2428_v59, %v5280_v42  ;;  %v2458_v40 = vsel %vm2429_vm12, %v2425_v30, %v5274_v12  ;;  %v2459_v62 = vsel %vm2429_vm12, %v2426_v10, %v5275_v43  ;;  %v12043_v29 = vld [vmem:[#allocation91_spill] sm:$0xff]  ;;  %v12046_v32 = vld [vmem:[#allocation93_spill] sm:$0xff] }
 0x1ce   : > { %v8658_v55 = vsel %vm2462_vm13, %v2456_v21, %v5349_v22  ;;  %v8661_v17 = vsel %vm2462_vm13, %v2457_v24, %v5350_v34  ;;  %v5345_v47 = vunpack.i.h.bf16 %v5343_v0  ;;  %v5344_v37 = vunpack.i.l.bf16 %v5343_v0  ;;  %v12042_v24 = vld [vmem:[#allocation89_spill] sm:$0xff]  ;;  %v12051_v30 = vld [vmem:[#allocation95_spill] sm:$0xff] }
 0x1cf   : > { %5632 = vrot.lane.b32.xlu0 %v12041_v3, %s6662_s24  ;;  %v5358_v60 = vpop.permute.xlu1 %5357  ;;  %v12048_v43 = vrot.slane %v8030_v7, 4 }
 0x1d0   : > { %v8670_v11 = vsel %vm2462_vm13, %v2454_v35, %v5344_v37  ;;  %v8673_v34 = vsel %vm2462_vm13, %v2455_v9, %v5345_v47  ;;  %v5360_v22 = vunpack.i.h.bf16 %v5358_v60  ;;  %v5359_v21 = vunpack.i.l.bf16 %v5358_v60 }
 0x1d1   : > { %v5353_v52 = vpop.permute.xlu0 %5352  ;;  %5647 = vrot.lane.b32.xlu1 %v12042_v24, %s6662_s24  ;;  %v12047_v9 = vrot.slane %v8033_v44, 4  ;;  %v12049_v60 = vrot.slane %v8094_v23, 4 }
 0x1d2   : > { %v8682_v0 = vsel %vm2462_vm13, %v2460_v57, %v5359_v21  ;;  %v8685_v47 = vsel %vm2462_vm13, %v2461_v15, %v5360_v22  ;;  %v5355_v37 = vunpack.i.h.bf16 %v5353_v52  ;;  %v5354_v35 = vunpack.i.l.bf16 %v5353_v52  ;;  %v12054_v15 = vld [vmem:[#allocation97_spill] sm:$0xff]  ;;  %v12055_v52 = vld [vmem:[#allocation98_spill] sm:$0xff] }
 0x1d3   : > { %5642 = vrot.lane.b32.xlu0 %v12043_v29, %s6662_s24  ;;  %v8691_v59 = vpop.permute.xlu1 %5367  ;;  %v644_v12 = vsel %vm520_vm3, %v12048_v43, %v12047_v9  ;;  %v12050_v22 = vmov %v12047_v9 }
 0x1d4   : > { %12044 = vst [vmem:[#allocation149_spill] sm:$0xff] %v8691_v59  ;;  %v8694_v31 = vsel %vm2462_vm13, %v2458_v40, %v5354_v35  ;;  %v8697_v20 = vsel %vm2462_vm13, %v2459_v62, %v5355_v37  ;;  %v646_v21 = vsel %vm520_vm3, %v12050_v22, %v12049_v60  ;;  %v6516_v40 = vld [vmem:[%s6744_s28 + $0x60] sm:$0xff]  ;;  %v6517_v62 = vld [vmem:[%s6744_s28 + $0x68] sm:$0xff] }
 0x1d5   : > { %v8699_v42 = vpop.permute.xlu0 %5362  ;;  %5657 = vrot.lane.b32.xlu1 %v12046_v32, %s6662_s24  ;;  %v8721_v7 = vpack.i.bf16 %v646_v21, %v644_v12  ;;  %v8729_v9 = vpack.i.bf16 %v6517_v62, %v6516_v40  ;;  %v12056_v21 = vld [vmem:[#allocation155_spill] sm:$0xff]  ;;  %v8745_v40 = vld [vmem:[%s6744_s28 + $0x50] sm:$0xff] }
 0x1d6   : > { %12045 = vst [vmem:[#allocation150_spill] sm:$0xff] %v8699_v42  ;;  %12058 = vst [vmem:[#allocation158_spill] sm:$0xff] %v8745_v40  ;;  %v6523_v42 = vld [vmem:[%s6744_s28 + $0x80] sm:$0xff] }
 0x1d7   : > { %5652 = vrot.lane.b32.xlu0 %v12051_v30, %s6662_s24  ;;  %v8715_v10 = vpop.permute.xlu1 %5377 }
 0x1d8   : > { %12052 = vst [vmem:[#allocation13_spill] sm:$0xff] %v8715_v10  ;;  %v6520_v10 = vld [vmem:[%s6744_s28 + $0x90] sm:$0xff] }
 0x1d9   : > { %v8717_v57 = vpop.permute.xlu0 %5372  ;;  %5667 = vrot.lane.b32.xlu1 %v12054_v15, %s6662_s24  ;;  %v8761_v18 = vpack.i.bf16 %v6521_v27, %v6520_v10  ;;  %v8776_v27 = vpack.i.bf16 %v6523_v42, %v6522_v33  ;;  %v8794_v33 = vld [vmem:[%s6744_s28 + $0xc8] sm:$0xff] }
 0x1da   : > { %12053 = vst [vmem:[#allocation156_spill] sm:$0xff] %v8717_v57  ;;  %v8742_v57 = vld [vmem:[%s6744_s28 + $0x48] sm:$0xff]  ;;  %12062 = vst [vmem:[#allocation166_spill] sm:$0xff] %v8794_v33 }
 0x1db   : > { %5662 = vrot.lane.b32.xlu0 %v12055_v52, %s6662_s24  ;;  %v5388_v23 = vpop.permute.xlu1 %5387  ;;  %12057 = vst [vmem:[#allocation157_spill] sm:$0xff] %v8742_v57 }
 0x1dc   : > { %v5390_v44 = vunpack.i.h.bf16 %v5388_v23  ;;  %v5389_v37 = vunpack.i.l.bf16 %v5388_v23 }
 0x1dd   : > { %v5383_v35 = vpop.permute.xlu0 %5382  ;;  %5677 = vrot.lane.b32.xlu1 %v8721_v7, %s6662_s24 }
 0x1de   : > { %v8733_v43 = vsel %vm11701_vm14, %v8550_v53, %v5389_v37  ;;  %v8737_v12 = vsel %vm11701_vm14, %v8553_v46, %v5390_v44  ;;  %v5385_v60 = vunpack.i.h.bf16 %v5383_v35  ;;  %v5384_v22 = vunpack.i.l.bf16 %v5383_v35 }
 0x1df   : > { %5672 = vrot.lane.b32.xlu0 %v12056_v21, %s6662_s24  ;;  %v5398_v23 = vpop.permute.xlu1 %5397  ;;  %v5681_v53 = vpack.i.bf16 %v8745_v40, %v8742_v57  ;;  %v8851_v57 = vld [vmem:[%s6744_s28 + $0x108] sm:$0xff]  ;;  %v6536_v40 = vld [vmem:[%s6744_s28 + $0x150] sm:$0xff]  ;;  %s158_s24 = sand.u32 1, %s6639_s13  }
 0x1e0   : > { %v8751_v37 = vsel %vm11701_vm14, %v8562_v45, %v5384_v22  ;;  %v8755_v46 = vsel %vm11701_vm14, %v8565_v25, %v5385_v60  ;;  %v5400_v44 = vunpack.i.h.bf16 %v5398_v23  ;;  %v5399_v35 = vunpack.i.l.bf16 %v5398_v23  ;;  %12072 = vst [vmem:[#allocation84_spill] sm:$0xff] %v8851_v57 }
 0x1e1   : > { %v5393_v62 = vpop.permute.xlu0 %5392  ;;  %5687 = vrot.lane.b32.xlu1 %v8729_v9, %s6663_s25 }
 0x1e2   : > { %v8765_v45 = vsel %vm11701_vm14, %v8574_v54, %v5399_v35  ;;  %v8769_v25 = vsel %vm11701_vm14, %v8577_v8, %v5400_v44  ;;  %v5395_v60 = vunpack.i.h.bf16 %v5393_v62  ;;  %v5394_v22 = vunpack.i.l.bf16 %v5393_v62  ;;  %v6527_v44 = vld [vmem:[%s6744_s28 + $0xb0] sm:$0xff] }
 0x1e3   : > { %5682 = vrot.lane.b32.xlu0 %v5681_v53, %s6663_s25  ;;  %v8772_v23 = vpop.permute.xlu1 %5407  ;;  %v8791_v53 = vld [vmem:[%s6744_s28 + $0xc0] sm:$0xff] }
 0x1e4   : > { %12059 = vst [vmem:[#allocation159_spill] sm:$0xff] %v8772_v23  ;;  %v8780_v54 = vsel %vm11701_vm14, %v8590_v1, %v5394_v22  ;;  %v8784_v8 = vsel %vm11701_vm14, %v8593_v16, %v5395_v60  ;;  %12061 = vst [vmem:[#allocation165_spill] sm:$0xff] %v8791_v53  ;;  %v8798_v42 = vpack.i.bf16 %v8794_v33, %v8791_v53  ;;  %v6526_v16 = vld [vmem:[%s6744_s28 + $0xa8] sm:$0xff]  ;;  %v8813_v60 = vld [vmem:[%s6744_s28 + $0xf0] sm:$0xff] }
 0x1e5   : > { %v8786_v10 = vpop.permute.xlu0 %5402  ;;  %5697 = vrot.lane.b32.xlu1 %v8761_v18, %s6663_s25  ;;  %v8806_v35 = vpack.i.bf16 %v6527_v44, %v6526_v16  ;;  %12066 = vst [vmem:[#allocation83_spill] sm:$0xff] %v8813_v60  ;;  %v8816_v22 = vld [vmem:[%s6744_s28 + $0xf8] sm:$0xff]  ;;  %v8828_v44 = vld [vmem:[%s6744_s28 + $0xe0] sm:$0xff] }
 0x1e6   : > { %12060 = vst [vmem:[#allocation164_spill] sm:$0xff] %v8786_v10  ;;  %12063 = vst [vmem:[#allocation167_spill] sm:$0xff] %v8798_v42  ;;  %v8820_v10 = vpack.i.bf16 %v8816_v22, %v8813_v60  ;;  %v8825_v16 = vld [vmem:[%s6744_s28 + $0xd8] sm:$0xff]  ;;  %v6533_v60 = vld [vmem:[%s6744_s28 + $0x128] sm:$0xff] }
 0x1e7   : > { %5692 = vrot.lane.b32.xlu0 %v8776_v27, %s6663_s25  ;;  %v8802_v1 = vpop.permute.xlu1 %5417  ;;  %12067 = vst [vmem:[#allocation143_spill] sm:$0xff] %v8816_v22  ;;  %12069 = vst [vmem:[#allocation18_spill] sm:$0xff] %v8825_v16  ;;  %v8838_v22 = vpack.i.bf16 %v6533_v60, %v6532_v50  ;;  %v8854_v50 = vld [vmem:[%s6744_s28 + $0x110] sm:$0xff] }
 0x1e8   : > { %12064 = vst [vmem:[#allocation81_spill] sm:$0xff] %v8802_v1  ;;  %12068 = vst [vmem:[#allocation16_spill] sm:$0xff] %v8820_v10  ;;  %v8858_v60 = vpack.i.bf16 %v8854_v50, %v8851_v57  ;;  %v6537_v57 = vld [vmem:[%s6744_s28 + $0x158] sm:$0xff] }
 0x1e9   : > { %v8808_v62 = vpop.permute.xlu0 %5412  ;;  %5707 = vrot.lane.b32.xlu1 %v8798_v42, %s6663_s25  ;;  %12070 = vst [vmem:[#allocation176_spill] sm:$0xff] %v8828_v44  ;;  %12071 = vst [vmem:[#allocation177_spill] sm:$0xff] %v8838_v22 }
 0x1ea   : > { %12065 = vst [vmem:[#allocation82_spill] sm:$0xff] %v8808_v62  ;;  %v8832_v62 = vpack.i.bf16 %v8828_v44, %v8825_v16  ;;  %12073 = vst [vmem:[#allocation85_spill] sm:$0xff] %v8854_v50  ;;  %v8872_v50 = vpack.i.bf16 %v6537_v57, %v6536_v40  ;;  %v6538_v57 = vld [vmem:[%s6744_s28 + $0x138] sm:$0xff]  ;;  %v6539_v40 = vld [vmem:[%s6744_s28 + $0x140] sm:$0xff] }
 0x1eb   : > { %5702 = vrot.lane.b32.xlu0 %v8806_v35, %s6663_s25  ;;  %v5428_v1 = vpop.permute.xlu1 %5427  ;;  %12074 = vst [vmem:[#allocation86_spill] sm:$0xff] %v8858_v60 }
 0x1ec   : > { %v5430_v23 = vunpack.i.h.bf16 %v5428_v1  ;;  %v5429_v59 = vunpack.i.l.bf16 %v5428_v1  ;;  %12075 = vst [vmem:[#allocation87_spill] sm:$0xff] %v8872_v50 }
 0x1ed   : > { %v5423_v2 = vpop.permute.xlu0 %5422  ;;  %5717 = vrot.lane.b32.xlu1 %v8820_v10, %s6663_s25  ;;  %v6545_v10 = vld [vmem:[%s6744_s28 + $0x1a0] sm:$0xff] }
 0x1ee   : > { %v8842_v53 = vsel %vm11701_vm14, %v8658_v55, %v5429_v59  ;;  %v8846_v33 = vsel %vm11701_vm14, %v8661_v17, %v5430_v23  ;;  %v5425_v16 = vunpack.i.h.bf16 %v5423_v2  ;;  %v5424_v1 = vunpack.i.l.bf16 %v5423_v2 }
 0x1ef   : > { %5712 = vrot.lane.b32.xlu0 %v8832_v62, %s6663_s25  ;;  %v5438_v44 = vpop.permute.xlu1 %5437 }
 0x1f0   : > { %v8862_v55 = vsel %vm11701_vm14, %v8670_v11, %v5424_v1  ;;  %v8866_v2 = vsel %vm11701_vm14, %v8673_v34, %v5425_v16  ;;  %v5440_v17 = vunpack.i.h.bf16 %v5438_v44  ;;  %v5439_v59 = vunpack.i.l.bf16 %v5438_v44 }
 0x1f1   : > { %v5433_v23 = vpop.permute.xlu0 %5432  ;;  %5727 = vrot.lane.b32.xlu1 %v8838_v22, %s6663_s25  ;;  %v8888_v22 = vpack.i.bf16 %v6539_v40, %v6538_v57  ;;  %v8905_v57 = vld [vmem:[%s6744_s28 + $0x1b0] sm:$0xff]  ;;  %v8908_v40 = vld [vmem:[%s6744_s28 + $0x1b8] sm:$0xff] }
 0x1f2   : > { %v8876_v11 = vsel %vm11701_vm14, %v8682_v0, %v5439_v59  ;;  %v8880_v34 = vsel %vm11701_vm14, %v8685_v47, %v5440_v17  ;;  %v5435_v16 = vunpack.i.h.bf16 %v5433_v23  ;;  %v5434_v44 = vunpack.i.l.bf16 %v5433_v23  ;;  %v6540_v59 = vld [vmem:[%s6744_s28 + $0x180] sm:$0xff]  ;;  %v6541_v23 = vld [vmem:[%s6744_s28 + $0x188] sm:$0xff] }
 0x1f3   : > { %5722 = vrot.lane.b32.xlu0 %v8858_v60, %s6663_s25  ;;  %v8884_v1 = vpop.permute.xlu1 %5447  ;;  %12077 = vst [vmem:[#allocation36_spill] sm:$0xff] %v8888_v22 }
 0x1f4   : > { %12076 = vst [vmem:[#allocation88_spill] sm:$0xff] %v8884_v1  ;;  %v8892_v0 = vsel %vm11701_vm14, %v8694_v31, %v5434_v44  ;;  %v8896_v47 = vsel %vm11701_vm14, %v8697_v20, %v5435_v16  ;;  %v5746_v1 = vpack.i.bf16 %v6541_v23, %v6540_v59  ;;  %v6542_v20 = vld [vmem:[%s6744_s28 + $0x168] sm:$0xff]  ;;  %v6543_v16 = vld [vmem:[%s6744_s28 + $0x170] sm:$0xff]  ;;  %v5756_v59 = vpack.i.bf16 %v8908_v40, %v8905_v57 }
 0x1f5   : > { %v8898_v17 = vpop.permute.xlu0 %5442  ;;  %5737 = vrot.lane.b32.xlu1 %v8872_v50, %s6663_s25  ;;  %v8916_v44 = vpack.i.bf16 %v6543_v16, %v6542_v20  ;;  %v6544_v50 = vld [vmem:[%s6744_s28 + $0x198] sm:$0xff] }
 0x1f6   : > { %12078 = vst [vmem:[#allocation89_spill] sm:$0xff] %v8898_v17 }
 0x1f7   : > { %5732 = vrot.lane.b32.xlu0 %v8888_v22, %s6663_s25  ;;  %v8912_v31 = vpop.permute.xlu1 %5457  ;;  %12080 = vst [vmem:[#allocation93_spill] sm:$0xff] %v8916_v44  ;;  %v5751_v22 = vpack.i.bf16 %v6545_v10, %v6544_v50 }
 0x1f8   : > { %12079 = vst [vmem:[#allocation91_spill] sm:$0xff] %v8912_v31 }
 0x1f9   : > { %v8918_v17 = vpop.permute.xlu0 %5452  ;;  %5747 = vrot.lane.b32.xlu1 %v5746_v1, %s6663_s25 }
 0x1fa   : > { %12081 = vst [vmem:[#allocation95_spill] sm:$0xff] %v8918_v17 }
 0x1fb   : > { %5742 = vrot.lane.b32.xlu0 %v8916_v44, %s6663_s25  ;;  %v5468_v23 = vpop.permute.xlu1 %5467 }
 0x1fc   : > { %v5470_v60 = vunpack.i.h.bf16 %v5468_v23  ;;  %v5469_v31 = vunpack.i.l.bf16 %v5468_v23 }
 0x1fd   : > { %v5463_v42 = vpop.permute.xlu0 %5462  ;;  %5757 = vrot.lane.b32.xlu1 %v5756_v59, %s6663_s25 }
 0x1fe   : > { %v8930_v20 = vsel %vm11631_vm15, %v8733_v43, %v5469_v31  ;;  %v8934_v1 = vsel %vm11631_vm15, %v8737_v12, %v5470_v60  ;;  %v5465_v16 = vunpack.i.h.bf16 %v5463_v42  ;;  %v5464_v17 = vunpack.i.l.bf16 %v5463_v42 }
 0x1ff   : > { %5752 = vrot.lane.b32.xlu0 %v5751_v22, %s6663_s25  ;;  %v5478_v44 = vpop.permute.xlu1 %5477  ;;  %s4377_s25 = sshll.u32 %s158_s24, 8 }
 0x200   : > { %v8939_v10 = vsel %vm11631_vm15, %v8751_v37, %v5464_v17  ;;  %v8943_v50 = vsel %vm11631_vm15, %v8755_v46, %v5465_v16  ;;  %v5480_v59 = vunpack.i.h.bf16 %v5478_v44  ;;  %v5479_v43 = vunpack.i.l.bf16 %v5478_v44  ;;  %v12085_v44 = vld [vmem:[#allocation65_spill] sm:$0xff]  ;;  %v12089_v16 = vld [vmem:[#allocation67_spill] sm:$0xff]  ;;  %s11007_s26 = scalar_lea.vmem [#allocation2], %s4377_s25 }
 0x201   : > { %v5473_v31 = vpop.permute.xlu0 %5472  ;;  %5767 = vrot.lane.b32.xlu1 %v11963_v28, %s6649_s29 }
 0x202   : > { %v8949_v12 = vsel %vm11631_vm15, %v8765_v45, %v5479_v43  ;;  %v8953_v42 = vsel %vm11631_vm15, %v8769_v25, %v5480_v59  ;;  %v5475_v37 = vunpack.i.h.bf16 %v5473_v31  ;;  %v5474_v22 = vunpack.i.l.bf16 %v5473_v31  ;;  %v12084_v25 = vld [vmem:[#allocation68_spill] sm:$0xff] }
 0x203   : > { %5762 = vrot.lane.b32.xlu0 %v11954_v39, %s6649_s29  ;;  %v8957_v46 = vpop.permute.xlu1 %5487 }
 0x204   : > { %12082 = vst [vmem:[#allocation97_spill] sm:$0xff] %v8957_v46  ;;  %v8961_v60 = vsel %vm11631_vm15, %v8780_v54, %v5474_v22  ;;  %v8965_v17 = vsel %vm11631_vm15, %v8784_v8, %v5475_v37  ;;  %v12088_v54 = vld [vmem:[#allocation70_spill] sm:$0xff]  ;;  %v12090_v37 = vld [vmem:[#allocation47_spill] sm:$0xff] }
 0x205   : > { %v8967_v45 = vpop.permute.xlu0 %5482  ;;  %5777 = vrot.lane.b32.xlu1 %v12084_v25, %s6649_s29  ;;  %v8992_v46 = vld [vmem:[%s6744_s28 + $0x1c0] sm:$0xf] }
 0x206   : > { %12083 = vst [vmem:[#allocation98_spill] sm:$0xff] %v8967_v45 }
 0x207   : > { %5772 = vrot.lane.b32.xlu0 %v12085_v44, %s6649_s29  ;;  %v8973_v39 = vpop.permute.xlu1 %5497 }
 0x208   : > { %12086 = vst [vmem:[#allocation155_spill] sm:$0xff] %v8973_v39 }
 0x209   : > { %v8975_v23 = vpop.permute.xlu0 %5492  ;;  %5787 = vrot.lane.b32.xlu1 %v12088_v54, %s6649_s29  ;;  %v12091_v54 = vld [vmem:[#allocation69_spill] sm:$0xff] }
 0x20a   : > { %12087 = vst [vmem:[#allocation185_spill] sm:$0xff] %v8975_v23 }
 0x20b   : > { %5782 = vrot.lane.b32.xlu0 %v12089_v16, %s6649_s29  ;;  %v5508_v8 = vpop.permute.xlu1 %5507 }
 0x20c   : > { %v5510_v59 = vunpack.i.h.bf16 %v5508_v8  ;;  %v5509_v43 = vunpack.i.l.bf16 %v5508_v8 }
 0x20d   : > { %v5503_v31 = vpop.permute.xlu0 %5502  ;;  %5797 = vrot.lane.b32.xlu1 %v12090_v37, %s6649_s29 }
 0x20e   : > { %v8985_v22 = vsel %vm11631_vm15, %v8842_v53, %v5509_v43  ;;  %v8989_v23 = vsel %vm11631_vm15, %v8846_v33, %v5510_v59  ;;  %v5505_v39 = vunpack.i.h.bf16 %v5503_v31  ;;  %v5504_v45 = vunpack.i.l.bf16 %v5503_v31 }
 0x20f   : > { %5792 = vrot.lane.b32.xlu0 %v12091_v54, %s6649_s29  ;;  %v5518_v8 = vpop.permute.xlu1 %5517  ;;  %v687_v59 = vrot.slane %v8905_v57, 2  ;;  %v688_v31 = vrot.slane %v8908_v40, 2  ;;  %v690_v54 = vrot.slane %v8992_v46, 2 }
 0x210   : > { %v8998_v16 = vsel %vm11631_vm15, %v8862_v55, %v5504_v45  ;;  %v9002_v53 = vsel %vm11631_vm15, %v8866_v2, %v5505_v39  ;;  %v5520_v43 = vunpack.i.h.bf16 %v5518_v8  ;;  %v5519_v37 = vunpack.i.l.bf16 %v5518_v8  ;;  %v12092_v8 = vld [vmem:[#allocation42_spill] sm:$0xff] }
 0x211   : > { %v5513_v33 = vpop.permute.xlu0 %5512  ;;  %5807 = vrot.lane.b32.xlu1 %v11984_v61, %s6649_s29 }
 0x212   : > { %v9011_v55 = vsel %vm11631_vm15, %v8876_v11, %v5519_v37  ;;  %v9015_v2 = vsel %vm11631_vm15, %v8880_v34, %v5520_v43  ;;  %v5515_v45 = vunpack.i.h.bf16 %v5513_v33  ;;  %v5514_v39 = vunpack.i.l.bf16 %v5513_v33  ;;  %v12098_v33 = vld [vmem:[#allocation73_spill] sm:$0xff] }
 0x213   : > { %5802 = vrot.lane.b32.xlu0 %v12092_v8, %s6649_s29  ;;  %v9019_v25 = vpop.permute.xlu1 %5527  ;;  %v689_v34 = vsel %vm358_vm1, %v687_v59, %v688_v31  ;;  %v691_v37 = vsel %vm358_vm1, %v688_v31, %v690_v54 }
 0x214   : > { %12093 = vst [vmem:[#allocation186_spill] sm:$0xff] %v9019_v25  ;;  %v9023_v44 = vsel %vm11631_vm15, %v8892_v0, %v5514_v39  ;;  %v9027_v28 = vsel %vm11631_vm15, %v8896_v47, %v5515_v45  ;;  %v9043_v47 = vpack.i.bf16 %v691_v37, %v689_v34  ;;  %vm11644_vm15 = vcmask 424960  }
 0x215   : > { %v9029_v11 = vpop.permute.xlu0 %5522  ;;  %5817 = vrot.lane.b32.xlu1 %v11991_v41, %s6649_s29 }
 0x216   : > { %12094 = vst [vmem:[#allocation187_spill] sm:$0xff] %v9029_v11  ;;  %12097 = vst [vmem:[#allocation190_spill] sm:$0xff] %v9043_v47 }
 0x217   : > { %5812 = vrot.lane.b32.xlu0 %v11982_v49, %s6649_s29  ;;  %v9037_v43 = vpop.permute.xlu1 %5537 }
 0x218   : > { %12095 = vst [vmem:[#allocation188_spill] sm:$0xff] %v9037_v43  ;;  %v12099_v43 = vld [vmem:[#allocation119_spill] sm:$0xff] }
 0x219   : > { %v9039_v0 = vpop.permute.xlu0 %5532  ;;  %5827 = vrot.lane.b32.xlu1 %v11992_v38, %s6649_s29 }
 0x21a   : > { %12096 = vst [vmem:[#allocation189_spill] sm:$0xff] %v9039_v0 }
 0x21b   : > { %5822 = vrot.lane.b32.xlu0 %v12098_v33, %s6649_s29  ;;  %v5548_v45 = vpop.permute.xlu1 %5547 }
 0x21c   : > { %v5550_v39 = vunpack.i.h.bf16 %v5548_v45  ;;  %v5549_v59 = vunpack.i.l.bf16 %v5548_v45 }
 0x21d   : > { %v5543_v54 = vpop.permute.xlu0 %5542  ;;  %5837 = vrot.lane.b32.xlu1 %v9043_v47, %s6649_s29  ;;  %v12101_v47 = vld [vmem:[#allocation12_spill] sm:$0xff] }
 0x21e   : > { %v9051_v31 = vsel %vm11644_vm15, %v8930_v20, %v5549_v59  ;;  %v9055_v0 = vsel %vm11644_vm15, %v8934_v1, %v5550_v39  ;;  %v5545_v34 = vunpack.i.h.bf16 %v5543_v54  ;;  %v5544_v37 = vunpack.i.l.bf16 %v5543_v54  ;;  %v12100_v1 = vld [vmem:[#allocation75_spill] sm:$0xff] }
 0x21f   : > { %5832 = vrot.lane.b32.xlu0 %v12099_v43, %s6649_s29  ;;  %v5558_v11 = vpop.permute.xlu1 %5557 }
 0x220   : > { %v9061_v45 = vsel %vm11644_vm15, %v8939_v10, %v5544_v37  ;;  %v9065_v25 = vsel %vm11644_vm15, %v8943_v50, %v5545_v34  ;;  %v5560_v20 = vunpack.i.h.bf16 %v5558_v11  ;;  %v5559_v59 = vunpack.i.l.bf16 %v5558_v11 }
 0x221   : > { %v5553_v8 = vpop.permute.xlu0 %5552  ;;  %5847 = vrot.lane.b32.xlu1 %v12100_v1, %s6650_s30 }
 0x222   : > { %v9071_v39 = vsel %vm11644_vm15, %v8949_v12, %v5559_v59  ;;  %v9075_v54 = vsel %vm11644_vm15, %v8953_v42, %v5560_v20  ;;  %v5555_v10 = vunpack.i.h.bf16 %v5553_v8  ;;  %v5554_v37 = vunpack.i.l.bf16 %v5553_v8  ;;  %v12104_v42 = vld [vmem:[#allocation14_spill] sm:$0xff]  ;;  %v12107_v20 = vld [vmem:[#allocation33_spill] sm:$0xff] }
 0x223   : > { %5842 = vrot.lane.b32.xlu0 %v12101_v47, %s6650_s30  ;;  %v9079_v50 = vpop.permute.xlu1 %5567 }
 0x224   : > { %12102 = vst [vmem:[#allocation73_spill] sm:$0xff] %v9079_v50  ;;  %v9083_v11 = vsel %vm11644_vm15, %v8961_v60, %v5554_v37  ;;  %v9087_v34 = vsel %vm11644_vm15, %v8965_v17, %v5555_v10  ;;  %v12108_v60 = vld [vmem:[#allocation76_spill] sm:$0xff] }
 0x225   : > { %v9089_v12 = vpop.permute.xlu0 %5562  ;;  %5857 = vrot.lane.b32.xlu1 %v12009_v63, %s6650_s30 }
 0x226   : > { %12103 = vst [vmem:[#allocation75_spill] sm:$0xff] %v9089_v12 }
 0x227   : > { %5852 = vrot.lane.b32.xlu0 %v12104_v42, %s6650_s30  ;;  %v9095_v8 = vpop.permute.xlu1 %5577 }
 0x228   : > { %12105 = vst [vmem:[#allocation12_spill] sm:$0xff] %v9095_v8 }
 0x229   : > { %v9097_v47 = vpop.permute.xlu0 %5572  ;;  %5867 = vrot.lane.b32.xlu1 %v12107_v20, %s6650_s30  ;;  %v12109_v20 = vld [vmem:[#allocation78_spill] sm:$0xff] }
 0x22a   : > { %12106 = vst [vmem:[#allocation14_spill] sm:$0xff] %v9097_v47 }
 0x22b   : > { %5862 = vrot.lane.b32.xlu0 %v12108_v60, %s6650_s30  ;;  %v5588_v17 = vpop.permute.xlu1 %5587 }
 0x22c   : > { %v5590_v59 = vunpack.i.h.bf16 %v5588_v17  ;;  %v5589_v10 = vunpack.i.l.bf16 %v5588_v17 }
 0x22d   : > { %v5583_v37 = vpop.permute.xlu0 %5582  ;;  %5877 = vrot.lane.b32.xlu1 %v12017_v56, %s6650_s30 }
 0x22e   : > { %v9107_v12 = vsel %vm11644_vm15, %v8985_v22, %v5589_v10  ;;  %v9111_v47 = vsel %vm11644_vm15, %v8989_v23, %v5590_v59  ;;  %v5585_v8 = vunpack.i.h.bf16 %v5583_v37  ;;  %v5584_v50 = vunpack.i.l.bf16 %v5583_v37 }
 0x22f   : > { %5872 = vrot.lane.b32.xlu0 %v12109_v20, %s6650_s30  ;;  %v5598_v43 = vpop.permute.xlu1 %5597  ;;  %v692_v23 = vrot.slane %v8905_v57, 3  ;;  %v693_v59 = vrot.slane %v8908_v40, 3  ;;  %v695_v37 = vrot.slane %v8992_v46, 3 }
 0x230   : > { %v9117_v17 = vsel %vm11644_vm15, %v8998_v16, %v5584_v50  ;;  %v9121_v56 = vsel %vm11644_vm15, %v9002_v53, %v5585_v8  ;;  %v5600_v22 = vunpack.i.h.bf16 %v5598_v43  ;;  %v5599_v10 = vunpack.i.l.bf16 %v5598_v43  ;;  %v12110_v8 = vld [vmem:[#allocation38_spill] sm:$0xff] }
 0x231   : > { %v5593_v38 = vpop.permute.xlu0 %5592  ;;  %5887 = vrot.lane.b32.xlu1 %v12021_v48, %s6650_s30 }
 0x232   : > { %v9130_v16 = vsel %vm11644_vm15, %v9011_v55, %v5599_v10  ;;  %v9134_v53 = vsel %vm11644_vm15, %v9015_v2, %v5600_v22  ;;  %v5595_v50 = vunpack.i.h.bf16 %v5593_v38  ;;  %v5594_v43 = vunpack.i.l.bf16 %v5593_v38  ;;  %v12113_v22 = vld [vmem:[#allocation80_spill] sm:$0xff] }
 0x233   : > { %5882 = vrot.lane.b32.xlu0 %v12110_v8, %s6650_s30  ;;  %v9138_v20 = vpop.permute.xlu1 %5607  ;;  %v694_v38 = vsel %vm439_vm2, %v692_v23, %v693_v59  ;;  %v696_v2 = vsel %vm439_vm2, %v693_v59, %v695_v37 }
 0x234   : > { %12111 = vst [vmem:[#allocation38_spill] sm:$0xff] %v9138_v20  ;;  %v9142_v60 = vsel %vm11644_vm15, %v9023_v44, %v5594_v43  ;;  %v9146_v63 = vsel %vm11644_vm15, %v9027_v28, %v5595_v50  ;;  %v9162_v28 = vpack.i.bf16 %v696_v2, %v694_v38  ;;  %vm11652_vm15 = vcmask 457728  }
 0x235   : > { %v9148_v55 = vpop.permute.xlu0 %5602  ;;  %5897 = vrot.lane.b32.xlu1 %v12025_v4, %s6650_s30 }
 0x236   : > { %12112 = vst [vmem:[#allocation191_spill] sm:$0xff] %v9148_v55 }
 0x237   : > { %5892 = vrot.lane.b32.xlu0 %v12113_v22, %s6650_s30  ;;  %v9156_v10 = vpop.permute.xlu1 %5617 }
 0x238   : > { %12114 = vst [vmem:[#allocation80_spill] sm:$0xff] %v9156_v10 }
 0x239   : > { %v9158_v44 = vpop.permute.xlu0 %5612  ;;  %5907 = vrot.lane.b32.xlu1 %v12026_v6, %s6650_s30 }
 0x23a   : > { %12115 = vst [vmem:[#allocation192_spill] sm:$0xff] %v9158_v44 }
 0x23b   : > { %5902 = vrot.lane.b32.xlu0 %v12024_v5, %s6650_s30  ;;  %v5628_v50 = vpop.permute.xlu1 %5627 }
 0x23c   : > { %v5630_v43 = vunpack.i.h.bf16 %v5628_v50  ;;  %v5629_v23 = vunpack.i.l.bf16 %v5628_v50 }
 0x23d   : > { %v5623_v59 = vpop.permute.xlu0 %5622  ;;  %5917 = vrot.lane.b32.xlu1 %v9162_v28, %s6650_s30 }
 0x23e   : > { %v9170_v37 = vsel %vm11652_vm15, %v9051_v31, %v5629_v23  ;;  %v9174_v44 = vsel %vm11652_vm15, %v9055_v0, %v5630_v43  ;;  %v5625_v38 = vunpack.i.h.bf16 %v5623_v59  ;;  %v5624_v2 = vunpack.i.l.bf16 %v5623_v59 }
 0x23f   : > { %5912 = vrot.lane.b32.xlu0 %v8432_v58, %s6650_s30  ;;  %v5638_v10 = vpop.permute.xlu1 %5637 }
 0x240   : > { %v9180_v50 = vsel %vm11652_vm15, %v9061_v45, %v5624_v2  ;;  %v9184_v55 = vsel %vm11652_vm15, %v9065_v25, %v5625_v38  ;;  %v5640_v31 = vunpack.i.h.bf16 %v5638_v10  ;;  %v5639_v23 = vunpack.i.l.bf16 %v5638_v10 }
 0x241   : > { %v5633_v20 = vpop.permute.xlu0 %5632  ;;  %5927 = vrot.lane.b32.xlu1 %v12035_v14, %s6651_s4 }
 0x242   : > { %v9190_v0 = vsel %vm11652_vm15, %v9071_v39, %v5639_v23  ;;  %v9194_v43 = vsel %vm11652_vm15, %v9075_v54, %v5640_v31  ;;  %v5635_v45 = vunpack.i.h.bf16 %v5633_v20  ;;  %v5634_v59 = vunpack.i.l.bf16 %v5633_v20 }
 0x243   : > { %5922 = vrot.lane.b32.xlu0 %v12027_v36, %s6651_s4  ;;  %v9198_v25 = vpop.permute.xlu1 %5647 }
 0x244   : > { %12116 = vst [vmem:[#allocation193_spill] sm:$0xff] %v9198_v25  ;;  %v9202_v10 = vsel %vm11652_vm15, %v9083_v11, %v5634_v59  ;;  %v9206_v38 = vsel %vm11652_vm15, %v9087_v34, %v5635_v45  ;;  %v12177_v25 = vld [vmem:[#allocation102_spill] sm:$0xff] }
 0x245   : > { %v9208_v39 = vpop.permute.xlu0 %5642  ;;  %5937 = vrot.lane.b32.xlu1 %v12039_v13, %s6651_s4 }
 0x246   : > { %12117 = vst [vmem:[#allocation194_spill] sm:$0xff] %v9208_v39 }
 0x247   : > { %5932 = vrot.lane.b32.xlu0 %v12033_v19, %s6651_s4  ;;  %v9214_v54 = vpop.permute.xlu1 %5657 }
 0x248   : > { %12118 = vst [vmem:[#allocation195_spill] sm:$0xff] %v9214_v54 }
 0x249   : > { %v9216_v36 = vpop.permute.xlu0 %5652  ;;  %5947 = vrot.lane.b32.xlu1 %v12041_v3, %s6651_s4 }
 0x24a   : > { %12119 = vst [vmem:[#allocation196_spill] sm:$0xff] %v9216_v36 }
 0x24b   : > { %5942 = vrot.lane.b32.xlu0 %v12038_v51, %s6651_s4  ;;  %v5668_v11 = vpop.permute.xlu1 %5667 }
 0x24c   : > { %v5670_v34 = vunpack.i.h.bf16 %v5668_v11  ;;  %v5669_v20 = vunpack.i.l.bf16 %v5668_v11 }
 0x24d   : > { %v5663_v2 = vpop.permute.xlu0 %5662  ;;  %5957 = vrot.lane.b32.xlu1 %v12043_v29, %s6651_s4 }
 0x24e   : > { %v9226_v31 = vsel %vm11652_vm15, %v9107_v12, %v5669_v20  ;;  %v9230_v23 = vsel %vm11652_vm15, %v9111_v47, %v5670_v34  ;;  %v5665_v45 = vunpack.i.h.bf16 %v5663_v2  ;;  %v5664_v59 = vunpack.i.l.bf16 %v5663_v2 }
 0x24f   : > { %5952 = vrot.lane.b32.xlu0 %v12040_v26, %s6651_s4  ;;  %v5678_v36 = vpop.permute.xlu1 %5677  ;;  %v697_v47 = vrot.slane %v8905_v57, 4  ;;  %v698_v34 = vrot.slane %v8908_v40, 4  ;;  %v700_v2 = vrot.slane %v8992_v46, 4 }
 0x250   : > { %v9236_v11 = vsel %vm11652_vm15, %v9117_v17, %v5664_v59  ;;  %v9240_v54 = vsel %vm11652_vm15, %v9121_v56, %v5665_v45  ;;  %v5680_v12 = vunpack.i.h.bf16 %v5678_v36  ;;  %v5679_v20 = vunpack.i.l.bf16 %v5678_v36 }
 0x251   : > { %v5673_v39 = vpop.permute.xlu0 %5672  ;;  %5967 = vrot.lane.b32.xlu1 %v12051_v30, %s6651_s4 }
 0x252   : > { %v9249_v17 = vsel %vm11652_vm15, %v9130_v16, %v5679_v20  ;;  %v9253_v56 = vsel %vm11652_vm15, %v9134_v53, %v5680_v12  ;;  %v5675_v45 = vunpack.i.h.bf16 %v5673_v39  ;;  %v5674_v36 = vunpack.i.l.bf16 %v5673_v39 }
 0x253   : > { %5962 = vrot.lane.b32.xlu0 %v12042_v24, %s6651_s4  ;;  %v9257_v59 = vpop.permute.xlu1 %5687  ;;  %v699_v16 = vsel %vm520_vm3, %v697_v47, %v698_v34  ;;  %v701_v53 = vsel %vm520_vm3, %v698_v34, %v700_v2 }
 0x254   : > { %12120 = vst [vmem:[#allocation197_spill] sm:$0xff] %v9257_v59  ;;  %v9261_v57 = vsel %vm11652_vm15, %v9142_v60, %v5674_v36  ;;  %v9265_v40 = vsel %vm11652_vm15, %v9146_v63, %v5675_v45  ;;  %v9281_v63 = vpack.i.bf16 %v701_v53, %v699_v16  ;;  %vm2627_vm15 = vcmask 490496  }
 0x255   : > { %v9267_v46 = vpop.permute.xlu0 %5682  ;;  %5977 = vrot.lane.b32.xlu1 %v12055_v52, %s6651_s4 }
 0x256   : > { %12121 = vst [vmem:[#allocation198_spill] sm:$0xff] %v9267_v46  ;;  %v12175_v46 = vld [vmem:[#allocation176_spill] sm:$0xff] }
 0x257   : > { %5972 = vrot.lane.b32.xlu0 %v12046_v32, %s6651_s4  ;;  %v9275_v39 = vpop.permute.xlu1 %5697 }
 0x258   : > { %12122 = vst [vmem:[#allocation199_spill] sm:$0xff] %v9275_v39 }
 0x259   : > { %v9277_v60 = vpop.permute.xlu0 %5692  ;;  %5987 = vrot.lane.b32.xlu1 %v12056_v21, %s6651_s4 }
 0x25a   : > { %12123 = vst [vmem:[#allocation200_spill] sm:$0xff] %v9277_v60 }
 0x25b   : > { %5982 = vrot.lane.b32.xlu0 %v12054_v15, %s6651_s4  ;;  %v5708_v12 = vpop.permute.xlu1 %5707 }
 0x25c   : > { %v5710_v20 = vunpack.i.h.bf16 %v5708_v12  ;;  %v5709_v47 = vunpack.i.l.bf16 %v5708_v12 }
 0x25d   : > { %v5703_v34 = vpop.permute.xlu0 %5702  ;;  %5997 = vrot.lane.b32.xlu1 %v9281_v63, %s6651_s4 }
 0x25e   : > { %v9289_v2 = vsel %vm2627_vm15, %v9170_v37, %v5709_v47  ;;  %v9293_v45 = vsel %vm2627_vm15, %v9174_v44, %v5710_v20  ;;  %v5705_v36 = vunpack.i.h.bf16 %v5703_v34  ;;  %v5704_v16 = vunpack.i.l.bf16 %v5703_v34 }
 0x25f   : > { %12124 = vst [vmem:[#allocation201_spill] sm:$0xff] %v9289_v2  ;;  %12125 = vst [vmem:[#allocation202_spill] sm:$0xff] %v9293_v45  ;;  %5992 = vrot.lane.b32.xlu0 %v8721_v7, %s6651_s4  ;;  %v5718_v53 = vpop.permute.xlu1 %5717  ;;  %v6547_v45 = vld [vmem:[%s6744_s28 + $0x30] sm:$0xff] }
 0x260   : > { %v9299_v12 = vsel %vm2627_vm15, %v9180_v50, %v5704_v16  ;;  %v9303_v39 = vsel %vm2627_vm15, %v9184_v55, %v5705_v36  ;;  %v5720_v37 = vunpack.i.h.bf16 %v5718_v53  ;;  %v5719_v47 = vunpack.i.l.bf16 %v5718_v53 }
 0x261   : > { %12126 = vst [vmem:[#allocation203_spill] sm:$0xff] %v9299_v12  ;;  %12127 = vst [vmem:[#allocation204_spill] sm:$0xff] %v9303_v39  ;;  %v5713_v2 = vpop.permute.xlu0 %5712  ;;  %6007 = vrot.lane.b32.xlu1 %v8776_v27, %s6652_s5  ;;  %v12167_v39 = vld [vmem:[#allocation158_spill] sm:$0xff] }
 0x262   : > { %v5715_v44 = vunpack.i.h.bf16 %v5713_v2  ;;  %v5714_v20 = vunpack.i.l.bf16 %v5713_v2  ;;  %v9313_v50 = vsel %vm2627_vm15, %v9190_v0, %v5719_v47  ;;  %v9317_v55 = vsel %vm2627_vm15, %v9194_v43, %v5720_v37  ;;  %v12136_v43 = vld [vmem:[#allocation167_spill] sm:$0xff]  ;;  %v12137_v37 = vld [vmem:[#allocation86_spill] sm:$0xff] }
 0x263   : > { %6002 = vrot.lane.b32.xlu0 %v8729_v9, %s6652_s5  ;;  %v9309_v34 = vpop.permute.xlu1 %5727  ;;  %12129 = vst [vmem:[#allocation206_spill] sm:$0xff] %v9313_v50  ;;  %12130 = vst [vmem:[#allocation207_spill] sm:$0xff] %v9317_v55  ;;  %v12144_v50 = vld [vmem:[#allocation177_spill] sm:$0xff]  ;;  %v12161_v55 = vld [vmem:[#allocation92_spill] sm:$0xff] }
 0x264   : > { %12128 = vst [vmem:[#allocation205_spill] sm:$0xff] %v9309_v34  ;;  %v9321_v36 = vsel %vm2627_vm15, %v9202_v10, %v5714_v20  ;;  %v9325_v27 = vsel %vm2627_vm15, %v9206_v38, %v5715_v44  ;;  %v12140_v44 = vld [vmem:[#allocation16_spill] sm:$0xff]  ;;  %v6551_v34 = vld [vmem:[%s6744_s28 + $0x18] sm:$0xff] }
 0x265   : > { %12131 = vst [vmem:[#allocation208_spill] sm:$0xff] %v9321_v36  ;;  %12132 = vst [vmem:[#allocation209_spill] sm:$0xff] %v9325_v27  ;;  %v9327_v2 = vpop.permute.xlu0 %5722  ;;  %6017 = vrot.lane.b32.xlu1 %v8806_v35, %s6652_s5 }
 0x266   : > { %12133 = vst [vmem:[#allocation210_spill] sm:$0xff] %v9327_v2 }
 0x267   : > { %6012 = vrot.lane.b32.xlu0 %v8761_v18, %s6652_s5  ;;  %v9333_v9 = vpop.permute.xlu1 %5737 }
 0x268   : > { %12134 = vst [vmem:[#allocation211_spill] sm:$0xff] %v9333_v9 }
 0x269   : > { %v9335_v0 = vpop.permute.xlu0 %5732  ;;  %6027 = vrot.lane.b32.xlu1 %v8832_v62, %s6652_s5 }
 0x26a   : > { %12135 = vst [vmem:[#allocation212_spill] sm:$0xff] %v9335_v0 }
 0x26b   : > { %6022 = vrot.lane.b32.xlu0 %v12136_v43, %s6652_s5  ;;  %v5748_v10 = vpop.permute.xlu1 %5747 }
 0x26c   : > { %v5750_v38 = vunpack.i.h.bf16 %v5748_v10  ;;  %v5749_v16 = vunpack.i.l.bf16 %v5748_v10 }
 0x26d   : > { %v5743_v53 = vpop.permute.xlu0 %5742  ;;  %6037 = vrot.lane.b32.xlu1 %v12137_v37, %s6652_s5 }
 0x26e   : > { %v9345_v18 = vsel %vm2627_vm15, %v9226_v31, %v5749_v16  ;;  %v9349_v35 = vsel %vm2627_vm15, %v9230_v23, %v5750_v38  ;;  %v5745_v47 = vunpack.i.h.bf16 %v5743_v53  ;;  %v5744_v62 = vunpack.i.l.bf16 %v5743_v53  ;;  %v12143_v23 = vld [vmem:[#allocation36_spill] sm:$0xff] }
 0x26f   : > { %12138 = vst [vmem:[#allocation167_spill] sm:$0xff] %v9345_v18  ;;  %12139 = vst [vmem:[#allocation86_spill] sm:$0xff] %v9349_v35  ;;  %6032 = vrot.lane.b32.xlu0 %v12140_v44, %s6652_s5  ;;  %v5758_v20 = vpop.permute.xlu1 %5757 }
 0x270   : > { %v9355_v43 = vsel %vm2627_vm15, %v9236_v11, %v5744_v62  ;;  %v9359_v10 = vsel %vm2627_vm15, %v9240_v54, %v5745_v47  ;;  %v5760_v31 = vunpack.i.h.bf16 %v5758_v20  ;;  %v5759_v16 = vunpack.i.l.bf16 %v5758_v20 }
 0x271   : > { %12141 = vst [vmem:[#allocation16_spill] sm:$0xff] %v9355_v43  ;;  %12142 = vst [vmem:[#allocation213_spill] sm:$0xff] %v9359_v10  ;;  %v5753_v37 = vpop.permute.xlu0 %5752  ;;  %6047 = vrot.lane.b32.xlu1 %v12143_v23, %s6652_s5  ;;  %v12156_v23 = vld [vmem:[#allocation66_spill] sm:$0xff]  ;;  %v12169_v43 = vld [vmem:[#allocation157_spill] sm:$0xff] }
 0x272   : > { %v5755_v38 = vunpack.i.h.bf16 %v5753_v37  ;;  %v5754_v53 = vunpack.i.l.bf16 %v5753_v37  ;;  %v9369_v11 = vsel %vm2627_vm15, %v9249_v17, %v5759_v16  ;;  %v9373_v54 = vsel %vm2627_vm15, %v9253_v56, %v5760_v31  ;;  %v12150_v17 = vld [vmem:[#allocation25_spill] sm:$0xff]  ;;  %v12152_v31 = vld [vmem:[#allocation54_spill] sm:$0xff] }
 0x273   : > { %6042 = vrot.lane.b32.xlu0 %v12144_v50, %s6652_s5  ;;  %v9365_v44 = vpop.permute.xlu1 %5767  ;;  %12145 = vst [vmem:[#allocation36_spill] sm:$0xff] %v9369_v11  ;;  %12146 = vst [vmem:[#allocation177_spill] sm:$0xff] %v9373_v54  ;;  %v12149_v50 = vld [vmem:[#allocation57_spill] sm:$0xff]  ;;  %v4565_v11 = vunpack.i.h.bf16 %v12161_v55  ;;  %v12163_v54 = vld [vmem:[#allocation94_spill] sm:$0xff] }
 0x274   : > { %v9377_v47 = vsel %vm2627_vm15, %v9261_v57, %v5754_v53  ;;  %v9381_v62 = vsel %vm2627_vm15, %v9265_v40, %v5755_v38  ;;  %v12153_v57 = vld [vmem:[#allocation22_spill] sm:$0xff]  ;;  %v4580_v27 = vunpack.i.h.bf16 %v12163_v54  ;;  %v4579_v36 = vunpack.i.l.bf16 %v12163_v54 }
 0x275   : > { %12147 = vst [vmem:[#allocation214_spill] sm:$0xff] %v9377_v47  ;;  %12148 = vst [vmem:[#allocation215_spill] sm:$0xff] %v9381_v62  ;;  %v9383_v20 = vpop.permute.xlu0 %5762  ;;  %6057 = vrot.lane.b32.xlu1 %v12149_v50, %s6653_s6  ;;  %v12159_v50 = vld [vmem:[#allocation65_spill] sm:$0xff]  ;;  %v12165_v47 = vld [vmem:[#allocation96_spill] sm:$0xff] }
 0x276   : > { %v4569_v54 = vunpack.i.l.bf16 %v12165_v47  ;;  %v2173_v12 = vsel %vm2165_vm4, %v12167_v39, %v4580_v27  ;;  %v12172_v39 = vld [vmem:[#allocation99_spill] sm:$0xff] }
 0x277   : > { %6052 = vrot.lane.b32.xlu0 %v12150_v17, %s6653_s6  ;;  %v9389_v16 = vpop.permute.xlu1 %5777  ;;  %v4620_v27 = vunpack.i.h.bf16 %v12172_v39  ;;  %v4619_v60 = vunpack.i.l.bf16 %v12172_v39 }
 0x279   : > { %v9391_v56 = vpop.permute.xlu0 %5772  ;;  %6067 = vrot.lane.b32.xlu1 %v12152_v31, %s6653_s6 }
 0x27a   : > { %12151 = vst [vmem:[#allocation57_spill] sm:$0xff] %v9391_v56 }
 0x27b   : > { %6062 = vrot.lane.b32.xlu0 %v12153_v57, %s6653_s6  ;;  %v9397_v40 = vpop.permute.xlu1 %5787 }
 0x27c   : > { %12154 = vst [vmem:[#allocation25_spill] sm:$0xff] %v9397_v40 }
 0x27d   : > { %v9399_v37 = vpop.permute.xlu0 %5782  ;;  %6077 = vrot.lane.b32.xlu1 %v11984_v61, %s6654_s7  ;;  %v12160_v61 = vld [vmem:[#allocation90_spill] sm:$0xff] }
 0x27e   : > { %12155 = vst [vmem:[#allocation54_spill] sm:$0xff] %v9399_v37  ;;  %v4575_v57 = vunpack.i.h.bf16 %v12160_v61  ;;  %v12185_v37 = vld [vmem:[#allocation83_spill] sm:$0xff] }
 0x27f   : > { %6072 = vrot.lane.b32.xlu0 %v12156_v23, %s6654_s7  ;;  %v9405_v38 = vpop.permute.xlu1 %5797  ;;  %v4574_v23 = vunpack.i.l.bf16 %v12160_v61  ;;  %v6546_v61 = vld [vmem:[%s6744_s28 + $0x38] sm:$0xff] }
 0x280   : > { %12157 = vst [vmem:[#allocation22_spill] sm:$0xff] %v9405_v38  ;;  %v9435_v62 = vsel %vm2165_vm4, %v6546_v61, %v4575_v57  ;;  %v6549_v57 = vld [vmem:[%s6744_s28] sm:$0xff] }
 0x281   : > { %v9407_v53 = vpop.permute.xlu0 %5792  ;;  %6087 = vrot.lane.b32.xlu1 %v11982_v49, %s6654_s7  ;;  %v9440_v18 = vsel %vm2165_vm4, %v6547_v45, %v4574_v23  ;;  %v12168_v45 = vld [vmem:[#allocation8_spill] sm:$0xff] }
 0x282   : > { %12158 = vst [vmem:[#allocation66_spill] sm:$0xff] %v9407_v53  ;;  %v4610_v23 = vunpack.i.h.bf16 %v12168_v45  ;;  %v4609_v10 = vunpack.i.l.bf16 %v12168_v45  ;;  %v12173_v45 = vld [vmem:[#allocation100_spill] sm:$0xff]  ;;  %v4644_v53 = vunpack.i.l.bf16 %v12177_v25 }
 0x283   : > { %6082 = vrot.lane.b32.xlu0 %v12159_v50, %s6654_s7  ;;  %v9413_v17 = vpop.permute.xlu1 %5807  ;;  %v4564_v50 = vunpack.i.l.bf16 %v12161_v55  ;;  %v6548_v55 = vld [vmem:[%s6744_s28 + $0x8] sm:$0xff]  ;;  %v4615_v0 = vunpack.i.h.bf16 %v12173_v45 }
 0x284   : > { %v2167_v35 = vsel %vm2165_vm4, %v6548_v55, %v4565_v11  ;;  %v2172_v11 = vsel %vm2165_vm4, %v12169_v43, %v4579_v36  ;;  %v2168_v36 = vsel %vm2165_vm4, %v6551_v34, %v4569_v54  ;;  %v4614_v43 = vunpack.i.l.bf16 %v12173_v45  ;;  %v12178_v34 = vld [vmem:[#allocation166_spill] sm:$0xff]  ;;  %v12179_v45 = vld [vmem:[#allocation165_spill] sm:$0xff] }
 0x285   : > { %v9415_v31 = vpop.permute.xlu0 %5802  ;;  %6097 = vrot.lane.b32.xlu1 %v12021_v48, %s6655_s8  ;;  %v2166_v61 = vsel %vm2165_vm4, %v6549_v57, %v4564_v50  ;;  %v6550_v50 = vld [vmem:[%s6744_s28 + $0x20] sm:$0xff] }
 0x287   : > { %6092 = vrot.lane.b32.xlu0 %v12100_v1, %s6655_s8  ;;  %v9424_v49 = vpop.permute.xlu1 %5817  ;;  %v4570_v1 = vunpack.i.h.bf16 %v12165_v47  ;;  %v12170_v47 = vld [vmem:[#allocation9_spill] sm:$0xff] }
 0x288   : > { %12162 = vst [vmem:[#allocation65_spill] sm:$0xff] %v9424_v49  ;;  %v4605_v55 = vunpack.i.h.bf16 %v12170_v47 }
 0x289   : > { %v9429_v48 = vpop.permute.xlu0 %5812  ;;  %6107 = vrot.lane.b32.xlu1 %v12113_v22, %s6655_s8  ;;  %v2169_v57 = vsel %vm2165_vm4, %v6550_v50, %v4570_v1  ;;  %v2185_v1 = vsel %vm2165_vm4, %v12175_v46, %v4610_v23  ;;  %v12176_v50 = vld [vmem:[#allocation18_spill] sm:$0xff]  ;;  %v12181_v46 = vld [vmem:[#allocation85_spill] sm:$0xff]  ;;  %v12182_v23 = vld [vmem:[#allocation84_spill] sm:$0xff] }
 0x28a   : > { %12164 = vst [vmem:[#allocation90_spill] sm:$0xff] %v9429_v48  ;;  %v2184_v39 = vsel %vm2165_vm4, %v12176_v50, %v4609_v10  ;;  %v2183_v54 = vsel %vm2165_vm4, %v12178_v34, %v4605_v55  ;;  %v2189_v10 = vsel %vm2165_vm4, %v12181_v46, %v4620_v27  ;;  %v12183_v50 = vld [vmem:[#allocation143_spill] sm:$0xff]  ;;  %v12186_v46 = vld [vmem:[#allocation104_spill] sm:$0xff] }
 0x28b   : > { %6102 = vrot.lane.b32.xlu0 %v12104_v42, %s6655_s8  ;;  %v9447_v22 = vpop.permute.xlu1 %5827  ;;  %v4604_v42 = vunpack.i.l.bf16 %v12170_v47  ;;  %v12174_v47 = vld [vmem:[#allocation101_spill] sm:$0xff]  ;;  %v12184_v55 = vld [vmem:[#allocation103_spill] sm:$0xff] }
 0x28c   : > { %12166 = vst [vmem:[#allocation92_spill] sm:$0xff] %v9447_v22  ;;  %v4649_v59 = vunpack.i.l.bf16 %v12174_v47  ;;  %v4650_v2 = vunpack.i.h.bf16 %v12174_v47  ;;  %v2188_v47 = vsel %vm2165_vm4, %v12182_v23, %v4619_v60  ;;  %v2187_v22 = vsel %vm2165_vm4, %v12183_v50, %v4615_v0 }
 0x28d   : > { %v9459_v9 = vpop.permute.xlu0 %5822  ;;  %6117 = vrot.lane.b32.xlu1 %v12051_v30, %s6656_s9  ;;  %v2182_v38 = vsel %vm2165_vm4, %v12179_v45, %v4604_v42  ;;  %v4660_v34 = vunpack.i.h.bf16 %v12184_v55  ;;  %v2186_v42 = vsel %vm2165_vm4, %v12185_v37, %v4614_v43  ;;  %v4659_v45 = vunpack.i.l.bf16 %v12184_v55  ;;  %v12187_v37 = vld [vmem:[#allocation10_spill] sm:$0xff] }
 0x28e   : > { %12171 = vst [vmem:[#allocation94_spill] sm:$0xff] %v9459_v9  ;;  %v2202_v27 = vsel %vm2198_vm5, %v2169_v57, %v4650_v2  ;;  %v2199_v60 = vsel %vm2198_vm5, %v2166_v61, %v4644_v53  ;;  %v4655_v0 = vunpack.i.h.bf16 %v12186_v46  ;;  %v4654_v23 = vunpack.i.l.bf16 %v12186_v46  ;;  %v12189_v2 = vld [vmem:[#allocation19_spill] sm:$0xff]  ;;  %v12190_v61 = vld [vmem:[#allocation17_spill] sm:$0xff] }
 0x28f   : > { %6112 = vrot.lane.b32.xlu0 %v12035_v14, %s6656_s9  ;;  %v9474_v30 = vpop.permute.xlu1 %5837  ;;  %v4645_v14 = vunpack.i.h.bf16 %v12177_v25  ;;  %v2201_v25 = vsel %vm2198_vm5, %v2168_v36, %v4649_v59  ;;  %v4690_v43 = vunpack.i.h.bf16 %v12187_v37  ;;  %v4689_v59 = vunpack.i.l.bf16 %v12187_v37  ;;  %v12192_v37 = vld [vmem:[#allocation87_spill] sm:$0xff] }
 0x290   : > { %v2206_v55 = vsel %vm2198_vm5, %v2173_v12, %v4660_v34  ;;  %v4685_v57 = vunpack.i.h.bf16 %v12189_v2  ;;  %v4684_v53 = vunpack.i.l.bf16 %v12189_v2  ;;  %v2205_v46 = vsel %vm2198_vm5, %v2172_v11, %v4659_v45  ;;  %v12194_v2 = vld [vmem:[#allocation109_spill] sm:$0xff] }
 0x291   : > { %v9487_v9 = vpop.permute.xlu0 %5832  ;;  %6127 = vrot.lane.b32.xlu1 %v12046_v32, %s6656_s9  ;;  %v2200_v50 = vsel %vm2198_vm5, %v2167_v35, %v4645_v14  ;;  %v4699_v35 = vunpack.i.l.bf16 %v12190_v61  ;;  %v12191_v14 = vld [vmem:[#allocation105_spill] sm:$0xff]  ;;  %v2204_v12 = vsel %vm2198_vm5, %v9435_v62, %v4655_v0  ;;  %v2203_v34 = vsel %vm2198_vm5, %v9440_v18, %v4654_v23  ;;  %v12197_v23 = vld [vmem:[#allocation110_spill] sm:$0xff] }
 0x292   : > { %12180 = vst [vmem:[#allocation96_spill] sm:$0xff] %v9487_v9  ;;  %v4700_v9 = vunpack.i.h.bf16 %v12190_v61  ;;  %v4694_v40 = vunpack.i.l.bf16 %v12191_v14  ;;  %v4729_v49 = vunpack.i.l.bf16 %v12194_v2  ;;  %v2218_v11 = vsel %vm2198_vm5, %v2185_v1, %v4690_v43  ;;  %v12198_v43 = vld [vmem:[#allocation34_spill] sm:$0xff] }
 0x293   : > { %6122 = vrot.lane.b32.xlu0 %v12033_v19, %s6656_s9  ;;  %v9504_v32 = vpop.permute.xlu1 %5847  ;;  %v12188_v19 = vld [vmem:[#allocation93_spill] sm:$0xff]  ;;  %v2217_v45 = vsel %vm2198_vm5, %v2184_v39, %v4689_v59  ;;  %v4730_v61 = vunpack.i.h.bf16 %v12194_v2  ;;  %v2215_v62 = vsel %vm2198_vm5, %v2182_v38, %v4684_v53  ;;  %v2216_v0 = vsel %vm2198_vm5, %v2183_v54, %v4685_v57 }
 0x294   : > { %v2222_v18 = vsel %vm2198_vm5, %v2189_v10, %v4700_v9  ;;  %v2219_v1 = vsel %vm2198_vm5, %v2186_v42, %v4694_v40  ;;  %v4725_v39 = vunpack.i.h.bf16 %v12197_v23  ;;  %v2234_v38 = vsel %vm2231_vm6, %v2201_v25, %v4729_v49  ;;  %v12200_v54 = vld [vmem:[#allocation113_spill] sm:$0xff]  ;;  %v12205_v25 = vld [vmem:[#allocation120_spill] sm:$0xff] }
 0x295   : > { %v9513_v36 = vpop.permute.xlu0 %5842  ;;  %6137 = vrot.lane.b32.xlu1 %v12188_v19, %s6652_s5  ;;  %v4695_v19 = vunpack.i.h.bf16 %v12191_v14  ;;  %v4724_v14 = vunpack.i.l.bf16 %v12197_v23  ;;  %v4740_v57 = vunpack.i.h.bf16 %v12200_v54  ;;  %v4739_v9 = vunpack.i.l.bf16 %v12200_v54 }
 0x296   : > { %v2235_v10 = vsel %vm2231_vm6, %v2202_v27, %v4730_v61  ;;  %v4764_v23 = vunpack.i.l.bf16 %v12205_v25  ;;  %v4765_v27 = vunpack.i.h.bf16 %v12205_v25  ;;  %v12206_v61 = vld [vmem:[#allocation121_spill] sm:$0xff] }
 0x297   : > { %6132 = vrot.lane.b32.xlu0 %v12192_v37, %s6652_s5  ;;  %v9526_v48 = vpop.permute.xlu1 %5857  ;;  %v12196_v37 = vld [vmem:[#allocation61_spill] sm:$0xff]  ;;  %v2220_v2 = vsel %vm2198_vm5, %v2187_v22, %v4695_v19  ;;  %v12204_v22 = vld [vmem:[#allocation62_spill] sm:$0xff]  ;;  %v4779_v54 = vunpack.i.l.bf16 %v12206_v61 }
 0x298   : > { %12193 = vst [vmem:[#allocation158_spill] sm:$0xff] %v9526_v48  ;;  %v2221_v48 = vsel %vm2198_vm5, %v2188_v47, %v4699_v35  ;;  %v12201_v47 = vld [vmem:[#allocation114_spill] sm:$0xff]  ;;  %v12203_v35 = vld [vmem:[#allocation60_spill] sm:$0xff]  ;;  %v4770_v19 = vunpack.i.h.bf16 %v12204_v22  ;;  %v4769_v49 = vunpack.i.l.bf16 %v12204_v22 }
 0x299   : > { %v9537_v56 = vpop.permute.xlu0 %5852  ;;  %6147 = vrot.lane.b32.xlu1 %v12196_v37, %s6653_s6  ;;  %v4735_v53 = vunpack.i.h.bf16 %v12201_v47  ;;  %v4734_v40 = vunpack.i.l.bf16 %v12201_v47  ;;  %v2232_v37 = vsel %vm2231_vm6, %v2199_v60, %v4724_v14  ;;  %v12207_v47 = vld [vmem:[#allocation29_spill] sm:$0xff]  ;;  %v2239_v60 = vsel %vm2231_vm6, %v2206_v55, %v4740_v57  ;;  %v12209_v22 = vld [vmem:[#allocation122_spill] sm:$0xff]  ;;  %v12211_v57 = vld [vmem:[#allocation127_spill] sm:$0xff] }
 0x29a   : > { %12195 = vst [vmem:[#allocation8_spill] sm:$0xff] %v9537_v56  ;;  %v4780_v14 = vunpack.i.h.bf16 %v12206_v61  ;;  %v2248_v55 = vsel %vm2231_vm6, %v2215_v62, %v4764_v23  ;;  %v2249_v61 = vsel %vm2231_vm6, %v2216_v0, %v4765_v27  ;;  %v12214_v0 = vld [vmem:[#allocation129_spill] sm:$0xff] }
 0x29b   : > { %6142 = vrot.lane.b32.xlu0 %v12198_v43, %s6653_s6  ;;  %v9550_v59 = vpop.permute.xlu1 %5867  ;;  %v2233_v43 = vsel %vm2231_vm6, %v2200_v50, %v4725_v39  ;;  %v2236_v56 = vsel %vm2231_vm6, %v2203_v34, %v4734_v40  ;;  %v2237_v50 = vsel %vm2231_vm6, %v2204_v12, %v4735_v53  ;;  %v4775_v39 = vunpack.i.h.bf16 %v12209_v22  ;;  %v12212_v53 = vld [vmem:[#allocation68_spill] sm:$0xff] }
 0x29c   : > { %12199 = vst [vmem:[#allocation157_spill] sm:$0xff] %v9550_v59  ;;  %v4774_v59 = vunpack.i.l.bf16 %v12209_v22  ;;  %v2254_v34 = vsel %vm2231_vm6, %v2221_v48, %v4779_v54  ;;  %v4810_v12 = vunpack.i.h.bf16 %v12211_v57  ;;  %v4820_v23 = vunpack.i.h.bf16 %v12214_v0 }
 0x29d   : > { %v9559_v42 = vpop.permute.xlu0 %5862  ;;  %6157 = vrot.lane.b32.xlu1 %v12203_v35, %s6653_s6  ;;  %v2238_v35 = vsel %vm2231_vm6, %v2205_v46, %v4739_v9  ;;  %v2251_v46 = vsel %vm2231_vm6, %v2218_v11, %v4770_v19  ;;  %v4809_v9 = vunpack.i.l.bf16 %v12211_v57  ;;  %v12213_v11 = vld [vmem:[#allocation128_spill] sm:$0xff]  ;;  %v4819_v48 = vunpack.i.l.bf16 %v12214_v0 }
 0x29e   : > { %12202 = vst [vmem:[#allocation9_spill] sm:$0xff] %v9559_v42  ;;  %v4805_v19 = vunpack.i.h.bf16 %v12213_v11  ;;  %v4804_v62 = vunpack.i.l.bf16 %v12213_v11  ;;  %v2268_v57 = vsel %vm2264_vm7, %v2235_v10, %v4810_v12  ;;  %v12218_v11 = vld [vmem:[#allocation67_spill] sm:$0xff]  ;;  %v2272_v10 = vsel %vm2264_vm7, %v2239_v60, %v4820_v23  ;;  %v12223_v23 = vld [vmem:[#allocation77_spill] sm:$0xff] }
 0x29f   : > { %6152 = vrot.lane.b32.xlu0 %v12207_v47, %s6653_s6  ;;  %v9572_v42 = vpop.permute.xlu1 %5877  ;;  %v2250_v47 = vsel %vm2231_vm6, %v2217_v45, %v4769_v49  ;;  %v2252_v45 = vsel %vm2231_vm6, %v2219_v1, %v4774_v59  ;;  %v2253_v49 = vsel %vm2231_vm6, %v2220_v2, %v4775_v39  ;;  %v2267_v54 = vsel %vm2264_vm7, %v2234_v38, %v4809_v9  ;;  %v12216_v59 = vld [vmem:[#allocation39_spill] sm:$0xff]  ;;  %v12217_v39 = vld [vmem:[#allocation133_spill] sm:$0xff] }
 0x2a0   : > { %12208 = vst [vmem:[#allocation99_spill] sm:$0xff] %v9572_v42  ;;  %v4849_v22 = vunpack.i.l.bf16 %v12216_v59  ;;  %v4850_v2 = vunpack.i.h.bf16 %v12216_v59  ;;  %v2266_v38 = vsel %vm2264_vm7, %v2233_v43, %v4805_v19  ;;  %v4845_v9 = vunpack.i.h.bf16 %v12217_v39  ;;  %v12222_v19 = vld [vmem:[#allocation135_spill] sm:$0xff] }
 0x2a1   : > { %v9581_v25 = vpop.permute.xlu0 %5872  ;;  %6167 = vrot.lane.b32.xlu1 %v11991_v41, %s6654_s7  ;;  %v2255_v41 = vsel %vm2231_vm6, %v2222_v18, %v4780_v14  ;;  %v12215_v18 = vld [vmem:[#allocation130_spill] sm:$0xff]  ;;  %v2271_v42 = vsel %vm2264_vm7, %v2238_v35, %v4819_v48  ;;  %v4855_v60 = vunpack.i.h.bf16 %v12222_v19 }
 0x2a2   : > { %12210 = vst [vmem:[#allocation100_spill] sm:$0xff] %v9581_v25  ;;  %v4815_v14 = vunpack.i.h.bf16 %v12215_v18  ;;  %v4814_v1 = vunpack.i.l.bf16 %v12215_v18  ;;  %v12220_v18 = vld [vmem:[#allocation134_spill] sm:$0xff]  ;;  %v2283_v43 = vsel %vm2264_vm7, %v2250_v47, %v4849_v22 }
 0x2a3   : > { %6162 = vrot.lane.b32.xlu0 %v12212_v53, %s6654_s7  ;;  %v9594_v40 = vpop.permute.xlu1 %5887  ;;  %v4844_v53 = vunpack.i.l.bf16 %v12217_v39  ;;  %v4859_v25 = vunpack.i.l.bf16 %v12220_v18  ;;  %v4860_v12 = vunpack.i.h.bf16 %v12220_v18  ;;  %v2284_v39 = vsel %vm2264_vm7, %v2251_v46, %v4850_v2  ;;  %v12226_v46 = vld [vmem:[#allocation140_spill] sm:$0xff] }
 0x2a4   : > { %v4885_v22 = vunpack.i.h.bf16 %v12226_v46 }
 0x2a5   : > { %v9603_v27 = vpop.permute.xlu0 %5882  ;;  %6177 = vrot.lane.b32.xlu1 %v12098_v33, %s6654_s7  ;;  %v2265_v33 = vsel %vm2264_vm7, %v2232_v37, %v4804_v62  ;;  %v2270_v37 = vsel %vm2264_vm7, %v2237_v50, %v4815_v14  ;;  %v4854_v62 = vunpack.i.l.bf16 %v12222_v19  ;;  %v2281_v35 = vsel %vm2264_vm7, %v2248_v55, %v4844_v53  ;;  %v12225_v50 = vld [vmem:[#allocation139_spill] sm:$0xff] }
 0x2a6   : > { %v4890_v14 = vunpack.i.h.bf16 %v12225_v50  ;;  %v4889_v47 = vunpack.i.l.bf16 %v12225_v50  ;;  %v4884_v55 = vunpack.i.l.bf16 %v12226_v46  ;;  %v2286_v19 = vsel %vm2264_vm7, %v2253_v49, %v4855_v60  ;;  %v12231_v50 = vld [vmem:[#allocation76_spill] sm:$0xff] }
 0x2a7   : > { %6172 = vrot.lane.b32.xlu0 %v12218_v11, %s6654_s7  ;;  %v9616_v0 = vpop.permute.xlu1 %5897  ;;  %v2269_v11 = vsel %vm2264_vm7, %v2236_v56, %v4814_v1  ;;  %v2287_v56 = vsel %vm2264_vm7, %v2254_v34, %v4859_v25  ;;  %v2288_v1 = vsel %vm2264_vm7, %v2255_v41, %v4860_v12  ;;  %v2285_v53 = vsel %vm2264_vm7, %v2252_v45, %v4854_v62  ;;  %v12229_v34 = vld [vmem:[#allocation142_spill] sm:$0xff]  ;;  %v12230_v12 = vld [vmem:[#allocation144_spill] sm:$0xff] }
 0x2a8   : > { %12219 = vst [vmem:[#allocation101_spill] sm:$0xff] %v9616_v0  ;;  %v4894_v18 = vunpack.i.l.bf16 %v12229_v34  ;;  %v4895_v41 = vunpack.i.h.bf16 %v12229_v34  ;;  %v2301_v45 = vsel %vm2297_vm8, %v2268_v57, %v4890_v14  ;;  %v4930_v62 = vunpack.i.h.bf16 %v12230_v12  ;;  %v12234_v14 = vld [vmem:[#allocation146_spill] sm:$0xff] }
 0x2a9   : > { %v9625_v59 = vpop.permute.xlu0 %5892  ;;  %6187 = vrot.lane.b32.xlu1 %v12025_v4, %s6655_s8  ;;  %v2282_v4 = vsel %vm2264_vm7, %v2249_v61, %v4845_v9  ;;  %v12228_v61 = vld [vmem:[#allocation141_spill] sm:$0xff]  ;;  %v2299_v49 = vsel %vm2297_vm8, %v2266_v38, %v4885_v22  ;;  %v4940_v22 = vunpack.i.h.bf16 %v12234_v14 }
 0x2aa   : > { %12221 = vst [vmem:[#allocation176_spill] sm:$0xff] %v9625_v59  ;;  %v4900_v9 = vunpack.i.h.bf16 %v12228_v61  ;;  %v4899_v25 = vunpack.i.l.bf16 %v12228_v61  ;;  %v12232_v61 = vld [vmem:[#allocation145_spill] sm:$0xff]  ;;  %v2302_v57 = vsel %vm2297_vm8, %v2269_v11, %v4894_v18  ;;  %v12235_v11 = vld [vmem:[#allocation147_spill] sm:$0xff]  ;;  %v12240_v59 = vld [vmem:[#allocation160_spill] sm:$0xff] }
 0x2ab   : > { %6182 = vrot.lane.b32.xlu0 %v12223_v23, %s6655_s8  ;;  %v9638_v48 = vpop.permute.xlu1 %5907  ;;  %v4929_v23 = vunpack.i.l.bf16 %v12230_v12  ;;  %v4925_v60 = vunpack.i.h.bf16 %v12232_v61  ;;  %v12237_v12 = vld [vmem:[#allocation152_spill] sm:$0xff]  ;;  %v5010_v0 = vunpack.i.h.bf16 %v12240_v59 }
 0x2ac   : > { %12224 = vst [vmem:[#allocation18_spill] sm:$0xff] %v9638_v48  ;;  %v2298_v48 = vsel %vm2297_vm8, %v2265_v33, %v4884_v55  ;;  %v2303_v33 = vsel %vm2297_vm8, %v2270_v37, %v4895_v41  ;;  %v4935_v55 = vunpack.i.h.bf16 %v12235_v11  ;;  %v12236_v37 = vld [vmem:[#allocation151_spill] sm:$0xff] }
 0x2ad   : > { %v9647_v2 = vpop.permute.xlu0 %5902  ;;  %6197 = vrot.lane.b32.xlu1 %v12024_v5, %s6655_s8  ;;  %v2300_v5 = vsel %vm2297_vm8, %v2267_v54, %v4889_v47  ;;  %v2305_v54 = vsel %vm2297_vm8, %v2272_v10, %v4900_v9  ;;  %v4939_v47 = vunpack.i.l.bf16 %v12234_v14  ;;  %v2316_v38 = vsel %vm2297_vm8, %v2283_v43, %v4929_v23 }
 0x2ae   : > { %12227 = vst [vmem:[#allocation102_spill] sm:$0xff] %v9647_v2  ;;  %v4924_v2 = vunpack.i.l.bf16 %v12232_v61  ;;  %v4934_v9 = vunpack.i.l.bf16 %v12235_v11  ;;  %v4970_v18 = vunpack.i.h.bf16 %v12236_v37  ;;  %v4969_v43 = vunpack.i.l.bf16 %v12236_v37  ;;  %v12239_v11 = vld [vmem:[#allocation154_spill] sm:$0xff] }
 0x2af   : > { %6192 = vrot.lane.b32.xlu0 %v12231_v50, %s6655_s8  ;;  %v9660_v46 = vpop.permute.xlu1 %5917  ;;  %v2304_v50 = vsel %vm2297_vm8, %v2271_v42, %v4899_v25  ;;  %v2317_v42 = vsel %vm2297_vm8, %v2284_v39, %v4930_v62  ;;  %v2315_v25 = vsel %vm2297_vm8, %v2282_v4, %v4925_v60  ;;  %v6553_v39 = vld [vmem:[%s6744_s28 + $0x1a0] sm:$0xff]  ;;  %v4965_v23 = vunpack.i.h.bf16 %v12237_v12  ;;  %v12238_v62 = vld [vmem:[#allocation153_spill] sm:$0xff] }
 0x2b0   : > { %v2314_v10 = vsel %vm2297_vm8, %v2281_v35, %v4924_v2  ;;  %v2320_v2 = vsel %vm2297_vm8, %v2287_v56, %v4939_v47  ;;  %v4964_v4 = vunpack.i.l.bf16 %v12237_v12  ;;  %v4979_v61 = vunpack.i.l.bf16 %v12238_v62 }
 0x2b1   : > { %v9669_v34 = vpop.permute.xlu0 %5912  ;;  %6207 = vrot.lane.b32.xlu1 %v12055_v52, %s6656_s9  ;;  %v2321_v60 = vsel %vm2297_vm8, %v2288_v1, %v4940_v22  ;;  %v4980_v14 = vunpack.i.h.bf16 %v12238_v62  ;;  %v4974_v37 = vunpack.i.l.bf16 %v12239_v11  ;;  %v2318_v47 = vsel %vm2297_vm8, %v2285_v53, %v4934_v9 }
 0x2b2   : > { %12233 = vst [vmem:[#allocation166_spill] sm:$0xff] %v9669_v34  ;;  %v2319_v12 = vsel %vm2297_vm8, %v2286_v19, %v4935_v55  ;;  %v4975_v34 = vunpack.i.h.bf16 %v12239_v11  ;;  %v5009_v1 = vunpack.i.l.bf16 %v12240_v59  ;;  %v2333_v22 = vsel %vm2330_vm9, %v2300_v5, %v4969_v43  ;;  %v12241_v55 = vld [vmem:[#allocation161_spill] sm:$0xff]  ;;  %v12243_v43 = vld [vmem:[#allocation162_spill] sm:$0xff] }
 0x2b3   : > { %6202 = vrot.lane.b32.xlu0 %v12039_v13, %s6656_s9  ;;  %v9682_v52 = vpop.permute.xlu1 %5927  ;;  %v6552_v13 = vld [vmem:[%s6744_s28 + $0x198] sm:$0xff]  ;;  %v2334_v62 = vsel %vm2330_vm9, %v2301_v45, %v4970_v18  ;;  %v2332_v53 = vsel %vm2330_vm9, %v2299_v49, %v4965_v23  ;;  %v2337_v19 = vsel %vm2330_vm9, %v2304_v50, %v4979_v61  ;;  %v5004_v9 = vunpack.i.l.bf16 %v12241_v55 }
 0x2b4   : > { %v6226_v35 = vpack.i.bf16 %v6553_v39, %v6552_v13  ;;  %v6554_v13 = vld [vmem:[%s6744_s28 + $0x180] sm:$0xff]  ;;  %v6555_v39 = vld [vmem:[%s6744_s28 + $0x188] sm:$0xff]  ;;  %v2338_v11 = vsel %vm2330_vm9, %v2305_v54, %v4980_v14  ;;  %v2335_v5 = vsel %vm2330_vm9, %v2302_v57, %v4974_v37  ;;  %v5005_v45 = vunpack.i.h.bf16 %v12241_v55  ;;  %v12250_v55 = vld [vmem:[#allocation46_spill] sm:$0xff] }
 0x2b5   : > { %v9691_v41 = vpop.permute.xlu0 %5922  ;;  %6217 = vrot.lane.b32.xlu1 %v12054_v15, %s6656_s9  ;;  %v6221_v56 = vpack.i.bf16 %v6555_v39, %v6554_v13  ;;  %v2331_v13 = vsel %vm2330_vm9, %v2298_v48, %v4964_v4  ;;  %v2336_v18 = vsel %vm2330_vm9, %v2303_v33, %v4975_v34  ;;  %v2349_v48 = vsel %vm2330_vm9, %v2316_v38, %v5009_v1  ;;  %v12244_v23 = vld [vmem:[#allocation163_spill] sm:$0xff]  ;;  %v12247_v34 = vld [vmem:[#allocation168_spill] sm:$0xff]  ;;  %v12248_v37 = vld [vmem:[#allocation169_spill] sm:$0xff] }
 0x2b6   : > { %v5020_v49 = vunpack.i.h.bf16 %v12243_v43  ;;  %v5019_v50 = vunpack.i.l.bf16 %v12243_v43  ;;  %v5015_v54 = vunpack.i.h.bf16 %v12244_v23  ;;  %v5014_v57 = vunpack.i.l.bf16 %v12244_v23  ;;  %v12246_v61 = vld [vmem:[#allocation115_spill] sm:$0xff] }
 0x2b7   : > { %6212 = vrot.lane.b32.xlu0 %v12038_v51, %s6656_s9  ;;  %v9706_v15 = vpop.permute.xlu1 %5937  ;;  %v2347_v14 = vsel %vm2330_vm9, %v2314_v10, %v5004_v9  ;;  %v5050_v33 = vunpack.i.h.bf16 %v12247_v34  ;;  %v5049_v38 = vunpack.i.l.bf16 %v12247_v34  ;;  %v5044_v39 = vunpack.i.l.bf16 %v12248_v37 }
 0x2b8   : > { %v2353_v23 = vsel %vm2330_vm9, %v2320_v2, %v5019_v50  ;;  %v2354_v10 = vsel %vm2330_vm9, %v2321_v60, %v5020_v49  ;;  %v12256_v50 = vld [vmem:[#allocation172_spill] sm:$0xff] }
 0x2b9   : > { %v9717_v51 = vpop.permute.xlu0 %5932  ;;  %6227 = vrot.lane.b32.xlu1 %v6226_v35, %s6652_s5  ;;  %v2350_v35 = vsel %vm2330_vm9, %v2317_v42, %v5010_v0  ;;  %v5045_v0 = vunpack.i.h.bf16 %v12248_v37  ;;  %v12249_v42 = vld [vmem:[#allocation170_spill] sm:$0xff]  ;;  %v2366_v2 = vsel %vm2363_vm10, %v2333_v22, %v5049_v38  ;;  %v2367_v60 = vsel %vm2363_vm10, %v2334_v62, %v5050_v33 }
 0x2ba   : > { %v5059_v1 = vunpack.i.l.bf16 %v12249_v42  ;;  %v5060_v9 = vunpack.i.h.bf16 %v12249_v42  ;;  %v2364_v49 = vsel %vm2363_vm10, %v2331_v13, %v5044_v39  ;;  %v5089_v42 = vunpack.i.l.bf16 %v12256_v50  ;;  %v12261_v13 = vld [vmem:[#allocation173_spill] sm:$0xff]  ;;  %v12263_v38 = vld [vmem:[#allocation174_spill] sm:$0xff] }
 0x2bb   : > { %6222 = vrot.lane.b32.xlu0 %v6221_v56, %s6652_s5  ;;  %v9728_v59 = vpop.permute.xlu1 %5947  ;;  %v2348_v56 = vsel %vm2330_vm9, %v2315_v25, %v5005_v45  ;;  %v9758_v25 = vsel %vm2330_vm9, %v2319_v12, %v5015_v54  ;;  %v5090_v54 = vunpack.i.h.bf16 %v12256_v50  ;;  %v5085_v33 = vunpack.i.h.bf16 %v12261_v13 }
 0x2bc   : > { %12242 = vst [vmem:[#allocation165_spill] sm:$0xff] %v9728_v59  ;;  %12253 = vst [vmem:[#allocation143_spill] sm:$0xff] %v9758_v25  ;;  %v9771_v12 = vsel %vm2363_vm10, %v2337_v19, %v5059_v1  ;;  %v9779_v22 = vsel %vm2363_vm10, %v2338_v11, %v5060_v9  ;;  %v5100_v39 = vunpack.i.h.bf16 %v12263_v38  ;;  %v12264_v11 = vld [vmem:[#allocation131_spill] sm:$0xff]  ;;  %v12314_v59 = vld [vmem:[#allocation52_spill] sm:$0xff] }
 0x2bd   : > { %v9737_v4 = vpop.permute.xlu0 %5942  ;;  %6237 = vrot.lane.b32.xlu1 %v12246_v61, %s6653_s6  ;;  %v12252_v61 = vld [vmem:[#allocation171_spill] sm:$0xff]  ;;  %12257 = vst [vmem:[#allocation83_spill] sm:$0xff] %v9771_v12  ;;  %12259 = vst [vmem:[#allocation104_spill] sm:$0xff] %v9779_v22 }
 0x2be   : > { %12245 = vst [vmem:[#allocation85_spill] sm:$0xff] %v9737_v4  ;;  %v5054_v34 = vunpack.i.l.bf16 %v12252_v61  ;;  %v2351_v4 = vsel %vm2330_vm9, %v2318_v47, %v5014_v57  ;;  %v5055_v45 = vunpack.i.h.bf16 %v12252_v61  ;;  %v2365_v47 = vsel %vm2363_vm10, %v2332_v53, %v5045_v0  ;;  %v12258_v57 = vld [vmem:[#allocation40_spill] sm:$0xff]  ;;  %v12265_v9 = vld [vmem:[#allocation175_spill] sm:$0xff] }
 0x2bf   : > { %6232 = vrot.lane.b32.xlu0 %v12250_v55, %s6653_s6  ;;  %v9750_v43 = vpop.permute.xlu1 %5957  ;;  %v12255_v55 = vld [vmem:[#allocation184_spill] sm:$0xff]  ;;  %v5084_v53 = vunpack.i.l.bf16 %v12261_v13  ;;  %v5099_v0 = vunpack.i.l.bf16 %v12263_v38 }
 0x2c0   : > { %12251 = vst [vmem:[#allocation84_spill] sm:$0xff] %v9750_v43  ;;  %v9782_v62 = vsel %vm2363_vm10, %v2335_v5, %v5054_v34  ;;  %v9787_v19 = vsel %vm2363_vm10, %v2336_v18, %v5055_v45  ;;  %v2382_v5 = vsel %vm2363_vm10, %v2349_v48, %v5089_v42  ;;  %v5094_v34 = vunpack.i.l.bf16 %v12265_v9 }
 0x2c1   : > { %v9761_v37 = vpop.permute.xlu0 %5952  ;;  %6247 = vrot.lane.b32.xlu1 %v12255_v55, %s6653_s6  ;;  %12260 = vst [vmem:[#allocation10_spill] sm:$0xff] %v9782_v62  ;;  %12262 = vst [vmem:[#allocation93_spill] sm:$0xff] %v9787_v19  ;;  %v12266_v55 = vld [vmem:[#allocation178_spill] sm:$0xff]  ;;  %v2383_v45 = vsel %vm2363_vm10, %v2350_v35, %v5090_v54  ;;  %v2380_v48 = vsel %vm2363_vm10, %v2347_v14, %v5084_v53  ;;  %v2381_v42 = vsel %vm2363_vm10, %v2348_v56, %v5085_v33  ;;  %v12273_v14 = vld [vmem:[#allocation119_spill] sm:$0xff] }
 0x2c2   : > { %12254 = vst [vmem:[#allocation103_spill] sm:$0xff] %v9761_v37  ;;  %v5130_v50 = vunpack.i.h.bf16 %v12266_v55  ;;  %v5129_v18 = vunpack.i.l.bf16 %v12266_v55  ;;  %v12268_v19 = vld [vmem:[#allocation70_spill] sm:$0xff]  ;;  %v9817_v54 = vsel %vm2363_vm10, %v2353_v23, %v5099_v0  ;;  %v9829_v33 = vsel %vm2363_vm10, %v2351_v4, %v5094_v34 }
 0x2c3   : > { %6242 = vrot.lane.b32.xlu0 %v12258_v57, %s6653_s6  ;;  %v9776_v61 = vpop.permute.xlu1 %5967  ;;  %v12267_v57 = vld [vmem:[#allocation179_spill] sm:$0xff]  ;;  %12270 = vst [vmem:[#allocation17_spill] sm:$0xff] %v9817_v54  ;;  %12274 = vst [vmem:[#allocation109_spill] sm:$0xff] %v9829_v33  ;;  %v5919_v34 = vunpack.i.l.bf16 %v9660_v46 }
 0x2c4   : > { %v5125_v13 = vunpack.i.h.bf16 %v12267_v57  ;;  %v5124_v38 = vunpack.i.l.bf16 %v12267_v57  ;;  %v9813_v55 = vld [vmem:[%s6744_s28 + $0x1b8] sm:$0xff]  ;;  %v9820_v57 = vsel %vm2363_vm10, %v2354_v10, %v5100_v39  ;;  %v2399_v53 = vsel %vm2396_vm11, %v2366_v2, %v5129_v18 }
 0x2c5   : > { %v9791_v1 = vpop.permute.xlu0 %5962  ;;  %6257 = vrot.lane.b32.xlu1 %v12264_v11, %s6654_s7  ;;  %v9809_v11 = vld [vmem:[%s6744_s28 + $0x1b0] sm:$0xff]  ;;  %v651_v35 = vrot.slane %v9813_v55, 1  ;;  %12271 = vst [vmem:[#allocation105_spill] sm:$0xff] %v9820_v57  ;;  %v2400_v23 = vsel %vm2396_vm11, %v2367_v60, %v5130_v50  ;;  %v5840_v2 = vunpack.i.h.bf16 %v9474_v30  ;;  %v5839_v60 = vunpack.i.l.bf16 %v9474_v30 }
 0x2c6   : > { %v650_v22 = vrot.slane %v9809_v11, 1  ;;  %v2397_v0 = vsel %vm2396_vm11, %v2364_v49, %v5124_v38  ;;  %v2398_v10 = vsel %vm2396_vm11, %v2365_v47, %v5125_v13  ;;  %v12276_v57 = vld [vmem:[#allocation69_spill] sm:$0xff]  ;;  %v5920_v47 = vunpack.i.h.bf16 %v9660_v46  ;;  %v12280_v38 = vld [vmem:[#allocation63_spill] sm:$0xff] }
 0x2c7   : > { %6252 = vrot.lane.b32.xlu0 %v12268_v19, %s6654_s7  ;;  %v9804_v62 = vpop.permute.xlu1 %5977  ;;  %v6558_v19 = vld [vmem:[%s6744_s28 + $0x1c0] sm:$0xf]  ;;  %v5169_v30 = vunpack.i.l.bf16 %v12280_v38  ;;  %v12283_v46 = vld [vmem:[#allocation33_spill] sm:$0xff] }
 0x2c8   : > { %12269 = vst [vmem:[#allocation19_spill] sm:$0xff] %v9804_v62  ;;  %v653_v12 = vrot.slane %v6558_v19, 1  ;;  %v9842_v4 = vsel %vm277_vm0, %v650_v22, %v651_v35  ;;  %v12281_v19 = vld [vmem:[#allocation106_spill] sm:$0xff] }
 0x2c9   : > { %v9823_v25 = vpop.permute.xlu0 %5972  ;;  %6267 = vrot.lane.b32.xlu1 %v12273_v14, %s6654_s7  ;;  %v12282_v14 = vld [vmem:[#allocation64_spill] sm:$0xff]  ;;  %v3458_v13 = vsel %vm2165_vm4, %v9842_v4, %v5839_v60 }
 0x2ca   : > { %12272 = vst [vmem:[#allocation87_spill] sm:$0xff] %v9823_v25  ;;  %v9847_v49 = vsel %vm277_vm0, %v651_v35, %v653_v12  ;;  %v5165_v12 = vunpack.i.h.bf16 %v12281_v19  ;;  %v5164_v35 = vunpack.i.l.bf16 %v12281_v19  ;;  %v5209_v56 = vunpack.i.l.bf16 %v12282_v14 }
 0x2cb   : > { %6262 = vrot.lane.b32.xlu0 %v12276_v57, %s6654_s7  ;;  %v9838_v54 = vpop.permute.xlu1 %5987  ;;  %v5170_v57 = vunpack.i.h.bf16 %v12280_v38  ;;  %v5210_v38 = vunpack.i.h.bf16 %v12282_v14  ;;  %v3490_v39 = vsel %vm2198_vm5, %v3458_v13, %v5919_v34  ;;  %v2415_v14 = vsel %vm2396_vm11, %v2382_v5, %v5169_v30  ;;  %v12288_v34 = vld [vmem:[#allocation78_spill] sm:$0xff] }
 0x2cc   : > { %12277 = vst [vmem:[#allocation61_spill] sm:$0xff] %v9838_v54  ;;  %v2414_v13 = vsel %vm2396_vm11, %v2381_v42, %v5165_v12  ;;  %v5930_v25 = vunpack.i.h.bf16 %v9682_v52 }
 0x2cd   : > { %v9851_v50 = vpop.permute.xlu0 %5982  ;;  %6277 = vrot.lane.b32.xlu1 %v12026_v6, %s6655_s8  ;;  %v3459_v6 = vsel %vm2165_vm4, %v9847_v49, %v5840_v2  ;;  %v2416_v60 = vsel %vm2396_vm11, %v2383_v45, %v5170_v57  ;;  %v12291_v45 = vld [vmem:[#allocation124_spill] sm:$0xff]  ;;  %v2433_v42 = vsel %vm2429_vm12, %v2400_v23, %v5210_v38  ;;  %v9919_v23 = vld [vmem:[%s6744_s28 + $0x1d8] sm:$0xf] }
 0x2ce   : > { %12278 = vst [vmem:[#allocation110_spill] sm:$0xff] %v9851_v50  ;;  %v3491_v19 = vsel %vm2198_vm5, %v3459_v6, %v5920_v47  ;;  %v2413_v47 = vsel %vm2396_vm11, %v2380_v48, %v5164_v35  ;;  %v12290_v6 = vld [vmem:[#allocation123_spill] sm:$0xff]  ;;  %v5245_v48 = vunpack.i.h.bf16 %v12291_v45  ;;  %v5244_v57 = vunpack.i.l.bf16 %v12291_v45 }
 0x2cf   : > { %6272 = vrot.lane.b32.xlu0 %v12283_v46, %s6655_s8  ;;  %v5998_v33 = vpop.permute.xlu1 %5997  ;;  %v12285_v46 = vld [vmem:[#allocation116_spill] sm:$0xff]  ;;  %v5250_v5 = vunpack.i.h.bf16 %v12290_v6  ;;  %v12293_v45 = vld [vmem:[#allocation71_spill] sm:$0xff]  ;;  %v5890_v50 = vunpack.i.h.bf16 %v9594_v40 }
 0x2d0   : > { %v6000_v22 = vunpack.i.h.bf16 %v5998_v33  ;;  %v5999_v18 = vunpack.i.l.bf16 %v5998_v33  ;;  %v5205_v37 = vunpack.i.h.bf16 %v12285_v46  ;;  %v5204_v2 = vunpack.i.l.bf16 %v12285_v46  ;;  %v9906_v46 = vld [vmem:[%s6744_s28 + $0x1c8] sm:$0xff] }
 0x2d1   : > { %v9871_v9 = vpop.permute.xlu0 %5992  ;;  %6287 = vrot.lane.b32.xlu1 %v8432_v58, %s6655_s8 }
 0x2d2   : > { %12284 = vst [vmem:[#allocation34_spill] sm:$0xff] %v9871_v9  ;;  %v9878_v43 = vsel %vm2231_vm6, %v3490_v39, %v5999_v18  ;;  %v9881_v33 = vsel %vm2231_vm6, %v3491_v19, %v6000_v22  ;;  %v2432_v22 = vsel %vm2429_vm12, %v2399_v53, %v5209_v56  ;;  %v5249_v19 = vunpack.i.l.bf16 %v12290_v6  ;;  %v12292_v53 = vld [vmem:[#allocation132_spill] sm:$0xff] }
 0x2d3   : > { %12286 = vst [vmem:[#allocation113_spill] sm:$0xff] %v9878_v43  ;;  %12287 = vst [vmem:[#allocation114_spill] sm:$0xff] %v9881_v33  ;;  %6282 = vrot.lane.b32.xlu0 %v12288_v34, %s6655_s8  ;;  %v9888_v58 = vpop.permute.xlu1 %6007  ;;  %v2430_v12 = vsel %vm2429_vm12, %v2397_v0, %v5204_v2  ;;  %v2431_v56 = vsel %vm2429_vm12, %v2398_v10, %v5205_v37  ;;  %v5289_v35 = vunpack.i.l.bf16 %v12292_v53  ;;  %v9909_v34 = vld [vmem:[%s6744_s28 + $0x1d0] sm:$0xff]  ;;  %v5290_v6 = vunpack.i.h.bf16 %v12292_v53 }
 0x2d4   : > { %v5285_v18 = vunpack.i.h.bf16 %v12293_v45  ;;  %v5284_v39 = vunpack.i.l.bf16 %v12293_v45  ;;  %v2448_v37 = vsel %vm2429_vm12, %v2415_v14, %v5249_v19  ;;  %v12295_v0 = vld [vmem:[#allocation137_spill] sm:$0xff]  ;;  %v12296_v2 = vld [vmem:[#allocation138_spill] sm:$0xff]  ;;  %v2449_v53 = vsel %vm2429_vm12, %v2416_v60, %v5250_v5 }
 0x2d5   : > { %v9897_v30 = vpop.permute.xlu0 %6002  ;;  %6297 = vrot.lane.b32.xlu1 %v12056_v21, %s6656_s9  ;;  %v5330_v10 = vunpack.i.h.bf16 %v12295_v0  ;;  %v5329_v38 = vunpack.i.l.bf16 %v12295_v0  ;;  %v5324_v33 = vunpack.i.l.bf16 %v12296_v2  ;;  %v2446_v43 = vsel %vm2429_vm12, %v2413_v47, %v5244_v57 }
 0x2d6   : > { %v9928_v45 = vsel %vm2429_vm12, %v2414_v13, %v5245_v48  ;;  %v6316_v14 = vpack.i.bf16 %v9909_v34, %v9906_v46  ;;  %v9937_v19 = vsel %vm2462_vm13, %v2432_v22, %v5289_v35  ;;  %v705_v0 = vrot.slane %v9906_v46, 1 }
 0x2d7   : > { %6292 = vrot.lane.b32.xlu0 %v12041_v3, %s6656_s9  ;;  %v9916_v21 = vpop.permute.xlu1 %6017  ;;  %v706_v60 = vrot.slane %v9909_v34, 1  ;;  %v708_v47 = vrot.slane %v9919_v23, 1  ;;  %v9943_v13 = vsel %vm2462_vm13, %v2433_v42, %v5290_v6  ;;  %v9946_v5 = vsel %vm2462_vm13, %v2430_v12, %v5284_v39  ;;  %v12303_v6 = vld [vmem:[#allocation159_spill] sm:$0xff] }
 0x2d8   : > { %12294 = vst [vmem:[#allocation60_spill] sm:$0xff] %v9916_v21  ;;  %v6311_v48 = vpack.i.bf16 %v9813_v55, %v9809_v11  ;;  %v9958_v57 = vsel %vm2462_vm13, %v2448_v37, %v5329_v38  ;;  %v9961_v42 = vsel %vm2462_vm13, %v2449_v53, %v5330_v10  ;;  %v9965_v12 = vsel %vm2462_vm13, %v2446_v43, %v5324_v33  ;;  %v12302_v53 = vld [vmem:[#allocation150_spill] sm:$0xff] }
 0x2d9   : > { %v9930_v3 = vpop.permute.xlu0 %6012  ;;  %6307 = vrot.lane.b32.xlu1 %v8721_v7, %s6656_s9  ;;  %v9949_v7 = vsel %vm2462_vm13, %v2431_v56, %v5285_v18  ;;  %v12299_v18 = vld [vmem:[#allocation149_spill] sm:$0xff]  ;;  %v710_v11 = vrot.slane %v9906_v46, 2  ;;  %v711_v55 = vrot.slane %v9909_v34, 2  ;;  %v707_v37 = vsel %vm277_vm0, %v705_v0, %v706_v60 }
 0x2da   : > { %12297 = vst [vmem:[#allocation62_spill] sm:$0xff] %v9930_v3  ;;  %v709_v43 = vsel %vm277_vm0, %v706_v60, %v708_v47  ;;  %v713_v33 = vrot.slane %v9919_v23, 2  ;;  %v715_v38 = vrot.slane %v9906_v46, 3  ;;  %v5769_v9 = vunpack.i.l.bf16 %v9365_v44  ;;  %v12305_v0 = vld [vmem:[#allocation49_spill] sm:$0xff] }
 0x2db   : > { %6302 = vrot.lane.b32.xlu0 %v12040_v26, %s6656_s9  ;;  %v9953_v22 = vpop.permute.xlu1 %6027  ;;  %v6326_v26 = vpack.i.bf16 %v9847_v49, %v9842_v4  ;;  %v716_v4 = vrot.slane %v9909_v34, 3  ;;  %v718_v49 = vrot.slane %v9919_v23, 3  ;;  %v712_v39 = vsel %vm358_vm1, %v710_v11, %v711_v55 }
 0x2dc   : > { %12298 = vst [vmem:[#allocation120_spill] sm:$0xff] %v9953_v22  ;;  %v5764_v56 = vunpack.i.l.bf16 %v9383_v20  ;;  %vm3962_vm0 = vcmask 1041408  }
 0x2dd   : > { %v9968_v35 = vpop.permute.xlu0 %6022  ;;  %6317 = vrot.lane.b32.xlu1 %v6316_v14, %s6652_s5  ;;  %v714_v14 = vsel %vm358_vm1, %v711_v55, %v713_v33  ;;  %v10006_v11 = vsel %vm439_vm2, %v716_v4, %v718_v49  ;;  %v6481_v33 = vld [vmem:[%s11296_s1 + $0x30] ss:$0 sps:$4 sm:$0x33]   ;;  %vm12349_vm1 = vcmask 392192  }
 0x2de   : > { %12300 = vst [vmem:[#allocation121_spill] sm:$0xff] %v9968_v35  ;;  %v5765_v35 = vunpack.i.h.bf16 %v9383_v20  ;;  %v6356_v20 = vpack.i.bf16 %v714_v14, %v712_v39  ;;  %v5810_v39 = vunpack.i.h.bf16 %v9413_v17  ;;  %v12310_v14 = vld [vmem:[#allocation48_spill] sm:$0xff]  ;;  %4494 = vmatprep.subr.msk.bf16.mxu0 %vm3962_vm0, %v6481_v33  ;;  %4495 = vmatprep.subr.msk.bf16.mxu1 %vm3962_vm0, %v6481_v33 }
 0x2df   : > { %6312 = vrot.lane.b32.xlu0 %v6311_v48, %s6652_s5  ;;  %v9980_v10 = vpop.permute.xlu1 %6037  ;;  %v6336_v48 = vpack.i.bf16 %v709_v43, %v707_v37  ;;  %v720_v37 = vrot.slane %v9906_v46, 4  ;;  %v723_v43 = vrot.slane %v9919_v23, 4  ;;  %v12308_v46 = vld [vmem:[#allocation15_spill] sm:$0xff] }
 0x2e0   : > { %12301 = vst [vmem:[#allocation29_spill] sm:$0xff] %v9980_v10  ;;  %v5770_v10 = vunpack.i.h.bf16 %v9365_v44  ;;  %v721_v44 = vrot.slane %v9909_v34, 4  ;;  %v3429_v34 = vsel %vm2165_vm4, %v12308_v46, %v5765_v35  ;;  %v12311_v46 = vld [vmem:[#allocation190_spill] sm:$0xff] }
 0x2e1   : > { %v9989_v47 = vpop.permute.xlu0 %6032  ;;  %6327 = vrot.lane.b32.xlu1 %v6326_v26, %s6653_s6  ;;  %v10003_v26 = vsel %vm439_vm2, %v715_v38, %v716_v4  ;;  %v12306_v38 = vld [vmem:[#allocation24_spill] sm:$0xff]  ;;  %v12307_v4 = vld [vmem:[#allocation23_spill] sm:$0xff]  ;;  %vm12379_vm2 = vmmov %vm12349_vm1 }
 0x2e2   : > { %12304 = vst [vmem:[#allocation122_spill] sm:$0xff] %v9989_v47  ;;  %v3430_v49 = vsel %vm2165_vm4, %v12307_v4, %v5769_v9  ;;  %v12309_v47 = vld [vmem:[#allocation11_spill] sm:$0xff]  ;;  %v5805_v9 = vunpack.i.h.bf16 %v9415_v31  ;;  %v10035_v35 = vsel %vm520_vm3, %v720_v37, %v721_v44  ;;  %v6482_v37 = vld [vmem:[%s11296_s1 + $0x28] sm:$0xff]  }
 0x2e3   : > { %6322 = vrot.lane.b32.xlu0 %v12305_v0, %s6653_s6  ;;  %v10000_v60 = vpop.permute.xlu1 %6047  ;;  %v3431_v0 = vsel %vm2165_vm4, %v12306_v38, %v5770_v10  ;;  %v5809_v10 = vunpack.i.l.bf16 %v9413_v17  ;;  %v10038_v38 = vsel %vm520_vm3, %v721_v44, %v723_v43  ;;  %v3964_v17 = vsel %vm3962_vm0, %v6481_v33, 0  ;;  %v12313_v33 = vld [vmem:[#allocation47_spill] sm:$0xff]  ;;  %vm12380_vm3 = vmmov %vm12349_vm1 }
 0x2e4   : > { %v5845_v44 = vunpack.i.h.bf16 %v9513_v36  ;;  %v5844_v43 = vunpack.i.l.bf16 %v9513_v36  ;;  %4435 = vmatpush3.bf16.msra.mxu0 %v3964_v17  ;;  %4487 = vmatpush3.bf16.msra.mxu1 %v3964_v17  ;;  %v12315_v17 = vld [vmem:[#allocation43_spill] sm:$0xff]  ;;  %vm12381_vm0 = vmmov %vm12349_vm1 }
 0x2e5   : > { %v10011_v55 = vpop.permute.xlu0 %6042  ;;  %6337 = vrot.lane.b32.xlu1 %v6336_v48, %s6653_s6  ;;  %v3428_v48 = vsel %vm2165_vm4, %v12309_v47, %v5764_v56  ;;  %v5804_v56 = vunpack.i.l.bf16 %v9415_v31  ;;  %v5849_v47 = vunpack.i.l.bf16 %v9504_v32  ;;  %v12312_v31 = vld [vmem:[#allocation53_spill] sm:$0xff]  ;;  %4436 = vmatprep.subr.bf16.mxu0 %v6482_v37  ;;  %v3446_v36 = vsel %vm2165_vm4, %v12314_v59, %v5809_v10  ;;  %v6483_v59 = vld [vmem:[%s11296_s1 + $0x20] sm:$0xff]  }
 0x2e6   : > { %v3447_v23 = vsel %vm2165_vm4, %v12312_v31, %v5810_v39  ;;  %v3445_v3 = vsel %vm2165_vm4, %v12315_v17, %v5805_v9  ;;  %v5885_v39 = vunpack.i.h.bf16 %v9603_v27  ;;  %v5884_v31 = vunpack.i.l.bf16 %v9603_v27  ;;  %4481 = vmatprep.subr.bf16.mxu1 %v6482_v37  ;;  %v12317_v17 = vld [vmem:[#allocation42_spill] sm:$0xff] }
 0x2e7   : > { %6332 = vrot.lane.b32.xlu0 %v12310_v14, %s6653_s6  ;;  %v10030_v22 = vpop.permute.xlu1 %6057  ;;  %v5850_v14 = vunpack.i.h.bf16 %v9504_v32  ;;  %v3462_v21 = vsel %vm2198_vm5, %v3430_v49, %v5849_v47  ;;  %v5929_v32 = vunpack.i.l.bf16 %v9682_v52  ;;  %v3460_v10 = vsel %vm2198_vm5, %v3428_v48, %v5844_v43 }
 0x2e8   : > { %v3461_v9 = vsel %vm2198_vm5, %v3429_v34, %v5845_v44  ;;  %v5924_v49 = vunpack.i.l.bf16 %v9691_v41  ;;  %4437 = vmatpush3.bf16.msra.mxu0 %v6482_v37  ;;  %4488 = vmatpush3.bf16.msra.mxu1 %v6482_v37  ;;  %v5969_v47 = vunpack.i.l.bf16 %v9776_v61  ;;  %v3477_v48 = vsel %vm2198_vm5, %v3445_v3, %v5885_v39  ;;  %v12318_v39 = vld [vmem:[#allocation79_spill] sm:$0xff] }
 0x2e9   : > { %v10042_v4 = vpop.permute.xlu0 %6052  ;;  %6347 = vrot.lane.b32.xlu1 %v12311_v46, %s6654_s7  ;;  %v5889_v46 = vunpack.i.l.bf16 %v9594_v40  ;;  %v12316_v40 = vld [vmem:[#allocation41_spill] sm:$0xff]  ;;  %v3463_v27 = vsel %vm2198_vm5, %v3431_v0, %v5850_v14  ;;  %4438 = vmatprep.subr.bf16.mxu0 %v6483_v59  ;;  %v5970_v37 = vunpack.i.h.bf16 %v9776_v61  ;;  %v5964_v14 = vunpack.i.l.bf16 %v9791_v1  ;;  %v6484_v61 = vld [vmem:[%s11296_s1 + $0x18] sm:$0xff]  }
 0x2ea   : > { %4482 = vmatprep.subr.bf16.mxu1 %v6483_v59  ;;  %v6009_v44 = vunpack.i.l.bf16 %v9888_v58  ;;  %v3492_v3 = vsel %vm2231_vm6, %v3460_v10, %v5924_v49  ;;  %v6059_v10 = vunpack.i.l.bf16 %v10030_v22  ;;  %v12319_v49 = vpack.i.bf16 %v10006_v11, %v10003_v26 }
 0x2eb   : > { %6342 = vrot.lane.b32.xlu0 %v12313_v33, %s6654_s7  ;;  %v10058_v54 = vpop.permute.xlu1 %6067  ;;  %v3444_v33 = vsel %vm2165_vm4, %v12316_v40, %v5804_v56  ;;  %v3478_v52 = vsel %vm2198_vm5, %v3446_v36, %v5889_v46  ;;  %v3479_v56 = vsel %vm2198_vm5, %v3447_v23, %v5890_v50  ;;  %v3494_v50 = vsel %vm2231_vm6, %v3462_v21, %v5929_v32 }
 0x2ec   : > { %v3476_v34 = vsel %vm2198_vm5, %v3444_v33, %v5884_v31  ;;  %v5965_v23 = vunpack.i.h.bf16 %v9791_v1  ;;  %v6010_v46 = vunpack.i.h.bf16 %v9888_v58  ;;  %v6005_v21 = vunpack.i.h.bf16 %v9897_v30  ;;  %4439 = vmatpush3.bf16.msra.mxu0 %v6483_v59  ;;  %4489 = vmatpush3.bf16.msra.mxu1 %v6483_v59 }
 0x2ed   : > { %v10073_v62 = vpop.permute.xlu0 %6062  ;;  %6357 = vrot.lane.b32.xlu1 %v6356_v20, %s6654_s7  ;;  %v5925_v20 = vunpack.i.h.bf16 %v9691_v41  ;;  %v3495_v41 = vsel %vm2231_vm6, %v3463_v27, %v5930_v25  ;;  %v6004_v25 = vunpack.i.l.bf16 %v9897_v30  ;;  %v3510_v32 = vsel %vm2231_vm6, %v3478_v52, %v5969_v47  ;;  %4440 = vmatprep.subr.bf16.mxu0 %v6484_v61 }
 0x2ee   : > { %v6049_v36 = vunpack.i.l.bf16 %v10000_v60  ;;  %v3511_v58 = vsel %vm2231_vm6, %v3479_v56, %v5970_v37  ;;  %v3508_v30 = vsel %vm2231_vm6, %v3476_v34, %v5964_v14  ;;  %v6045_v40 = vunpack.i.h.bf16 %v10011_v55  ;;  %4483 = vmatprep.subr.bf16.mxu1 %v6484_v61 }
 0x2ef   : > { %6352 = vrot.lane.b32.xlu0 %v12317_v17, %s6654_s7  ;;  %v10089_v0 = vpop.permute.xlu1 %6077  ;;  %v3493_v1 = vsel %vm2231_vm6, %v3461_v9, %v5925_v20  ;;  %v6044_v33 = vunpack.i.l.bf16 %v10011_v55  ;;  %v3509_v59 = vsel %vm2231_vm6, %v3477_v48, %v5965_v23  ;;  %v3526_v27 = vsel %vm2264_vm7, %v3494_v50, %v6009_v44  ;;  %v6485_v55 = vld [vmem:[%s11296_s1 + $0x10] sm:$0xff]  }
 0x2f0   : > { %v3527_v52 = vsel %vm2264_vm7, %v3495_v41, %v6010_v46  ;;  %v3524_v56 = vsel %vm2264_vm7, %v3492_v3, %v6004_v25  ;;  %v3525_v20 = vsel %vm2264_vm7, %v3493_v1, %v6005_v21  ;;  %v6054_v47 = vunpack.i.l.bf16 %v10042_v4  ;;  %4441 = vmatpush3.bf16.msra.mxu0 %v6484_v61  ;;  %4490 = vmatpush3.bf16.msra.mxu1 %v6484_v61  ;;  %v6486_v61 = vld [vmem:[%s11296_s1 + $0x8] sm:$0xff]  }
 0x2f1   : > { %v10099_v43 = vpop.permute.xlu0 %6072  ;;  %6367 = vrot.lane.b32.xlu1 %v9162_v28, %s6655_s8  ;;  %v6050_v28 = vunpack.i.h.bf16 %v10000_v60  ;;  %v6060_v60 = vunpack.i.h.bf16 %v10030_v22  ;;  %v3542_v22 = vsel %vm2264_vm7, %v3510_v32, %v6049_v36  ;;  %v6055_v26 = vunpack.i.h.bf16 %v10042_v4  ;;  %4442 = vmatprep.subr.bf16.mxu0 %v6485_v55 }
 0x2f2   : > { %v6069_v11 = vunpack.i.l.bf16 %v10058_v54  ;;  %v3540_v48 = vsel %vm2264_vm7, %v3508_v30, %v6044_v33  ;;  %v3541_v37 = vsel %vm2264_vm7, %v3509_v59, %v6045_v40  ;;  %v6070_v14 = vunpack.i.h.bf16 %v10058_v54  ;;  %4484 = vmatprep.subr.bf16.mxu1 %v6485_v55  ;;  %v6487_v33 = vld [vmem:[%s11296_s1] sm:$0xff]  }
 0x2f3   : > { %6362 = vrot.lane.b32.xlu0 %v12318_v39, %s6655_s8  ;;  %v10116_v31 = vpop.permute.xlu1 %6087  ;;  %v3543_v17 = vsel %vm2264_vm7, %v3511_v58, %v6050_v28  ;;  %v6065_v50 = vunpack.i.h.bf16 %v10073_v62  ;;  %v3572_v41 = vsel %vm2297_vm8, %v3540_v48, %v6059_v10  ;;  %v3573_v4 = vsel %vm2297_vm8, %v3541_v37, %v6060_v60  ;;  %v12321_v59 = vld [vmem:[#allocation164_spill] sm:$0xff] }
 0x2f4   : > { %v6064_v23 = vunpack.i.l.bf16 %v10073_v62  ;;  %v6079_v44 = vunpack.i.l.bf16 %v10089_v0  ;;  %v3556_v54 = vsel %vm2297_vm8, %v3524_v56, %v6054_v47  ;;  %v6080_v3 = vunpack.i.h.bf16 %v10089_v0  ;;  %4443 = vmatpush3.bf16.msra.mxu0 %v6485_v55  ;;  %4491 = vmatpush3.bf16.msra.mxu1 %v6485_v55 }
 0x2f5   : > { %v10126_v9 = vpop.permute.xlu0 %6082  ;;  %6377 = vrot.lane.b32.xlu1 %v12319_v49, %s6655_s8  ;;  %v6075_v46 = vunpack.i.h.bf16 %v10099_v43  ;;  %v6074_v21 = vunpack.i.l.bf16 %v10099_v43  ;;  %v3557_v62 = vsel %vm2297_vm8, %v3525_v20, %v6055_v26  ;;  %v3574_v25 = vsel %vm2297_vm8, %v3542_v22, %v6069_v11  ;;  %4444 = vmatprep.subr.bf16.mxu0 %v6486_v61 }
 0x2f6   : > { %v6089_v1 = vunpack.i.l.bf16 %v10116_v31  ;;  %v3575_v0 = vsel %vm2297_vm8, %v3543_v17, %v6070_v14  ;;  %v3559_v28 = vsel %vm2297_vm8, %v3527_v52, %v6065_v50  ;;  %v6084_v43 = vunpack.i.l.bf16 %v10126_v9  ;;  %4485 = vmatprep.subr.bf16.mxu1 %v6486_v61 }
 0x2f7   : > { %6372 = vrot.lane.b32.xlu0 %v12110_v8, %s6655_s8  ;;  %v6098_v34 = vpop.permute.xlu1 %6097  ;;  %v3558_v39 = vsel %vm2297_vm8, %v3526_v27, %v6064_v23  ;;  %v3604_v58 = vsel %vm2330_vm9, %v3572_v41, %v6079_v44  ;;  %v5405_v60 = vunpack.i.h.bf16 %v12321_v59  ;;  %v3605_v10 = vsel %vm2330_vm9, %v3573_v4, %v6080_v3 }
 0x2f8   : > { %v6099_v36 = vunpack.i.l.bf16 %v6098_v34  ;;  %v6100_v30 = vunpack.i.h.bf16 %v6098_v34  ;;  %v3588_v27 = vsel %vm2330_vm9, %v3556_v54, %v6074_v21  ;;  %v3589_v49 = vsel %vm2330_vm9, %v3557_v62, %v6075_v46  ;;  %4445 = vmatpush3.bf16.msra.mxu0 %v6486_v61  ;;  %4492 = vmatpush3.bf16.msra.mxu1 %v6486_v61 }
 0x2f9   : > { %v6093_v8 = vpop.permute.xlu0 %6092  ;;  %6387 = vrot.lane.b32.xlu1 %v9281_v63, %s6656_s9  ;;  %v6090_v63 = vunpack.i.h.bf16 %v10116_v31  ;;  %v3606_v55 = vsel %vm2330_vm9, %v3574_v25, %v6089_v1  ;;  %4446 = vmatprep.subr.bf16.mxu0 %v6487_v33  ;;  %v3590_v20 = vsel %vm2330_vm9, %v3558_v39, %v6084_v43  ;;  %v5404_v39 = vunpack.i.l.bf16 %v12321_v59  ;;  %v12332_v59 = vld [vmem:[#allocation30_spill] sm:$0xff] }
 0x2fa   : > { %v6094_v40 = vunpack.i.l.bf16 %v6093_v8  ;;  %v3636_v47 = vsel %vm2363_vm10, %v3604_v58, %v6099_v36  ;;  %4486 = vmatprep.subr.bf16.mxu1 %v6487_v33  ;;  %v3637_v26 = vsel %vm2363_vm10, %v3605_v10, %v6100_v30 }
 0x2fb   : > { %6382 = vrot.lane.b32.xlu0 %v12043_v29, %s6656_s9  ;;  %v6108_v32 = vpop.permute.xlu1 %6107  ;;  %v12320_v29 = vpack.i.bf16 %v10038_v38, %v10035_v35  ;;  %v3607_v52 = vsel %vm2330_vm9, %v3575_v0, %v6090_v63  ;;  %v6085_v35 = vunpack.i.h.bf16 %v10126_v9  ;;  %v6095_v38 = vunpack.i.h.bf16 %v6093_v8 }
 0x2fc   : > { %v3620_v11 = vsel %vm2363_vm10, %v3588_v27, %v6094_v40  ;;  %v6110_v34 = vunpack.i.h.bf16 %v6108_v32  ;;  %v6109_v48 = vunpack.i.l.bf16 %v6108_v32  ;;  %4447 = vmatpush3.bf16.msra.mxu0 %v6487_v33  ;;  %4493 = vmatpush3.bf16.msra.mxu1 %v6487_v33  ;;  %v12323_v33 = vunpack.i.l.bf16 %v12299_v18 }
 0x2fd   : > { %v6103_v31 = vpop.permute.xlu0 %6102  ;;  %6397 = vrot.lane.b32.xlu1 %v12320_v29, %s6656_s9  ;;  %v3621_v41 = vsel %vm2363_vm10, %v3589_v49, %v6095_v38  ;;  %v3591_v21 = vsel %vm2330_vm9, %v3559_v28, %v6085_v35 }
 0x2fe   : > { %v6105_v4 = vunpack.i.h.bf16 %v6103_v31  ;;  %v6104_v23 = vunpack.i.l.bf16 %v6103_v31  ;;  %v3638_v62 = vsel %vm2363_vm10, %v3606_v55, %v6109_v48  ;;  %v3639_v25 = vsel %vm2363_vm10, %v3607_v52, %v6110_v34  ;;  %v12331_v34 = vld [vmem:[#allocation65_spill] sm:$0xff] }
 0x2ff   : > { %6392 = vrot.lane.b32.xlu0 %v12042_v24, %s6656_s9  ;;  %v6118_v56 = vpop.permute.xlu1 %6117  ;;  %s6664_s9 = smov 64   ;;  %v12322_v31 = vunpack.i.h.bf16 %v12296_v2  ;;  %v10218_v10 = vsel %vm11701_vm14, %v9937_v19, %v12323_v33  ;;  %v12324_v55 = vunpack.i.h.bf16 %v12299_v18  ;;  %v5780_v2 = vunpack.i.h.bf16 %v9389_v16  ;;  %v12344_v33 = vld [vmem:[#allocation50_spill] sm:$0xff] }
 0x300   : > { %v6120_v22 = vunpack.i.h.bf16 %v6118_v56  ;;  %v6119_v17 = vunpack.i.l.bf16 %v6118_v56  ;;  %v3622_v58 = vsel %vm2363_vm10, %v3590_v20, %v6104_v23  ;;  %v3623_v28 = vsel %vm2363_vm10, %v3591_v21, %v6105_v4  ;;  %v12335_v4 = vld [vmem:[#allocation158_spill] sm:$0xff]  ;;  %v12338_v21 = vld [vmem:[#allocation20_spill] sm:$0xff] }
 0x301   : > { %v6113_v9 = vpop.permute.xlu0 %6112  ;;  %v2480_v29 = vsel %vm2462_vm13, %v9928_v45, %v12322_v31  ;;  %v10226_v52 = vsel %vm11701_vm14, %v9943_v13, %v12324_v55  ;;  %v5779_v45 = vunpack.i.l.bf16 %v9389_v16  ;;  %v12325_v19 = vunpack.i.l.bf16 %v12302_v53  ;;  %v12343_v31 = vld [vmem:[#allocation51_spill] sm:$0xff] }
 0x302   : > { %v3668_v37 = vsel %vm2396_vm11, %v3636_v47, %v6119_v17  ;;  %v3669_v24 = vsel %vm2396_vm11, %v3637_v26, %v6120_v22  ;;  %v6115_v14 = vunpack.i.h.bf16 %v6113_v9  ;;  %v6114_v50 = vunpack.i.l.bf16 %v6113_v9  ;;  %v12330_v26 = vld [vmem:[#allocation88_spill] sm:$0xff] }
 0x303   : > { %v6406_v44 = vpack.i.bf16 %v3669_v24, %v3668_v37  ;;  %v6128_v8 = vpop.permute.xlu1 %6127  ;;  %v10237_v56 = vsel %vm11701_vm14, %v9946_v5, %v12325_v19  ;;  %v12326_v18 = vunpack.i.h.bf16 %v12302_v53  ;;  %v12327_v20 = vunpack.i.l.bf16 %v12303_v6  ;;  %v12329_v53 = vld [vmem:[#allocation57_spill] sm:$0xff]  ;;  %v12333_v9 = vld [vmem:[#allocation28_spill] sm:$0xff]  ;;  %v12334_v24 = vld [vmem:[#allocation90_spill] sm:$0xff] }
 0x304   : > { %v3652_v61 = vsel %vm2396_vm11, %v3620_v11, %v6114_v50  ;;  %v3653_v54 = vsel %vm2396_vm11, %v3621_v41, %v6115_v14  ;;  %v6130_v3 = vunpack.i.h.bf16 %v6128_v8  ;;  %v6129_v46 = vunpack.i.l.bf16 %v6128_v8  ;;  %v12336_v8 = vld [vmem:[#allocation8_spill] sm:$0xff] }
 0x305   : > { %v6401_v63 = vpack.i.bf16 %v3653_v54, %v3652_v61  ;;  %v6123_v1 = vpop.permute.xlu0 %6122  ;;  %6407 = vrot.lane.b32.xlu1 %v6406_v44, %s6664_s9  ;;  %v10243_v13 = vsel %vm11701_vm14, %v9949_v7, %v12326_v18  ;;  %v10249_v16 = vsel %vm11701_vm14, %v9958_v57, %v12327_v20  ;;  %v12328_v47 = vunpack.i.h.bf16 %v12303_v6 }
 0x306   : > { %v3670_v32 = vsel %vm2396_vm11, %v3638_v62, %v6129_v46  ;;  %v3671_v0 = vsel %vm2396_vm11, %v3639_v25, %v6130_v3  ;;  %v6125_v43 = vunpack.i.h.bf16 %v6123_v1  ;;  %v6124_v36 = vunpack.i.l.bf16 %v6123_v1  ;;  %v12337_v3 = vld [vmem:[#allocation21_spill] sm:$0xff] }
 0x307   : > { %v6416_v30 = vpack.i.bf16 %v3671_v0, %v3670_v32  ;;  %6402 = vrot.lane.b32.xlu0 %v6401_v63, %s6664_s9  ;;  %v10208_v40 = vpop.permute.xlu1 %6137  ;;  %v10255_v22 = vsel %vm11701_vm14, %v9961_v42, %v12328_v47  ;;  %v10259_v5 = vsel %vm11701_vm14, %v9965_v12, %v5404_v39  ;;  %v10264_v7 = vsel %vm11701_vm14, %v2480_v29, %v5405_v60  ;;  %v12339_v25 = vld [vmem:[#allocation101_spill] sm:$0xff]  ;;  %v12340_v0 = vld [vmem:[#allocation59_spill] sm:$0xff] }
 0x308   : > { %v3654_v27 = vsel %vm2396_vm11, %v3622_v58, %v6124_v36  ;;  %v3655_v49 = vsel %vm2396_vm11, %v3623_v28, %v6125_v43  ;;  %v5775_v17 = vunpack.i.h.bf16 %v12329_v53  ;;  %v5774_v57 = vunpack.i.l.bf16 %v12329_v53  ;;  %v12341_v36 = vld [vmem:[#allocation58_spill] sm:$0xff]  ;;  %v12342_v58 = vld [vmem:[#allocation176_spill] sm:$0xff] }
 0x309   : > { %v6411_v35 = vpack.i.bf16 %v3655_v49, %v3654_v27  ;;  %v10230_v38 = vpop.permute.xlu0 %6132  ;;  %6417 = vrot.lane.b32.xlu1 %v6416_v30, %s6664_s9  ;;  %v5450_v42 = vunpack.i.h.bf16 %v12330_v26  ;;  %v5449_v11 = vunpack.i.l.bf16 %v12330_v26  ;;  %v5820_v12 = vunpack.i.h.bf16 %v12331_v34 }
 0x30a   : > { %v5819_v48 = vunpack.i.l.bf16 %v12331_v34  ;;  %v3435_v60 = vsel %vm2165_vm4, %v12332_v59, %v5780_v2  ;;  %v3434_v37 = vsel %vm2165_vm4, %v12333_v9, %v5779_v45  ;;  %v5815_v14 = vunpack.i.h.bf16 %v12334_v24 }
 0x30b   : > { %6412 = vrot.lane.b32.xlu0 %v6411_v35, %s6664_s9  ;;  %v10269_v6 = vpop.permute.xlu1 %6147  ;;  %v5814_v50 = vunpack.i.l.bf16 %v12334_v24  ;;  %v5860_v23 = vunpack.i.h.bf16 %v12335_v4  ;;  %v5859_v44 = vunpack.i.l.bf16 %v12335_v4  ;;  %v5855_v61 = vunpack.i.h.bf16 %v12336_v8 }
 0x30c   : > { %v5854_v54 = vunpack.i.l.bf16 %v12336_v8  ;;  %v3433_v46 = vsel %vm2165_vm4, %v12337_v3, %v5775_v17  ;;  %v3432_v62 = vsel %vm2165_vm4, %v12338_v21, %v5774_v57  ;;  %v5900_v63 = vunpack.i.h.bf16 %v12339_v25 }
 0x30d   : > { %v10281_v41 = vpop.permute.xlu0 %6142  ;;  %v5899_v1 = vunpack.i.l.bf16 %v12339_v25  ;;  %v3451_v43 = vsel %vm2165_vm4, %v12340_v0, %v5820_v12  ;;  %v3450_v39 = vsel %vm2165_vm4, %v12341_v36, %v5819_v48  ;;  %v5895_v28 = vunpack.i.h.bf16 %v12342_v58  ;;  %v12345_v12 = vld [vmem:[#allocation19_spill] sm:$0xff] }
 0x30e   : > { %v5894_v30 = vunpack.i.l.bf16 %v12342_v58  ;;  %v3449_v29 = vsel %vm2165_vm4, %v12343_v31, %v5815_v14  ;;  %v3448_v27 = vsel %vm2165_vm4, %v12344_v33, %v5814_v50  ;;  %v5940_v49 = vunpack.i.h.bf16 %v9706_v15 }
 0x30f   : > { %v10293_v32 = vpop.permute.xlu1 %6157  ;;  %v5939_v55 = vunpack.i.l.bf16 %v9706_v15  ;;  %v3466_v45 = vsel %vm2198_vm5, %v3434_v37, %v5859_v44  ;;  %v3467_v35 = vsel %vm2198_vm5, %v3435_v60, %v5860_v23  ;;  %v3464_v19 = vsel %vm2198_vm5, %v3432_v62, %v5854_v54  ;;  %v12346_v37 = vld [vmem:[#allocation87_spill] sm:$0xff]  ;;  %v12348_v44 = vld [vmem:[#allocation62_spill] sm:$0xff] }
 0x310   : > { %v3465_v18 = vsel %vm2198_vm5, %v3433_v46, %v5855_v61  ;;  %v3482_v20 = vsel %vm2198_vm5, %v3450_v39, %v5899_v1  ;;  %v3483_v47 = vsel %vm2198_vm5, %v3451_v43, %v5900_v63  ;;  %v5935_v53 = vunpack.i.h.bf16 %v9717_v51 }
 0x311   : > { %v10307_v2 = vpop.permute.xlu0 %6152  ;;  %v5934_v17 = vunpack.i.l.bf16 %v9717_v51  ;;  %v3480_v15 = vsel %vm2198_vm5, %v3448_v27, %v5894_v30  ;;  %v3481_v34 = vsel %vm2198_vm5, %v3449_v29, %v5895_v28  ;;  %v5980_v48 = vunpack.i.h.bf16 %v12345_v12  ;;  %v12347_v51 = vld [vmem:[#allocation60_spill] sm:$0xff] }
 0x312   : > { %v5979_v59 = vunpack.i.l.bf16 %v12345_v12  ;;  %v3498_v60 = vsel %vm2231_vm6, %v3466_v45, %v5939_v55  ;;  %v3499_v9 = vsel %vm2231_vm6, %v3467_v35, %v5940_v49  ;;  %v5975_v24 = vunpack.i.h.bf16 %v12346_v37 }
 0x313   : > { %v10317_v57 = vpop.permute.xlu1 %6167  ;;  %v5974_v14 = vunpack.i.l.bf16 %v12346_v37  ;;  %v6020_v4 = vunpack.i.h.bf16 %v12347_v51  ;;  %v6019_v23 = vunpack.i.l.bf16 %v12347_v51  ;;  %v6015_v8 = vunpack.i.h.bf16 %v12348_v44 }
 0x314   : > { %v6014_v61 = vunpack.i.l.bf16 %v12348_v44  ;;  %v3496_v54 = vsel %vm2231_vm6, %v3464_v19, %v5934_v17  ;;  %v3497_v3 = vsel %vm2231_vm6, %v3465_v18, %v5935_v53  ;;  %v6140_v46 = vunpack.i.h.bf16 %v10208_v40 }
 0x315   : > { %v6163_v50 = vpop.permute.xlu0 %6162  ;;  %v6139_v21 = vunpack.i.l.bf16 %v10208_v40  ;;  %v3514_v25 = vsel %vm2231_vm6, %v3482_v20, %v5979_v59  ;;  %v3515_v63 = vsel %vm2231_vm6, %v3483_v47, %v5980_v48  ;;  %v6135_v1 = vunpack.i.h.bf16 %v10230_v38 }
 0x316   : > { %v6134_v0 = vunpack.i.l.bf16 %v10230_v38  ;;  %v3512_v43 = vsel %vm2231_vm6, %v3480_v15, %v5974_v14  ;;  %v3513_v36 = vsel %vm2231_vm6, %v3481_v34, %v5975_v24  ;;  %v6150_v39 = vunpack.i.h.bf16 %v10269_v6 }
 0x317   : > { %v6178_v62 = vpop.permute.xlu1 %6177  ;;  %v6149_v58 = vunpack.i.l.bf16 %v10269_v6  ;;  %v3530_v40 = vsel %vm2264_vm7, %v3498_v60, %v6019_v23  ;;  %v3531_v30 = vsel %vm2264_vm7, %v3499_v9, %v6020_v4  ;;  %v3528_v31 = vsel %vm2264_vm7, %v3496_v54, %v6014_v61 }
 0x318   : > { %v3529_v29 = vsel %vm2264_vm7, %v3497_v3, %v6015_v8  ;;  %v3546_v38 = vsel %vm2264_vm7, %v3514_v25, %v6139_v21  ;;  %v3547_v33 = vsel %vm2264_vm7, %v3515_v63, %v6140_v46  ;;  %v6145_v27 = vunpack.i.h.bf16 %v10281_v41 }
 0x319   : > { %v10343_v28 = vpop.permute.xlu0 %6172  ;;  %v6144_v49 = vunpack.i.l.bf16 %v10281_v41  ;;  %v3544_v6 = vsel %vm2264_vm7, %v3512_v43, %v6134_v0  ;;  %v3545_v45 = vsel %vm2264_vm7, %v3513_v36, %v6135_v1  ;;  %v6160_v35 = vunpack.i.h.bf16 %v10293_v32 }
 0x31a   : > { %v6159_v19 = vunpack.i.l.bf16 %v10293_v32  ;;  %v3576_v18 = vsel %vm2297_vm8, %v3544_v6, %v6149_v58  ;;  %v3577_v20 = vsel %vm2297_vm8, %v3545_v45, %v6150_v39  ;;  %v6155_v47 = vunpack.i.h.bf16 %v10307_v2 }
 0x31b   : > { %v6188_v55 = vpop.permute.xlu1 %6187  ;;  %v6154_v53 = vunpack.i.l.bf16 %v10307_v2  ;;  %v6170_v41 = vunpack.i.h.bf16 %v10317_v57  ;;  %v6169_v15 = vunpack.i.l.bf16 %v10317_v57  ;;  %v6165_v34 = vunpack.i.h.bf16 %v6163_v50 }
 0x31c   : > { %v6164_v12 = vunpack.i.l.bf16 %v6163_v50  ;;  %v3560_v48 = vsel %vm2297_vm8, %v3528_v31, %v6144_v49  ;;  %v3561_v59 = vsel %vm2297_vm8, %v3529_v29, %v6145_v27  ;;  %v6180_v32 = vunpack.i.h.bf16 %v6178_v62 }
 0x31d   : > { %v6183_v17 = vpop.permute.xlu0 %6182  ;;  %v6179_v60 = vunpack.i.l.bf16 %v6178_v62  ;;  %v3578_v37 = vsel %vm2297_vm8, %v3546_v38, %v6159_v19  ;;  %v3579_v24 = vsel %vm2297_vm8, %v3547_v33, %v6160_v35  ;;  %v6174_v2 = vunpack.i.l.bf16 %v10343_v28 }
 0x31e   : > { %v6189_v14 = vunpack.i.l.bf16 %v6188_v55  ;;  %v3563_v51 = vsel %vm2297_vm8, %v3531_v30, %v6155_v47  ;;  %v3562_v57 = vsel %vm2297_vm8, %v3530_v40, %v6154_v53  ;;  %v6190_v4 = vunpack.i.h.bf16 %v6188_v55 }
 0x31f   : > { %v6198_v9 = vpop.permute.xlu1 %6197  ;;  %v6184_v50 = vunpack.i.l.bf16 %v6183_v17  ;;  %v3608_v44 = vsel %vm2330_vm9, %v3576_v18, %v6169_v15  ;;  %v3609_v8 = vsel %vm2330_vm9, %v3577_v20, %v6170_v41  ;;  %v3592_v61 = vsel %vm2330_vm9, %v3560_v48, %v6164_v12 }
 0x320   : > { %v3593_v54 = vsel %vm2330_vm9, %v3561_v59, %v6165_v34  ;;  %v3610_v3 = vsel %vm2330_vm9, %v3578_v37, %v6179_v60  ;;  %v3611_v46 = vsel %vm2330_vm9, %v3579_v24, %v6180_v32  ;;  %v6175_v21 = vunpack.i.h.bf16 %v10343_v28  ;;  %v12350_v24 = vld [vmem:[#allocation89_spill] sm:$0xff] }
 0x321   : > { %v6193_v23 = vpop.permute.xlu0 %6192  ;;  %v6185_v62 = vunpack.i.h.bf16 %v6183_v17  ;;  %v3594_v63 = vsel %vm2330_vm9, %v3562_v57, %v6174_v2  ;;  %v3640_v1 = vsel %vm2363_vm10, %v3608_v44, %v6189_v14  ;;  %v3641_v36 = vsel %vm2363_vm10, %v3609_v8, %v6190_v4  ;;  %v12351_v4 = vld [vmem:[#allocation97_spill] sm:$0xff] }
 0x322   : > { %v3624_v39 = vsel %vm2363_vm10, %v3592_v61, %v6184_v50  ;;  %v6200_v58 = vunpack.i.h.bf16 %v6198_v9  ;;  %v6199_v40 = vunpack.i.l.bf16 %v6198_v9  ;;  %v6195_v27 = vunpack.i.h.bf16 %v6193_v23 }
 0x323   : > { %v6208_v25 = vpop.permute.xlu1 %6207  ;;  %v3625_v33 = vsel %vm2363_vm10, %v3593_v54, %v6185_v62  ;;  %v6194_v49 = vunpack.i.l.bf16 %v6193_v23  ;;  %v3595_v20 = vsel %vm2330_vm9, %v3563_v51, %v6175_v21  ;;  %v10396_v59 = vsel %vm12349_vm1, %v10218_v10, %v5449_v11  ;;  %v12352_v11 = vld [vmem:[#allocation25_spill] sm:$0xff]  ;;  %v12353_v54 = vld [vmem:[#allocation98_spill] sm:$0xff]  ;;  %vm12382_vm1 = vmmov %vm12381_vm0 }
 0x324   : > { %v6210_v0 = vunpack.i.h.bf16 %v6208_v25  ;;  %v6209_v43 = vunpack.i.l.bf16 %v6208_v25  ;;  %v3642_v47 = vsel %vm2363_vm10, %v3610_v3, %v6199_v40  ;;  %v3643_v53 = vsel %vm2363_vm10, %v3611_v46, %v6200_v58  ;;  %v12354_v21 = vld [vmem:[#allocation186_spill] sm:$0xff]  ;;  %v12357_v40 = vld [vmem:[#allocation73_spill] sm:$0xff] }
 0x325   : > { %v6203_v30 = vpop.permute.xlu0 %6202  ;;  %v3626_v32 = vsel %vm2363_vm10, %v3594_v63, %v6194_v49  ;;  %v3627_v60 = vsel %vm2363_vm10, %v3595_v20, %v6195_v27  ;;  %v5445_v2 = vunpack.i.h.bf16 %v12350_v24  ;;  %v5444_v14 = vunpack.i.l.bf16 %v12350_v24  ;;  %v12355_v63 = vld [vmem:[#allocation187_spill] sm:$0xff] }
 0x326   : > { %v3672_v31 = vsel %vm2396_vm11, %v3640_v1, %v6209_v43  ;;  %v3673_v29 = vsel %vm2396_vm11, %v3641_v36, %v6210_v0  ;;  %v6205_v28 = vunpack.i.h.bf16 %v6203_v30  ;;  %v6204_v38 = vunpack.i.l.bf16 %v6203_v30  ;;  %v12356_v0 = vld [vmem:[#allocation54_spill] sm:$0xff]  ;;  %v12360_v27 = vld [vmem:[#allocation35_spill] sm:$0xff] }
 0x327   : > { %v6426_v55 = vpack.i.bf16 %v3673_v29, %v3672_v31  ;;  %v6218_v6 = vpop.permute.xlu1 %6217  ;;  %v5490_v10 = vunpack.i.h.bf16 %v12351_v4  ;;  %v5790_v50 = vunpack.i.h.bf16 %v12352_v11  ;;  %v5789_v23 = vunpack.i.l.bf16 %v12352_v11  ;;  %v12358_v31 = vld [vmem:[#allocation92_spill] sm:$0xff]  ;;  %v12368_v11 = vld [vmem:[#allocation111_spill] sm:$0xff] }
 0x328   : > { %v3656_v45 = vsel %vm2396_vm11, %v3624_v39, %v6204_v38  ;;  %v3657_v35 = vsel %vm2396_vm11, %v3625_v33, %v6205_v28  ;;  %v6220_v19 = vunpack.i.h.bf16 %v6218_v6  ;;  %v6219_v18 = vunpack.i.l.bf16 %v6218_v6  ;;  %v12359_v38 = vld [vmem:[#allocation37_spill] sm:$0xff] }
 0x329   : > { %v6421_v17 = vpack.i.bf16 %v3657_v35, %v3656_v45  ;;  %v6213_v41 = vpop.permute.xlu0 %6212  ;;  %6427 = vrot.lane.b32.xlu1 %v6426_v55, %s6664_s9  ;;  %v5489_v61 = vunpack.i.l.bf16 %v12351_v4  ;;  %v5485_v3 = vunpack.i.h.bf16 %v12353_v54  ;;  %v5484_v46 = vunpack.i.l.bf16 %v12353_v54  ;;  %v12361_v55 = vld [vmem:[#allocation94_spill] sm:$0xff] }
 0x32a   : > { %v3674_v15 = vsel %vm2396_vm11, %v3642_v47, %v6219_v18  ;;  %v3675_v34 = vsel %vm2396_vm11, %v3643_v53, %v6220_v19  ;;  %v6215_v12 = vunpack.i.h.bf16 %v6213_v41  ;;  %v6214_v48 = vunpack.i.l.bf16 %v6213_v41  ;;  %v12362_v19 = vld [vmem:[#allocation157_spill] sm:$0xff]  ;;  %v12364_v41 = vld [vmem:[#allocation27_spill] sm:$0xff]  ;;  %v12393_v4 = vld [vmem:[#allocation38_spill] sm:$0xff] }
 0x32b   : > { %v6436_v9 = vpack.i.bf16 %v3675_v34, %v3674_v15  ;;  %6422 = vrot.lane.b32.xlu0 %v6421_v17, %s6664_s9  ;;  %v10401_v37 = vpop.permute.xlu1 %6227  ;;  %v5530_v62 = vunpack.i.h.bf16 %v12354_v21  ;;  %v5529_v25 = vunpack.i.l.bf16 %v12354_v21  ;;  %v5525_v1 = vunpack.i.h.bf16 %v12355_v63  ;;  %v12363_v47 = vld [vmem:[#allocation9_spill] sm:$0xff]  ;;  %v12365_v34 = vld [vmem:[#allocation26_spill] sm:$0xff] }
 0x32c   : > { %v3658_v51 = vsel %vm2396_vm11, %v3626_v32, %v6214_v48  ;;  %v3659_v57 = vsel %vm2396_vm11, %v3627_v60, %v6215_v12  ;;  %v5785_v43 = vunpack.i.h.bf16 %v12356_v0  ;;  %v5784_v36 = vunpack.i.l.bf16 %v12356_v0  ;;  %v12366_v48 = vld [vmem:[#allocation18_spill] sm:$0xff] }
 0x32d   : > { %v6431_v44 = vpack.i.bf16 %v3659_v57, %v3658_v51  ;;  %v10410_v8 = vpop.permute.xlu0 %6222  ;;  %6437 = vrot.lane.b32.xlu1 %v6436_v9, %s6664_s9  ;;  %v5524_v58 = vunpack.i.l.bf16 %v12355_v63  ;;  %v5570_v30 = vunpack.i.h.bf16 %v12357_v40  ;;  %v5830_v29 = vunpack.i.h.bf16 %v12358_v31  ;;  %v12367_v51 = vld [vmem:[#allocation112_spill] sm:$0xff] }
 0x32e   : > { %v5829_v28 = vunpack.i.l.bf16 %v12358_v31  ;;  %v3439_v33 = vsel %vm2165_vm4, %v12359_v38, %v5790_v50  ;;  %v3438_v49 = vsel %vm2165_vm4, %v12360_v27, %v5789_v23  ;;  %v5825_v6 = vunpack.i.h.bf16 %v12361_v55  ;;  %v12369_v23 = vld [vmem:[#allocation102_spill] sm:$0xff]  ;;  %v12372_v27 = vld [vmem:[#allocation165_spill] sm:$0xff] }
 0x32f   : > { %6432 = vrot.lane.b32.xlu0 %v6431_v44, %s6664_s9  ;;  %v10422_v39 = vpop.permute.xlu1 %6237  ;;  %v5824_v45 = vunpack.i.l.bf16 %v12361_v55  ;;  %v5870_v18 = vunpack.i.h.bf16 %v12362_v19  ;;  %v5869_v20 = vunpack.i.l.bf16 %v12362_v19  ;;  %v5865_v53 = vunpack.i.h.bf16 %v12363_v47 }
 0x330   : > { %v5864_v17 = vunpack.i.l.bf16 %v12363_v47  ;;  %v3437_v15 = vsel %vm2165_vm4, %v12364_v41, %v5785_v43  ;;  %v3436_v12 = vsel %vm2165_vm4, %v12365_v34, %v5784_v36  ;;  %v5910_v32 = vunpack.i.h.bf16 %v12366_v48  ;;  %v12370_v43 = vld [vmem:[#allocation56_spill] sm:$0xff]  ;;  %v12371_v36 = vld [vmem:[#allocation55_spill] sm:$0xff] }
 0x331   : > { %v10434_v35 = vpop.permute.xlu0 %6232  ;;  %v5909_v60 = vunpack.i.l.bf16 %v12366_v48  ;;  %v3455_v57 = vsel %vm2165_vm4, %v12367_v51, %v5830_v29  ;;  %v3454_v50 = vsel %vm2165_vm4, %v12368_v11, %v5829_v28  ;;  %v5905_v44 = vunpack.i.h.bf16 %v12369_v23  ;;  %v12373_v51 = vld [vmem:[#allocation85_spill] sm:$0xff] }
 0x332   : > { %v5904_v0 = vunpack.i.l.bf16 %v12369_v23  ;;  %v3453_v31 = vsel %vm2165_vm4, %v12370_v43, %v5825_v6  ;;  %v3452_v38 = vsel %vm2165_vm4, %v12371_v36, %v5824_v45  ;;  %v5950_v55 = vunpack.i.h.bf16 %v12372_v27 }
 0x333   : > { %v10446_v9 = vpop.permute.xlu1 %6247  ;;  %v5949_v19 = vunpack.i.l.bf16 %v12372_v27  ;;  %v3470_v29 = vsel %vm2198_vm5, %v3438_v49, %v5869_v20  ;;  %v3471_v28 = vsel %vm2198_vm5, %v3439_v33, %v5870_v18  ;;  %v3468_v41 = vsel %vm2198_vm5, %v3436_v12, %v5864_v17  ;;  %v12374_v20 = vld [vmem:[#allocation61_spill] sm:$0xff] }
 0x334   : > { %v3469_v34 = vsel %vm2198_vm5, %v3437_v15, %v5865_v53  ;;  %v3486_v48 = vsel %vm2198_vm5, %v3454_v50, %v5909_v60  ;;  %v3487_v6 = vsel %vm2198_vm5, %v3455_v57, %v5910_v32  ;;  %v5945_v45 = vunpack.i.h.bf16 %v12373_v51  ;;  %v12375_v15 = vld [vmem:[#allocation110_spill] sm:$0xff]  ;;  %v12376_v57 = vld [vmem:[#allocation120_spill] sm:$0xff] }
 0x335   : > { %v10460_v47 = vpop.permute.xlu0 %6242  ;;  %v5944_v11 = vunpack.i.l.bf16 %v12373_v51  ;;  %v3484_v43 = vsel %vm2198_vm5, %v3452_v38, %v5904_v0  ;;  %v3485_v49 = vsel %vm2198_vm5, %v3453_v31, %v5905_v44  ;;  %v5990_v33 = vunpack.i.h.bf16 %v12374_v20  ;;  %v12377_v0 = vld [vmem:[#allocation121_spill] sm:$0xff] }
 0x336   : > { %v5989_v18 = vunpack.i.l.bf16 %v12374_v20  ;;  %v3502_v53 = vsel %vm2231_vm6, %v3470_v29, %v5949_v19  ;;  %v3503_v17 = vsel %vm2231_vm6, %v3471_v28, %v5950_v55  ;;  %v5985_v12 = vunpack.i.h.bf16 %v12375_v15 }
 0x337   : > { %v10470_v23 = vpop.permute.xlu1 %6257  ;;  %v5984_v32 = vunpack.i.l.bf16 %v12375_v15  ;;  %v6030_v50 = vunpack.i.h.bf16 %v12376_v57  ;;  %v6029_v36 = vunpack.i.l.bf16 %v12376_v57  ;;  %v6025_v38 = vunpack.i.h.bf16 %v12377_v0 }
 0x338   : > { %v6024_v44 = vunpack.i.l.bf16 %v12377_v0  ;;  %v3500_v31 = vsel %vm2231_vm6, %v3468_v41, %v5944_v11  ;;  %v3501_v27 = vsel %vm2231_vm6, %v3469_v34, %v5945_v45  ;;  %v6230_v19 = vunpack.i.h.bf16 %v10401_v37 }
 0x339   : > { %v6253_v60 = vpop.permute.xlu0 %6252  ;;  %v6229_v55 = vunpack.i.l.bf16 %v10401_v37  ;;  %v3518_v28 = vsel %vm2231_vm6, %v3486_v48, %v5989_v18  ;;  %v3519_v51 = vsel %vm2231_vm6, %v3487_v6, %v5990_v33  ;;  %v6225_v20 = vunpack.i.h.bf16 %v10410_v8 }
 0x33a   : > { %v6224_v15 = vunpack.i.l.bf16 %v10410_v8  ;;  %v3516_v57 = vsel %vm2231_vm6, %v3484_v43, %v5984_v32  ;;  %v3517_v0 = vsel %vm2231_vm6, %v3485_v49, %v5985_v12  ;;  %v6240_v41 = vunpack.i.h.bf16 %v10422_v39 }
 0x33b   : > { %v6268_v29 = vpop.permute.xlu1 %6267  ;;  %v6239_v34 = vunpack.i.l.bf16 %v10422_v39  ;;  %v3534_v37 = vsel %vm2264_vm7, %v3502_v53, %v6029_v36  ;;  %v3535_v48 = vsel %vm2264_vm7, %v3503_v17, %v6030_v50  ;;  %v3532_v6 = vsel %vm2264_vm7, %v3500_v31, %v6024_v44 }
 0x33c   : > { %v3533_v11 = vsel %vm2264_vm7, %v3501_v27, %v6025_v38  ;;  %v3550_v8 = vsel %vm2264_vm7, %v3518_v28, %v6229_v55  ;;  %v3551_v43 = vsel %vm2264_vm7, %v3519_v51, %v6230_v19  ;;  %v6235_v49 = vunpack.i.h.bf16 %v10434_v35 }
 0x33d   : > { %v10496_v45 = vpop.permute.xlu0 %6262  ;;  %v6234_v33 = vunpack.i.l.bf16 %v10434_v35  ;;  %v3548_v39 = vsel %vm2264_vm7, %v3516_v57, %v6224_v15  ;;  %v3549_v12 = vsel %vm2264_vm7, %v3517_v0, %v6225_v20  ;;  %v6250_v53 = vunpack.i.h.bf16 %v10446_v9 }
 0x33e   : > { %v6249_v17 = vunpack.i.l.bf16 %v10446_v9  ;;  %v3580_v32 = vsel %vm2297_vm8, %v3548_v39, %v6239_v34  ;;  %v3581_v50 = vsel %vm2297_vm8, %v3549_v12, %v6240_v41  ;;  %v6245_v36 = vunpack.i.h.bf16 %v10460_v47 }
 0x33f   : > { %v6278_v18 = vpop.permute.xlu1 %6277  ;;  %v6244_v38 = vunpack.i.l.bf16 %v10460_v47  ;;  %v6260_v35 = vunpack.i.h.bf16 %v10470_v23  ;;  %v6259_v31 = vunpack.i.l.bf16 %v10470_v23  ;;  %v6255_v27 = vunpack.i.h.bf16 %v6253_v60 }
 0x340   : > { %v6254_v19 = vunpack.i.l.bf16 %v6253_v60  ;;  %v3564_v55 = vsel %vm2297_vm8, %v3532_v6, %v6234_v33  ;;  %v3565_v28 = vsel %vm2297_vm8, %v3533_v11, %v6235_v49  ;;  %v6270_v9 = vunpack.i.h.bf16 %v6268_v29 }
 0x341   : > { %v6273_v44 = vpop.permute.xlu0 %6272  ;;  %v6269_v51 = vunpack.i.l.bf16 %v6268_v29  ;;  %v3582_v15 = vsel %vm2297_vm8, %v3550_v8, %v6249_v17  ;;  %v3583_v57 = vsel %vm2297_vm8, %v3551_v43, %v6250_v53  ;;  %v6264_v47 = vunpack.i.l.bf16 %v10496_v45 }
 0x342   : > { %v6279_v0 = vunpack.i.l.bf16 %v6278_v18  ;;  %v3567_v41 = vsel %vm2297_vm8, %v3535_v48, %v6245_v36  ;;  %v3566_v23 = vsel %vm2297_vm8, %v3534_v37, %v6244_v38  ;;  %v6280_v34 = vunpack.i.h.bf16 %v6278_v18 }
 0x343   : > { %v6288_v20 = vpop.permute.xlu1 %6287  ;;  %v6274_v60 = vunpack.i.l.bf16 %v6273_v44  ;;  %v3612_v6 = vsel %vm2330_vm9, %v3580_v32, %v6259_v31  ;;  %v3613_v11 = vsel %vm2330_vm9, %v3581_v50, %v6260_v35  ;;  %v3596_v29 = vsel %vm2330_vm9, %v3564_v55, %v6254_v19 }
 0x344   : > { %v3597_v8 = vsel %vm2330_vm9, %v3565_v28, %v6255_v27  ;;  %v3614_v43 = vsel %vm2330_vm9, %v3582_v15, %v6269_v51  ;;  %v3615_v49 = vsel %vm2330_vm9, %v3583_v57, %v6270_v9  ;;  %v6265_v33 = vunpack.i.h.bf16 %v10496_v45 }
 0x345   : > { %v6283_v39 = vpop.permute.xlu0 %6282  ;;  %v6275_v48 = vunpack.i.h.bf16 %v6273_v44  ;;  %v3598_v37 = vsel %vm2330_vm9, %v3566_v23, %v6264_v47  ;;  %v3644_v18 = vsel %vm2363_vm10, %v3612_v6, %v6279_v0  ;;  %v3645_v32 = vsel %vm2363_vm10, %v3613_v11, %v6280_v34 }
 0x346   : > { %v3628_v50 = vsel %vm2363_vm10, %v3596_v29, %v6274_v60  ;;  %v6290_v36 = vunpack.i.h.bf16 %v6288_v20  ;;  %v6289_v38 = vunpack.i.l.bf16 %v6288_v20  ;;  %v6285_v55 = vunpack.i.h.bf16 %v6283_v39 }
 0x347   : > { %v6298_v12 = vpop.permute.xlu1 %6297  ;;  %v3629_v19 = vsel %vm2363_vm10, %v3597_v8, %v6275_v48  ;;  %v6284_v28 = vunpack.i.l.bf16 %v6283_v39  ;;  %v3599_v20 = vsel %vm2330_vm9, %v3567_v41, %v6265_v33  ;;  %v5569_v48 = vunpack.i.l.bf16 %v12357_v40 }
 0x348   : > { %v6300_v53 = vunpack.i.h.bf16 %v6298_v12  ;;  %v6299_v17 = vunpack.i.l.bf16 %v6298_v12  ;;  %v3646_v23 = vsel %vm2363_vm10, %v3614_v43, %v6289_v38  ;;  %v3647_v34 = vsel %vm2363_vm10, %v3615_v49, %v6290_v36  ;;  %v12378_v49 = vld [vmem:[#allocation75_spill] sm:$0xff] }
 0x349   : > { %v6293_v35 = vpop.permute.xlu0 %6292  ;;  %v3630_v12 = vsel %vm2363_vm10, %v3598_v37, %v6284_v28  ;;  %v3631_v41 = vsel %vm2363_vm10, %v3599_v20, %v6285_v55  ;;  %v2532_v37 = vsel %vm12379_vm2, %v10226_v52, %v5450_v42  ;;  %v2530_v36 = vsel %vm12381_vm0, %v10243_v13, %v5445_v2  ;;  %vm12383_vm2 = vmmov %vm12381_vm0  ;;  %v12402_v20 = vld [vmem:[#allocation45_spill] sm:$0xff] }
 0x34a   : > { %v3676_v31 = vsel %vm2396_vm11, %v3644_v18, %v6299_v17  ;;  %v3677_v27 = vsel %vm2396_vm11, %v3645_v32, %v6300_v53  ;;  %v6295_v45 = vunpack.i.h.bf16 %v6293_v35  ;;  %v6294_v44 = vunpack.i.l.bf16 %v6293_v35 }
 0x34b   : > { %v6446_v9 = vpack.i.bf16 %v3677_v27, %v3676_v31  ;;  %v6308_v51 = vpop.permute.xlu1 %6307  ;;  %v5565_v18 = vunpack.i.h.bf16 %v12378_v49  ;;  %v5564_v53 = vunpack.i.l.bf16 %v12378_v49  ;;  %v2547_v52 = vsel %vm12382_vm1, %v10249_v16, %v5489_v61  ;;  %v12394_v61 = vld [vmem:[#allocation191_spill] sm:$0xff]  ;;  %v12398_v27 = vld [vmem:[#allocation193_spill] sm:$0xff] }
 0x34c   : > { %v3660_v15 = vsel %vm2396_vm11, %v3628_v50, %v6294_v44  ;;  %v3661_v57 = vsel %vm2396_vm11, %v3629_v19, %v6295_v45  ;;  %v6310_v47 = vunpack.i.h.bf16 %v6308_v51  ;;  %v6309_v0 = vunpack.i.l.bf16 %v6308_v51  ;;  %v12399_v44 = vld [vmem:[#allocation99_spill] sm:$0xff]  ;;  %v12400_v51 = vld [vmem:[#allocation194_spill] sm:$0xff] }
 0x34d   : > { %v6441_v60 = vpack.i.bf16 %v3661_v57, %v3660_v15  ;;  %v6303_v6 = vpop.permute.xlu0 %6302  ;;  %6447 = vrot.lane.b32.xlu1 %v6446_v9, %s6664_s9  ;;  %v2529_v50 = vsel %vm12380_vm3, %v10237_v56, %v5444_v14  ;;  %v2548_v56 = vsel %vm12383_vm2, %v10255_v22, %v5490_v10  ;;  %vm12384_vm3 = vmmov %vm12381_vm0  ;;  %v2546_v26 = vsel %vm12381_vm0, %v10264_v7, %v5485_v3  ;;  %v12395_v3 = vld [vmem:[#allocation22_spill] sm:$0xff]  ;;  %v12401_v57 = vld [vmem:[#allocation100_spill] sm:$0xff] }
 0x34e   : > { %v3678_v39 = vsel %vm2396_vm11, %v3646_v23, %v6309_v0  ;;  %v3679_v11 = vsel %vm2396_vm11, %v3647_v34, %v6310_v47  ;;  %v6305_v29 = vunpack.i.h.bf16 %v6303_v6  ;;  %v6304_v8 = vunpack.i.l.bf16 %v6303_v6  ;;  %v12403_v34 = vld [vmem:[#allocation44_spill] sm:$0xff]  ;;  %v12404_v6 = vld [vmem:[#allocation166_spill] sm:$0xff] }
 0x34f   : > { %v6456_v33 = vpack.i.bf16 %v3679_v11, %v3678_v39  ;;  %6442 = vrot.lane.b32.xlu0 %v6441_v60, %s6664_s9  ;;  %v10549_v43 = vpop.permute.xlu1 %6317  ;;  %v2545_v13 = vsel %vm12384_vm3, %v10259_v5, %v5484_v46  ;;  %vm12385_vm14 = vcmask 424960   ;;  %v5609_v10 = vunpack.i.l.bf16 %v12393_v4 }
 0x350   : > { %v3662_v17 = vsel %vm2396_vm11, %v3630_v12, %v6304_v8  ;;  %v3663_v32 = vsel %vm2396_vm11, %v3631_v41, %v6305_v29  ;;  %v10590_v16 = vsel %vm12385_vm14, %v10396_v59, %v5529_v25  ;;  %vm12386_vm1 = vmmov %vm12385_vm14  ;;  %v5605_v54 = vunpack.i.h.bf16 %v12394_v61  ;;  %v12396_v25 = vld [vmem:[#allocation66_spill] sm:$0xff]  ;;  %v12405_v8 = vld [vmem:[#allocation32_spill] sm:$0xff] }
 0x351   : > { %v6451_v38 = vpack.i.bf16 %v3663_v32, %v3662_v17  ;;  %v10567_v35 = vpop.permute.xlu0 %6312  ;;  %6457 = vrot.lane.b32.xlu1 %v6456_v33, %s6664_s9  ;;  %v10595_v22 = vsel %vm12386_vm1, %v2532_v37, %v5530_v62  ;;  %vm12387_vm2 = vmmov %vm12386_vm1  ;;  %v5800_v46 = vunpack.i.h.bf16 %v12395_v3  ;;  %v5799_v21 = vunpack.i.l.bf16 %v12395_v3  ;;  %v12406_v12 = vld [vmem:[#allocation31_spill] sm:$0xff]  ;;  %v12407_v33 = vld [vmem:[#allocation181_spill] sm:$0xff] }
 0x352   : > { %v10600_v5 = vsel %vm12387_vm2, %v2529_v50, %v5524_v58  ;;  %vm12388_vm3 = vmmov %vm12386_vm1  ;;  %v5795_v63 = vunpack.i.h.bf16 %v12396_v25  ;;  %v12397_v58 = vld [vmem:[#allocation96_spill] sm:$0xff]  ;;  %v5604_v31 = vunpack.i.l.bf16 %v12394_v61  ;;  %v5650_v45 = vunpack.i.h.bf16 %v12398_v27  ;;  %v12425_v61 = vld [vmem:[#allocation197_spill] sm:$0xff] }
 0x353   : > { %v10605_v7 = vsel %vm12388_vm3, %v2530_v36, %v5525_v1  ;;  %6452 = vrot.lane.b32.xlu0 %v6451_v38, %s6664_s9  ;;  %v10608_v42 = vpop.permute.xlu1 %6327  ;;  %vm12389_vm14 = vmmov %vm12386_vm1  ;;  %v5794_v1 = vunpack.i.l.bf16 %v12396_v25  ;;  %v5835_v40 = vunpack.i.h.bf16 %v12397_v58  ;;  %v5880_v19 = vunpack.i.h.bf16 %v12399_v44  ;;  %v12409_v37 = vld [vmem:[#allocation84_spill] sm:$0xff]  ;;  %v12411_v25 = vld [vmem:[#allocation34_spill] sm:$0xff] }
 0x354   : > { %v10611_v59 = vsel %vm12389_vm14, %v2547_v52, %v5569_v48  ;;  %vm12390_vm0 = vmmov %vm12386_vm1  ;;  %v5879_v55 = vunpack.i.l.bf16 %v12399_v44  ;;  %v5649_v9 = vunpack.i.l.bf16 %v12398_v27  ;;  %v5644_v15 = vunpack.i.l.bf16 %v12400_v51 }
 0x355   : > { %v10616_v24 = vsel %vm12390_vm0, %v2548_v56, %v5570_v30  ;;  %vm12391_vm1 = vmmov %vm12390_vm0  ;;  %v10628_v62 = vpop.permute.xlu0 %6322  ;;  %v5834_v30 = vunpack.i.l.bf16 %v12397_v58  ;;  %v5875_v47 = vunpack.i.h.bf16 %v12401_v57  ;;  %v5874_v0 = vunpack.i.l.bf16 %v12401_v57 }
 0x356   : > { %v10619_v2 = vsel %vm12391_vm1, %v2545_v13, %v5564_v53  ;;  %vm12392_vm2 = vmmov %vm12390_vm0  ;;  %v3443_v23 = vsel %vm2165_vm4, %v12402_v20, %v5800_v46  ;;  %v3442_v60 = vsel %vm2165_vm4, %v12403_v34, %v5799_v21  ;;  %v5915_v39 = vunpack.i.h.bf16 %v12404_v6  ;;  %v12410_v13 = vld [vmem:[#allocation103_spill] sm:$0xff] }
 0x357   : > { %v10622_v14 = vsel %vm12392_vm2, %v2546_v26, %v5565_v18  ;;  %v10638_v28 = vpop.permute.xlu1 %6337  ;;  %v5914_v11 = vunpack.i.l.bf16 %v12404_v6  ;;  %v3441_v48 = vsel %vm2165_vm4, %v12405_v8, %v5795_v63  ;;  %v3440_v41 = vsel %vm2165_vm4, %v12406_v12, %v5794_v1  ;;  %v12408_v18 = vld [vmem:[#allocation180_spill] sm:$0xff] }
 0x358   : > { %v3457_v49 = vsel %vm2165_vm4, %v12407_v33, %v5835_v40  ;;  %v3456_v53 = vsel %vm2165_vm4, %v12408_v18, %v5834_v30  ;;  %v3474_v17 = vsel %vm2198_vm5, %v3442_v60, %v5879_v55  ;;  %v3475_v32 = vsel %vm2198_vm5, %v3443_v23, %v5880_v19  ;;  %v12412_v40 = vld [vmem:[#allocation29_spill] sm:$0xff]  ;;  %v12413_v19 = vld [vmem:[#allocation122_spill] sm:$0xff] }
 0x359   : > { %v10650_v29 = vpop.permute.xlu0 %6332  ;;  %v5960_v50 = vunpack.i.h.bf16 %v12409_v37  ;;  %v5959_v36 = vunpack.i.l.bf16 %v12409_v37  ;;  %v3472_v52 = vsel %vm2198_vm5, %v3440_v41, %v5874_v0  ;;  %v3473_v56 = vsel %vm2198_vm5, %v3441_v48, %v5875_v47 }
 0x35a   : > { %v5955_v26 = vunpack.i.h.bf16 %v12410_v13  ;;  %v5954_v3 = vunpack.i.l.bf16 %v12410_v13  ;;  %v3488_v46 = vsel %vm2198_vm5, %v3456_v53, %v5914_v11  ;;  %v3489_v21 = vsel %vm2198_vm5, %v3457_v49, %v5915_v39 }
 0x35b   : > { %v10664_v38 = vpop.permute.xlu1 %6347  ;;  %v5995_v63 = vunpack.i.h.bf16 %v12411_v25  ;;  %v5994_v1 = vunpack.i.l.bf16 %v12411_v25  ;;  %v6040_v30 = vunpack.i.h.bf16 %v12412_v40  ;;  %v6039_v44 = vunpack.i.l.bf16 %v12412_v40 }
 0x35c   : > { %v6035_v55 = vunpack.i.h.bf16 %v12413_v19  ;;  %v6034_v57 = vunpack.i.l.bf16 %v12413_v19  ;;  %v3506_v47 = vsel %vm2231_vm6, %v3474_v17, %v5959_v36  ;;  %v3507_v0 = vsel %vm2231_vm6, %v3475_v32, %v5960_v50  ;;  %v12414_v17 = vld [vmem:[#allocation113_spill] sm:$0xff]  ;;  %v12415_v32 = vld [vmem:[#allocation114_spill] sm:$0xff] }
 0x35d   : > { %v6343_v58 = vpop.permute.xlu0 %6342  ;;  %v6320_v20 = vunpack.i.h.bf16 %v10549_v43  ;;  %v6319_v23 = vunpack.i.l.bf16 %v10549_v43  ;;  %v3504_v60 = vsel %vm2231_vm6, %v3472_v52, %v5954_v3  ;;  %v3505_v6 = vsel %vm2231_vm6, %v3473_v56, %v5955_v26 }
 0x35e   : > { %v6315_v39 = vunpack.i.h.bf16 %v10567_v35  ;;  %v6314_v11 = vunpack.i.l.bf16 %v10567_v35  ;;  %v3520_v8 = vsel %vm2231_vm6, %v3488_v46, %v5994_v1  ;;  %v3521_v48 = vsel %vm2231_vm6, %v3489_v21, %v5995_v63 }
 0x35f   : > { %v6358_v34 = vpop.permute.xlu1 %6357  ;;  %v6330_v12 = vunpack.i.h.bf16 %v10608_v42  ;;  %v6329_v41 = vunpack.i.l.bf16 %v10608_v42  ;;  %v3538_v43 = vsel %vm2264_vm7, %v3506_v47, %v6039_v44  ;;  %v3539_v49 = vsel %vm2264_vm7, %v3507_v0, %v6040_v30 }
 0x360   : > { %v3536_v18 = vsel %vm2264_vm7, %v3504_v60, %v6034_v57  ;;  %v3537_v53 = vsel %vm2264_vm7, %v3505_v6, %v6035_v55  ;;  %v3554_v35 = vsel %vm2264_vm7, %v12414_v17, %v6319_v23  ;;  %v3555_v37 = vsel %vm2264_vm7, %v12415_v32, %v6320_v20 }
 0x361   : > { %v10690_v33 = vpop.permute.xlu0 %6352  ;;  %v6325_v50 = vunpack.i.h.bf16 %v10628_v62  ;;  %v6324_v42 = vunpack.i.l.bf16 %v10628_v62  ;;  %v3552_v52 = vsel %vm2264_vm7, %v3520_v8, %v6314_v11  ;;  %v3553_v56 = vsel %vm2264_vm7, %v3521_v48, %v6315_v39 }
 0x362   : > { %v6340_v13 = vunpack.i.h.bf16 %v10638_v28  ;;  %v6339_v26 = vunpack.i.l.bf16 %v10638_v28  ;;  %v3584_v3 = vsel %vm2297_vm8, %v3552_v52, %v6329_v41  ;;  %v3585_v46 = vsel %vm2297_vm8, %v3553_v56, %v6330_v12 }
 0x363   : > { %v6368_v36 = vpop.permute.xlu1 %6367  ;;  %v6335_v21 = vunpack.i.h.bf16 %v10650_v29  ;;  %v6334_v25 = vunpack.i.l.bf16 %v10650_v29  ;;  %v6350_v62 = vunpack.i.h.bf16 %v10664_v38  ;;  %v6349_v1 = vunpack.i.l.bf16 %v10664_v38 }
 0x364   : > { %v6345_v40 = vunpack.i.h.bf16 %v6343_v58  ;;  %v6344_v30 = vunpack.i.l.bf16 %v6343_v58  ;;  %v3568_v44 = vsel %vm2297_vm8, %v3536_v18, %v6324_v42  ;;  %v3569_v19 = vsel %vm2297_vm8, %v3537_v53, %v6325_v50 }
 0x365   : > { %v6363_v63 = vpop.permute.xlu0 %6362  ;;  %v6360_v28 = vunpack.i.h.bf16 %v6358_v34  ;;  %v6359_v55 = vunpack.i.l.bf16 %v6358_v34  ;;  %v3586_v47 = vsel %vm2297_vm8, %v3554_v35, %v6339_v26  ;;  %v3587_v0 = vsel %vm2297_vm8, %v3555_v37, %v6340_v13 }
 0x366   : > { %v6354_v29 = vunpack.i.l.bf16 %v10690_v33  ;;  %v6369_v20 = vunpack.i.l.bf16 %v6368_v36  ;;  %v3571_v23 = vsel %vm2297_vm8, %v3539_v49, %v6335_v21  ;;  %v3570_v38 = vsel %vm2297_vm8, %v3538_v43, %v6334_v25 }
 0x367   : > { %v6378_v57 = vpop.permute.xlu1 %6377  ;;  %v6370_v60 = vunpack.i.h.bf16 %v6368_v36  ;;  %v6364_v58 = vunpack.i.l.bf16 %v6363_v63  ;;  %v3616_v39 = vsel %vm2330_vm9, %v3584_v3, %v6349_v1  ;;  %v3617_v11 = vsel %vm2330_vm9, %v3585_v46, %v6350_v62 }
 0x368   : > { %v3600_v34 = vsel %vm2330_vm9, %v3568_v44, %v6344_v30  ;;  %v3601_v8 = vsel %vm2330_vm9, %v3569_v19, %v6345_v40  ;;  %v3618_v48 = vsel %vm2330_vm9, %v3586_v47, %v6359_v55  ;;  %v3619_v12 = vsel %vm2330_vm9, %v3587_v0, %v6360_v28 }
 0x369   : > { %v6373_v6 = vpop.permute.xlu0 %6372  ;;  %v6355_v41 = vunpack.i.h.bf16 %v10690_v33  ;;  %v6365_v49 = vunpack.i.h.bf16 %v6363_v63  ;;  %v3602_v43 = vsel %vm2330_vm9, %v3570_v38, %v6354_v29  ;;  %v3648_v53 = vsel %vm2363_vm10, %v3616_v39, %v6369_v20 }
 0x36a   : > { %v3649_v32 = vsel %vm2363_vm10, %v3617_v11, %v6370_v60  ;;  %v3632_v37 = vsel %vm2363_vm10, %v3600_v34, %v6364_v58  ;;  %v6380_v50 = vunpack.i.h.bf16 %v6378_v57  ;;  %v6379_v42 = vunpack.i.l.bf16 %v6378_v57  ;;  %v12417_v34 = vld [vmem:[#allocation210_spill] sm:$0xff] }
 0x36b   : > { %v6388_v18 = vpop.permute.xlu1 %6387  ;;  %v3633_v26 = vsel %vm2363_vm10, %v3601_v8, %v6365_v49  ;;  %v6375_v3 = vunpack.i.h.bf16 %v6373_v6  ;;  %v6374_v46 = vunpack.i.l.bf16 %v6373_v6  ;;  %v3603_v30 = vsel %vm2330_vm9, %v3571_v23, %v6355_v41 }
 0x36c   : > { %v6390_v17 = vunpack.i.h.bf16 %v6388_v18  ;;  %v6389_v35 = vunpack.i.l.bf16 %v6388_v18  ;;  %v3650_v44 = vsel %vm2363_vm10, %v3618_v48, %v6379_v42  ;;  %v3651_v19 = vsel %vm2363_vm10, %v3619_v12, %v6380_v50 }
 0x36d   : > { %v6383_v36 = vpop.permute.xlu0 %6382  ;;  %v5645_v20 = vunpack.i.h.bf16 %v12400_v51  ;;  %v3634_v38 = vsel %vm2363_vm10, %v3602_v43, %v6374_v46  ;;  %v3635_v23 = vsel %vm2363_vm10, %v3603_v30, %v6375_v3  ;;  %v5610_v58 = vunpack.i.h.bf16 %v12393_v4  ;;  %v12428_v30 = vld [vmem:[#allocation107_spill] sm:$0xff] }
 0x36e   : > { %v3680_v52 = vsel %vm2396_vm11, %v3648_v53, %v6389_v35  ;;  %v3681_v56 = vsel %vm2396_vm11, %v3649_v32, %v6390_v17  ;;  %v6385_v33 = vunpack.i.h.bf16 %v6383_v36  ;;  %v6384_v13 = vunpack.i.l.bf16 %v6383_v36 }
 0x36f   : > { %v6466_v21 = vpack.i.bf16 %v3681_v56, %v3680_v52  ;;  %v6398_v25 = vpop.permute.xlu1 %6397  ;;  %vm12416_vm4 = vcmask 457728   ;;  %v5725_v8 = vunpack.i.h.bf16 %v12417_v34  ;;  %v5724_v48 = vunpack.i.l.bf16 %v12417_v34  ;;  %v12434_v34 = vld [vmem:[#allocation182_spill] sm:$0xff] }
 0x370   : > { %v3664_v63 = vsel %vm2396_vm11, %v3632_v37, %v6384_v13  ;;  %v3665_v62 = vsel %vm2396_vm11, %v3633_v26, %v6385_v33  ;;  %v6400_v1 = vunpack.i.h.bf16 %v6398_v25  ;;  %v6399_v40 = vunpack.i.l.bf16 %v6398_v25  ;;  %vm12418_vm5 = vmmov %vm12416_vm4 }
 0x371   : > { %v6461_v28 = vpack.i.bf16 %v3665_v62, %v3664_v63  ;;  %v6393_v55 = vpop.permute.xlu0 %6392  ;;  %6467 = vrot.lane.b32.xlu1 %v6466_v21, %s6664_s9  ;;  %v2597_v6 = vsel %vm12416_vm4, %v10590_v16, %v5609_v10  ;;  %v2595_v41 = vsel %vm12418_vm5, %v10600_v5, %v5604_v31  ;;  %vm12419_vm6 = vmmov %vm12416_vm4  ;;  %v12423_v31 = vld [vmem:[#allocation198_spill] sm:$0xff]  ;;  %vm3812_vm3 = vcmask 523264  }
 0x372   : > { %v3682_v57 = vsel %vm2396_vm11, %v3650_v44, %v6399_v40  ;;  %v3683_v47 = vsel %vm2396_vm11, %v3651_v19, %v6400_v1  ;;  %v6395_v0 = vunpack.i.h.bf16 %v6393_v55  ;;  %v6394_v29 = vunpack.i.l.bf16 %v6393_v55  ;;  %vm12420_vm7 = vmmov %vm12416_vm4  ;;  %v12429_v55 = vld [vmem:[#allocation175_spill] sm:$0xff] }
 0x373   : > { %v6476_v60 = vpack.i.bf16 %v3683_v47, %v3682_v57  ;;  %6462 = vrot.lane.b32.xlu0 %v6461_v28, %s6664_s9  ;;  %v2613_v16 = vsel %vm12419_vm6, %v10611_v59, %v5649_v9  ;;  %v2614_v4 = vsel %vm12420_vm7, %v10616_v24, %v5650_v45  ;;  %vm12421_vm8 = vmmov %vm12416_vm4  ;;  %v5685_v49 = vunpack.i.h.bf16 %v12423_v31  ;;  %v12426_v45 = vld [vmem:[#allocation205_spill] sm:$0xff]  ;;  %v12431_v47 = vld [vmem:[#allocation143_spill] sm:$0xff] }
 0x374   : > { %v3666_v39 = vsel %vm2396_vm11, %v3634_v38, %v6394_v29  ;;  %v3667_v11 = vsel %vm2396_vm11, %v3635_v23, %v6395_v0  ;;  %v2596_v10 = vsel %vm12421_vm8, %v10605_v7, %v5605_v54  ;;  %vm12422_vm9 = vmmov %vm12416_vm4  ;;  %v5684_v18 = vunpack.i.l.bf16 %v12423_v31  ;;  %v12432_v29 = vld [vmem:[#allocation108_spill] sm:$0xff]  ;;  %v12441_v31 = vld [vmem:[#allocation10_spill] sm:$0xff] }
 0x375   : > { %v6471_v12 = vpack.i.bf16 %v3667_v11, %v3666_v39  ;;  %6477 = vrot.lane.b32.xlu1 %v6476_v60, %s6664_s9  ;;  %v2611_v5 = vsel %vm12422_vm9, %v10619_v2, %v5644_v15  ;;  %vm12424_vm14 = vmmov %vm12416_vm4  ;;  %v5690_v27 = vunpack.i.h.bf16 %v12425_v61  ;;  %v5730_v7 = vunpack.i.h.bf16 %v12426_v45 }
 0x376   : > { %v2612_v24 = vsel %vm12424_vm14, %v10622_v14, %v5645_v20  ;;  %v5729_v51 = vunpack.i.l.bf16 %v12426_v45  ;;  %vm3913_vm0 = vcmask 818176   ;;  %v2644_v15 = vsel %vm2627_vm15, %v2611_v5, %v5724_v48  ;;  %vm12427_vm1 = vmmov %vm12416_vm4  ;;  %v12436_v48 = vld [vmem:[#allocation83_spill] sm:$0xff] }
 0x377   : > { %6472 = vrot.lane.b32.xlu0 %v6471_v12, %s6664_s9  ;;  %v6408_v59 = vpop.permute.xlu1 %6407  ;;  %v2645_v43 = vsel %vm2627_vm15, %v2612_v24, %v5725_v8  ;;  %v5689_v32 = vunpack.i.l.bf16 %v12425_v61  ;;  %v2628_v50 = vsel %vm2627_vm15, %v2595_v41, %v5684_v18  ;;  %v2629_v42 = vsel %vm2627_vm15, %v2596_v10, %v5685_v49  ;;  %v12439_v10 = vld [vmem:[#allocation183_spill] sm:$0xff]  ;;  %v12444_v61 = vld [vmem:[#allocation17_spill] sm:$0xff] }
 0x378   : > { %v6410_v54 = vunpack.i.h.bf16 %v6408_v59  ;;  %v6409_v9 = vunpack.i.l.bf16 %v6408_v59  ;;  %v2598_v26 = vsel %vm12427_vm1, %v10595_v22, %v5610_v58  ;;  %v2646_v3 = vsel %vm2627_vm15, %v2613_v16, %v5729_v51  ;;  %v12433_v58 = vld [vmem:[#allocation117_spill] sm:$0xff]  ;;  %v12438_v16 = vld [vmem:[#allocation104_spill] sm:$0xff] }
 0x379   : > { %v6403_v2 = vpop.permute.xlu0 %6402  ;;  %v2647_v46 = vsel %vm2627_vm15, %v2614_v4, %v5730_v7  ;;  %v5179_v44 = vunpack.i.l.bf16 %v12428_v30  ;;  %v2630_v19 = vsel %vm2627_vm15, %v2597_v6, %v5689_v32  ;;  %v2631_v22 = vsel %vm2627_vm15, %v2598_v26, %v5690_v27  ;;  %v12443_v59 = vld [vmem:[#allocation93_spill] sm:$0xff] }
 0x37a   : > { %v6405_v53 = vunpack.i.h.bf16 %v6403_v2  ;;  %v6404_v17 = vunpack.i.l.bf16 %v6403_v2  ;;  %v3829_v35 = vsel %vm3812_vm3, %v2644_v15, %v6409_v9  ;;  %v3830_v14 = vsel %vm3812_vm3, %v2645_v43, %v6410_v54  ;;  %v12446_v7 = vld [vmem:[#allocation105_spill] sm:$0xff]  ;;  %v12447_v9 = vld [vmem:[#allocation118_spill] sm:$0xff] }
 0x37b   : > { %v6418_v37 = vpop.permute.xlu1 %6417  ;;  %v3853_v36 = vpack.c.bf16 %v3830_v14, %v3829_v35  ;;  %v12430_v57 = vunpack.i.h.bf16 %v12429_v55  ;;  %v5174_v20 = vunpack.i.l.bf16 %v12432_v29  ;;  %v5175_v60 = vunpack.i.h.bf16 %v12432_v29  ;;  %v12448_v15 = vld [vmem:[#allocation109_spill] sm:$0xff]  ;;  %v12450_v14 = vld [vmem:[#allocation126_spill] sm:$0xff] }
 0x37c   : > { %v6420_v52 = vunpack.i.h.bf16 %v6418_v37  ;;  %v6419_v56 = vunpack.i.l.bf16 %v6418_v37  ;;  %v3813_v33 = vsel %vm3812_vm3, %v2628_v50, %v6404_v17  ;;  %v3814_v13 = vsel %vm3812_vm3, %v2629_v42, %v6405_v53  ;;  %v12449_v53 = vld [vmem:[#allocation125_spill] sm:$0xff] }
 0x37d   : > { %v6413_v21 = vpop.permute.xlu0 %6412  ;;  %v3845_v25 = vpack.c.bf16 %v3814_v13, %v3813_v33  ;;  %4464 = vmatprep.mubr.msk.bf16.mxu1 %vm3913_vm0, %v3853_v36  ;;  %v2385_v0 = vsel %vm2363_vm10, %v12431_v47, %v12430_v57  ;;  %v5220_v6 = vunpack.i.h.bf16 %v12433_v58  ;;  %v5219_v39 = vunpack.i.l.bf16 %v12433_v58  ;;  %v12452_v13 = vld [vmem:[#allocation72_spill] sm:$0xff]  ;;  %v12455_v55 = vld [vmem:[#allocation13_spill] sm:$0xff] }
 0x37e   : > { %v3832_v63 = vsel %vm3812_vm3, %v2647_v46, %v6420_v52  ;;  %v3831_v62 = vsel %vm3812_vm3, %v2646_v3, %v6419_v56  ;;  %v6415_v1 = vunpack.i.h.bf16 %v6413_v21  ;;  %v6414_v40 = vunpack.i.l.bf16 %v6413_v21  ;;  %v12451_v52 = vld [vmem:[#allocation136_spill] sm:$0xff] }
 0x37f   : > { %v3854_v28 = vpack.c.bf16 %v3832_v63, %v3831_v62  ;;  %4448 = vmatprep.mubr.msk.bf16.mxu0 %vm3913_vm0, %v3845_v25  ;;  %v12435_v8 = vunpack.i.l.bf16 %v12434_v34  ;;  %v12437_v41 = vunpack.i.h.bf16 %v12434_v34  ;;  %v12440_v5 = vunpack.i.l.bf16 %v12439_v10  ;;  %v12453_v25 = vld [vmem:[#allocation74_spill] sm:$0xff]  ;;  %v12456_v58 = vld [vmem:[#allocation156_spill] sm:$0xff]  ;;  %v12457_v34 = vld [vmem:[#allocation81_spill] sm:$0xff] }
 0x380   : > { %v3815_v38 = vsel %vm3812_vm3, %v2630_v19, %v6414_v40  ;;  %v3816_v23 = vsel %vm3812_vm3, %v2631_v22, %v6415_v1  ;;  %v12442_v18 = vunpack.i.h.bf16 %v12439_v10  ;;  %v2419_v27 = vsel %vm2396_vm11, %v12444_v61, %v5179_v44  ;;  %v12454_v44 = vld [vmem:[#allocation148_spill] sm:$0xff] }
 0x381   : > { %v3846_v11 = vpack.c.bf16 %v3816_v23, %v3815_v38  ;;  %4465 = vmatmul.mubr.msk.bf16.vlgmr.msra.gmra.mxu1 %vm3913_vm0, %v3854_v28  ;;  %v2403_v12 = vsel %vm2396_vm11, %v12436_v48, %v12435_v8  ;;  %v2404_v4 = vsel %vm2396_vm11, %v12438_v16, %v12437_v41  ;;  %v2401_v49 = vsel %vm2396_vm11, %v12441_v31, %v12440_v5  ;;  %v12461_v31 = vld [vmem:[#allocation91_spill] sm:$0xff] }
 0x382   : > { %v2402_v24 = vsel %vm2396_vm11, %v12443_v59, %v12442_v18  ;;  %v12445_v45 = vunpack.i.h.bf16 %v12428_v30  ;;  %v5215_v51 = vunpack.i.h.bf16 %v12447_v9  ;;  %v5214_v2 = vunpack.i.l.bf16 %v12447_v9  ;;  %v12462_v59 = vld [vmem:[#allocation95_spill] sm:$0xff] }
 0x383   : > { %4449 = vmatmul.mubr.msk.bf16.vlgmr.msra.gmra.mxu0 %vm3913_vm0, %v3846_v11  ;;  %v2417_v43 = vsel %vm2396_vm11, %v12448_v15, %v5174_v20  ;;  %v5260_v17 = vunpack.i.h.bf16 %v12449_v53  ;;  %v5259_v35 = vunpack.i.l.bf16 %v12449_v53  ;;  %v5254_v32 = vunpack.i.l.bf16 %v12450_v14 }
 0x384   : > { %v2420_v54 = vsel %vm2396_vm11, %v12446_v7, %v12445_v45  ;;  %v2418_v37 = vsel %vm2396_vm11, %v2385_v0, %v5175_v60  ;;  %v2436_v50 = vsel %vm2429_vm12, %v2403_v12, %v5219_v39  ;;  %v2437_v42 = vsel %vm2429_vm12, %v2404_v4, %v5220_v6  ;;  %v12458_v12 = vld [vmem:[#allocation82_spill] sm:$0xff]  ;;  %v12465_v7 = vld [vmem:[#allocation155_spill] sm:$0xff] }
 0x385   : > { %v5255_v36 = vunpack.i.h.bf16 %v12450_v14  ;;  %v5300_v56 = vunpack.i.h.bf16 %v12451_v52  ;;  %v5299_v33 = vunpack.i.l.bf16 %v12451_v52  ;;  %v5295_v26 = vunpack.i.h.bf16 %v12452_v13  ;;  %v12471_v14 = vld [vmem:[#allocation188_spill] sm:$0xff] }
 0x386   : > { %v5294_v3 = vunpack.i.l.bf16 %v12452_v13  ;;  %v2434_v46 = vsel %vm2429_vm12, %v2401_v49, %v5214_v2  ;;  %v2435_v21 = vsel %vm2429_vm12, %v2402_v24, %v5215_v51  ;;  %v5340_v63 = vunpack.i.h.bf16 %v12453_v25  ;;  %v12478_v13 = vld [vmem:[#allocation189_spill] sm:$0xff] }
 0x387   : > { %v5339_v62 = vunpack.i.l.bf16 %v12453_v25  ;;  %v2452_v1 = vsel %vm2429_vm12, %v2419_v27, %v5259_v35  ;;  %v2453_v40 = vsel %vm2429_vm12, %v2420_v54, %v5260_v17  ;;  %v2450_v30 = vsel %vm2429_vm12, %v2417_v43, %v5254_v32  ;;  %v12469_v43 = vld [vmem:[#allocation185_spill] sm:$0xff] }
 0x388   : > { %v5334_v19 = vunpack.i.l.bf16 %v12454_v44  ;;  %v2451_v22 = vsel %vm2429_vm12, %v2418_v37, %v5255_v36  ;;  %v5335_v28 = vunpack.i.h.bf16 %v12454_v44  ;;  %v5380_v57 = vunpack.i.h.bf16 %v12455_v55 }
 0x389   : > { %v5379_v47 = vunpack.i.l.bf16 %v12455_v55  ;;  %v2469_v0 = vsel %vm2462_vm13, %v2436_v50, %v5299_v33  ;;  %v2470_v29 = vsel %vm2462_vm13, %v2437_v42, %v5300_v56  ;;  %v2467_v20 = vsel %vm2462_vm13, %v2434_v46, %v5294_v3  ;;  %v12486_v55 = vld [vmem:[#allocation192_spill] sm:$0xff] }
 0x38a   : > { %v2468_v38 = vsel %vm2462_vm13, %v2435_v21, %v5295_v26  ;;  %v2485_v23 = vsel %vm2462_vm13, %v2452_v1, %v5339_v62  ;;  %v2486_v60 = vsel %vm2462_vm13, %v2453_v40, %v5340_v63  ;;  %v5375_v6 = vunpack.i.h.bf16 %v12456_v58  ;;  %v12480_v21 = vld [vmem:[#allocation12_spill] sm:$0xff]  ;;  %v12481_v62 = vld [vmem:[#allocation14_spill] sm:$0xff] }
 0x38b   : > { %v5374_v39 = vunpack.i.l.bf16 %v12456_v58  ;;  %v2483_v11 = vsel %vm2462_vm13, %v2450_v30, %v5334_v19  ;;  %v5420_v8 = vunpack.i.h.bf16 %v12457_v34  ;;  %v5419_v48 = vunpack.i.l.bf16 %v12457_v34 }
 0x38c   : > { %v5414_v41 = vunpack.i.l.bf16 %v12458_v12  ;;  %v2484_v16 = vsel %vm2462_vm13, %v2451_v22, %v5335_v28  ;;  %vm12459_vm10 = vcmask 359424   ;;  %v5415_v5 = vunpack.i.h.bf16 %v12458_v12  ;;  %v12485_v22 = vld [vmem:[#allocation80_spill] sm:$0xff] }
 0x38d   : > { %v2502_v4 = vsel %vm12459_vm10, %v2469_v0, %v5379_v47  ;;  %vm12460_vm11 = vmmov %vm12459_vm10  ;;  %v5460_v49 = vunpack.i.h.bf16 %v12461_v31  ;;  %v5459_v18 = vunpack.i.l.bf16 %v12461_v31  ;;  %v5455_v24 = vunpack.i.h.bf16 %v12462_v59  ;;  %v12487_v0 = vld [vmem:[#allocation195_spill] sm:$0xff]  ;;  %v12495_v12 = vld [vmem:[#allocation212_spill] sm:$0xff] }
 0x38e   : > { %v2503_v10 = vsel %vm12460_vm11, %v2470_v29, %v5380_v57  ;;  %v5454_v61 = vunpack.i.l.bf16 %v12462_v59  ;;  %vm12463_vm12 = vmmov %vm12459_vm10  ;;  %v5500_v54 = vunpack.i.h.bf16 %v12465_v7  ;;  %v5499_v9 = vunpack.i.l.bf16 %v12465_v7  ;;  %v12502_v59 = vld [vmem:[#allocation200_spill] sm:$0xff]  ;;  %v12504_v7 = vld [vmem:[#allocation199_spill] sm:$0xff] }
 0x38f   : > { %v2500_v27 = vsel %vm12463_vm12, %v2467_v20, %v5374_v39  ;;  %vm12464_vm2 = vmmov %vm12459_vm10  ;;  %v5494_v53 = vunpack.i.l.bf16 %v12469_v43  ;;  %v5495_v35 = vunpack.i.h.bf16 %v12469_v43  ;;  %v5540_v32 = vunpack.i.h.bf16 %v12471_v14 }
 0x390   : > { %v2501_v45 = vsel %vm12464_vm2, %v2468_v38, %v5375_v6  ;;  %vm12466_vm13 = vmmov %vm12464_vm2  ;;  %v5539_v37 = vunpack.i.l.bf16 %v12471_v14  ;;  %vm12472_vm7 = vcmask 392192   ;;  %v5535_v26 = vunpack.i.h.bf16 %v12478_v13 }
 0x391   : > { %v2518_v51 = vsel %vm12466_vm13, %v2485_v23, %v5419_v48  ;;  %vm12467_vm4 = vmmov %vm12464_vm2  ;;  %v2535_v50 = vsel %vm12472_vm7, %v2502_v4, %v5459_v18  ;;  %v5534_v3 = vunpack.i.l.bf16 %v12478_v13  ;;  %v5580_v25 = vunpack.i.h.bf16 %v12480_v21 }
 0x392   : > { %v2519_v2 = vsel %vm12467_vm4, %v2486_v60, %v5420_v8  ;;  %vm12468_vm5 = vmmov %vm12464_vm2  ;;  %v5579_v63 = vunpack.i.l.bf16 %v12480_v21  ;;  %v5574_v1 = vunpack.i.l.bf16 %v12481_v62  ;;  %v5575_v19 = vunpack.i.h.bf16 %v12481_v62  ;;  %v12490_v60 = vld [vmem:[#allocation196_spill] sm:$0xff] }
 0x393   : > { %v2516_v15 = vsel %vm12468_vm5, %v2483_v11, %v5414_v41  ;;  %vm12470_vm6 = vmmov %vm12464_vm2  ;;  %vm12483_vm2 = vcmask 424960   ;;  %v5619_v28 = vunpack.i.l.bf16 %v12485_v22  ;;  %v5615_v57 = vunpack.i.h.bf16 %v12486_v55 }
 0x394   : > { %v2517_v17 = vsel %vm12470_vm6, %v2484_v16, %v5415_v5  ;;  %vm12473_vm8 = vmmov %vm12472_vm7  ;;  %v2568_v30 = vsel %vm12483_vm2, %v2535_v50, %v5539_v37  ;;  %v5614_v47 = vunpack.i.l.bf16 %v12486_v55  ;;  %v5659_v29 = vunpack.i.l.bf16 %v12487_v0 }
 0x395   : > { %v2536_v42 = vsel %vm12473_vm8, %v2503_v10, %v5460_v49  ;;  %vm12474_vm9 = vmmov %vm12472_vm7  ;;  %v5660_v23 = vunpack.i.h.bf16 %v12487_v0  ;;  %v5654_v58 = vunpack.i.l.bf16 %v12490_v60  ;;  %v5655_v34 = vunpack.i.h.bf16 %v12490_v60  ;;  %v12507_v60 = vld [vmem:[#allocation16_spill] sm:$0xff] }
 0x396   : > { %v2533_v36 = vsel %vm12474_vm9, %v2500_v27, %v5454_v61  ;;  %vm12475_vm14 = vmmov %vm12472_vm7  ;;  %v5620_v48 = vunpack.i.h.bf16 %v12485_v22  ;;  %v5735_v41 = vunpack.i.h.bf16 %v12495_v12  ;;  %v5734_v16 = vunpack.i.l.bf16 %v12495_v12  ;;  %v12509_v12 = vld [vmem:[#allocation203_spill] sm:$0xff] }
 0x397   : > { %v2534_v52 = vsel %vm12475_vm14, %v2501_v45, %v5455_v24  ;;  %vm12476_vm1 = vmmov %vm12472_vm7  ;;  %vm12496_vm14 = vcmask 457728   ;;  %v5695_v24 = vunpack.i.h.bf16 %v12502_v59  ;;  %v5694_v61 = vunpack.i.l.bf16 %v12502_v59 }
 0x398   : > { %v2551_v56 = vsel %vm12476_vm1, %v2518_v51, %v5499_v9  ;;  %vm12477_vm10 = vmmov %vm12476_vm1  ;;  %v2601_v4 = vsel %vm12496_vm14, %v2568_v30, %v5619_v28 }
 0x399   : > { %v2552_v33 = vsel %vm12477_vm10, %v2519_v2, %v5500_v54  ;;  %vm12479_vm11 = vmmov %vm12476_vm1  ;;  %v5700_v54 = vunpack.i.h.bf16 %v12504_v7  ;;  %v12505_v2 = vld [vmem:[#allocation211_spill] sm:$0xff] }
 0x39a   : > { %v2549_v46 = vsel %vm12479_vm11, %v2516_v15, %v5494_v53  ;;  %vm12482_vm12 = vmmov %vm12476_vm1  ;;  %v5740_v15 = vunpack.i.h.bf16 %v12505_v2  ;;  %v5739_v43 = vunpack.i.l.bf16 %v12505_v2 }
 0x39b   : > { %v2550_v40 = vsel %vm12482_vm12, %v2517_v17, %v5495_v35  ;;  %vm12484_vm13 = vmmov %vm12483_vm2  ;;  %v6428_v27 = vpop.permute.xlu1 %6427 }
 0x39c   : > { %v2569_v44 = vsel %vm12484_vm13, %v2536_v42, %v5540_v32  ;;  %vm12488_vm4 = vmmov %vm12483_vm2  ;;  %v6430_v9 = vunpack.i.h.bf16 %v6428_v27  ;;  %v6429_v51 = vunpack.i.l.bf16 %v6428_v27  ;;  %v5699_v42 = vunpack.i.l.bf16 %v12504_v7 }
 0x39d   : > { %v2566_v20 = vsel %vm12488_vm4, %v2533_v36, %v5534_v3  ;;  %vm12489_vm5 = vmmov %vm12483_vm2  ;;  %v6423_v35 = vpop.permute.xlu0 %6422 }
 0x39e   : > { %v2567_v38 = vsel %vm12489_vm5, %v2534_v52, %v5535_v26  ;;  %vm12491_vm6 = vmmov %vm12483_vm2  ;;  %v6425_v37 = vunpack.i.h.bf16 %v6423_v35  ;;  %v6424_v50 = vunpack.i.l.bf16 %v6423_v35  ;;  %v2634_v28 = vsel %vm2627_vm15, %v2601_v4, %v5699_v42 }
 0x39f   : > { %v2584_v6 = vsel %vm12491_vm6, %v2551_v56, %v5579_v63  ;;  %vm12492_vm7 = vmmov %vm12483_vm2 }
 0x3a0   : > { %v2585_v39 = vsel %vm12492_vm7, %v2552_v33, %v5580_v25  ;;  %vm12493_vm8 = vmmov %vm12483_vm2  ;;  %v6438_v33 = vpop.permute.xlu1 %6437 }
 0x3a1   : > { %v2582_v11 = vsel %vm12493_vm8, %v2549_v46, %v5574_v1  ;;  %vm12494_vm9 = vmmov %vm12483_vm2  ;;  %v6440_v3 = vunpack.i.h.bf16 %v6438_v33  ;;  %v6439_v46 = vunpack.i.l.bf16 %v6438_v33  ;;  %v6433_v1 = vpop.permute.xlu0 %6432  ;;  %v12517_v33 = vld [vmem:[#allocation208_spill] sm:$0xff] }
 0x3a2   : > { %v2583_v8 = vsel %vm12494_vm9, %v2550_v40, %v5575_v19  ;;  %vm12497_vm1 = vmmov %vm12496_vm14  ;;  %v6435_v19 = vunpack.i.h.bf16 %v6433_v1  ;;  %v6434_v22 = vunpack.i.l.bf16 %v6433_v1 }
 0x3a3   : > { %v2599_v10 = vsel %vm12497_vm1, %v2566_v20, %v5614_v47  ;;  %vm12498_vm10 = vmmov %vm12497_vm1 }
 0x3a4   : > { %v2600_v5 = vsel %vm12498_vm10, %v2567_v38, %v5615_v57  ;;  %vm12499_vm11 = vmmov %vm12497_vm1  ;;  %v2632_v36 = vsel %vm2627_vm15, %v2599_v10, %v5694_v61  ;;  %v3819_v47 = vsel %vm3812_vm3, %v2634_v28, %v6434_v22 }
 0x3a5   : > { %v2617_v31 = vsel %vm12499_vm11, %v2584_v6, %v5659_v29  ;;  %vm12500_vm12 = vmmov %vm12497_vm1  ;;  %v2633_v52 = vsel %vm2627_vm15, %v2600_v5, %v5695_v24  ;;  %v3817_v13 = vsel %vm3812_vm3, %v2632_v36, %v6424_v50  ;;  %v12508_v6 = vld [vmem:[#allocation213_spill] sm:$0xff]  ;;  %v12512_v24 = vld [vmem:[#allocation167_spill] sm:$0xff] }
 0x3a6   : > { %v2618_v49 = vsel %vm12500_vm12, %v2585_v39, %v5660_v23  ;;  %vm12501_vm2 = vmmov %vm12497_vm1  ;;  %v3818_v26 = vsel %vm3812_vm3, %v2633_v52, %v6425_v37  ;;  %v2650_v25 = vsel %vm2627_vm15, %v2617_v31, %v5739_v43  ;;  %v12516_v37 = vld [vmem:[#allocation215_spill] sm:$0xff] }
 0x3a7   : > { %v2615_v18 = vsel %vm12501_vm2, %v2582_v11, %v5654_v58  ;;  %vm12503_vm13 = vmmov %vm12497_vm1  ;;  %v2651_v63 = vsel %vm2627_vm15, %v2618_v49, %v5740_v15  ;;  %v3847_v62 = vpack.c.bf16 %v3818_v26, %v3817_v13  ;;  %v3835_v30 = vsel %vm3812_vm3, %v2650_v25, %v6439_v46  ;;  %v12518_v26 = vld [vmem:[#allocation209_spill] sm:$0xff] }
 0x3a8   : > { %v2616_v45 = vsel %vm12503_vm13, %v2583_v8, %v5655_v34  ;;  %v2648_v53 = vsel %vm2627_vm15, %v2615_v18, %v5734_v16  ;;  %vm12506_vm4 = vmmov %vm12497_vm1  ;;  %v3836_v40 = vsel %vm3812_vm3, %v2651_v63, %v6440_v3  ;;  %v12510_v16 = vld [vmem:[#allocation204_spill] sm:$0xff]  ;;  %v12511_v18 = vld [vmem:[#allocation86_spill] sm:$0xff] }
 0x3a9   : > { %v2649_v17 = vsel %vm2627_vm15, %v2616_v45, %v5735_v41  ;;  %v3833_v14 = vsel %vm3812_vm3, %v2648_v53, %v6429_v51  ;;  %v2602_v21 = vsel %vm12506_vm4, %v2569_v44, %v5620_v48  ;;  %v3856_v57 = vpack.c.bf16 %v3836_v40, %v3835_v30  ;;  %4452 = vmatprep.mubr.msk.bf16.mxu0 %vm3913_vm0, %v3847_v62  ;;  %v12514_v51 = vld [vmem:[#allocation201_spill] sm:$0xff]  ;;  %v12520_v40 = vld [vmem:[#allocation36_spill] sm:$0xff] }
 0x3aa   : > { %v3834_v32 = vsel %vm3812_vm3, %v2649_v17, %v6430_v9  ;;  %v2635_v55 = vsel %vm2627_vm15, %v2602_v21, %v5700_v54  ;;  %v12513_v54 = vld [vmem:[#allocation202_spill] sm:$0xff]  ;;  %v12519_v62 = vld [vmem:[#allocation177_spill] sm:$0xff] }
 0x3ab   : > { %v3855_v56 = vpack.c.bf16 %v3834_v32, %v3833_v14  ;;  %v3820_v44 = vsel %vm3812_vm3, %v2635_v55, %v6435_v19  ;;  %v12515_v14 = vld [vmem:[#allocation214_spill] sm:$0xff]  ;;  %v12521_v55 = vld [vmem:[#allocation207_spill] sm:$0xff] }
 0x3ac   : > { %v3848_v0 = vpack.c.bf16 %v3820_v44, %v3819_v47  ;;  %v12522_v44 = vld [vmem:[#allocation206_spill] sm:$0xff] }
 0x3ad   : > { %4468 = vmatprep.mubr.msk.bf16.mxu1 %vm3913_vm0, %v3855_v56 }
 0x3ae   : > { %4469 = vmatmul.mubr.msk.bf16.gmra.mxu1 %vm3913_vm0, %v3856_v57  ;;  %4453 = vmatmul.mubr.msk.bf16.gmra.mxu0 %vm3913_vm0, %v3848_v0 }
 0x3bf   : > { %v6448_v29 = vpop.permute.xlu1 %6447 }
 0x3c0   : > { %v6450_v20 = vunpack.i.h.bf16 %v6448_v29  ;;  %v6449_v38 = vunpack.i.l.bf16 %v6448_v29 }
 0x3c1   : > { %v6443_v23 = vpop.permute.xlu0 %6442 }
 0x3c2   : > { %v3837_v58 = vsel %vm3812_vm3, %v12507_v60, %v6449_v38  ;;  %v3838_v39 = vsel %vm3812_vm3, %v12508_v6, %v6450_v20  ;;  %v6445_v11 = vunpack.i.h.bf16 %v6443_v23  ;;  %v6444_v34 = vunpack.i.l.bf16 %v6443_v23 }
 0x3c3   : > { %v3857_v8 = vpack.c.bf16 %v3838_v39, %v3837_v58  ;;  %v6458_v48 = vpop.permute.xlu1 %6457 }
 0x3c4   : > { %v3821_v41 = vsel %vm3812_vm3, %v12509_v12, %v6444_v34  ;;  %v3822_v4 = vsel %vm3812_vm3, %v12510_v16, %v6445_v11  ;;  %v6460_v10 = vunpack.i.h.bf16 %v6458_v48  ;;  %v6459_v5 = vunpack.i.l.bf16 %v6458_v48 }
 0x3c5   : > { %v3849_v31 = vpack.c.bf16 %v3822_v4, %v3821_v41  ;;  %v6453_v49 = vpop.permute.xlu0 %6452  ;;  %4472 = vmatprep.mubr.msk.bf16.mxu1 %vm3913_vm0, %v3857_v8 }
 0x3c6   : > { %v3840_v59 = vsel %vm3812_vm3, %v12511_v18, %v6460_v10  ;;  %v3839_v61 = vsel %vm3812_vm3, %v12512_v24, %v6459_v5  ;;  %v6455_v27 = vunpack.i.h.bf16 %v6453_v49  ;;  %v6454_v45 = vunpack.i.l.bf16 %v6453_v49 }
 0x3c7   : > { %v3858_v7 = vpack.c.bf16 %v3840_v59, %v3839_v61  ;;  %4456 = vmatprep.mubr.msk.bf16.mxu0 %vm3913_vm0, %v3849_v31 }
 0x3c8   : > { %v3824_v9 = vsel %vm3812_vm3, %v12513_v54, %v6455_v27  ;;  %v3823_v2 = vsel %vm3812_vm3, %v12514_v51, %v6454_v45 }
 0x3c9   : > { %v3850_v15 = vpack.c.bf16 %v3824_v9, %v3823_v2  ;;  %4473 = vmatmul.mubr.msk.bf16.gmra.mxu1 %vm3913_vm0, %v3858_v7 }
 0x3cb   : > { %4457 = vmatmul.mubr.msk.bf16.gmra.mxu0 %vm3913_vm0, %v3850_v15 }
 0x3e3   : > { %v6468_v43 = vpop.permute.xlu1 %6467 }
 0x3e4   : > { %v6470_v53 = vunpack.i.h.bf16 %v6468_v43  ;;  %v6469_v17 = vunpack.i.l.bf16 %v6468_v43 }
 0x3e5   : > { %v6463_v35 = vpop.permute.xlu0 %6462 }
 0x3e6   : > { %v3841_v32 = vsel %vm3812_vm3, %v12515_v14, %v6469_v17  ;;  %v3842_v50 = vsel %vm3812_vm3, %v12516_v37, %v6470_v53  ;;  %v6465_v42 = vunpack.i.h.bf16 %v6463_v35  ;;  %v6464_v36 = vunpack.i.l.bf16 %v6463_v35 }
 0x3e7   : > { %v3859_v52 = vpack.c.bf16 %v3842_v50, %v3841_v32  ;;  %v6478_v56 = vpop.permute.xlu1 %6477 }
 0x3e8   : > { %v3825_v13 = vsel %vm3812_vm3, %v12517_v33, %v6464_v36  ;;  %v3826_v3 = vsel %vm3812_vm3, %v12518_v26, %v6465_v42  ;;  %v6480_v46 = vunpack.i.h.bf16 %v6478_v56  ;;  %v6479_v21 = vunpack.i.l.bf16 %v6478_v56 }
 0x3e9   : > { %v3851_v25 = vpack.c.bf16 %v3826_v3, %v3825_v13  ;;  %v6473_v63 = vpop.permute.xlu0 %6472  ;;  %4476 = vmatprep.mubr.msk.bf16.mxu1 %vm3913_vm0, %v3859_v52 }
 0x3ea   : > { %v3844_v1 = vsel %vm3812_vm3, %v12519_v62, %v6480_v46  ;;  %v3843_v30 = vsel %vm3812_vm3, %v12520_v40, %v6479_v21  ;;  %v6475_v19 = vunpack.i.h.bf16 %v6473_v63  ;;  %v6474_v22 = vunpack.i.l.bf16 %v6473_v63 }
 0x3eb   : > { %v3860_v28 = vpack.c.bf16 %v3844_v1, %v3843_v30  ;;  %4460 = vmatprep.mubr.msk.bf16.mxu0 %vm3913_vm0, %v3851_v25 }
 0x3ec   : > { %v3828_v57 = vsel %vm3812_vm3, %v12521_v55, %v6475_v19  ;;  %v3827_v47 = vsel %vm3812_vm3, %v12522_v44, %v6474_v22 }
 0x3ed   : > { %v3852_v0 = vpack.c.bf16 %v3828_v57, %v3827_v47  ;;  %4477 = vmatmul.mubr.msk.bf16.gmra.mxu1 %vm3913_vm0, %v3860_v28 }
 0x3ef   : > { %4461 = vmatmul.mubr.msk.bf16.gmra.mxu0 %vm3913_vm0, %v3852_v0 }
 0x441   : > { %v11005_v29 = vpop.f32.mrf.mxu1 }
 0x442   : > { %4145 = vst [vmem:[%s11007_s26 + $0x90] sm:$0xff] %v11005_v29 }
 0x443   : > { %v11011_v20 = vpop.f32.mrf.mxu0  ;;  %v11013_v38 = vpop.f32.mrf.mxu1 }
 0x444   : > { %4129 = vst [vmem:[%s11007_s26 + $0x10] sm:$0xff] %v11011_v20  ;;  %4143 = vst [vmem:[%s11007_s26 + $0x80] sm:$0xff] %v11013_v38 }
 0x445   : > { %v11019_v23 = vpop.f32.mrf.mxu0  ;;  %v11021_v60 = vpop.f32.mrf.mxu1 }
 0x446   : > { %4127 = vst [vmem:[%s11007_s26] sm:$0xff] %v11019_v23  ;;  %4146 = vst [vmem:[%s11007_s26 + $0x98] sm:$0xff] %v11021_v60 }
 0x447   : > { %v11027_v58 = vpop.f32.mrf.mxu0  ;;  %v11029_v6 = vpop.f32.mrf.mxu1 }
 0x448   : > { %4130 = vst [vmem:[%s11007_s26 + $0x18] sm:$0xff] %v11027_v58  ;;  %4144 = vst [vmem:[%s11007_s26 + $0x88] sm:$0xff] %v11029_v6 }
 0x449   : > { %v11035_v39 = vpop.f32.mrf.mxu0 }
 0x44a   : > { %4128 = vst [vmem:[%s11007_s26 + $0x8] sm:$0xff] %v11035_v39 }
 0x46e   : > { %v11039_v11 = vpop.f32.mrf.mxu1  ;;  %v11043_v34 = vpop.f32.mrf.mxu0 }
 0x46f   : > { %4149 = vst [vmem:[%s11007_s26 + $0xb0] sm:$0xff] %v11039_v11  ;;  %4133 = vst [vmem:[%s11007_s26 + $0x30] sm:$0xff] %v11043_v34 }
 0x470   : > { %v11045_v8 = vpop.f32.mrf.mxu1  ;;  %v11051_v48 = vpop.f32.mrf.mxu0 }
 0x471   : > { %4147 = vst [vmem:[%s11007_s26 + $0xa0] sm:$0xff] %v11045_v8  ;;  %4131 = vst [vmem:[%s11007_s26 + $0x20] sm:$0xff] %v11051_v48 }
 0x472   : > { %v11053_v12 = vpop.f32.mrf.mxu1  ;;  %v11059_v41 = vpop.f32.mrf.mxu0 }
 0x473   : > { %4150 = vst [vmem:[%s11007_s26 + $0xb8] sm:$0xff] %v11053_v12  ;;  %4134 = vst [vmem:[%s11007_s26 + $0x38] sm:$0xff] %v11059_v41 }
 0x474   : > { %v11061_v16 = vpop.f32.mrf.mxu1  ;;  %v11067_v4 = vpop.f32.mrf.mxu0 }
 0x475   : > { %4148 = vst [vmem:[%s11007_s26 + $0xa8] sm:$0xff] %v11061_v16  ;;  %4132 = vst [vmem:[%s11007_s26 + $0x28] sm:$0xff] %v11067_v4 }
 0x489   : > { %v11071_v10 = vpop.f32.mrf.mxu1 }
 0x48a   : > { %4153 = vst [vmem:[%s11007_s26 + $0xd0] sm:$0xff] %v11071_v10 }
 0x48b   : > { %v11075_v5 = vpop.f32.mrf.mxu0  ;;  %v11077_v31 = vpop.f32.mrf.mxu1 }
 0x48c   : > { %4137 = vst [vmem:[%s11007_s26 + $0x50] sm:$0xff] %v11075_v5  ;;  %4151 = vst [vmem:[%s11007_s26 + $0xc0] sm:$0xff] %v11077_v31 }
 0x48d   : > { %v11083_v49 = vpop.f32.mrf.mxu0  ;;  %v11085_v18 = vpop.f32.mrf.mxu1 }
 0x48e   : > { %4135 = vst [vmem:[%s11007_s26 + $0x40] sm:$0xff] %v11083_v49  ;;  %4154 = vst [vmem:[%s11007_s26 + $0xd8] sm:$0xff] %v11085_v18 }
 0x48f   : > { %v11091_v59 = vpop.f32.mrf.mxu0  ;;  %v11093_v24 = vpop.f32.mrf.mxu1 }
 0x490   : > { %4138 = vst [vmem:[%s11007_s26 + $0x58] sm:$0xff] %v11091_v59  ;;  %4152 = vst [vmem:[%s11007_s26 + $0xc8] sm:$0xff] %v11093_v24 }
 0x491   : > { %v11099_v61 = vpop.f32.mrf.mxu0 }
 0x492   : > { %4136 = vst [vmem:[%s11007_s26 + $0x48] sm:$0xff] %v11099_v61 }
 0x4ad   : > { %v11103_v27 = vpop.f32.mrf.mxu1 }
 0x4ae   : > { %4157 = vst [vmem:[%s11007_s26 + $0xf0] sm:$0xff] %v11103_v27 }
 0x4af   : > { %v11107_v45 = vpop.f32.mrf.mxu0  ;;  %v11109_v7 = vpop.f32.mrf.mxu1 }
 0x4b0   : > { %4141 = vst [vmem:[%s11007_s26 + $0x70] sm:$0xff] %v11107_v45  ;;  %4155 = vst [vmem:[%s11007_s26 + $0xe0] sm:$0xff] %v11109_v7 }
 0x4b1   : > { %v11115_v54 = vpop.f32.mrf.mxu0  ;;  %v11117_v9 = vpop.f32.mrf.mxu1 }
 0x4b2   : > { %4139 = vst [vmem:[%s11007_s26 + $0x60] sm:$0xff] %v11115_v54  ;;  %4158 = vst [vmem:[%s11007_s26 + $0xf8] sm:$0xff] %v11117_v9  ;;  %4162 = sbr.rel (%p4402_p11) target bundleno = 1209 (0x4b9), region = 32 }
 0x4b3   : > { %v11123_v51 = vpop.f32.mrf.mxu0  ;;  %v11125_v2 = vpop.f32.mrf.mxu1 }
 0x4b4   : > { %4142 = vst [vmem:[%s11007_s26 + $0x78] sm:$0xff] %v11123_v51  ;;  %4156 = vst [vmem:[%s11007_s26 + $0xe8] sm:$0xff] %v11125_v2 }
 0x4b5   : > { %v11131_v15 = vpop.f32.mrf.mxu0 }
 0x4b6   : > { %4140 = vst [vmem:[%s11007_s26 + $0x68] sm:$0xff] %v11131_v15 }
 0x4b7   : > { %v6665_v43 = vmov 0.0  }
 0x4b8   : > { %4163 = vst [vmem:[#allocation4] sm:$0x3] %v6665_v43 }
 0x4b9 PF: > { %v4165_v53 = vadd.f32 %v11035_v39, %v11019_v23  ;;  %s4410_s27 = sshll.u32 %s6710_s16, 12  ;;  %s4289_s5 = sshll.u32 %s11007_s26, 4  ;;  %s11146_s5 = int_to_ptr.vmem [resolvable:$true] %s4289_s5 }
 0x4ba   : > { %s11142_s4 = scalar_lea.hbm %s11297_s2, %s4410_s27  ;;  %s11150_s6 = scalar_lea.sflag [#allocation3], %s158_s24 }
 0x4bb   : > { %v4166_v17 = vadd.f32 %v11011_v20, %v4165_v53  ;;  %s6559_s7 = scalar_lea.vmem %s11146_s5, 4096  ;;  %s6666_s10 = smov [#allocation2]  }
 0x4bc   : > { %p6560_p12 = scmp.ne.s32.totalorder %s11146_s5, %s6559_s7  ;;  %s6563_s11 = sshll.u32 %s6666_s10, 4  ;;  %s6564_s11 = int_to_ptr.vmem [resolvable:$false] %s6563_s11 }
 0x4bd   : > { %s6565_s8 = scalar_lea.vmem %s6564_s11, 8192  ;;  %p6566_p1 = scmp.lt.s32.totalorder %s11146_s5, %s6564_s11 }
 0x4be   : > { %p6561_p13 = pnand %p6560_p12, %p6729_p5  ;;  %p6567_p3 = scmp.lt.s32.totalorder %s6565_s8, %s6559_s7 }
 0x4c0   : > { %p6562_p0 = pneg %p6561_p13  ;;  %p6568_p4 = por %p6567_p3, %p6566_p1 }
 0x4c2   : > { %p6569_p7 = pnand %p6568_p4, %p6562_p0 }
 0x4c4   : > { %6572 = shalt.err (!%p6569_p7)
}
 0x4c5   : > { %s6573_s17 = scalar_lea.hbm %s11142_s4, 4096  ;;  %s6577_s9 = scalar_lea.hbm %s11297_s2, 8192 }
 0x4c6   : > { %p6574_p8 = scmp.ne.s32.totalorder %s11142_s4, %s6573_s17  ;;  %p6578_p11 = scmp.lt.s32.totalorder %s11142_s4, %s11297_s2 }
 0x4c7   : > { %p6579_p12 = scmp.lt.s32.totalorder %s6577_s9, %s6573_s17 }
 0x4c8   : > { %p6575_p9 = pnand %p6574_p8, %p6729_p5 }
 0x4c9   : > { %p6580_p13 = por %p6579_p12, %p6578_p11 }
 0x4ca   : > { %p6576_p10 = pneg %p6575_p9 }
 0x4cc   : > { %p6581_p0 = pnand %p6580_p13, %p6576_p10 }
 0x4ce   : > { %6584 = shalt.err (!%p6581_p0)
}
 0x4cf   : > { %s6667_s26 = smov 128   ;;  %v4167_v35 = vadd.f32 %v11027_v58, %v4166_v17  ;;  %v4202_v14 = vmul.f32 %v11019_v23, %v11019_v23  ;;  %v4203_v32 = vmul.f32 %v11035_v39, %v11035_v39  ;;  %v4204_v50 = vmul.f32 %v11011_v20, %v11011_v20  ;;  %s6668_s22 = smov [#allocation4]  }
 0x4d0   : > { %4497 = dma.vmem_to_hbm [thread:$0]  (%p6729_p5), %s11146_s5, 4096, %s11142_s4, %s11150_s6, %s6667_s26, %s6667_s26, %s6650_s30   ;;  %v4205_v36 = vmul.f32 %v11027_v58, %v11027_v58  ;;  %v4206_v33 = vmul.f32 %v11051_v48, %v11051_v48  ;;  %v4207_v3 = vmul.f32 %v11067_v4, %v11067_v4  ;;  %v4208_v25 = vmul.f32 %v11043_v34, %v11043_v34 }
 0x4d1   : > { %v4168_v37 = vadd.f32 %v4167_v35, %v11051_v48  ;;  %v4234_v52 = vadd.f32 %v4203_v32, %v4202_v14  ;;  %v4209_v1 = vmul.f32 %v11059_v41, %v11059_v41  ;;  %v4210_v19 = vmul.f32 %v11083_v49, %v11083_v49  ;;  %s4303_s30 = sshll.u32 %s6668_s22, 4  ;;  %s4304_s30 = int_to_ptr.vmem [resolvable:$true] %s4303_s30 }
 0x4d2   : > { %v4211_v55 = vmul.f32 %v11099_v61, %v11099_v61  ;;  %v4212_v47 = vmul.f32 %v11075_v5, %v11075_v5  ;;  %v4213_v23 = vmul.f32 %v11091_v59, %v11091_v59  ;;  %v4217_v53 = vmul.f32 %v11123_v51, %v11123_v51  ;;  %s6585_s27 = scalar_lea.vmem %s4304_s30, 32  ;;  %p6592_p4 = scmp.lt.s32.totalorder %s4304_s30, %s4304_s30 }
 0x4d3   : > { %v4169_v42 = vadd.f32 %v4168_v37, %v11067_v4  ;;  %v4235_v13 = vadd.f32 %v4234_v52, %v4204_v50  ;;  %v4215_v4 = vmul.f32 %v11131_v15, %v11131_v15  ;;  %v4218_v35 = vmul.f32 %v11013_v38, %v11013_v38  ;;  %p6586_p5 = scmp.ne.s32.totalorder %s4304_s30, %s6585_s27  ;;  %p6593_p7 = scmp.lt.s32.totalorder %s6585_s27, %s6585_s27 }
 0x4d4   : > { %v4219_v32 = vmul.f32 %v11029_v6, %v11029_v6  ;;  %v4220_v50 = vmul.f32 %v11005_v29, %v11005_v29  ;;  %vm4271_vm15 = vcmask 1040384  }
 0x4d5   : > { %v4170_v56 = vadd.f32 %v11043_v34, %v4169_v42  ;;  %v4236_v46 = vadd.f32 %v4235_v13, %v4205_v36  ;;  %v4214_v34 = vmul.f32 %v11115_v54, %v11115_v54  ;;  %v4221_v36 = vmul.f32 %v11021_v60, %v11021_v60  ;;  %p6587_p1 = pnand %p6586_p5, %p83_p2  ;;  %p6594_p8 = por %p6593_p7, %p6592_p4 }
 0x4d6   : > { %v4223_v13 = vmul.f32 %v11061_v16, %v11061_v16 }
 0x4d7   : > { %v4171_v26 = vadd.f32 %v11059_v41, %v4170_v56  ;;  %v4237_v63 = vadd.f32 %v4236_v46, %v4206_v33  ;;  %v4222_v56 = vmul.f32 %v11045_v8, %v11045_v8  ;;  %p6588_p3 = pneg %p6587_p1 }
 0x4d9   : > { %v4172_v21 = vadd.f32 %v4171_v26, %v11083_v49  ;;  %v4238_v40 = vadd.f32 %v4237_v63, %v4207_v3  ;;  %v4224_v3 = vmul.f32 %v11039_v11, %v11039_v11  ;;  %v4226_v63 = vmul.f32 %v11077_v31, %v11077_v31  ;;  %p6595_p9 = pnand %p6594_p8, %p6588_p3 }
 0x4db   : > { %v4173_v62 = vadd.f32 %v4172_v21, %v11099_v61  ;;  %v4239_v22 = vadd.f32 %v4238_v40, %v4208_v25  ;;  %v4216_v61 = vmul.f32 %v11107_v45, %v11107_v45  ;;  %v4225_v21 = vmul.f32 %v11053_v12, %v11053_v12 }
 0x4dd   : > { %v4174_v30 = vadd.f32 %v11075_v5, %v4173_v62  ;;  %v4240_v57 = vadd.f32 %v4239_v22, %v4209_v1  ;;  %v4227_v1 = vmul.f32 %v11093_v24, %v11093_v24  ;;  %v4229_v22 = vmul.f32 %v11085_v18, %v11085_v18 }
 0x4df   : > { %v4175_v28 = vadd.f32 %v11091_v59, %v4174_v30  ;;  %v4241_v0 = vadd.f32 %v4240_v57, %v4210_v19  ;;  %v4228_v30 = vmul.f32 %v11071_v10, %v11071_v10 }
 0x4e1   : > { %v4176_v44 = vadd.f32 %v4175_v28, %v11115_v54  ;;  %v4242_v58 = vadd.f32 %v4241_v0, %v4211_v55  ;;  %v4230_v55 = vmul.f32 %v11109_v7, %v11109_v7  ;;  %v4232_v0 = vmul.f32 %v11103_v27, %v11103_v27 }
 0x4e3   : > { %v4177_v20 = vadd.f32 %v4176_v44, %v11131_v15  ;;  %v4243_v48 = vadd.f32 %v4242_v58, %v4212_v47  ;;  %v4231_v44 = vmul.f32 %v11125_v2, %v11125_v2 }
 0x4e5   : > { %v4178_v39 = vadd.f32 %v11107_v45, %v4177_v20  ;;  %v4244_v49 = vadd.f32 %v4243_v48, %v4213_v23 }
 0x4e7   : > { %v4179_v41 = vadd.f32 %v11123_v51, %v4178_v39  ;;  %v4245_v43 = vadd.f32 %v4244_v49, %v4214_v34 }
 0x4e9   : > { %v4180_v5 = vadd.f32 %v4179_v41, %v11013_v38  ;;  %v4246_v17 = vadd.f32 %v4245_v43, %v4215_v4 }
 0x4eb   : > { %v4181_v59 = vadd.f32 %v4180_v5, %v11029_v6  ;;  %v4247_v14 = vadd.f32 %v4246_v17, %v4216_v61 }
 0x4ed   : > { %v4182_v54 = vadd.f32 %v11005_v29, %v4181_v59  ;;  %v4248_v37 = vadd.f32 %v4247_v14, %v4217_v53 }
 0x4ef   : > { %v4183_v15 = vadd.f32 %v11021_v60, %v4182_v54  ;;  %v4249_v42 = vadd.f32 %v4248_v37, %v4218_v35 }
 0x4f1   : > { %v4184_v45 = vadd.f32 %v4183_v15, %v11045_v8  ;;  %v4250_v52 = vadd.f32 %v4249_v42, %v4219_v32 }
 0x4f3   : > { %v4185_v51 = vadd.f32 %v4184_v45, %v11061_v16  ;;  %v4251_v33 = vadd.f32 %v4250_v52, %v4220_v50 }
 0x4f5   : > { %v4186_v38 = vadd.f32 %v11039_v11, %v4185_v51  ;;  %v4252_v26 = vadd.f32 %v4251_v33, %v4221_v36 }
 0x4f7   : > { %v4187_v6 = vadd.f32 %v11053_v12, %v4186_v38  ;;  %v4253_v46 = vadd.f32 %v4252_v26, %v4222_v56 }
 0x4f9   : > { %v4188_v29 = vadd.f32 %v4187_v6, %v11077_v31  ;;  %v4254_v25 = vadd.f32 %v4253_v46, %v4223_v13 }
 0x4fb   : > { %v4189_v60 = vadd.f32 %v4188_v29, %v11093_v24  ;;  %v4255_v62 = vadd.f32 %v4254_v25, %v4224_v3 }
 0x4fd   : > { %v4190_v8 = vadd.f32 %v11071_v10, %v4189_v60  ;;  %v4256_v40 = vadd.f32 %v4255_v62, %v4225_v21 }
 0x4ff   : > { %v4191_v16 = vadd.f32 %v11085_v18, %v4190_v8  ;;  %v4257_v19 = vadd.f32 %v4256_v40, %v4226_v63  ;;  %v4233_v18 = vmul.f32 %v11117_v9, %v11117_v9 }
 0x501   : > { %v4192_v11 = vadd.f32 %v4191_v16, %v11109_v7  ;;  %v4258_v28 = vadd.f32 %v4257_v19, %v4227_v1 }
 0x503   : > { %v4193_v12 = vadd.f32 %v4192_v11, %v11125_v2  ;;  %v4259_v57 = vadd.f32 %v4258_v28, %v4228_v30 }
 0x505   : > { %v4194_v31 = vadd.f32 %v11103_v27, %v4193_v12  ;;  %v4260_v47 = vadd.f32 %v4259_v57, %v4229_v22  ;;  %v4164_v27 = vld [vmem:[#allocation4] sm:$0x3] }
 0x507   : > { %v4195_v24 = vadd.f32 %v11117_v9, %v4194_v31  ;;  %v4261_v20 = vadd.f32 %v4260_v47, %v4230_v55 }
 0x509   : > { %v4196_v10 = vrot.slane %v4195_v24, 4  ;;  %v4262_v58 = vadd.f32 %v4261_v20, %v4231_v44 }
 0x50b   : > { %v4197_v23 = vadd.f32 %v4196_v10, %v4195_v24  ;;  %v4263_v34 = vadd.f32 %v4262_v58, %v4232_v0 }
 0x50d   : > { %v4198_v39 = vrot.slane %v4197_v23, 2  ;;  %v4264_v7 = vadd.f32 %v4263_v34, %v4233_v18 }
 0x50f   : > { %v4199_v48 = vadd.f32 %v4198_v39, %v4197_v23  ;;  %v4265_v41 = vrot.slane %v4264_v7, 4 }
 0x511   : > { %v4266_v4 = vadd.f32 %v4265_v41, %v4264_v7  ;;  %v4200_v49 = vrot.slane %v4199_v48, 1 }
 0x513   : > { %v4267_v2 = vrot.slane %v4266_v4, 2  ;;  %v4201_v61 = vadd.f32 %v4200_v49, %v4199_v48 }
 0x515   : > { %v4268_v5 = vadd.f32 %v4267_v2, %v4266_v4 }
 0x517   : > { %v4269_v43 = vrot.slane %v4268_v5, 1 }
 0x519   : > { %v4270_v59 = vadd.f32 %v4269_v43, %v4268_v5 }
 0x51b   : > { %v4272_v53 = vsel %vm4271_vm15, %v4201_v61, %v4270_v59 }
 0x51c   : > { %v4273_v9 = vadd.f32 %v4272_v53, %v4164_v27 }
 0x51e   : > { %4274 = vst [vmem:[#allocation4] sm:$0x3] %v4273_v9 }
 0x51f   : > { %6598 = shalt.err (!%p6595_p9)
}
 0x520   : > { %4499 = dma.vmem_to_hbm [thread:$0]  (%p83_p2), %s4304_s30, 32, %s11298_s3, [#allocation5]  }
 0x521   : > { %6626 = dma.done.wait (%p83_p2), [#allocation5], 32  }
 0x522   : > { %6628 = vsyncadd (%p83_p2), [#allocation5], 4294967264 }
 0x523 PF: > { %p4509_p10 = scmp.ge.s32.totalorder %s6647_s15, 2  ;;  %s4319_s4 = sand.u32 1, %s6635_s12  }
 0x524   : > { %s4320_s5 = scalar_lea.sflag [#allocation3], %s4319_s4 }
 0x525   : > { %p4504_p11 = pnand %p4509_p10, %p6733_p6 }
 0x527   : > { %p4505_p12 = pneg %p4504_p11 }
 0x529   : > { %6630 = dma.done.wait (%p4505_p12), %s4320_s5, 4096  }
 0x52a   : > { %6632 = vsyncadd (%p4505_p12), %s4320_s5, 4294963200  ;;  %p15_p13 = scmp.ge.s32.totalorder %s6714_s18, 4   ;;  %s12523_s12 = smov %s6639_s13 }
 0x52b   : > { %s12524_s13 = smov %s6643_s14  ;;  %s12525_s14 = smov %s6725_s21 }
 0x52c   : > { %s12526_s15 = smov %s6714_s18  ;;  %17 = sbr.rel (!%p15_p13) target bundleno = 4 (0x4), region = 75 }
 0x531   :  { %4325 = vsyncpa [#allocation3], 1 }
 0x532   :  { %4327 = vsyncpa [#allocation3 + $0x1], 1 }
 0x533   :  { %4328 = vsyncpa [#allocation5], 1 }

</bundles_post_ra>
